<compile_context>
chip_gen: v5e
topology: v5e:2x2
jax: 0.10.0
libtpu: 0.0.40
codegen_flags: <defaults>
</compile_context>

<pallas_src>
import functools

import jax
import jax.numpy as jnp
from jax.experimental import pallas as pl
from jax.experimental.pallas import tpu as pltpu


WIDTH = 4 * (5 - 1)   # causal left-pad of the temporal CNN (matches the module)
K1D = 5               # Conv1d kernel size

# im2col rows folded into one lane-dense output row, per conv layer
REP1, REP2, REP3 = 8, 4, 4


def _round_up(x, m):
    return (x + m - 1) // m * m


# ------------------------ conv-as-matmul Pallas kernel ------------------------ #

def _mm_bias_relu_kernel(x_ref, w_ref, b_ref, o_ref):
    acc = jnp.dot(x_ref[...], w_ref[...], preferred_element_type=jnp.float32)
    acc = jnp.maximum(acc + b_ref[...], 0.0)
    o_ref[...] = acc.astype(o_ref.dtype)


def conv_mm(patches, w_big, b_big, *, n_blocks=2):
    """relu(patches @ w_big + b_big).

    patches: (M, K) bf16 block-diag-folded im2col rows; w_big: (K, N) bf16 with
    N a multiple of 128; b_big: (1, N) f32 -> (M, N) bf16, lane-dense stores.
    Ragged last M block is handled by Pallas (garbage rows never written back).
    """
    M, K = patches.shape
    N = w_big.shape[1]
    tm = min(_round_up(pl.cdiv(M, n_blocks), 8), _round_up(M, 8))
    grid = (pl.cdiv(M, tm),)
    return pl.pallas_call(
        _mm_bias_relu_kernel,
        out_shape=jax.ShapeDtypeStruct((M, N), jnp.bfloat16),
        grid=grid,
        in_specs=[
            pl.BlockSpec((tm, K), lambda i: (i, 0)),
            pl.BlockSpec((K, N), lambda i: (0, 0)),
            pl.BlockSpec((1, N), lambda i: (0, 0)),
        ],
        out_specs=pl.BlockSpec((tm, N), lambda i: (i, 0)),
        compiler_params=pltpu.CompilerParams(
            dimension_semantics=("parallel",)),
    )(patches, w_big, b_big)


# ------------------------------ XLA-side im2col ------------------------------- #

def _im2col_nhwc(x, k, stride, pad):
    """x: (N,H,W,C) bf16 -> (N*OH*OW, C*k*k) bf16 patches (PyTorch (C,KH,KW) order)."""
    N, H, W, C = x.shape
    xp = jnp.pad(x, ((0, 0), (pad, pad), (pad, pad), (0, 0)))
    OH = (H + 2 * pad - k) // stride + 1
    OW = (W + 2 * pad - k) // stride + 1
    cols = [xp[:, i:i + stride * OH:stride, j:j + stride * OW:stride, :]
            for i in range(k) for j in range(k)]
    patches = jnp.stack(cols, axis=-1)                     # (N,OH,OW,C,k*k)
    return patches.reshape(N * OH * OW, C * k * k), OH, OW


# --------- fused tail: conv3 -> flatten -> fc1 -> fc2 -> 4x Conv1d ------------ #

def _tail_kernel(p3_ref, w3_ref, b3_ref, f1w, f1b, f2w, f2b,
                 t1w, t1b, t2w, t2b, t3w, t3b, t4w, t4b,
                 o_ref, pad_ref, *, b, s, width, k):
    # conv3 as a block-diagonal matmul: output row = frame, columns = spatial-major
    # flatten (spatial*64 + oc), exactly what the permuted fc1 weight expects.
    z = jnp.dot(p3_ref[...], w3_ref[...], preferred_element_type=jnp.float32)
    z = jnp.maximum(z + b3_ref[...], 0.0).astype(jnp.bfloat16)          # (b*s, 256)

    h = jnp.dot(z, f1w[...], preferred_element_type=jnp.float32) + f1b[...]
    h = jnp.maximum(h, 0.0).astype(jnp.bfloat16)                         # (b*s, 64)
    h = jnp.dot(h, f2w[...], preferred_element_type=jnp.float32) + f2b[...]   # (b*s,32)

    def c1d(hin, w_ref, b_ref, relu):
        # Conv1d as a k-tap matmul sum: y[t] = b + sum_tap hin[t+tap] @ W[tap]
        ol = hin.shape[0] - k + 1
        acc = b_ref[...]
        for tap in range(k):
            acc = acc + jnp.dot(hin[tap:tap + ol, :].astype(jnp.bfloat16), w_ref[tap],
                                preferred_element_type=jnp.float32)
        return jnp.maximum(acc, 0.0) if relu else acc

    # F.pad(h, (width, 0)) via a pre-zeroed VMEM scratch (rows [:width] stay zero).
    pad_ref[...] = jnp.zeros_like(pad_ref)
    for bi in range(b):
        pad_ref[width:, :] = h[bi * s:(bi + 1) * s, :]
        a = pad_ref[...]                                   # (width + s, 32) f32
        a = c1d(a, t1w, t1b, True)                         # (s+12, 16)
        a = c1d(a, t2w, t2b, True)                         # (s+8, 16)
        a = c1d(a, t3w, t3b, True)                         # (s+4, 16)
        a = c1d(a, t4w, t4b, False)                        # (s, 6)
        o_ref[bi, :, :] = a.astype(o_ref.dtype)


def tail_forward(q, p3, b, s):
    ins = [p3,
           q["c3_w"], q["c3_b"],
           q["fc1_w"], q["fc1_b"], q["fc2_w"], q["fc2_b"],
           q["t1_w"], q["t1_b"], q["t2_w"], q["t2_b"],
           q["t3_w"], q["t3_b"], q["t4_w"], q["t4_b"]]

    def full_spec(shape):
        return pl.BlockSpec(shape, lambda i, _n=len(shape): (0,) * _n)

    return pl.pallas_call(
        functools.partial(_tail_kernel, b=b, s=s, width=WIDTH, k=K1D),
        out_shape=jax.ShapeDtypeStruct((b, s, 6), jnp.float32),
        grid=(1,),
        in_specs=[full_spec(a.shape) for a in ins],
        out_specs=pl.BlockSpec((b, s, 6), lambda i: (0, 0, 0)),
        scratch_shapes=[pltpu.VMEM((WIDTH + s, 32), jnp.float32)],
        compiler_params=pltpu.CompilerParams(
            dimension_semantics=("arbitrary",)),
    )(*ins)


# ------------------------------ parameters ----------------------------------- #

def init_params(key):
    keys = jax.random.split(key, 18)
    ki = iter(keys)

    def u(k, shape, fan_in):
        bound = fan_in ** -0.5
        return jax.random.uniform(k, shape, jnp.float32, -bound, bound)

    p = {}
    for name, (oc, ic, ks) in [("c1", (16, 3, 5)), ("c2", (32, 16, 5)), ("c3", (64, 32, 5))]:
        fan = ic * ks * ks
        p[f"{name}_w"] = u(next(ki), (oc, ic, ks, ks), fan)
        p[f"{name}_b"] = u(next(ki), (oc,), fan)
    for name, (of, inf) in [("fc1", (64, 256)), ("fc2", (32, 64))]:
        p[f"{name}_w"] = u(next(ki), (of, inf), inf)
        p[f"{name}_b"] = u(next(ki), (of,), inf)
    for name, (oc, ic, ks) in [("t1", (16, 32, 5)), ("t2", (16, 16, 5)),
                               ("t3", (16, 16, 5)), ("t4", (6, 16, 5))]:
        fan = ic * ks
        p[f"{name}_w"] = u(next(ki), (oc, ic, ks), fan)
        p[f"{name}_b"] = u(next(ki), (oc,), fan)
    return p


def prepare_params(p):
    """One-time layout/cast work, outside the per-forward trace."""
    q = {}
    # Conv2d weights -> block-diagonal, lane-dense matmul operands (bf16):
    # 'rep' consecutive im2col rows are folded into one output row, so the output
    # minor dim is rep*OC = 128 (conv1/conv2) or 256 (conv3) -> unmasked stores.
    for name, rep in (("c1", REP1), ("c2", REP2), ("c3", REP3)):
        w = p[f"{name}_w"]                                  # (OC, IC, k, k)
        oc = w.shape[0]
        km = w.reshape(oc, -1).T                            # (IC*k*k, OC), PyTorch flatten order
        q[f"{name}_w"] = jnp.kron(jnp.eye(rep, dtype=km.dtype), km).astype(jnp.bfloat16)
        q[f"{name}_b"] = jnp.tile(p[f"{name}_b"], rep).reshape(1, -1).astype(jnp.float32)
    # fc1: permute rows from PyTorch's channel-major flatten (oc*4 + spatial) to the
    # spatial-major order (spatial*64 + oc) the fused conv3 kernel emits -> the NCHW
    # flatten transpose disappears entirely from the forward path.
    w1 = p["fc1_w"].T.reshape(64, 4, 64).transpose(1, 0, 2).reshape(256, 64)
    q["fc1_w"] = w1.astype(jnp.bfloat16)
    q["fc1_b"] = p["fc1_b"].reshape(1, -1).astype(jnp.float32)
    q["fc2_w"] = p["fc2_w"].T.astype(jnp.bfloat16)
    q["fc2_b"] = p["fc2_b"].reshape(1, -1).astype(jnp.float32)
    for name in ("t1", "t2", "t3", "t4"):
        w = p[f"{name}_w"]                                  # (OC, IC, k)
        q[f"{name}_w"] = w.transpose(2, 1, 0).astype(jnp.bfloat16)   # (k, IC, OC)
        q[f"{name}_b"] = p[f"{name}_b"].reshape(1, -1).astype(jnp.float32)
    return q


# -------------------------------- forward ------------------------------------ #

def forward(q, hist):
    b, s, c, H, W = hist.shape
    bs = b * s
    # NCHW -> NHWC once, cast to bf16 BEFORE padding / im2col (half the bytes).
    x = hist.reshape(bs, c, H, W).astype(jnp.bfloat16).transpose(0, 2, 3, 1)

    # conv1 -------------------------------------------------------------------
    p1, oh, ow = _im2col_nhwc(x, 5, 3, 1)                       # (bs*21*21, 75)
    assert p1.shape[0] % REP1 == 0
    p1 = p1.reshape(p1.shape[0] // REP1, REP1 * p1.shape[1])    # (882, 600)
    y1 = conv_mm(p1, q["c1_w"], q["c1_b"], n_blocks=2)          # (882, 128) bf16
    y1 = y1.reshape(bs, oh, ow, 16)

    # conv2 -------------------------------------------------------------------
    p2, oh, ow = _im2col_nhwc(y1, 5, 3, 1)                      # (bs*7*7, 400)
    assert p2.shape[0] % REP2 == 0
    p2 = p2.reshape(p2.shape[0] // REP2, REP2 * p2.shape[1])    # (196, 1600)
    y2 = conv_mm(p2, q["c2_w"], q["c2_b"], n_blocks=2)          # (196, 128) bf16
    y2 = y2.reshape(bs, oh, ow, 32)

    # conv3 + flatten + fc1 + fc2 + causal pad + 4x Conv1d: one Pallas kernel --
    p3, _, _ = _im2col_nhwc(y2, 5, 3, 1)                        # (bs*2*2, 800)
    p3 = p3.reshape(bs, REP3 * p3.shape[1])                     # (bs, 3200)
    return tail_forward(q, p3, b, s)                            # (b, s, 6) f32


# ---------------------------------- main -------------------------------------- #

if __name__ == "__main__":
    key = jax.random.PRNGKey(0)
    pkey, xkey = jax.random.split(key)
    params = init_params(pkey)
    q = prepare_params(params)          # hoisted out of the per-step forward

    # batch=2, seq=8, NCHW frames of 3x64x64 (64x64 is what .view(-1, 256) implies)
    hist = jax.random.normal(xkey, (2, 8, 3, 64, 64), jnp.float32)

    fwd = jax.jit(forward)
    out = jax.block_until_ready(fwd(q, hist))
    assert out.shape == (2, 8, 6), out.shape
    assert out.dtype == jnp.float32
    print("KERNEL_OK")
</pallas_src>

<mosaic_0001>
module attributes {stable_mosaic.version = 11 : i64} {
  func.func @_mm_bias_relu_kernel(%arg0: i32, %arg1: memref<448x600xbf16, #tpu.memory_space<vmem>>, %arg2: memref<600x128xbf16, #tpu.memory_space<vmem>>, %arg3: memref<1x128xf32, #tpu.memory_space<vmem>>, %arg4: memref<448x128xbf16, #tpu.memory_space<vmem>>) attributes {dimension_semantics = [#tpu.dimension_semantics<parallel>], iteration_bounds = array<i64: 2>, scalar_prefetch = 0 : i64, scratch_operands = 0 : i64, tpu.core_type = #tpu.core_type<tc>, window_params = [{transform_indices = @transform_0, window_bounds = array<i64: 448, 600>}, {pipeline_mode = #tpu.pipeline_mode<synchronous>, transform_indices = @transform_1, window_bounds = array<i64: 600, 128>}, {pipeline_mode = #tpu.pipeline_mode<synchronous>, transform_indices = @transform_2, window_bounds = array<i64: 1, 128>}, {transform_indices = @transform_3, window_bounds = array<i64: 448, 128>}]} {
    %c0 = arith.constant 0 : index
    %c0_0 = arith.constant 0 : index
    %0 = vector.load %arg1[%c0, %c0_0] : memref<448x600xbf16, #tpu.memory_space<vmem>>, vector<448x600xbf16>
    %c0_1 = arith.constant 0 : index
    %c0_2 = arith.constant 0 : index
    %1 = vector.load %arg2[%c0_1, %c0_2] : memref<600x128xbf16, #tpu.memory_space<vmem>>, vector<600x128xbf16>
    %cst = arith.constant dense<0.000000e+00> : vector<448x128xf32>
    %2 = tpu.matmul %0, %1, %cst {dimension_numbers = #tpu.dot_dimension_numbers<[1], [0], [0], [1], [0, 0, 1, 1], [], []>} : vector<448x600xbf16>, vector<600x128xbf16>, vector<448x128xf32> -> vector<448x128xf32>
    %c0_3 = arith.constant 0 : index
    %c0_4 = arith.constant 0 : index
    %3 = vector.load %arg3[%c0_3, %c0_4] : memref<1x128xf32, #tpu.memory_space<vmem>>, vector<1x128xf32>
    %4 = vector.broadcast %3 : vector<1x128xf32> to vector<448x128xf32>
    %5 = arith.addf %2, %4 : vector<448x128xf32>
    %cst_5 = arith.constant 0.000000e+00 : f32
    %6 = vector.broadcast %cst_5 : f32 to vector<448x128xf32>
    %7 = arith.maximumf %5, %6 : vector<448x128xf32>
    %8 = arith.truncf %7 : vector<448x128xf32> to vector<448x128xbf16>
    %c0_6 = arith.constant 0 : index
    %c0_7 = arith.constant 0 : index
    %9 = vector.load %arg4[%c0_6, %c0_7] : memref<448x128xbf16, #tpu.memory_space<vmem>>, vector<448x128xbf16>
    tpu.vector_store %arg4[%c0_6, %c0_7], %8 {strides = array<i32>} : memref<448x128xbf16, #tpu.memory_space<vmem>>, vector<448x128xbf16>,
    return
  }
  func.func @transform_0(%arg0: i32) -> (i32, i32) {
    %c0_i32 = arith.constant 0 : i32
    %c0_i32_0 = arith.constant 0 : i32
    return %arg0, %c0_i32 : i32, i32
  }
  func.func @transform_1(%arg0: i32) -> (i32, i32) {
    %c0_i32 = arith.constant 0 : i32
    %c0_i32_0 = arith.constant 0 : i32
    %c0_i32_1 = arith.constant 0 : i32
    return %c0_i32, %c0_i32_0 : i32, i32
  }
  func.func @transform_2(%arg0: i32) -> (i32, i32) {
    %c0_i32 = arith.constant 0 : i32
    %c0_i32_0 = arith.constant 0 : i32
    %c0_i32_1 = arith.constant 0 : i32
    return %c0_i32, %c0_i32_0 : i32, i32
  }
  func.func @transform_3(%arg0: i32) -> (i32, i32) {
    %c0_i32 = arith.constant 0 : i32
    %c0_i32_0 = arith.constant 0 : i32
    return %arg0, %c0_i32 : i32, i32
  }
}

module attributes {stable_mosaic.version = 11 : i64} {
  func.func @_mm_bias_relu_kernel(%arg0: i32, %arg1: memref<104x1600xbf16, #tpu.memory_space<vmem>>, %arg2: memref<1600x128xbf16, #tpu.memory_space<vmem>>, %arg3: memref<1x128xf32, #tpu.memory_space<vmem>>, %arg4: memref<104x128xbf16, #tpu.memory_space<vmem>>) attributes {dimension_semantics = [#tpu.dimension_semantics<parallel>], iteration_bounds = array<i64: 2>, scalar_prefetch = 0 : i64, scratch_operands = 0 : i64, tpu.core_type = #tpu.core_type<tc>, window_params = [{transform_indices = @transform_0, window_bounds = array<i64: 104, 1600>}, {pipeline_mode = #tpu.pipeline_mode<synchronous>, transform_indices = @transform_1, window_bounds = array<i64: 1600, 128>}, {pipeline_mode = #tpu.pipeline_mode<synchronous>, transform_indices = @transform_2, window_bounds = array<i64: 1, 128>}, {transform_indices = @transform_3, window_bounds = array<i64: 104, 128>}]} {
    %c0 = arith.constant 0 : index
    %c0_0 = arith.constant 0 : index
    %0 = vector.load %arg1[%c0, %c0_0] : memref<104x1600xbf16, #tpu.memory_space<vmem>>, vector<104x1600xbf16>
    %c0_1 = arith.constant 0 : index
    %c0_2 = arith.constant 0 : index
    %1 = vector.load %arg2[%c0_1, %c0_2] : memref<1600x128xbf16, #tpu.memory_space<vmem>>, vector<1600x128xbf16>
    %cst = arith.constant dense<0.000000e+00> : vector<104x128xf32>
    %2 = tpu.matmul %0, %1, %cst {dimension_numbers = #tpu.dot_dimension_numbers<[1], [0], [0], [1], [0, 0, 1, 1], [], []>} : vector<104x1600xbf16>, vector<1600x128xbf16>, vector<104x128xf32> -> vector<104x128xf32>
    %c0_3 = arith.constant 0 : index
    %c0_4 = arith.constant 0 : index
    %3 = vector.load %arg3[%c0_3, %c0_4] : memref<1x128xf32, #tpu.memory_space<vmem>>, vector<1x128xf32>
    %4 = vector.broadcast %3 : vector<1x128xf32> to vector<104x128xf32>
    %5 = arith.addf %2, %4 : vector<104x128xf32>
    %cst_5 = arith.constant 0.000000e+00 : f32
    %6 = vector.broadcast %cst_5 : f32 to vector<104x128xf32>
    %7 = arith.maximumf %5, %6 : vector<104x128xf32>
    %8 = arith.truncf %7 : vector<104x128xf32> to vector<104x128xbf16>
    %c0_6 = arith.constant 0 : index
    %c0_7 = arith.constant 0 : index
    %9 = vector.load %arg4[%c0_6, %c0_7] : memref<104x128xbf16, #tpu.memory_space<vmem>>, vector<104x128xbf16>
    tpu.vector_store %arg4[%c0_6, %c0_7], %8 {strides = array<i32>} : memref<104x128xbf16, #tpu.memory_space<vmem>>, vector<104x128xbf16>,
    return
  }
  func.func @transform_0(%arg0: i32) -> (i32, i32) {
    %c0_i32 = arith.constant 0 : i32
    %c0_i32_0 = arith.constant 0 : i32
    return %arg0, %c0_i32 : i32, i32
  }
  func.func @transform_1(%arg0: i32) -> (i32, i32) {
    %c0_i32 = arith.constant 0 : i32
    %c0_i32_0 = arith.constant 0 : i32
    %c0_i32_1 = arith.constant 0 : i32
    return %c0_i32, %c0_i32_0 : i32, i32
  }
  func.func @transform_2(%arg0: i32) -> (i32, i32) {
    %c0_i32 = arith.constant 0 : i32
    %c0_i32_0 = arith.constant 0 : i32
    %c0_i32_1 = arith.constant 0 : i32
    return %c0_i32, %c0_i32_0 : i32, i32
  }
  func.func @transform_3(%arg0: i32) -> (i32, i32) {
    %c0_i32 = arith.constant 0 : i32
    %c0_i32_0 = arith.constant 0 : i32
    return %arg0, %c0_i32 : i32, i32
  }
}

module attributes {stable_mosaic.version = 11 : i64} {
  func.func @_tail_kernel(%arg0: i32, %arg1: memref<16x3200xbf16, #tpu.memory_space<vmem>>, %arg2: memref<3200x256xbf16, #tpu.memory_space<vmem>>, %arg3: memref<1x256xf32, #tpu.memory_space<vmem>>, %arg4: memref<256x64xbf16, #tpu.memory_space<vmem>>, %arg5: memref<1x64xf32, #tpu.memory_space<vmem>>, %arg6: memref<64x32xbf16, #tpu.memory_space<vmem>>, %arg7: memref<1x32xf32, #tpu.memory_space<vmem>>, %arg8: memref<5x32x16xbf16, #tpu.memory_space<vmem>>, %arg9: memref<1x16xf32, #tpu.memory_space<vmem>>, %arg10: memref<5x16x16xbf16, #tpu.memory_space<vmem>>, %arg11: memref<1x16xf32, #tpu.memory_space<vmem>>, %arg12: memref<5x16x16xbf16, #tpu.memory_space<vmem>>, %arg13: memref<1x16xf32, #tpu.memory_space<vmem>>, %arg14: memref<5x16x6xbf16, #tpu.memory_space<vmem>>, %arg15: memref<1x6xf32, #tpu.memory_space<vmem>>, %arg16: memref<2x8x6xf32, #tpu.memory_space<vmem>>, %arg17: memref<24x32xf32, #tpu.memory_space<vmem>>) attributes {dimension_semantics = [#tpu.dimension_semantics<arbitrary>], iteration_bounds = array<i64: 1>, scalar_prefetch = 0 : i64, scratch_operands = 1 : i64, tpu.core_type = #tpu.core_type<tc>, window_params = [{pipeline_mode = #tpu.pipeline_mode<synchronous>, transform_indices = @transform_0, window_bounds = array<i64: 16, 3200>}, {pipeline_mode = #tpu.pipeline_mode<synchronous>, transform_indices = @transform_1, window_bounds = array<i64: 3200, 256>}, {pipeline_mode = #tpu.pipeline_mode<synchronous>, transform_indices = @transform_2, window_bounds = array<i64: 1, 256>}, {pipeline_mode = #tpu.pipeline_mode<synchronous>, transform_indices = @transform_3, window_bounds = array<i64: 256, 64>}, {pipeline_mode = #tpu.pipeline_mode<synchronous>, transform_indices = @transform_4, window_bounds = array<i64: 1, 64>}, {pipeline_mode = #tpu.pipeline_mode<synchronous>, transform_indices = @transform_5, window_bounds = array<i64: 64, 32>}, {pipeline_mode = #tpu.pipeline_mode<synchronous>, transform_indices = @transform_6, window_bounds = array<i64: 1, 32>}, {pipeline_mode = #tpu.pipeline_mode<synchronous>, transform_indices = @transform_7, window_bounds = array<i64: 5, 32, 16>}, {pipeline_mode = #tpu.pipeline_mode<synchronous>, transform_indices = @transform_8, window_bounds = array<i64: 1, 16>}, {pipeline_mode = #tpu.pipeline_mode<synchronous>, transform_indices = @transform_9, window_bounds = array<i64: 5, 16, 16>}, {pipeline_mode = #tpu.pipeline_mode<synchronous>, transform_indices = @transform_10, window_bounds = array<i64: 1, 16>}, {pipeline_mode = #tpu.pipeline_mode<synchronous>, transform_indices = @transform_11, window_bounds = array<i64: 5, 16, 16>}, {pipeline_mode = #tpu.pipeline_mode<synchronous>, transform_indices = @transform_12, window_bounds = array<i64: 1, 16>}, {pipeline_mode = #tpu.pipeline_mode<synchronous>, transform_indices = @transform_13, window_bounds = array<i64: 5, 16, 6>}, {pipeline_mode = #tpu.pipeline_mode<synchronous>, transform_indices = @transform_14, window_bounds = array<i64: 1, 6>}, {pipeline_mode = #tpu.pipeline_mode<synchronous>, transform_indices = @transform_15, window_bounds = array<i64: 2, 8, 6>}]} {
    %c0 = arith.constant 0 : index
    %c0_0 = arith.constant 0 : index
    %0 = vector.load %arg1[%c0, %c0_0] : memref<16x3200xbf16, #tpu.memory_space<vmem>>, vector<16x3200xbf16>
    %c0_1 = arith.constant 0 : index
    %c0_2 = arith.constant 0 : index
    %1 = vector.load %arg2[%c0_1, %c0_2] : memref<3200x256xbf16, #tpu.memory_space<vmem>>, vector<3200x256xbf16>
    %cst = arith.constant dense<0.000000e+00> : vector<16x256xf32>
    %2 = tpu.matmul %0, %1, %cst {dimension_numbers = #tpu.dot_dimension_numbers<[1], [0], [0], [1], [0, 0, 1, 1], [], []>} : vector<16x3200xbf16>, vector<3200x256xbf16>, vector<16x256xf32> -> vector<16x256xf32>
    %c0_3 = arith.constant 0 : index
    %c0_4 = arith.constant 0 : index
    %3 = vector.load %arg3[%c0_3, %c0_4] : memref<1x256xf32, #tpu.memory_space<vmem>>, vector<1x256xf32>
    %4 = vector.broadcast %3 : vector<1x256xf32> to vector<16x256xf32>
    %5 = arith.addf %2, %4 : vector<16x256xf32>
    %cst_5 = arith.constant 0.000000e+00 : f32
    %6 = vector.broadcast %cst_5 : f32 to vector<16x256xf32>
    %7 = arith.maximumf %5, %6 : vector<16x256xf32>
    %8 = arith.truncf %7 : vector<16x256xf32> to vector<16x256xbf16>
    %c0_6 = arith.constant 0 : index
    %c0_7 = arith.constant 0 : index
    %9 = vector.load %arg4[%c0_6, %c0_7] : memref<256x64xbf16, #tpu.memory_space<vmem>>, vector<256x64xbf16>
    %cst_8 = arith.constant dense<0.000000e+00> : vector<16x64xf32>
    %10 = tpu.matmul %8, %9, %cst_8 {dimension_numbers = #tpu.dot_dimension_numbers<[1], [0], [0], [1], [0, 0, 1, 1], [], []>} : vector<16x256xbf16>, vector<256x64xbf16>, vector<16x64xf32> -> vector<16x64xf32>
    %c0_9 = arith.constant 0 : index
    %c0_10 = arith.constant 0 : index
    %11 = vector.load %arg5[%c0_9, %c0_10] : memref<1x64xf32, #tpu.memory_space<vmem>>, vector<1x64xf32>
    %12 = vector.broadcast %11 : vector<1x64xf32> to vector<16x64xf32>
    %13 = arith.addf %10, %12 : vector<16x64xf32>
    %cst_11 = arith.constant 0.000000e+00 : f32
    %14 = vector.broadcast %cst_11 : f32 to vector<16x64xf32>
    %15 = arith.maximumf %13, %14 : vector<16x64xf32>
    %16 = arith.truncf %15 : vector<16x64xf32> to vector<16x64xbf16>
    %c0_12 = arith.constant 0 : index
    %c0_13 = arith.constant 0 : index
    %17 = vector.load %arg6[%c0_12, %c0_13] : memref<64x32xbf16, #tpu.memory_space<vmem>>, vector<64x32xbf16>
    %cst_14 = arith.constant dense<0.000000e+00> : vector<16x32xf32>
    %18 = tpu.matmul %16, %17, %cst_14 {dimension_numbers = #tpu.dot_dimension_numbers<[1], [0], [0], [1], [0, 0, 1, 1], [], []>} : vector<16x64xbf16>, vector<64x32xbf16>, vector<16x32xf32> -> vector<16x32xf32>
    %c0_15 = arith.constant 0 : index
    %c0_16 = arith.constant 0 : index
    %19 = vector.load %arg7[%c0_15, %c0_16] : memref<1x32xf32, #tpu.memory_space<vmem>>, vector<1x32xf32>
    %20 = vector.broadcast %19 : vector<1x32xf32> to vector<16x32xf32>
    %21 = arith.addf %18, %20 : vector<16x32xf32>
    %cst_17 = arith.constant 0.000000e+00 : f32
    %22 = vector.broadcast %cst_17 : f32 to vector<24x32xf32>
    %c0_18 = arith.constant 0 : index
    %c0_19 = arith.constant 0 : index
    %23 = vector.load %arg17[%c0_18, %c0_19] : memref<24x32xf32, #tpu.memory_space<vmem>>, vector<24x32xf32>
    tpu.vector_store %arg17[%c0_18, %c0_19], %22 {strides = array<i32>} : memref<24x32xf32, #tpu.memory_space<vmem>>, vector<24x32xf32>,
    %24 = vector.extract_strided_slice %21 {offsets = [0, 0], sizes = [8, 32], strides = [1, 1]} : vector<16x32xf32> to vector<8x32xf32>
    %c16 = arith.constant 16 : index
    %c0_20 = arith.constant 0 : index
    %25 = vector.load %arg17[%c16, %c0_20] : memref<24x32xf32, #tpu.memory_space<vmem>>, vector<8x32xf32>
    tpu.vector_store %arg17[%c16, %c0_20], %24 {strides = array<i32>} : memref<24x32xf32, #tpu.memory_space<vmem>>, vector<8x32xf32>,
    %c0_21 = arith.constant 0 : index
    %c0_22 = arith.constant 0 : index
    %26 = vector.load %arg17[%c0_21, %c0_22] : memref<24x32xf32, #tpu.memory_space<vmem>>, vector<24x32xf32>
    %c0_23 = arith.constant 0 : index
    %c0_24 = arith.constant 0 : index
    %27 = vector.load %arg9[%c0_23, %c0_24] : memref<1x16xf32, #tpu.memory_space<vmem>>, vector<1x16xf32>
    %28 = vector.extract_strided_slice %26 {offsets = [0, 0], sizes = [20, 32], strides = [1, 1]} : vector<24x32xf32> to vector<20x32xf32>
    %29 = arith.truncf %28 : vector<20x32xf32> to vector<20x32xbf16>
    %c0_25 = arith.constant 0 : index
    %c0_26 = arith.constant 0 : index
    %c0_27 = arith.constant 0 : index
    %30 = vector.load %arg8[%c0_25, %c0_26, %c0_27] : memref<5x32x16xbf16, #tpu.memory_space<vmem>>, vector<1x32x16xbf16>
    %31 = vector.shape_cast %30 : vector<1x32x16xbf16> to vector<32x16xbf16>
    %cst_28 = arith.constant dense<0.000000e+00> : vector<20x16xf32>
    %32 = tpu.matmul %29, %31, %cst_28 {dimension_numbers = #tpu.dot_dimension_numbers<[1], [0], [0], [1], [0, 0, 1, 1], [], []>} : vector<20x32xbf16>, vector<32x16xbf16>, vector<20x16xf32> -> vector<20x16xf32>
    %33 = vector.broadcast %27 : vector<1x16xf32> to vector<20x16xf32>
    %34 = arith.addf %33, %32 : vector<20x16xf32>
    %35 = vector.extract_strided_slice %26 {offsets = [1, 0], sizes = [20, 32], strides = [1, 1]} : vector<24x32xf32> to vector<20x32xf32>
    %36 = arith.truncf %35 : vector<20x32xf32> to vector<20x32xbf16>
    %c1 = arith.constant 1 : index
    %c0_29 = arith.constant 0 : index
    %c0_30 = arith.constant 0 : index
    %37 = vector.load %arg8[%c1, %c0_29, %c0_30] : memref<5x32x16xbf16, #tpu.memory_space<vmem>>, vector<1x32x16xbf16>
    %38 = vector.shape_cast %37 : vector<1x32x16xbf16> to vector<32x16xbf16>
    %cst_31 = arith.constant dense<0.000000e+00> : vector<20x16xf32>
    %39 = tpu.matmul %36, %38, %cst_31 {dimension_numbers = #tpu.dot_dimension_numbers<[1], [0], [0], [1], [0, 0, 1, 1], [], []>} : vector<20x32xbf16>, vector<32x16xbf16>, vector<20x16xf32> -> vector<20x16xf32>
    %40 = arith.addf %34, %39 : vector<20x16xf32>
    %41 = vector.extract_strided_slice %26 {offsets = [2, 0], sizes = [20, 32], strides = [1, 1]} : vector<24x32xf32> to vector<20x32xf32>
    %42 = arith.truncf %41 : vector<20x32xf32> to vector<20x32xbf16>
    %c2 = arith.constant 2 : index
    %c0_32 = arith.constant 0 : index
    %c0_33 = arith.constant 0 : index
    %43 = vector.load %arg8[%c2, %c0_32, %c0_33] : memref<5x32x16xbf16, #tpu.memory_space<vmem>>, vector<1x32x16xbf16>
    %44 = vector.shape_cast %43 : vector<1x32x16xbf16> to vector<32x16xbf16>
    %cst_34 = arith.constant dense<0.000000e+00> : vector<20x16xf32>
    %45 = tpu.matmul %42, %44, %cst_34 {dimension_numbers = #tpu.dot_dimension_numbers<[1], [0], [0], [1], [0, 0, 1, 1], [], []>} : vector<20x32xbf16>, vector<32x16xbf16>, vector<20x16xf32> -> vector<20x16xf32>
    %46 = arith.addf %40, %45 : vector<20x16xf32>
    %47 = vector.extract_strided_slice %26 {offsets = [3, 0], sizes = [20, 32], strides = [1, 1]} : vector<24x32xf32> to vector<20x32xf32>
    %48 = arith.truncf %47 : vector<20x32xf32> to vector<20x32xbf16>
    %c3 = arith.constant 3 : index
    %c0_35 = arith.constant 0 : index
    %c0_36 = arith.constant 0 : index
    %49 = vector.load %arg8[%c3, %c0_35, %c0_36] : memref<5x32x16xbf16, #tpu.memory_space<vmem>>, vector<1x32x16xbf16>
    %50 = vector.shape_cast %49 : vector<1x32x16xbf16> to vector<32x16xbf16>
    %cst_37 = arith.constant dense<0.000000e+00> : vector<20x16xf32>
    %51 = tpu.matmul %48, %50, %cst_37 {dimension_numbers = #tpu.dot_dimension_numbers<[1], [0], [0], [1], [0, 0, 1, 1], [], []>} : vector<20x32xbf16>, vector<32x16xbf16>, vector<20x16xf32> -> vector<20x16xf32>
    %52 = arith.addf %46, %51 : vector<20x16xf32>
    %53 = vector.extract_strided_slice %26 {offsets = [4, 0], sizes = [20, 32], strides = [1, 1]} : vector<24x32xf32> to vector<20x32xf32>
    %54 = arith.truncf %53 : vector<20x32xf32> to vector<20x32xbf16>
    %c4 = arith.constant 4 : index
    %c0_38 = arith.constant 0 : index
    %c0_39 = arith.constant 0 : index
    %55 = vector.load %arg8[%c4, %c0_38, %c0_39] : memref<5x32x16xbf16, #tpu.memory_space<vmem>>, vector<1x32x16xbf16>
    %56 = vector.shape_cast %55 : vector<1x32x16xbf16> to vector<32x16xbf16>
    %cst_40 = arith.constant dense<0.000000e+00> : vector<20x16xf32>
    %57 = tpu.matmul %54, %56, %cst_40 {dimension_numbers = #tpu.dot_dimension_numbers<[1], [0], [0], [1], [0, 0, 1, 1], [], []>} : vector<20x32xbf16>, vector<32x16xbf16>, vector<20x16xf32> -> vector<20x16xf32>
    %58 = arith.addf %52, %57 : vector<20x16xf32>
    %cst_41 = arith.constant 0.000000e+00 : f32
    %59 = vector.broadcast %cst_41 : f32 to vector<20x16xf32>
    %60 = arith.maximumf %58, %59 : vector<20x16xf32>
    %c0_42 = arith.constant 0 : index
    %c0_43 = arith.constant 0 : index
    %61 = vector.load %arg11[%c0_42, %c0_43] : memref<1x16xf32, #tpu.memory_space<vmem>>, vector<1x16xf32>
    %62 = vector.extract_strided_slice %60 {offsets = [0, 0], sizes = [16, 16], strides = [1, 1]} : vector<20x16xf32> to vector<16x16xf32>
    %63 = arith.truncf %62 : vector<16x16xf32> to vector<16x16xbf16>
    %c0_44 = arith.constant 0 : index
    %c0_45 = arith.constant 0 : index
    %c0_46 = arith.constant 0 : index
    %64 = vector.load %arg10[%c0_44, %c0_45, %c0_46] : memref<5x16x16xbf16, #tpu.memory_space<vmem>>, vector<1x16x16xbf16>
    %65 = vector.shape_cast %64 : vector<1x16x16xbf16> to vector<16x16xbf16>
    %cst_47 = arith.constant dense<0.000000e+00> : vector<16x16xf32>
    %66 = tpu.matmul %63, %65, %cst_47 {dimension_numbers = #tpu.dot_dimension_numbers<[1], [0], [0], [1], [0, 0, 1, 1], [], []>} : vector<16x16xbf16>, vector<16x16xbf16>, vector<16x16xf32> -> vector<16x16xf32>
    %67 = vector.broadcast %61 : vector<1x16xf32> to vector<16x16xf32>
    %68 = arith.addf %67, %66 : vector<16x16xf32>
    %69 = vector.extract_strided_slice %60 {offsets = [1, 0], sizes = [16, 16], strides = [1, 1]} : vector<20x16xf32> to vector<16x16xf32>
    %70 = arith.truncf %69 : vector<16x16xf32> to vector<16x16xbf16>
    %c1_48 = arith.constant 1 : index
    %c0_49 = arith.constant 0 : index
    %c0_50 = arith.constant 0 : index
    %71 = vector.load %arg10[%c1_48, %c0_49, %c0_50] : memref<5x16x16xbf16, #tpu.memory_space<vmem>>, vector<1x16x16xbf16>
    %72 = vector.shape_cast %71 : vector<1x16x16xbf16> to vector<16x16xbf16>
    %cst_51 = arith.constant dense<0.000000e+00> : vector<16x16xf32>
    %73 = tpu.matmul %70, %72, %cst_51 {dimension_numbers = #tpu.dot_dimension_numbers<[1], [0], [0], [1], [0, 0, 1, 1], [], []>} : vector<16x16xbf16>, vector<16x16xbf16>, vector<16x16xf32> -> vector<16x16xf32>
    %74 = arith.addf %68, %73 : vector<16x16xf32>
    %75 = vector.extract_strided_slice %60 {offsets = [2, 0], sizes = [16, 16], strides = [1, 1]} : vector<20x16xf32> to vector<16x16xf32>
    %76 = arith.truncf %75 : vector<16x16xf32> to vector<16x16xbf16>
    %c2_52 = arith.constant 2 : index
    %c0_53 = arith.constant 0 : index
    %c0_54 = arith.constant 0 : index
    %77 = vector.load %arg10[%c2_52, %c0_53, %c0_54] : memref<5x16x16xbf16, #tpu.memory_space<vmem>>, vector<1x16x16xbf16>
    %78 = vector.shape_cast %77 : vector<1x16x16xbf16> to vector<16x16xbf16>
    %cst_55 = arith.constant dense<0.000000e+00> : vector<16x16xf32>
    %79 = tpu.matmul %76, %78, %cst_55 {dimension_numbers = #tpu.dot_dimension_numbers<[1], [0], [0], [1], [0, 0, 1, 1], [], []>} : vector<16x16xbf16>, vector<16x16xbf16>, vector<16x16xf32> -> vector<16x16xf32>
    %80 = arith.addf %74, %79 : vector<16x16xf32>
    %81 = vector.extract_strided_slice %60 {offsets = [3, 0], sizes = [16, 16], strides = [1, 1]} : vector<20x16xf32> to vector<16x16xf32>
    %82 = arith.truncf %81 : vector<16x16xf32> to vector<16x16xbf16>
    %c3_56 = arith.constant 3 : index
    %c0_57 = arith.constant 0 : index
    %c0_58 = arith.constant 0 : index
    %83 = vector.load %arg10[%c3_56, %c0_57, %c0_58] : memref<5x16x16xbf16, #tpu.memory_space<vmem>>, vector<1x16x16xbf16>
    %84 = vector.shape_cast %83 : vector<1x16x16xbf16> to vector<16x16xbf16>
    %cst_59 = arith.constant dense<0.000000e+00> : vector<16x16xf32>
    %85 = tpu.matmul %82, %84, %cst_59 {dimension_numbers = #tpu.dot_dimension_numbers<[1], [0], [0], [1], [0, 0, 1, 1], [], []>} : vector<16x16xbf16>, vector<16x16xbf16>, vector<16x16xf32> -> vector<16x16xf32>
    %86 = arith.addf %80, %85 : vector<16x16xf32>
    %87 = vector.extract_strided_slice %60 {offsets = [4, 0], sizes = [16, 16], strides = [1, 1]} : vector<20x16xf32> to vector<16x16xf32>
    %88 = arith.truncf %87 : vector<16x16xf32> to vector<16x16xbf16>
    %c4_60 = arith.constant 4 : index
    %c0_61 = arith.constant 0 : index
    %c0_62 = arith.constant 0 : index
    %89 = vector.load %arg10[%c4_60, %c0_61, %c0_62] : memref<5x16x16xbf16, #tpu.memory_space<vmem>>, vector<1x16x16xbf16>
    %90 = vector.shape_cast %89 : vector<1x16x16xbf16> to vector<16x16xbf16>
    %cst_63 = arith.constant dense<0.000000e+00> : vector<16x16xf32>
    %91 = tpu.matmul %88, %90, %cst_63 {dimension_numbers = #tpu.dot_dimension_numbers<[1], [0], [0], [1], [0, 0, 1, 1], [], []>} : vector<16x16xbf16>, vector<16x16xbf16>, vector<16x16xf32> -> vector<16x16xf32>
    %92 = arith.addf %86, %91 : vector<16x16xf32>
    %cst_64 = arith.constant 0.000000e+00 : f32
    %93 = vector.broadcast %cst_64 : f32 to vector<16x16xf32>
    %94 = arith.maximumf %92, %93 : vector<16x16xf32>
    %c0_65 = arith.constant 0 : index
    %c0_66 = arith.constant 0 : index
    %95 = vector.load %arg13[%c0_65, %c0_66] : memref<1x16xf32, #tpu.memory_space<vmem>>, vector<1x16xf32>
    %96 = vector.extract_strided_slice %94 {offsets = [0, 0], sizes = [12, 16], strides = [1, 1]} : vector<16x16xf32> to vector<12x16xf32>
    %97 = arith.truncf %96 : vector<12x16xf32> to vector<12x16xbf16>
    %c0_67 = arith.constant 0 : index
    %c0_68 = arith.constant 0 : index
    %c0_69 = arith.constant 0 : index
    %98 = vector.load %arg12[%c0_67, %c0_68, %c0_69] : memref<5x16x16xbf16, #tpu.memory_space<vmem>>, vector<1x16x16xbf16>
    %99 = vector.shape_cast %98 : vector<1x16x16xbf16> to vector<16x16xbf16>
    %cst_70 = arith.constant dense<0.000000e+00> : vector<12x16xf32>
    %100 = tpu.matmul %97, %99, %cst_70 {dimension_numbers = #tpu.dot_dimension_numbers<[1], [0], [0], [1], [0, 0, 1, 1], [], []>} : vector<12x16xbf16>, vector<16x16xbf16>, vector<12x16xf32> -> vector<12x16xf32>
    %101 = vector.broadcast %95 : vector<1x16xf32> to vector<12x16xf32>
    %102 = arith.addf %101, %100 : vector<12x16xf32>
    %103 = vector.extract_strided_slice %94 {offsets = [1, 0], sizes = [12, 16], strides = [1, 1]} : vector<16x16xf32> to vector<12x16xf32>
    %104 = arith.truncf %103 : vector<12x16xf32> to vector<12x16xbf16>
    %c1_71 = arith.constant 1 : index
    %c0_72 = arith.constant 0 : index
    %c0_73 = arith.constant 0 : index
    %105 = vector.load %arg12[%c1_71, %c0_72, %c0_73] : memref<5x16x16xbf16, #tpu.memory_space<vmem>>, vector<1x16x16xbf16>
    %106 = vector.shape_cast %105 : vector<1x16x16xbf16> to vector<16x16xbf16>
    %cst_74 = arith.constant dense<0.000000e+00> : vector<12x16xf32>
    %107 = tpu.matmul %104, %106, %cst_74 {dimension_numbers = #tpu.dot_dimension_numbers<[1], [0], [0], [1], [0, 0, 1, 1], [], []>} : vector<12x16xbf16>, vector<16x16xbf16>, vector<12x16xf32> -> vector<12x16xf32>
    %108 = arith.addf %102, %107 : vector<12x16xf32>
    %109 = vector.extract_strided_slice %94 {offsets = [2, 0], sizes = [12, 16], strides = [1, 1]} : vector<16x16xf32> to vector<12x16xf32>
    %110 = arith.truncf %109 : vector<12x16xf32> to vector<12x16xbf16>
    %c2_75 = arith.constant 2 : index
    %c0_76 = arith.constant 0 : index
    %c0_77 = arith.constant 0 : index
    %111 = vector.load %arg12[%c2_75, %c0_76, %c0_77] : memref<5x16x16xbf16, #tpu.memory_space<vmem>>, vector<1x16x16xbf16>
    %112 = vector.shape_cast %111 : vector<1x16x16xbf16> to vector<16x16xbf16>
    %cst_78 = arith.constant dense<0.000000e+00> : vector<12x16xf32>
    %113 = tpu.matmul %110, %112, %cst_78 {dimension_numbers = #tpu.dot_dimension_numbers<[1], [0], [0], [1], [0, 0, 1, 1], [], []>} : vector<12x16xbf16>, vector<16x16xbf16>, vector<12x16xf32> -> vector<12x16xf32>
    %114 = arith.addf %108, %113 : vector<12x16xf32>
    %115 = vector.extract_strided_slice %94 {offsets = [3, 0], sizes = [12, 16], strides = [1, 1]} : vector<16x16xf32> to vector<12x16xf32>
    %116 = arith.truncf %115 : vector<12x16xf32> to vector<12x16xbf16>
    %c3_79 = arith.constant 3 : index
    %c0_80 = arith.constant 0 : index
    %c0_81 = arith.constant 0 : index
    %117 = vector.load %arg12[%c3_79, %c0_80, %c0_81] : memref<5x16x16xbf16, #tpu.memory_space<vmem>>, vector<1x16x16xbf16>
    %118 = vector.shape_cast %117 : vector<1x16x16xbf16> to vector<16x16xbf16>
    %cst_82 = arith.constant dense<0.000000e+00> : vector<12x16xf32>
    %119 = tpu.matmul %116, %118, %cst_82 {dimension_numbers = #tpu.dot_dimension_numbers<[1], [0], [0], [1], [0, 0, 1, 1], [], []>} : vector<12x16xbf16>, vector<16x16xbf16>, vector<12x16xf32> -> vector<12x16xf32>
    %120 = arith.addf %114, %119 : vector<12x16xf32>
    %121 = vector.extract_strided_slice %94 {offsets = [4, 0], sizes = [12, 16], strides = [1, 1]} : vector<16x16xf32> to vector<12x16xf32>
    %122 = arith.truncf %121 : vector<12x16xf32> to vector<12x16xbf16>
    %c4_83 = arith.constant 4 : index
    %c0_84 = arith.constant 0 : index
    %c0_85 = arith.constant 0 : index
    %123 = vector.load %arg12[%c4_83, %c0_84, %c0_85] : memref<5x16x16xbf16, #tpu.memory_space<vmem>>, vector<1x16x16xbf16>
    %124 = vector.shape_cast %123 : vector<1x16x16xbf16> to vector<16x16xbf16>
    %cst_86 = arith.constant dense<0.000000e+00> : vector<12x16xf32>
    %125 = tpu.matmul %122, %124, %cst_86 {dimension_numbers = #tpu.dot_dimension_numbers<[1], [0], [0], [1], [0, 0, 1, 1], [], []>} : vector<12x16xbf16>, vector<16x16xbf16>, vector<12x16xf32> -> vector<12x16xf32>
    %126 = arith.addf %120, %125 : vector<12x16xf32>
    %cst_87 = arith.constant 0.000000e+00 : f32
    %127 = vector.broadcast %cst_87 : f32 to vector<12x16xf32>
    %128 = arith.maximumf %126, %127 : vector<12x16xf32>
    %c0_88 = arith.constant 0 : index
    %c0_89 = arith.constant 0 : index
    %129 = vector.load %arg15[%c0_88, %c0_89] : memref<1x6xf32, #tpu.memory_space<vmem>>, vector<1x6xf32>
    %130 = vector.extract_strided_slice %128 {offsets = [0, 0], sizes = [8, 16], strides = [1, 1]} : vector<12x16xf32> to vector<8x16xf32>
    %131 = arith.truncf %130 : vector<8x16xf32> to vector<8x16xbf16>
    %c0_90 = arith.constant 0 : index
    %c0_91 = arith.constant 0 : index
    %c0_92 = arith.constant 0 : index
    %132 = vector.load %arg14[%c0_90, %c0_91, %c0_92] : memref<5x16x6xbf16, #tpu.memory_space<vmem>>, vector<1x16x6xbf16>
    %133 = vector.shape_cast %132 : vector<1x16x6xbf16> to vector<16x6xbf16>
    %cst_93 = arith.constant dense<0.000000e+00> : vector<8x6xf32>
    %134 = tpu.matmul %131, %133, %cst_93 {dimension_numbers = #tpu.dot_dimension_numbers<[1], [0], [0], [1], [0, 0, 1, 1], [], []>} : vector<8x16xbf16>, vector<16x6xbf16>, vector<8x6xf32> -> vector<8x6xf32>
    %135 = vector.broadcast %129 : vector<1x6xf32> to vector<8x6xf32>
    %136 = arith.addf %135, %134 : vector<8x6xf32>
    %137 = vector.extract_strided_slice %128 {offsets = [1, 0], sizes = [8, 16], strides = [1, 1]} : vector<12x16xf32> to vector<8x16xf32>
    %138 = arith.truncf %137 : vector<8x16xf32> to vector<8x16xbf16>
    %c1_94 = arith.constant 1 : index
    %c0_95 = arith.constant 0 : index
    %c0_96 = arith.constant 0 : index
    %139 = vector.load %arg14[%c1_94, %c0_95, %c0_96] : memref<5x16x6xbf16, #tpu.memory_space<vmem>>, vector<1x16x6xbf16>
    %140 = vector.shape_cast %139 : vector<1x16x6xbf16> to vector<16x6xbf16>
    %cst_97 = arith.constant dense<0.000000e+00> : vector<8x6xf32>
    %141 = tpu.matmul %138, %140, %cst_97 {dimension_numbers = #tpu.dot_dimension_numbers<[1], [0], [0], [1], [0, 0, 1, 1], [], []>} : vector<8x16xbf16>, vector<16x6xbf16>, vector<8x6xf32> -> vector<8x6xf32>
    %142 = arith.addf %136, %141 : vector<8x6xf32>
    %143 = vector.extract_strided_slice %128 {offsets = [2, 0], sizes = [8, 16], strides = [1, 1]} : vector<12x16xf32> to vector<8x16xf32>
    %144 = arith.truncf %143 : vector<8x16xf32> to vector<8x16xbf16>
    %c2_98 = arith.constant 2 : index
    %c0_99 = arith.constant 0 : index
    %c0_100 = arith.constant 0 : index
    %145 = vector.load %arg14[%c2_98, %c0_99, %c0_100] : memref<5x16x6xbf16, #tpu.memory_space<vmem>>, vector<1x16x6xbf16>
    %146 = vector.shape_cast %145 : vector<1x16x6xbf16> to vector<16x6xbf16>
    %cst_101 = arith.constant dense<0.000000e+00> : vector<8x6xf32>
    %147 = tpu.matmul %144, %146, %cst_101 {dimension_numbers = #tpu.dot_dimension_numbers<[1], [0], [0], [1], [0, 0, 1, 1], [], []>} : vector<8x16xbf16>, vector<16x6xbf16>, vector<8x6xf32> -> vector<8x6xf32>
    %148 = arith.addf %142, %147 : vector<8x6xf32>
    %149 = vector.extract_strided_slice %128 {offsets = [3, 0], sizes = [8, 16], strides = [1, 1]} : vector<12x16xf32> to vector<8x16xf32>
    %150 = arith.truncf %149 : vector<8x16xf32> to vector<8x16xbf16>
    %c3_102 = arith.constant 3 : index
    %c0_103 = arith.constant 0 : index
    %c0_104 = arith.constant 0 : index
    %151 = vector.load %arg14[%c3_102, %c0_103, %c0_104] : memref<5x16x6xbf16, #tpu.memory_space<vmem>>, vector<1x16x6xbf16>
    %152 = vector.shape_cast %151 : vector<1x16x6xbf16> to vector<16x6xbf16>
    %cst_105 = arith.constant dense<0.000000e+00> : vector<8x6xf32>
    %153 = tpu.matmul %150, %152, %cst_105 {dimension_numbers = #tpu.dot_dimension_numbers<[1], [0], [0], [1], [0, 0, 1, 1], [], []>} : vector<8x16xbf16>, vector<16x6xbf16>, vector<8x6xf32> -> vector<8x6xf32>
    %154 = arith.addf %148, %153 : vector<8x6xf32>
    %155 = vector.extract_strided_slice %128 {offsets = [4, 0], sizes = [8, 16], strides = [1, 1]} : vector<12x16xf32> to vector<8x16xf32>
    %156 = arith.truncf %155 : vector<8x16xf32> to vector<8x16xbf16>
    %c4_106 = arith.constant 4 : index
    %c0_107 = arith.constant 0 : index
    %c0_108 = arith.constant 0 : index
    %157 = vector.load %arg14[%c4_106, %c0_107, %c0_108] : memref<5x16x6xbf16, #tpu.memory_space<vmem>>, vector<1x16x6xbf16>
    %158 = vector.shape_cast %157 : vector<1x16x6xbf16> to vector<16x6xbf16>
    %cst_109 = arith.constant dense<0.000000e+00> : vector<8x6xf32>
    %159 = tpu.matmul %156, %158, %cst_109 {dimension_numbers = #tpu.dot_dimension_numbers<[1], [0], [0], [1], [0, 0, 1, 1], [], []>} : vector<8x16xbf16>, vector<16x6xbf16>, vector<8x6xf32> -> vector<8x6xf32>
    %160 = arith.addf %154, %159 : vector<8x6xf32>
    %c0_110 = arith.constant 0 : index
    %c0_111 = arith.constant 0 : index
    %c0_112 = arith.constant 0 : index
    %161 = vector.load %arg16[%c0_110, %c0_111, %c0_112] : memref<2x8x6xf32, #tpu.memory_space<vmem>>, vector<1x8x6xf32>
    %162 = vector.shape_cast %161 : vector<1x8x6xf32> to vector<8x6xf32>
    %163 = vector.shape_cast %160 : vector<8x6xf32> to vector<1x8x6xf32>
    tpu.vector_store %arg16[%c0_110, %c0_111, %c0_112], %163 {strides = array<i32>} : memref<2x8x6xf32, #tpu.memory_space<vmem>>, vector<1x8x6xf32>,
    %164 = vector.extract_strided_slice %21 {offsets = [8, 0], sizes = [8, 32], strides = [1, 1]} : vector<16x32xf32> to vector<8x32xf32>
    %c16_113 = arith.constant 16 : index
    %c0_114 = arith.constant 0 : index
    %165 = vector.load %arg17[%c16_113, %c0_114] : memref<24x32xf32, #tpu.memory_space<vmem>>, vector<8x32xf32>
    tpu.vector_store %arg17[%c16_113, %c0_114], %164 {strides = array<i32>} : memref<24x32xf32, #tpu.memory_space<vmem>>, vector<8x32xf32>,
    %c0_115 = arith.constant 0 : index
    %c0_116 = arith.constant 0 : index
    %166 = vector.load %arg17[%c0_115, %c0_116] : memref<24x32xf32, #tpu.memory_space<vmem>>, vector<24x32xf32>
    %c0_117 = arith.constant 0 : index
    %c0_118 = arith.constant 0 : index
    %167 = vector.load %arg9[%c0_117, %c0_118] : memref<1x16xf32, #tpu.memory_space<vmem>>, vector<1x16xf32>
    %168 = vector.extract_strided_slice %166 {offsets = [0, 0], sizes = [20, 32], strides = [1, 1]} : vector<24x32xf32> to vector<20x32xf32>
    %169 = arith.truncf %168 : vector<20x32xf32> to vector<20x32xbf16>
    %c0_119 = arith.constant 0 : index
    %c0_120 = arith.constant 0 : index
    %c0_121 = arith.constant 0 : index
    %170 = vector.load %arg8[%c0_119, %c0_120, %c0_121] : memref<5x32x16xbf16, #tpu.memory_space<vmem>>, vector<1x32x16xbf16>
    %171 = vector.shape_cast %170 : vector<1x32x16xbf16> to vector<32x16xbf16>
    %cst_122 = arith.constant dense<0.000000e+00> : vector<20x16xf32>
    %172 = tpu.matmul %169, %171, %cst_122 {dimension_numbers = #tpu.dot_dimension_numbers<[1], [0], [0], [1], [0, 0, 1, 1], [], []>} : vector<20x32xbf16>, vector<32x16xbf16>, vector<20x16xf32> -> vector<20x16xf32>
    %173 = vector.broadcast %167 : vector<1x16xf32> to vector<20x16xf32>
    %174 = arith.addf %173, %172 : vector<20x16xf32>
    %175 = vector.extract_strided_slice %166 {offsets = [1, 0], sizes = [20, 32], strides = [1, 1]} : vector<24x32xf32> to vector<20x32xf32>
    %176 = arith.truncf %175 : vector<20x32xf32> to vector<20x32xbf16>
    %c1_123 = arith.constant 1 : index
    %c0_124 = arith.constant 0 : index
    %c0_125 = arith.constant 0 : index
    %177 = vector.load %arg8[%c1_123, %c0_124, %c0_125] : memref<5x32x16xbf16, #tpu.memory_space<vmem>>, vector<1x32x16xbf16>
    %178 = vector.shape_cast %177 : vector<1x32x16xbf16> to vector<32x16xbf16>
    %cst_126 = arith.constant dense<0.000000e+00> : vector<20x16xf32>
    %179 = tpu.matmul %176, %178, %cst_126 {dimension_numbers = #tpu.dot_dimension_numbers<[1], [0], [0], [1], [0, 0, 1, 1], [], []>} : vector<20x32xbf16>, vector<32x16xbf16>, vector<20x16xf32> -> vector<20x16xf32>
    %180 = arith.addf %174, %179 : vector<20x16xf32>
    %181 = vector.extract_strided_slice %166 {offsets = [2, 0], sizes = [20, 32], strides = [1, 1]} : vector<24x32xf32> to vector<20x32xf32>
    %182 = arith.truncf %181 : vector<20x32xf32> to vector<20x32xbf16>
    %c2_127 = arith.constant 2 : index
    %c0_128 = arith.constant 0 : index
    %c0_129 = arith.constant 0 : index
    %183 = vector.load %arg8[%c2_127, %c0_128, %c0_129] : memref<5x32x16xbf16, #tpu.memory_space<vmem>>, vector<1x32x16xbf16>
    %184 = vector.shape_cast %183 : vector<1x32x16xbf16> to vector<32x16xbf16>
    %cst_130 = arith.constant dense<0.000000e+00> : vector<20x16xf32>
    %185 = tpu.matmul %182, %184, %cst_130 {dimension_numbers = #tpu.dot_dimension_numbers<[1], [0], [0], [1], [0, 0, 1, 1], [], []>} : vector<20x32xbf16>, vector<32x16xbf16>, vector<20x16xf32> -> vector<20x16xf32>
    %186 = arith.addf %180, %185 : vector<20x16xf32>
    %187 = vector.extract_strided_slice %166 {offsets = [3, 0], sizes = [20, 32], strides = [1, 1]} : vector<24x32xf32> to vector<20x32xf32>
    %188 = arith.truncf %187 : vector<20x32xf32> to vector<20x32xbf16>
    %c3_131 = arith.constant 3 : index
    %c0_132 = arith.constant 0 : index
    %c0_133 = arith.constant 0 : index
    %189 = vector.load %arg8[%c3_131, %c0_132, %c0_133] : memref<5x32x16xbf16, #tpu.memory_space<vmem>>, vector<1x32x16xbf16>
    %190 = vector.shape_cast %189 : vector<1x32x16xbf16> to vector<32x16xbf16>
    %cst_134 = arith.constant dense<0.000000e+00> : vector<20x16xf32>
    %191 = tpu.matmul %188, %190, %cst_134 {dimension_numbers = #tpu.dot_dimension_numbers<[1], [0], [0], [1], [0, 0, 1, 1], [], []>} : vector<20x32xbf16>, vector<32x16xbf16>, vector<20x16xf32> -> vector<20x16xf32>
    %192 = arith.addf %186, %191 : vector<20x16xf32>
    %193 = vector.extract_strided_slice %166 {offsets = [4, 0], sizes = [20, 32], strides = [1, 1]} : vector<24x32xf32> to vector<20x32xf32>
    %194 = arith.truncf %193 : vector<20x32xf32> to vector<20x32xbf16>
    %c4_135 = arith.constant 4 : index
    %c0_136 = arith.constant 0 : index
    %c0_137 = arith.constant 0 : index
    %195 = vector.load %arg8[%c4_135, %c0_136, %c0_137] : memref<5x32x16xbf16, #tpu.memory_space<vmem>>, vector<1x32x16xbf16>
    %196 = vector.shape_cast %195 : vector<1x32x16xbf16> to vector<32x16xbf16>
    %cst_138 = arith.constant dense<0.000000e+00> : vector<20x16xf32>
    %197 = tpu.matmul %194, %196, %cst_138 {dimension_numbers = #tpu.dot_dimension_numbers<[1], [0], [0], [1], [0, 0, 1, 1], [], []>} : vector<20x32xbf16>, vector<32x16xbf16>, vector<20x16xf32> -> vector<20x16xf32>
    %198 = arith.addf %192, %197 : vector<20x16xf32>
    %cst_139 = arith.constant 0.000000e+00 : f32
    %199 = vector.broadcast %cst_139 : f32 to vector<20x16xf32>
    %200 = arith.maximumf %198, %199 : vector<20x16xf32>
    %c0_140 = arith.constant 0 : index
    %c0_141 = arith.constant 0 : index
    %201 = vector.load %arg11[%c0_140, %c0_141] : memref<1x16xf32, #tpu.memory_space<vmem>>, vector<1x16xf32>
    %202 = vector.extract_strided_slice %200 {offsets = [0, 0], sizes = [16, 16], strides = [1, 1]} : vector<20x16xf32> to vector<16x16xf32>
    %203 = arith.truncf %202 : vector<16x16xf32> to vector<16x16xbf16>
    %c0_142 = arith.constant 0 : index
    %c0_143 = arith.constant 0 : index
    %c0_144 = arith.constant 0 : index
    %204 = vector.load %arg10[%c0_142, %c0_143, %c0_144] : memref<5x16x16xbf16, #tpu.memory_space<vmem>>, vector<1x16x16xbf16>
    %205 = vector.shape_cast %204 : vector<1x16x16xbf16> to vector<16x16xbf16>
    %cst_145 = arith.constant dense<0.000000e+00> : vector<16x16xf32>
    %206 = tpu.matmul %203, %205, %cst_145 {dimension_numbers = #tpu.dot_dimension_numbers<[1], [0], [0], [1], [0, 0, 1, 1], [], []>} : vector<16x16xbf16>, vector<16x16xbf16>, vector<16x16xf32> -> vector<16x16xf32>
    %207 = vector.broadcast %201 : vector<1x16xf32> to vector<16x16xf32>
    %208 = arith.addf %207, %206 : vector<16x16xf32>
    %209 = vector.extract_strided_slice %200 {offsets = [1, 0], sizes = [16, 16], strides = [1, 1]} : vector<20x16xf32> to vector<16x16xf32>
    %210 = arith.truncf %209 : vector<16x16xf32> to vector<16x16xbf16>
    %c1_146 = arith.constant 1 : index
    %c0_147 = arith.constant 0 : index
    %c0_148 = arith.constant 0 : index
    %211 = vector.load %arg10[%c1_146, %c0_147, %c0_148] : memref<5x16x16xbf16, #tpu.memory_space<vmem>>, vector<1x16x16xbf16>
    %212 = vector.shape_cast %211 : vector<1x16x16xbf16> to vector<16x16xbf16>
    %cst_149 = arith.constant dense<0.000000e+00> : vector<16x16xf32>
    %213 = tpu.matmul %210, %212, %cst_149 {dimension_numbers = #tpu.dot_dimension_numbers<[1], [0], [0], [1], [0, 0, 1, 1], [], []>} : vector<16x16xbf16>, vector<16x16xbf16>, vector<16x16xf32> -> vector<16x16xf32>
    %214 = arith.addf %208, %213 : vector<16x16xf32>
    %215 = vector.extract_strided_slice %200 {offsets = [2, 0], sizes = [16, 16], strides = [1, 1]} : vector<20x16xf32> to vector<16x16xf32>
    %216 = arith.truncf %215 : vector<16x16xf32> to vector<16x16xbf16>
    %c2_150 = arith.constant 2 : index
    %c0_151 = arith.constant 0 : index
    %c0_152 = arith.constant 0 : index
    %217 = vector.load %arg10[%c2_150, %c0_151, %c0_152] : memref<5x16x16xbf16, #tpu.memory_space<vmem>>, vector<1x16x16xbf16>
    %218 = vector.shape_cast %217 : vector<1x16x16xbf16> to vector<16x16xbf16>
    %cst_153 = arith.constant dense<0.000000e+00> : vector<16x16xf32>
    %219 = tpu.matmul %216, %218, %cst_153 {dimension_numbers = #tpu.dot_dimension_numbers<[1], [0], [0], [1], [0, 0, 1, 1], [], []>} : vector<16x16xbf16>, vector<16x16xbf16>, vector<16x16xf32> -> vector<16x16xf32>
    %220 = arith.addf %214, %219 : vector<16x16xf32>
    %221 = vector.extract_strided_slice %200 {offsets = [3, 0], sizes = [16, 16], strides = [1, 1]} : vector<20x16xf32> to vector<16x16xf32>
    %222 = arith.truncf %221 : vector<16x16xf32> to vector<16x16xbf16>
    %c3_154 = arith.constant 3 : index
    %c0_155 = arith.constant 0 : index
    %c0_156 = arith.constant 0 : index
    %223 = vector.load %arg10[%c3_154, %c0_155, %c0_156] : memref<5x16x16xbf16, #tpu.memory_space<vmem>>, vector<1x16x16xbf16>
    %224 = vector.shape_cast %223 : vector<1x16x16xbf16> to vector<16x16xbf16>
    %cst_157 = arith.constant dense<0.000000e+00> : vector<16x16xf32>
    %225 = tpu.matmul %222, %224, %cst_157 {dimension_numbers = #tpu.dot_dimension_numbers<[1], [0], [0], [1], [0, 0, 1, 1], [], []>} : vector<16x16xbf16>, vector<16x16xbf16>, vector<16x16xf32> -> vector<16x16xf32>
    %226 = arith.addf %220, %225 : vector<16x16xf32>
    %227 = vector.extract_strided_slice %200 {offsets = [4, 0], sizes = [16, 16], strides = [1, 1]} : vector<20x16xf32> to vector<16x16xf32>
    %228 = arith.truncf %227 : vector<16x16xf32> to vector<16x16xbf16>
    %c4_158 = arith.constant 4 : index
    %c0_159 = arith.constant 0 : index
    %c0_160 = arith.constant 0 : index
    %229 = vector.load %arg10[%c4_158, %c0_159, %c0_160] : memref<5x16x16xbf16, #tpu.memory_space<vmem>>, vector<1x16x16xbf16>
    %230 = vector.shape_cast %229 : vector<1x16x16xbf16> to vector<16x16xbf16>
    %cst_161 = arith.constant dense<0.000000e+00> : vector<16x16xf32>
    %231 = tpu.matmul %228, %230, %cst_161 {dimension_numbers = #tpu.dot_dimension_numbers<[1], [0], [0], [1], [0, 0, 1, 1], [], []>} : vector<16x16xbf16>, vector<16x16xbf16>, vector<16x16xf32> -> vector<16x16xf32>
    %232 = arith.addf %226, %231 : vector<16x16xf32>
    %cst_162 = arith.constant 0.000000e+00 : f32
    %233 = vector.broadcast %cst_162 : f32 to vector<16x16xf32>
    %234 = arith.maximumf %232, %233 : vector<16x16xf32>
    %c0_163 = arith.constant 0 : index
    %c0_164 = arith.constant 0 : index
    %235 = vector.load %arg13[%c0_163, %c0_164] : memref<1x16xf32, #tpu.memory_space<vmem>>, vector<1x16xf32>
    %236 = vector.extract_strided_slice %234 {offsets = [0, 0], sizes = [12, 16], strides = [1, 1]} : vector<16x16xf32> to vector<12x16xf32>
    %237 = arith.truncf %236 : vector<12x16xf32> to vector<12x16xbf16>
    %c0_165 = arith.constant 0 : index
    %c0_166 = arith.constant 0 : index
    %c0_167 = arith.constant 0 : index
    %238 = vector.load %arg12[%c0_165, %c0_166, %c0_167] : memref<5x16x16xbf16, #tpu.memory_space<vmem>>, vector<1x16x16xbf16>
    %239 = vector.shape_cast %238 : vector<1x16x16xbf16> to vector<16x16xbf16>
    %cst_168 = arith.constant dense<0.000000e+00> : vector<12x16xf32>
    %240 = tpu.matmul %237, %239, %cst_168 {dimension_numbers = #tpu.dot_dimension_numbers<[1], [0], [0], [1], [0, 0, 1, 1], [], []>} : vector<12x16xbf16>, vector<16x16xbf16>, vector<12x16xf32> -> vector<12x16xf32>
    %241 = vector.broadcast %235 : vector<1x16xf32> to vector<12x16xf32>
    %242 = arith.addf %241, %240 : vector<12x16xf32>
    %243 = vector.extract_strided_slice %234 {offsets = [1, 0], sizes = [12, 16], strides = [1, 1]} : vector<16x16xf32> to vector<12x16xf32>
    %244 = arith.truncf %243 : vector<12x16xf32> to vector<12x16xbf16>
    %c1_169 = arith.constant 1 : index
    %c0_170 = arith.constant 0 : index
    %c0_171 = arith.constant 0 : index
    %245 = vector.load %arg12[%c1_169, %c0_170, %c0_171] : memref<5x16x16xbf16, #tpu.memory_space<vmem>>, vector<1x16x16xbf16>
    %246 = vector.shape_cast %245 : vector<1x16x16xbf16> to vector<16x16xbf16>
    %cst_172 = arith.constant dense<0.000000e+00> : vector<12x16xf32>
    %247 = tpu.matmul %244, %246, %cst_172 {dimension_numbers = #tpu.dot_dimension_numbers<[1], [0], [0], [1], [0, 0, 1, 1], [], []>} : vector<12x16xbf16>, vector<16x16xbf16>, vector<12x16xf32> -> vector<12x16xf32>
    %248 = arith.addf %242, %247 : vector<12x16xf32>
    %249 = vector.extract_strided_slice %234 {offsets = [2, 0], sizes = [12, 16], strides = [1, 1]} : vector<16x16xf32> to vector<12x16xf32>
    %250 = arith.truncf %249 : vector<12x16xf32> to vector<12x16xbf16>
    %c2_173 = arith.constant 2 : index
    %c0_174 = arith.constant 0 : index
    %c0_175 = arith.constant 0 : index
    %251 = vector.load %arg12[%c2_173, %c0_174, %c0_175] : memref<5x16x16xbf16, #tpu.memory_space<vmem>>, vector<1x16x16xbf16>
    %252 = vector.shape_cast %251 : vector<1x16x16xbf16> to vector<16x16xbf16>
    %cst_176 = arith.constant dense<0.000000e+00> : vector<12x16xf32>
    %253 = tpu.matmul %250, %252, %cst_176 {dimension_numbers = #tpu.dot_dimension_numbers<[1], [0], [0], [1], [0, 0, 1, 1], [], []>} : vector<12x16xbf16>, vector<16x16xbf16>, vector<12x16xf32> -> vector<12x16xf32>
    %254 = arith.addf %248, %253 : vector<12x16xf32>
    %255 = vector.extract_strided_slice %234 {offsets = [3, 0], sizes = [12, 16], strides = [1, 1]} : vector<16x16xf32> to vector<12x16xf32>
    %256 = arith.truncf %255 : vector<12x16xf32> to vector<12x16xbf16>
    %c3_177 = arith.constant 3 : index
    %c0_178 = arith.constant 0 : index
    %c0_179 = arith.constant 0 : index
    %257 = vector.load %arg12[%c3_177, %c0_178, %c0_179] : memref<5x16x16xbf16, #tpu.memory_space<vmem>>, vector<1x16x16xbf16>
    %258 = vector.shape_cast %257 : vector<1x16x16xbf16> to vector<16x16xbf16>
    %cst_180 = arith.constant dense<0.000000e+00> : vector<12x16xf32>
    %259 = tpu.matmul %256, %258, %cst_180 {dimension_numbers = #tpu.dot_dimension_numbers<[1], [0], [0], [1], [0, 0, 1, 1], [], []>} : vector<12x16xbf16>, vector<16x16xbf16>, vector<12x16xf32> -> vector<12x16xf32>
    %260 = arith.addf %254, %259 : vector<12x16xf32>
    %261 = vector.extract_strided_slice %234 {offsets = [4, 0], sizes = [12, 16], strides = [1, 1]} : vector<16x16xf32> to vector<12x16xf32>
    %262 = arith.truncf %261 : vector<12x16xf32> to vector<12x16xbf16>
    %c4_181 = arith.constant 4 : index
    %c0_182 = arith.constant 0 : index
    %c0_183 = arith.constant 0 : index
    %263 = vector.load %arg12[%c4_181, %c0_182, %c0_183] : memref<5x16x16xbf16, #tpu.memory_space<vmem>>, vector<1x16x16xbf16>
    %264 = vector.shape_cast %263 : vector<1x16x16xbf16> to vector<16x16xbf16>
    %cst_184 = arith.constant dense<0.000000e+00> : vector<12x16xf32>
    %265 = tpu.matmul %262, %264, %cst_184 {dimension_numbers = #tpu.dot_dimension_numbers<[1], [0], [0], [1], [0, 0, 1, 1], [], []>} : vector<12x16xbf16>, vector<16x16xbf16>, vector<12x16xf32> -> vector<12x16xf32>
    %266 = arith.addf %260, %265 : vector<12x16xf32>
    %cst_185 = arith.constant 0.000000e+00 : f32
    %267 = vector.broadcast %cst_185 : f32 to vector<12x16xf32>
    %268 = arith.maximumf %266, %267 : vector<12x16xf32>
    %c0_186 = arith.constant 0 : index
    %c0_187 = arith.constant 0 : index
    %269 = vector.load %arg15[%c0_186, %c0_187] : memref<1x6xf32, #tpu.memory_space<vmem>>, vector<1x6xf32>
    %270 = vector.extract_strided_slice %268 {offsets = [0, 0], sizes = [8, 16], strides = [1, 1]} : vector<12x16xf32> to vector<8x16xf32>
    %271 = arith.truncf %270 : vector<8x16xf32> to vector<8x16xbf16>
    %c0_188 = arith.constant 0 : index
    %c0_189 = arith.constant 0 : index
    %c0_190 = arith.constant 0 : index
    %272 = vector.load %arg14[%c0_188, %c0_189, %c0_190] : memref<5x16x6xbf16, #tpu.memory_space<vmem>>, vector<1x16x6xbf16>
    %273 = vector.shape_cast %272 : vector<1x16x6xbf16> to vector<16x6xbf16>
    %cst_191 = arith.constant dense<0.000000e+00> : vector<8x6xf32>
    %274 = tpu.matmul %271, %273, %cst_191 {dimension_numbers = #tpu.dot_dimension_numbers<[1], [0], [0], [1], [0, 0, 1, 1], [], []>} : vector<8x16xbf16>, vector<16x6xbf16>, vector<8x6xf32> -> vector<8x6xf32>
    %275 = vector.broadcast %269 : vector<1x6xf32> to vector<8x6xf32>
    %276 = arith.addf %275, %274 : vector<8x6xf32>
    %277 = vector.extract_strided_slice %268 {offsets = [1, 0], sizes = [8, 16], strides = [1, 1]} : vector<12x16xf32> to vector<8x16xf32>
    %278 = arith.truncf %277 : vector<8x16xf32> to vector<8x16xbf16>
    %c1_192 = arith.constant 1 : index
    %c0_193 = arith.constant 0 : index
    %c0_194 = arith.constant 0 : index
    %279 = vector.load %arg14[%c1_192, %c0_193, %c0_194] : memref<5x16x6xbf16, #tpu.memory_space<vmem>>, vector<1x16x6xbf16>
    %280 = vector.shape_cast %279 : vector<1x16x6xbf16> to vector<16x6xbf16>
    %cst_195 = arith.constant dense<0.000000e+00> : vector<8x6xf32>
    %281 = tpu.matmul %278, %280, %cst_195 {dimension_numbers = #tpu.dot_dimension_numbers<[1], [0], [0], [1], [0, 0, 1, 1], [], []>} : vector<8x16xbf16>, vector<16x6xbf16>, vector<8x6xf32> -> vector<8x6xf32>
    %282 = arith.addf %276, %281 : vector<8x6xf32>
    %283 = vector.extract_strided_slice %268 {offsets = [2, 0], sizes = [8, 16], strides = [1, 1]} : vector<12x16xf32> to vector<8x16xf32>
    %284 = arith.truncf %283 : vector<8x16xf32> to vector<8x16xbf16>
    %c2_196 = arith.constant 2 : index
    %c0_197 = arith.constant 0 : index
    %c0_198 = arith.constant 0 : index
    %285 = vector.load %arg14[%c2_196, %c0_197, %c0_198] : memref<5x16x6xbf16, #tpu.memory_space<vmem>>, vector<1x16x6xbf16>
    %286 = vector.shape_cast %285 : vector<1x16x6xbf16> to vector<16x6xbf16>
    %cst_199 = arith.constant dense<0.000000e+00> : vector<8x6xf32>
    %287 = tpu.matmul %284, %286, %cst_199 {dimension_numbers = #tpu.dot_dimension_numbers<[1], [0], [0], [1], [0, 0, 1, 1], [], []>} : vector<8x16xbf16>, vector<16x6xbf16>, vector<8x6xf32> -> vector<8x6xf32>
    %288 = arith.addf %282, %287 : vector<8x6xf32>
    %289 = vector.extract_strided_slice %268 {offsets = [3, 0], sizes = [8, 16], strides = [1, 1]} : vector<12x16xf32> to vector<8x16xf32>
    %290 = arith.truncf %289 : vector<8x16xf32> to vector<8x16xbf16>
    %c3_200 = arith.constant 3 : index
    %c0_201 = arith.constant 0 : index
    %c0_202 = arith.constant 0 : index
    %291 = vector.load %arg14[%c3_200, %c0_201, %c0_202] : memref<5x16x6xbf16, #tpu.memory_space<vmem>>, vector<1x16x6xbf16>
    %292 = vector.shape_cast %291 : vector<1x16x6xbf16> to vector<16x6xbf16>
    %cst_203 = arith.constant dense<0.000000e+00> : vector<8x6xf32>
    %293 = tpu.matmul %290, %292, %cst_203 {dimension_numbers = #tpu.dot_dimension_numbers<[1], [0], [0], [1], [0, 0, 1, 1], [], []>} : vector<8x16xbf16>, vector<16x6xbf16>, vector<8x6xf32> -> vector<8x6xf32>
    %294 = arith.addf %288, %293 : vector<8x6xf32>
    %295 = vector.extract_strided_slice %268 {offsets = [4, 0], sizes = [8, 16], strides = [1, 1]} : vector<12x16xf32> to vector<8x16xf32>
    %296 = arith.truncf %295 : vector<8x16xf32> to vector<8x16xbf16>
    %c4_204 = arith.constant 4 : index
    %c0_205 = arith.constant 0 : index
    %c0_206 = arith.constant 0 : index
    %297 = vector.load %arg14[%c4_204, %c0_205, %c0_206] : memref<5x16x6xbf16, #tpu.memory_space<vmem>>, vector<1x16x6xbf16>
    %298 = vector.shape_cast %297 : vector<1x16x6xbf16> to vector<16x6xbf16>
    %cst_207 = arith.constant dense<0.000000e+00> : vector<8x6xf32>
    %299 = tpu.matmul %296, %298, %cst_207 {dimension_numbers = #tpu.dot_dimension_numbers<[1], [0], [0], [1], [0, 0, 1, 1], [], []>} : vector<8x16xbf16>, vector<16x6xbf16>, vector<8x6xf32> -> vector<8x6xf32>
    %300 = arith.addf %294, %299 : vector<8x6xf32>
    %c1_208 = arith.constant 1 : index
    %c0_209 = arith.constant 0 : index
    %c0_210 = arith.constant 0 : index
    %301 = vector.load %arg16[%c1_208, %c0_209, %c0_210] : memref<2x8x6xf32, #tpu.memory_space<vmem>>, vector<1x8x6xf32>
    %302 = vector.shape_cast %301 : vector<1x8x6xf32> to vector<8x6xf32>
    %303 = vector.shape_cast %300 : vector<8x6xf32> to vector<1x8x6xf32>
    tpu.vector_store %arg16[%c1_208, %c0_209, %c0_210], %303 {strides = array<i32>} : memref<2x8x6xf32, #tpu.memory_space<vmem>>, vector<1x8x6xf32>,
    return
  }
  func.func @transform_0(%arg0: i32) -> (i32, i32) {
    %c0_i32 = arith.constant 0 : i32
    %c0_i32_0 = arith.constant 0 : i32
    %c0_i32_1 = arith.constant 0 : i32
    return %c0_i32, %c0_i32_0 : i32, i32
  }
  func.func @transform_1(%arg0: i32) -> (i32, i32) {
    %c0_i32 = arith.constant 0 : i32
    %c0_i32_0 = arith.constant 0 : i32
    %c0_i32_1 = arith.constant 0 : i32
    return %c0_i32, %c0_i32_0 : i32, i32
  }
  func.func @transform_2(%arg0: i32) -> (i32, i32) {
    %c0_i32 = arith.constant 0 : i32
    %c0_i32_0 = arith.constant 0 : i32
    %c0_i32_1 = arith.constant 0 : i32
    return %c0_i32, %c0_i32_0 : i32, i32
  }
  func.func @transform_3(%arg0: i32) -> (i32, i32) {
    %c0_i32 = arith.constant 0 : i32
    %c0_i32_0 = arith.constant 0 : i32
    %c0_i32_1 = arith.constant 0 : i32
    return %c0_i32, %c0_i32_0 : i32, i32
  }
  func.func @transform_4(%arg0: i32) -> (i32, i32) {
    %c0_i32 = arith.constant 0 : i32
    %c0_i32_0 = arith.constant 0 : i32
    %c0_i32_1 = arith.constant 0 : i32
    return %c0_i32, %c0_i32_0 : i32, i32
  }
  func.func @transform_5(%arg0: i32) -> (i32, i32) {
    %c0_i32 = arith.constant 0 : i32
    %c0_i32_0 = arith.constant 0 : i32
    %c0_i32_1 = arith.constant 0 : i32
    return %c0_i32, %c0_i32_0 : i32, i32
  }
  func.func @transform_6(%arg0: i32) -> (i32, i32) {
    %c0_i32 = arith.constant 0 : i32
    %c0_i32_0 = arith.constant 0 : i32
    %c0_i32_1 = arith.constant 0 : i32
    return %c0_i32, %c0_i32_0 : i32, i32
  }
  func.func @transform_7(%arg0: i32) -> (i32, i32, i32) {
    %c0_i32 = arith.constant 0 : i32
    %c0_i32_0 = arith.constant 0 : i32
    %c0_i32_1 = arith.constant 0 : i32
    %c0_i32_2 = arith.constant 0 : i32
    return %c0_i32, %c0_i32_0, %c0_i32_1 : i32, i32, i32
  }
  func.func @transform_8(%arg0: i32) -> (i32, i32) {
    %c0_i32 = arith.constant 0 : i32
    %c0_i32_0 = arith.constant 0 : i32
    %c0_i32_1 = arith.constant 0 : i32
    return %c0_i32, %c0_i32_0 : i32, i32
  }
  func.func @transform_9(%arg0: i32) -> (i32, i32, i32) {
    %c0_i32 = arith.constant 0 : i32
    %c0_i32_0 = arith.constant 0 : i32
    %c0_i32_1 = arith.constant 0 : i32
    %c0_i32_2 = arith.constant 0 : i32
    return %c0_i32, %c0_i32_0, %c0_i32_1 : i32, i32, i32
  }
  func.func @transform_10(%arg0: i32) -> (i32, i32) {
    %c0_i32 = arith.constant 0 : i32
    %c0_i32_0 = arith.constant 0 : i32
    %c0_i32_1 = arith.constant 0 : i32
    return %c0_i32, %c0_i32_0 : i32, i32
  }
  func.func @transform_11(%arg0: i32) -> (i32, i32, i32) {
    %c0_i32 = arith.constant 0 : i32
    %c0_i32_0 = arith.constant 0 : i32
    %c0_i32_1 = arith.constant 0 : i32
    %c0_i32_2 = arith.constant 0 : i32
    return %c0_i32, %c0_i32_0, %c0_i32_1 : i32, i32, i32
  }
  func.func @transform_12(%arg0: i32) -> (i32, i32) {
    %c0_i32 = arith.constant 0 : i32
    %c0_i32_0 = arith.constant 0 : i32
    %c0_i32_1 = arith.constant 0 : i32
    return %c0_i32, %c0_i32_0 : i32, i32
  }
  func.func @transform_13(%arg0: i32) -> (i32, i32, i32) {
    %c0_i32 = arith.constant 0 : i32
    %c0_i32_0 = arith.constant 0 : i32
    %c0_i32_1 = arith.constant 0 : i32
    %c0_i32_2 = arith.constant 0 : i32
    return %c0_i32, %c0_i32_0, %c0_i32_1 : i32, i32, i32
  }
  func.func @transform_14(%arg0: i32) -> (i32, i32) {
    %c0_i32 = arith.constant 0 : i32
    %c0_i32_0 = arith.constant 0 : i32
    %c0_i32_1 = arith.constant 0 : i32
    return %c0_i32, %c0_i32_0 : i32, i32
  }
  func.func @transform_15(%arg0: i32) -> (i32, i32, i32) {
    %c0_i32 = arith.constant 0 : i32
    %c0_i32_0 = arith.constant 0 : i32
    %c0_i32_1 = arith.constant 0 : i32
    %c0_i32_2 = arith.constant 0 : i32
    return %c0_i32, %c0_i32_0, %c0_i32_1 : i32, i32, i32
  }
}

</mosaic_0001>

<bundles_post_ra>
// kernel: forward.3
= control target key start
LH: loop header
LB: loop body
LE: loop exit
PB: predicated region body
PF: predicated region fallthrough
CT: control target
= control target key end

     0   :  { %s4042_s12 = smov 0   ;;  %s4044_s13 = smov 0   ;;  %s4910_s0 = inlined_call_operand.vmem [shape: bf16[882,600], index: 0, kind: input, shape index: {}]   ;;  %s4911_s1 = inlined_call_operand.vmem [shape: bf16[600,128], index: 1, kind: input, shape index: {}]   ;;  %s4912_s2 = inlined_call_operand.vmem [shape: f32[1,128], index: 2, kind: input, shape index: {}]   ;;  %s4913_s3 = inlined_call_operand.vmem [shape: bf16[882,128], index: 3, kind: output, shape index: {}]  }
   0x1   :  { %s4046_s14 = smov 0  }
   0x2 LB: > { %s4055_s15 = sadd.s32 4294967295, %s3988_s14   ;;  %s4057_s16 = sadd.s32 1, %s3988_s14   ;;  %s3988_s14 = sphi %s4046_s14, %s4960_s14   ;;  %s3984_s13 = sphi %s4044_s13, %s4959_s13   ;;  %s3980_s12 = sphi %s4042_s12, %s4958_s12  }
   0x3   : > { %s85_s17 = ssub.s32 %s3988_s14, %s4057_s16  ;;  %s88_s18 = sadd.s32 1, %s3984_s13 }
   0x4   : > { %p86_p0 = scmp.eq.s32.totalorder %s85_s17, 0  ;;  %p98_p1 = scmp.ne.s32.totalorder %s3984_s13, %s3980_s12 }
   0x5   : > { %p99_p2 = scmp.eq.s32.totalorder %s4055_s15, 1  ;;  %p2718_p3 = scmp.ge.s32.totalorder %s3988_s14, 1 }
   0x6   : > { %s4065_s19 = scalar_select %p86_p0, %s3984_s13, %s88_s18  }
   0x7   : > { %p4067_p4 = por %p99_p2, %p98_p1  ;;  %p149_p5 = scmp.lt.s32.totalorder %s3988_s14, 3 }
   0x9   : > { %p150_p6 = pnand %p2718_p3, %p149_p5 }
   0xb   : > { %153 = sbr.rel (%p150_p6) target bundleno = 807 (0x327), region = 32 }
  0x10   : > { %v3618_v0 = vld [vmem:[%s4911_s1 + $0x38] sm:$0xff]  ;;  %v3617_v1 = vld [vmem:[%s4911_s1 + $0x30] sm:$0xff]  ;;  %v3616_v2 = vld [vmem:[%s4911_s1 + $0x28] sm:$0xff]  ;;  %s4081_s27 = smul.u32 56, %s4055_s15  ;;  %vm1458_vm0 = vcmask 1043456   ;;  %vm1373_vm1 = vcmask 719872  }
  0x11   : > { %3818 = vmatpush.bf16.msra.mxu1 %v3618_v0  ;;  %3819 = vmatpush.bf16.msra.mxu2 %v3618_v0  ;;  %v3615_v3 = vld [vmem:[%s4911_s1 + $0x20] sm:$0xff]  ;;  %v3614_v4 = vld [vmem:[%s4911_s1 + $0x18] sm:$0xff]  ;;  %v3613_v5 = vld [vmem:[%s4911_s1 + $0x10] sm:$0xff]  ;;  %s175_s28 = sand.u32 1, %s3980_s12  }
  0x12   : > { %3820 = vmatpush.bf16.msra.mxu3 %v3618_v0  ;;  %1462 = vmatpush.bf16.msra.mxu0 %v3618_v0  ;;  %p184_p7 = scmp.lt.s32.totalorder %s4081_s27, 110  ;;  %v443_v6 = vld [vmem:[%s4911_s1 + $0x128] sm:$0xf]  ;;  %v3611_v9 = vld [vmem:[%s4911_s1] sm:$0xff]  ;;  %v3634_v18 = vld [vmem:[%s4911_s1 + $0xb8] sm:$0xff]  ;;  %s3842_s29 = smul.u32 224, %s175_s28 }
  0x13   : > { %v3612_v7 = vld [vmem:[%s4911_s1 + $0x8] sm:$0xff]  ;;  %v1297_v8 = vunpack.c.l.b16 %v443_v6  ;;  %v3642_v19 = vld [vmem:[%s4911_s1 + $0xf8] sm:$0xff]  ;;  %v3633_v27 = vld [vmem:[%s4911_s1 + $0xb0] sm:$0xff] }
  0x14   : > { %s185_s5 = scalar_select %p184_p7, %s4081_s27, 110  ;;  %v3626_v25 = vld [vmem:[%s4911_s1 + $0x78] sm:$0xff]  ;;  %v3641_v28 = vld [vmem:[%s4911_s1 + $0xf0] sm:$0xff]  ;;  %v3647_v30 = vld [vmem:[%s4911_s1 + $0x120] sm:$0xff] }
  0x15   : > { %3821 = vmatpush.bf16.msra.mxu1 %v3617_v1  ;;  %3822 = vmatpush.bf16.msra.mxu2 %v3617_v1  ;;  %v1335_v20 = vpack.c.b16 %v1297_v8, %v1297_v8  ;;  %v3625_v29 = vld [vmem:[%s4911_s1 + $0x70] sm:$0xff]  ;;  %v3632_v31 = vld [vmem:[%s4911_s1 + $0xa8] sm:$0xff]  ;;  %v3631_v34 = vld [vmem:[%s4911_s1 + $0xa0] sm:$0xff]  ;;  %s4465_s12 = scalar_lea.vmem [#allocation2], %s3842_s29  }
  0x16   : > { %3823 = vmatpush.bf16.msra.mxu3 %v3617_v1  ;;  %1463 = vmatpush.bf16.msra.mxu0 %v3617_v1  ;;  %s3843_s8 = smul.u32 20, %s185_s5  ;;  %v3640_v32 = vld [vmem:[%s4911_s1 + $0xe8] sm:$0xff]  ;;  %v3639_v35 = vld [vmem:[%s4911_s1 + $0xe0] sm:$0xff]  ;;  %v3646_v49 = vld [vmem:[%s4911_s1 + $0x118] sm:$0xff] }
  0x17   : > { %v1460_v26 = vsel %vm1458_vm0, %v1335_v20, 0  ;;  %v3624_v33 = vld [vmem:[%s4911_s1 + $0x68] sm:$0xff]  ;;  %v3623_v44 = vld [vmem:[%s4911_s1 + $0x60] sm:$0xff]  ;;  %v3630_v50 = vld [vmem:[%s4911_s1 + $0x98] sm:$0xff]  ;;  %s3648_s5 = smul.u32 (%p4067_p4), 224, %s4055_s15 }
  0x18   : > { %s4103_s21 = scalar_lea.vmem %s4910_s0, %s3843_s8  ;;  %v3638_v51 = vld [vmem:[%s4911_s1 + $0xd8] sm:$0xff]  ;;  %v3645_v1 = vld [vmem:[%s4911_s1 + $0x110] sm:$0xff]  ;;  %v3620_v20 = vld [vmem:[%s4911_s1 + $0x48] sm:$0xff] }
  0x19   : > { %3824 = vmatpush.bf16.msra.mxu1 %v3616_v2  ;;  %3825 = vmatpush.bf16.msra.mxu2 %v3616_v2  ;;  %v2862_v10 = vld [vmem:[%s4103_s21 + $0x118] sm:$0xf]  ;;  %v3508_v11 = vld [vmem:[%s4103_s21 + $0x128] sm:$0xf0]  ;;  %v3002_v12 = vld [vmem:[%s4103_s21 + $0x230] sm:$0xf]  ;;  %s4775_s8 = scalar_lea.vmem (%p4067_p4), %s4913_s3, %s3648_s5  }
  0x1a   : > { %3826 = vmatpush.bf16.msra.mxu3 %v3616_v2  ;;  %1464 = vmatpush.bf16.msra.mxu0 %v3616_v2  ;;  %v3543_v13 = vld [vmem:[%s4103_s21 + $0x240] sm:$0xf0]  ;;  %v3142_v14 = vld [vmem:[%s4103_s21 + $0x348] sm:$0xf]  ;;  %v3578_v15 = vld [vmem:[%s4103_s21 + $0x358] sm:$0xf0]  ;;  %v2863_v21 = vor.u32 %v3508_v11, %v2862_v10 }
  0x1b   : > { %v2722_v16 = vld [vmem:[%s4103_s21] sm:$0xf]  ;;  %v3473_v17 = vld [vmem:[%s4103_s21 + $0x10] sm:$0xf0]  ;;  %v3003_v22 = vor.u32 %v3543_v13, %v3002_v12  ;;  %v3143_v23 = vor.u32 %v3578_v15, %v3142_v14  ;;  %v3022_v38 = vld [vmem:[%s4103_s21 + $0x258] sm:$0xf] }
  0x1c   : > { %v2723_v24 = vor.u32 %v3473_v17, %v2722_v16  ;;  %v2882_v36 = vld [vmem:[%s4103_s21 + $0x140] sm:$0xf]  ;;  %v3513_v37 = vld [vmem:[%s4103_s21 + $0x150] sm:$0xf0]  ;;  %v3548_v39 = vld [vmem:[%s4103_s21 + $0x268] sm:$0xf0] }
  0x1d   : > { %3827 = vmatpush.bf16.msra.mxu1 %v3615_v3  ;;  %3828 = vmatpush.bf16.msra.mxu2 %v3615_v3  ;;  %v3162_v40 = vld [vmem:[%s4103_s21 + $0x370] sm:$0xf]  ;;  %v3583_v41 = vld [vmem:[%s4103_s21 + $0x380] sm:$0xf0]  ;;  %v2742_v42 = vld [vmem:[%s4103_s21 + $0x28] sm:$0xf]  ;;  %v2883_v45 = vor.u32 %v3513_v37, %v2882_v36  ;;  %v3023_v46 = vor.u32 %v3548_v39, %v3022_v38 }
  0x1e   : > { %3829 = vmatpush.bf16.msra.mxu3 %v3615_v3  ;;  %1465 = vmatpush.bf16.msra.mxu0 %v3615_v3  ;;  %v3478_v43 = vld [vmem:[%s4103_s21 + $0x38] sm:$0xf0]  ;;  %v3163_v47 = vor.u32 %v3583_v41, %v3162_v40  ;;  %v2902_v53 = vld [vmem:[%s4103_s21 + $0x168] sm:$0xf]  ;;  %v3042_v55 = vld [vmem:[%s4103_s21 + $0x280] sm:$0xf] }
  0x1f   : > { %v2743_v48 = vor.u32 %v3478_v43, %v2742_v42  ;;  %v3622_v52 = vld [vmem:[%s4911_s1 + $0x58] sm:$0xff]  ;;  %v3553_v56 = vld [vmem:[%s4103_s21 + $0x290] sm:$0xf0]  ;;  %v3588_v58 = vld [vmem:[%s4103_s21 + $0x3a8] sm:$0xf0] }
  0x20   : > { %v3518_v54 = vld [vmem:[%s4103_s21 + $0x178] sm:$0xf0]  ;;  %v3182_v57 = vld [vmem:[%s4103_s21 + $0x398] sm:$0xf]  ;;  %v2762_v59 = vld [vmem:[%s4103_s21 + $0x50] sm:$0xf]  ;;  %v3043_v62 = vor.u32 %v3553_v56, %v3042_v55 }
  0x21   : > { %3830 = vmatpush.bf16.msra.mxu1 %v3614_v4  ;;  %3831 = vmatpush.bf16.msra.mxu2 %v3614_v4  ;;  %v3483_v60 = vld [vmem:[%s4103_s21 + $0x60] sm:$0xf0]  ;;  %v2903_v61 = vor.u32 %v3518_v54, %v2902_v53  ;;  %v3183_v63 = vor.u32 %v3588_v58, %v3182_v57  ;;  %v3629_v2 = vld [vmem:[%s4911_s1 + $0x90] sm:$0xff]  ;;  %v3558_v8 = vld [vmem:[%s4103_s21 + $0x2b8] sm:$0xf0] }
  0x22   : > { %3832 = vmatpush.bf16.msra.mxu3 %v3614_v4  ;;  %1466 = vmatpush.bf16.msra.mxu0 %v3614_v4  ;;  %v2763_v0 = vor.u32 %v3483_v60, %v2762_v59  ;;  %v3637_v3 = vld [vmem:[%s4911_s1 + $0xd0] sm:$0xff]  ;;  %v3523_v6 = vld [vmem:[%s4103_s21 + $0x1a0] sm:$0xf0]  ;;  %v2782_v11 = vld [vmem:[%s4103_s21 + $0x78] sm:$0xf] }
  0x23   : > { %v3621_v4 = vld [vmem:[%s4911_s1 + $0x50] sm:$0xff]  ;;  %v3488_v12 = vld [vmem:[%s4103_s21 + $0x88] sm:$0xf0]  ;;  %v3643_v36 = vld [vmem:[%s4911_s1 + $0x100] sm:$0xff] }
  0x24   : > { %v3593_v10 = vld [vmem:[%s4103_s21 + $0x3d0] sm:$0xf0]  ;;  %v2783_v16 = vor.u32 %v3488_v12, %v2782_v11  ;;  %v3628_v17 = vld [vmem:[%s4911_s1 + $0x88] sm:$0xff]  ;;  %v2962_v37 = vld [vmem:[%s4103_s21 + $0x1e0] sm:$0xf] }
  0x25   : > { %3833 = vmatpush.bf16.msra.mxu1 %v3613_v5  ;;  %3834 = vmatpush.bf16.msra.mxu2 %v3613_v5  ;;  %v3533_v38 = vld [vmem:[%s4103_s21 + $0x1f0] sm:$0xf0]  ;;  %v3102_v39 = vld [vmem:[%s4103_s21 + $0x2f8] sm:$0xf]  ;;  %v3568_v40 = vld [vmem:[%s4103_s21 + $0x308] sm:$0xf0] }
  0x26   : > { %3835 = vmatpush.bf16.msra.mxu3 %v3613_v5  ;;  %1467 = vmatpush.bf16.msra.mxu0 %v3613_v5  ;;  %v2922_v5 = vld [vmem:[%s4103_s21 + $0x190] sm:$0xf]  ;;  %v3603_v42 = vld [vmem:[%s4103_s21 + $0x420] sm:$0xf0]  ;;  %v2822_v43 = vld [vmem:[%s4103_s21 + $0xc8] sm:$0xf] }
  0x27   : > { %v2923_v13 = vor.u32 %v3523_v6, %v2922_v5  ;;  %v3242_v41 = vld [vmem:[%s4103_s21 + $0x410] sm:$0xf]  ;;  %v3262_v53 = vld [vmem:[%s4103_s21 + $0x438] sm:$0xf]  ;;  %v3608_v54 = vld [vmem:[%s4103_s21 + $0x448] sm:$0xf0] }
  0x28   : > { %v2842_v55 = vld [vmem:[%s4103_s21 + $0xf0] sm:$0xf]  ;;  %v3503_v56 = vld [vmem:[%s4103_s21 + $0x100] sm:$0xf0]  ;;  %v3263_v59 = vor.u32 %v3608_v54, %v3262_v53  ;;  %v2798_v53 = vld [vmem:[%s4103_s21 + $0x88] sm:$0xf] }
  0x29   : > { %3836 = vmatpush.bf16.msra.mxu1 %v3612_v7  ;;  %3837 = vmatpush.bf16.msra.mxu2 %v3612_v7  ;;  %v2843_v60 = vor.u32 %v3503_v56, %v2842_v55  ;;  %v2750_v11 = vld [vmem:[%s4103_s21 + $0x30] sm:$0xf]  ;;  %v3479_v12 = vld [vmem:[%s4103_s21 + $0x40] sm:$0xf0]  ;;  %v3490_v54 = vld [vmem:[%s4103_s21 + $0x98] sm:$0xf0] }
  0x2a   : > { %3838 = vmatpush.bf16.msra.mxu3 %v3612_v7  ;;  %1468 = vmatpush.bf16.msra.mxu0 %v3612_v7  ;;  %v3062_v7 = vld [vmem:[%s4103_s21 + $0x2a8] sm:$0xf] }
  0x2b   : > { %v3063_v14 = vor.u32 %v3558_v8, %v3062_v7 }
  0x2d   : > { %3839 = vmatpush.bf16.msra.mxu1 %v3611_v9  ;;  %3840 = vmatpush.bf16.msra.mxu2 %v3611_v9 }
  0x2e   : > { %3841 = vmatpush.bf16.msra.mxu3 %v3611_v9  ;;  %1469 = vmatpush.bf16.msra.mxu0 %v3611_v9  ;;  %v3202_v9 = vld [vmem:[%s4103_s21 + $0x3c0] sm:$0xf] }
  0x2f   : > { %v3203_v15 = vor.u32 %v3593_v10, %v3202_v9  ;;  %v3476_v9 = vld [vmem:[%s4103_s21 + $0x2c] sm:$0xf]  ;;  %v2744_v10 = vld [vmem:[%s4103_s21 + $0x3c] sm:$0xf0] }
  0x30   : > { %1505 = vmatmul.bf16.vlgmr.msra.gmra.mxu1 %v2863_v21  ;;  %1540 = vmatmul.bf16.vlgmr.msra.gmra.mxu2 %v3003_v22  ;;  %v2942_v21 = vld [vmem:[%s4103_s21 + $0x1b8] sm:$0xf]  ;;  %v3528_v22 = vld [vmem:[%s4103_s21 + $0x1c8] sm:$0xf0] }
  0x31   : > { %1760 = vmatpush.bf16.msrb.mxu2 %v3634_v18  ;;  %1575 = vmatmul.bf16.vlgmr.msra.gmra.mxu3 %v3143_v23  ;;  %v3644_v18 = vld [vmem:[%s4911_s1 + $0x108] sm:$0xff]  ;;  %v3082_v23 = vld [vmem:[%s4103_s21 + $0x2d0] sm:$0xf] }
  0x32   : > { %1909 = vmatpush.bf16.msrb.mxu3 %v3642_v19  ;;  %1470 = vmatmul.bf16.vlgmr.msra.gmra.mxu0 %v2723_v24  ;;  %v3636_v19 = vld [vmem:[%s4911_s1 + $0xc8] sm:$0xff]  ;;  %v3563_v24 = vld [vmem:[%s4103_s21 + $0x2e0] sm:$0xf0] }
  0x33   : > { %1611 = vmatpush.bf16.msrb.mxu1 %v3626_v25  ;;  %2060 = vmatpush.bf16.msrb.mxu0 %v1460_v26  ;;  %v3222_v25 = vld [vmem:[%s4103_s21 + $0x3e8] sm:$0xf]  ;;  %v3598_v26 = vld [vmem:[%s4103_s21 + $0x3f8] sm:$0xf0] }
  0x35   : > { %1761 = vmatpush.bf16.msrb.mxu2 %v3633_v27  ;;  %v2802_v27 = vld [vmem:[%s4103_s21 + $0xa0] sm:$0xf] }
  0x36   : > { %1910 = vmatpush.bf16.msrb.mxu3 %v3641_v28  ;;  %v3493_v28 = vld [vmem:[%s4103_s21 + $0xb0] sm:$0xf0] }
  0x37   : > { %1612 = vmatpush.bf16.msrb.mxu1 %v3625_v29  ;;  %2061 = vmatpush.bf16.msrb.mxu0 %v3647_v30  ;;  %v2943_v29 = vor.u32 %v3528_v22, %v2942_v21  ;;  %v3083_v30 = vor.u32 %v3563_v24, %v3082_v23 }
  0x39   : > { %1762 = vmatpush.bf16.msrb.mxu2 %v3632_v31  ;;  %v3223_v31 = vor.u32 %v3598_v26, %v3222_v25 }
  0x3a   : > { %1911 = vmatpush.bf16.msrb.mxu3 %v3640_v32  ;;  %v2803_v32 = vor.u32 %v3493_v28, %v2802_v27  ;;  %v3481_v27 = vld [vmem:[%s4103_s21 + $0x54] sm:$0xf]  ;;  %v2764_v28 = vld [vmem:[%s4103_s21 + $0x64] sm:$0xf0] }
  0x3b   : > { %1613 = vmatpush.bf16.msrb.mxu1 %v3624_v33  ;;  %2062 = vmatpush.bf16.msrb.mxu0 %v3646_v49  ;;  %v3627_v33 = vld [vmem:[%s4911_s1 + $0x80] sm:$0xff]  ;;  %v2982_v49 = vld [vmem:[%s4103_s21 + $0x208] sm:$0xf] }
  0x3d   : > { %1763 = vmatpush.bf16.msrb.mxu2 %v3631_v34  ;;  %v3635_v34 = vld [vmem:[%s4911_s1 + $0xc0] sm:$0xff] }
  0x3e   : > { %1912 = vmatpush.bf16.msrb.mxu3 %v3639_v35  ;;  %v3619_v35 = vld [vmem:[%s4911_s1 + $0x40] sm:$0xff] }
  0x3f   : > { %1614 = vmatpush.bf16.msrb.mxu1 %v3623_v44  ;;  %2063 = vmatpush.bf16.msrb.mxu0 %v3645_v1  ;;  %v3498_v44 = vld [vmem:[%s4103_s21 + $0xd8] sm:$0xf0]  ;;  %v3472_v1 = vld [vmem:[%s4103_s21 + $0xc] sm:$0xf] }
  0x40   : > { %1510 = vmatmul.bf16.gmra.mxu1 %v2883_v45  ;;  %1545 = vmatmul.bf16.gmra.mxu2 %v3023_v46  ;;  %v2963_v45 = vor.u32 %v3533_v38, %v2962_v37  ;;  %v3103_v46 = vor.u32 %v3568_v40, %v3102_v39  ;;  %v2767_v37 = vor.u32 %v3481_v27, %v2764_v28 }
  0x41   : > { %1580 = vmatmul.bf16.gmra.mxu3 %v3163_v47  ;;  %1764 = vmatpush.bf16.msrb.mxu2 %v3630_v50  ;;  %v3243_v47 = vor.u32 %v3603_v42, %v3242_v41  ;;  %v3538_v50 = vld [vmem:[%s4103_s21 + $0x218] sm:$0xf0] }
  0x42   : > { %1475 = vmatmul.bf16.gmra.mxu0 %v2743_v48  ;;  %1913 = vmatpush.bf16.msrb.mxu3 %v3638_v51  ;;  %v2823_v48 = vor.u32 %v3498_v44, %v2822_v43  ;;  %v3122_v51 = vld [vmem:[%s4103_s21 + $0x320] sm:$0xf]  ;;  %v2983_v57 = vor.u32 %v3538_v50, %v2982_v49  ;;  %v3489_v50 = vld [vmem:[%s4103_s21 + $0x90] sm:$0xf0] }
  0x43   : > { %1615 = vmatpush.bf16.msrb.mxu1 %v3622_v52  ;;  %2064 = vmatpush.bf16.msrb.mxu0 %v3644_v18  ;;  %v3573_v52 = vld [vmem:[%s4103_s21 + $0x330] sm:$0xf0]  ;;  %v2751_v18 = vor.u32 %v3479_v12, %v2750_v11  ;;  %v2790_v49 = vld [vmem:[%s4103_s21 + $0x80] sm:$0xf] }
  0x44   : > { %v3123_v58 = vor.u32 %v3573_v52, %v3122_v51  ;;  %v3487_v51 = vld [vmem:[%s4103_s21 + $0x84] sm:$0xf]  ;;  %v2792_v52 = vld [vmem:[%s4103_s21 + $0x94] sm:$0xf0] }
  0x45   : > { %1765 = vmatpush.bf16.msrb.mxu2 %v3629_v2  ;;  %v2732_v2 = vld [vmem:[%s4103_s21 + $0x1c] sm:$0xf0] }
  0x46   : > { %1914 = vmatpush.bf16.msrb.mxu3 %v3637_v3  ;;  %v2738_v3 = vld [vmem:[%s4103_s21 + $0x10] sm:$0xf]  ;;  %v2735_v7 = vor.u32 %v3472_v1, %v2732_v2 }
  0x47   : > { %1616 = vmatpush.bf16.msrb.mxu1 %v3621_v4  ;;  %2065 = vmatpush.bf16.msrb.mxu0 %v3643_v36  ;;  %v3475_v4 = vld [vmem:[%s4103_s21 + $0x20] sm:$0xf0] }
  0x48   : > { %v2739_v8 = vor.u32 %v3475_v4, %v2738_v3  ;;  %v3491_v3 = vld [vmem:[%s4103_s21 + $0xa4] sm:$0xf]  ;;  %v2804_v4 = vld [vmem:[%s4103_s21 + $0xb4] sm:$0xf0] }
  0x49   : > { %1766 = vmatpush.bf16.msrb.mxu2 %v3628_v17  ;;  %v2747_v17 = vor.u32 %v3476_v9, %v2744_v10  ;;  %v2818_v9 = vld [vmem:[%s4103_s21 + $0xb0] sm:$0xf]  ;;  %v3495_v10 = vld [vmem:[%s4103_s21 + $0xc0] sm:$0xf0] }
  0x4a   : > { %1915 = vmatpush.bf16.msrb.mxu3 %v3636_v19 }
  0x4b   : > { %1617 = vmatpush.bf16.msrb.mxu1 %v3620_v20 }
  0x4d   : > { %1767 = vmatpush.bf16.msrb.mxu2 %v3627_v33  ;;  %v2778_v33 = vld [vmem:[%s4103_s21 + $0x60] sm:$0xf] }
  0x4e   : > { %1916 = vmatpush.bf16.msrb.mxu3 %v3635_v34  ;;  %v3485_v34 = vld [vmem:[%s4103_s21 + $0x70] sm:$0xf0] }
  0x4f   : > { %1618 = vmatpush.bf16.msrb.mxu1 %v3619_v35  ;;  %v2779_v41 = vor.u32 %v3485_v34, %v2778_v33  ;;  %v3497_v33 = vld [vmem:[%s4103_s21 + $0xd4] sm:$0xf]  ;;  %v2832_v34 = vld [vmem:[%s4103_s21 + $0xe4] sm:$0xf0] }
  0x50   : > { %1515 = vmatmul.bf16.gmra.mxu1 %v2903_v61  ;;  %1550 = vmatmul.bf16.gmra.mxu2 %v3043_v62  ;;  %v3471_v61 = vld [vmem:[%s4103_s21 + $0x4] sm:$0xf]  ;;  %v2724_v62 = vld [vmem:[%s4103_s21 + $0x14] sm:$0xf0] }
  0x51   : > { %1585 = vmatmul.bf16.gmra.mxu3 %v3183_v63  ;;  %v2730_v63 = vld [vmem:[%s4103_s21 + $0x8] sm:$0xf]  ;;  %v2727_v5 = vor.u32 %v3471_v61, %v2724_v62  ;;  %v2799_v61 = vor.u32 %v3490_v54, %v2798_v53 }
  0x52   : > { %1480 = vmatmul.bf16.gmra.mxu0 %v2763_v0  ;;  %v3474_v0 = vld [vmem:[%s4103_s21 + $0x18] sm:$0xf0] }
  0x53   : > { %v2731_v6 = vor.u32 %v3474_v0, %v2730_v63 }
  0x60   : > { %1520 = vmatmul.bf16.gmra.mxu1 %v2923_v13  ;;  %1555 = vmatmul.bf16.gmra.mxu2 %v3063_v14  ;;  %v3477_v13 = vld [vmem:[%s4103_s21 + $0x34] sm:$0xf]  ;;  %v2752_v14 = vld [vmem:[%s4103_s21 + $0x44] sm:$0xf0] }
  0x61   : > { %1590 = vmatmul.bf16.gmra.mxu3 %v3203_v15  ;;  %v2758_v15 = vld [vmem:[%s4103_s21 + $0x38] sm:$0xf]  ;;  %v2755_v20 = vor.u32 %v3477_v13, %v2752_v14  ;;  %v2807_v13 = vor.u32 %v3491_v3, %v2804_v4  ;;  %v3504_v4 = vld [vmem:[%s4103_s21 + $0x108] sm:$0xf0] }
  0x62   : > { %1485 = vmatmul.bf16.gmra.mxu0 %v2783_v16  ;;  %v3480_v16 = vld [vmem:[%s4103_s21 + $0x48] sm:$0xf0]  ;;  %v2850_v3 = vld [vmem:[%s4103_s21 + $0xf8] sm:$0xf] }
  0x63   : > { %v2759_v21 = vor.u32 %v3480_v16, %v2758_v15 }
  0x70   : > { %1525 = vmatmul.bf16.gmra.mxu1 %v2943_v29  ;;  %1560 = vmatmul.bf16.gmra.mxu2 %v3083_v30  ;;  %v2770_v29 = vld [vmem:[%s4103_s21 + $0x58] sm:$0xf]  ;;  %v3484_v30 = vld [vmem:[%s4103_s21 + $0x68] sm:$0xf0] }
  0x71   : > { %1595 = vmatmul.bf16.gmra.mxu3 %v3223_v31  ;;  %v3482_v31 = vld [vmem:[%s4103_s21 + $0x5c] sm:$0xf]  ;;  %v2771_v38 = vor.u32 %v3484_v30, %v2770_v29  ;;  %v3496_v29 = vld [vmem:[%s4103_s21 + $0xcc] sm:$0xf]  ;;  %v2824_v30 = vld [vmem:[%s4103_s21 + $0xdc] sm:$0xf0] }
  0x72   : > { %1490 = vmatmul.bf16.gmra.mxu0 %v2803_v32  ;;  %v2772_v32 = vld [vmem:[%s4103_s21 + $0x6c] sm:$0xf0] }
  0x73   : > { %v2775_v40 = vor.u32 %v3482_v31, %v2772_v32  ;;  %v2830_v31 = vld [vmem:[%s4103_s21 + $0xd0] sm:$0xf]  ;;  %v3499_v32 = vld [vmem:[%s4103_s21 + $0xe0] sm:$0xf0] }
  0x80   : > { %1530 = vmatmul.bf16.gmra.mxu1 %v2963_v45  ;;  %1565 = vmatmul.bf16.gmra.mxu2 %v3103_v46 }
  0x81   : > { %1600 = vmatmul.bf16.gmra.mxu3 %v3243_v47  ;;  %v3486_v47 = vld [vmem:[%s4103_s21 + $0x7c] sm:$0xf] }
  0x82   : > { %1495 = vmatmul.bf16.gmra.mxu0 %v2823_v48  ;;  %v2784_v48 = vld [vmem:[%s4103_s21 + $0x8c] sm:$0xf0] }
  0x90   : > { %1535 = vmatmul.bf16.gmra.mxu1 %v2983_v57  ;;  %1570 = vmatmul.bf16.gmra.mxu2 %v3123_v58  ;;  %v2787_v57 = vor.u32 %v3486_v47, %v2784_v48  ;;  %v2791_v58 = vor.u32 %v3489_v50, %v2790_v49  ;;  %v2827_v47 = vor.u32 %v3496_v29, %v2824_v30 }
  0x91   : > { %1605 = vmatmul.bf16.gmra.mxu3 %v3263_v59  ;;  %v2831_v48 = vor.u32 %v3499_v32, %v2830_v31  ;;  %v2835_v50 = vor.u32 %v3497_v33, %v2832_v34 }
  0x92   : > { %1500 = vmatmul.bf16.gmra.mxu0 %v2843_v60  ;;  %v2795_v60 = vor.u32 %v3487_v51, %v2792_v52 }
  0xa0   : > { %1619 = vmatmul.bf16.vlgmr.msrb.gmra.mxu1 %v2727_v5  ;;  %1768 = vmatmul.bf16.vlgmr.msrb.gmra.mxu2 %v2731_v6  ;;  %v2810_v5 = vld [vmem:[%s4103_s21 + $0xa8] sm:$0xf]  ;;  %v3494_v6 = vld [vmem:[%s4103_s21 + $0xb8] sm:$0xf0] }
  0xa1   : > { %1917 = vmatmul.bf16.vlgmr.msrb.gmra.mxu3 %v2735_v7  ;;  %v3492_v7 = vld [vmem:[%s4103_s21 + $0xac] sm:$0xf]  ;;  %v2811_v14 = vor.u32 %v3494_v6, %v2810_v5  ;;  %v3502_v5 = vld [vmem:[%s4103_s21 + $0xfc] sm:$0xf]  ;;  %v2852_v6 = vld [vmem:[%s4103_s21 + $0x10c] sm:$0xf0] }
  0xa2   : > { %3428 = vmatmul.msk.bf16.vlgmr.msrb.gmra.mxu0 %vm1373_vm1, %v2739_v8  ;;  %v2812_v8 = vld [vmem:[%s4103_s21 + $0xbc] sm:$0xf0] }
  0xa3   : > { %v2815_v16 = vor.u32 %v3492_v7, %v2812_v8  ;;  %v2858_v7 = vld [vmem:[%s4103_s21 + $0x100] sm:$0xf]  ;;  %v3505_v8 = vld [vmem:[%s4103_s21 + $0x110] sm:$0xf0] }
  0xa4   : > { %v2859_v29 = vor.u32 %v3505_v8, %v2858_v7 }
  0xad   : > { %v4268_v19 = vpop.f32.mrf.mxu1 }
  0xaf   : > { %v4270_v22 = vpop.f32.mrf.mxu0 }
  0xb0   : > { %1624 = vmatmul.bf16.gmra.mxu1 %v2747_v17  ;;  %1773 = vmatmul.bf16.gmra.mxu2 %v2751_v18  ;;  %v2819_v17 = vor.u32 %v3495_v10, %v2818_v9 }
  0xb1   : > { %1922 = vmatmul.bf16.gmra.mxu3 %v2755_v20 }
  0xb2   : > { %3429 = vmatmul.msk.bf16.gmra.mxu0 %vm1373_vm1, %v2759_v21 }
  0xb3   : > { %v4273_v23 = vpop.f32.mrf.mxu2 }
  0xb4   : > { %v4275_v24 = vpop.f32.mrf.mxu3 }
  0xb5   : > { %4915 = vst [vmem:[#allocation3_spill] sm:$0xff] %v4275_v24  ;;  %v4277_v25 = vpop.f32.mrf.mxu1 }
  0xb7   : > { %v4279_v26 = vpop.f32.mrf.mxu0 }
  0xbb   : > { %v4289_v35 = vpop.f32.mrf.mxu2 }
  0xbc   : > { %v4291_v36 = vpop.f32.mrf.mxu3 }
  0xbd   : > { %4916 = vst [vmem:[#allocation4_spill] sm:$0xff] %v4291_v36  ;;  %v4293_v39 = vpop.f32.mrf.mxu1 }
  0xbf   : > { %v4295_v42 = vpop.f32.mrf.mxu0 }
  0xc0   : > { %1629 = vmatmul.bf16.gmra.mxu1 %v2767_v37  ;;  %1778 = vmatmul.bf16.gmra.mxu2 %v2771_v38  ;;  %v2838_v37 = vld [vmem:[%s4103_s21 + $0xd8] sm:$0xf]  ;;  %v3500_v38 = vld [vmem:[%s4103_s21 + $0xe8] sm:$0xf0] }
  0xc1   : > { %1927 = vmatmul.bf16.gmra.mxu3 %v2775_v40  ;;  %v2839_v51 = vor.u32 %v3500_v38, %v2838_v37  ;;  %v3506_v37 = vld [vmem:[%s4103_s21 + $0x11c] sm:$0xf]  ;;  %v2864_v38 = vld [vmem:[%s4103_s21 + $0x12c] sm:$0xf0] }
  0xc2   : > { %3430 = vmatmul.msk.bf16.gmra.mxu0 %vm1373_vm1, %v2779_v41 }
  0xc3   : > { %v4298_v43 = vpop.f32.mrf.mxu2 }
  0xc4   : > { %v4300_v44 = vpop.f32.mrf.mxu3 }
  0xc5   : > { %4917 = vst [vmem:[#allocation5_spill] sm:$0xff] %v4300_v44  ;;  %v4302_v45 = vpop.f32.mrf.mxu1  ;;  %v3520_v44 = vld [vmem:[%s4103_s21 + $0x188] sm:$0xf0] }
  0xc7   : > { %v4304_v46 = vpop.f32.mrf.mxu0 }
  0xcb   : > { %v4314_v55 = vpop.f32.mrf.mxu2 }
  0xcc   : > { %v4316_v56 = vpop.f32.mrf.mxu3 }
  0xcd   : > { %4918 = vst [vmem:[#allocation6_spill] sm:$0xff] %v4316_v56  ;;  %v4318_v59 = vpop.f32.mrf.mxu1  ;;  %v2918_v56 = vld [vmem:[%s4103_s21 + $0x178] sm:$0xf] }
  0xcf   : > { %v4320_v62 = vpop.f32.mrf.mxu0 }
  0xd0   : > { %1634 = vmatmul.bf16.gmra.mxu1 %v2787_v57  ;;  %1783 = vmatmul.bf16.gmra.mxu2 %v2791_v58 }
  0xd1   : > { %1932 = vmatmul.bf16.gmra.mxu3 %v2795_v60  ;;  %v3501_v60 = vld [vmem:[%s4103_s21 + $0xf4] sm:$0xf] }
  0xd2   : > { %3431 = vmatmul.msk.bf16.gmra.mxu0 %vm1373_vm1, %v2799_v61  ;;  %v2844_v61 = vld [vmem:[%s4103_s21 + $0x104] sm:$0xf0] }
  0xd3   : > { %v4323_v63 = vpop.f32.mrf.mxu2 }
  0xd4   : > { %v4325_v0 = vpop.f32.mrf.mxu3 }
  0xd5   : > { %4919 = vst [vmem:[#allocation7_spill] sm:$0xff] %v4325_v0  ;;  %v4327_v1 = vpop.f32.mrf.mxu1 }
  0xd7   : > { %v4329_v2 = vpop.f32.mrf.mxu0 }
  0xdb   : > { %v4339_v11 = vpop.f32.mrf.mxu2 }
  0xdc   : > { %v4341_v12 = vpop.f32.mrf.mxu3 }
  0xdd   : > { %4920 = vst [vmem:[#allocation8_spill] sm:$0xff] %v4341_v12  ;;  %v4343_v15 = vpop.f32.mrf.mxu1 }
  0xdf   : > { %v4345_v18 = vpop.f32.mrf.mxu0 }
  0xe0   : > { %1639 = vmatmul.bf16.gmra.mxu1 %v2807_v13  ;;  %1788 = vmatmul.bf16.gmra.mxu2 %v2811_v14  ;;  %v2847_v13 = vor.u32 %v3501_v60, %v2844_v61  ;;  %v2851_v14 = vor.u32 %v3504_v4, %v2850_v3  ;;  %v2878_v60 = vld [vmem:[%s4103_s21 + $0x128] sm:$0xf]  ;;  %v3510_v61 = vld [vmem:[%s4103_s21 + $0x138] sm:$0xf0] }
  0xe1   : > { %1937 = vmatmul.bf16.gmra.mxu3 %v2815_v16 }
  0xe2   : > { %3432 = vmatmul.msk.bf16.gmra.mxu0 %vm1373_vm1, %v2819_v17  ;;  %v2855_v17 = vor.u32 %v3502_v5, %v2852_v6  ;;  %v2867_v5 = vor.u32 %v3506_v37, %v2864_v38 }
  0xe3   : > { %v4348_v20 = vpop.f32.mrf.mxu2 }
  0xe4   : > { %v4350_v21 = vpop.f32.mrf.mxu3 }
  0xe5   : > { %4921 = vst [vmem:[#allocation9_spill] sm:$0xff] %v4350_v21  ;;  %v4352_v27 = vpop.f32.mrf.mxu1  ;;  %v4446_v21 = vld [vmem:[%s4912_s2] ss:$0 sm:$0xff] }
  0xe7   : > { %v4354_v28 = vpop.f32.mrf.mxu0 }
  0xeb   : > { %v4364_v40 = vpop.f32.mrf.mxu2 }
  0xec   : > { %v4366_v41 = vpop.f32.mrf.mxu3 }
  0xed   : > { %4922 = vst [vmem:[#allocation10_spill] sm:$0xff] %v4366_v41  ;;  %v4368_v49 = vpop.f32.mrf.mxu1 }
  0xef   : > { %v4370_v52 = vpop.f32.mrf.mxu0 }
  0xf0   : > { %1644 = vmatmul.bf16.gmra.mxu1 %v2827_v47  ;;  %1793 = vmatmul.bf16.gmra.mxu2 %v2831_v48  ;;  %v2870_v47 = vld [vmem:[%s4103_s21 + $0x120] sm:$0xf]  ;;  %v3509_v48 = vld [vmem:[%s4103_s21 + $0x130] sm:$0xf0] }
  0xf1   : > { %1942 = vmatmul.bf16.gmra.mxu3 %v2835_v50  ;;  %v3507_v50 = vld [vmem:[%s4103_s21 + $0x124] sm:$0xf]  ;;  %v2871_v6 = vor.u32 %v3509_v48, %v2870_v47  ;;  %v2884_v48 = vld [vmem:[%s4103_s21 + $0x154] sm:$0xf0] }
  0xf2   : > { %3433 = vmatmul.msk.bf16.gmra.mxu0 %vm1373_vm1, %v2839_v51  ;;  %v2872_v51 = vld [vmem:[%s4103_s21 + $0x134] sm:$0xf0]  ;;  %v3511_v47 = vld [vmem:[%s4103_s21 + $0x144] sm:$0xf] }
  0xf3   : > { %v4373_v53 = vpop.f32.mrf.mxu2  ;;  %v2875_v8 = vor.u32 %v3507_v50, %v2872_v51  ;;  %v2890_v50 = vld [vmem:[%s4103_s21 + $0x148] sm:$0xf]  ;;  %v3514_v51 = vld [vmem:[%s4103_s21 + $0x158] sm:$0xf0] }
  0xf4   : > { %v4375_v54 = vpop.f32.mrf.mxu3 }
  0xf5   : > { %4923 = vst [vmem:[#allocation11_spill] sm:$0xff] %v4375_v54  ;;  %v4377_v57 = vpop.f32.mrf.mxu1 }
  0xf7   : > { %v4379_v58 = vpop.f32.mrf.mxu0 }
  0xfb   : > { %v4389_v9 = vpop.f32.mrf.mxu2 }
  0xfc   : > { %4924 = vst [vmem:[#allocation12_spill] sm:$0xff] %v4389_v9  ;;  %v4391_v10 = vpop.f32.mrf.mxu3 }
  0xfd   : > { %4925 = vst [vmem:[#allocation13_spill] sm:$0xff] %v4391_v10  ;;  %v4393_v16 = vpop.f32.mrf.mxu1 }
  0xff   : > { %v4395_v30 = vpop.f32.mrf.mxu0 }
 0x100   : > { %1649 = vmatmul.bf16.gmra.mxu1 %v2847_v13  ;;  %1798 = vmatmul.bf16.gmra.mxu2 %v2851_v14  ;;  %v2879_v13 = vor.u32 %v3510_v61, %v2878_v60  ;;  %v3512_v60 = vld [vmem:[%s4103_s21 + $0x14c] sm:$0xf]  ;;  %v2892_v61 = vld [vmem:[%s4103_s21 + $0x15c] sm:$0xf0] }
 0x101   : > { %1947 = vmatmul.bf16.gmra.mxu3 %v2855_v17 }
 0x102   : > { %3434 = vmatmul.msk.bf16.gmra.mxu0 %vm1373_vm1, %v2859_v29 }
 0x103   : > { %v4398_v31 = vpop.f32.mrf.mxu2 }
 0x104   : > { %4926 = vst [vmem:[#allocation14_spill] sm:$0xff] %v4398_v31  ;;  %v4400_v32 = vpop.f32.mrf.mxu3 }
 0x105   : > { %4927 = vst [vmem:[#allocation15_spill] sm:$0xff] %v4400_v32  ;;  %v4402_v33 = vpop.f32.mrf.mxu1  ;;  %v2891_v32 = vor.u32 %v3514_v51, %v2890_v50 }
 0x107   : > { %v4404_v34 = vpop.f32.mrf.mxu0 }
 0x10b   : > { %v4414_v3 = vpop.f32.mrf.mxu2 }
 0x10c   : > { %4928 = vst [vmem:[#allocation16_spill] sm:$0xff] %v4414_v3  ;;  %v4416_v4 = vpop.f32.mrf.mxu3 }
 0x10d   : > { %4929 = vst [vmem:[#allocation17_spill] sm:$0xff] %v4416_v4  ;;  %v4418_v7 = vpop.f32.mrf.mxu1  ;;  %v2898_v4 = vld [vmem:[%s4103_s21 + $0x150] sm:$0xf] }
 0x10f   : > { %v4420_v14 = vpop.f32.mrf.mxu0 }
 0x110   : > { %1654 = vmatmul.bf16.gmra.mxu1 %v2867_v5  ;;  %1803 = vmatmul.bf16.gmra.mxu2 %v2871_v6  ;;  %v3515_v5 = vld [vmem:[%s4103_s21 + $0x160] sm:$0xf0] }
 0x111   : > { %1952 = vmatmul.bf16.gmra.mxu3 %v2875_v8  ;;  %v2899_v54 = vor.u32 %v3515_v5, %v2898_v4  ;;  %v1474_v5 = vadd.f32 %v4446_v21, %v4279_v26 }
 0x112   : > { %3435 = vmatmul.msk.bf16.gmra.mxu0 %vm1373_vm1, %v2879_v13  ;;  %v2887_v13 = vor.u32 %v3511_v47, %v2884_v48  ;;  %v1472_v47 = vadd.f32 %v4446_v21, %v4270_v22  ;;  %v2912_v22 = vld [vmem:[%s4103_s21 + $0x184] sm:$0xf0] }
 0x113   : > { %v4423_v17 = vpop.f32.mrf.mxu2 }
 0x114   : > { %4930 = vst [vmem:[#allocation18_spill] sm:$0xff] %v4423_v17  ;;  %v4425_v29 = vpop.f32.mrf.mxu3  ;;  %v2919_v17 = vor.u32 %v3520_v44, %v2918_v56 }
 0x115   : > { %4931 = vst [vmem:[#allocation19_spill] sm:$0xff] %v4425_v29  ;;  %v4427_v37 = vpop.f32.mrf.mxu1  ;;  %v2895_v29 = vor.u32 %v3512_v60, %v2892_v61 }
 0x117   : > { %v4429_v38 = vpop.f32.mrf.mxu0 }
 0x11b   : > { %v4439_v6 = vpop.f32.mrf.mxu2 }
 0x11c   : > { %4932 = vst [vmem:[#allocation20_spill] sm:$0xff] %v4439_v6  ;;  %v4441_v8 = vpop.f32.mrf.mxu3 }
 0x11d   : > { %4933 = vst [vmem:[#allocation21_spill] sm:$0xff] %v4441_v8  ;;  %v1620_v10 = vpop.f32.mrf.mxu1  ;;  %v3517_v8 = vld [vmem:[%s4103_s21 + $0x174] sm:$0xf] }
 0x11e   : > { %v1621_v48 = vadd.f32 %v1620_v10, %v1472_v47  ;;  %v2915_v6 = vor.u32 %v3517_v8, %v2912_v22  ;;  %v3521_v8 = vld [vmem:[%s4103_s21 + $0x194] sm:$0xf] }
 0x11f   : > { %v2067_v41 = vpop.f32.mrf.mxu0 }
 0x120   : > { %1659 = vmatmul.bf16.gmra.mxu1 %v2887_v13  ;;  %1808 = vmatmul.bf16.gmra.mxu2 %v2891_v32  ;;  %v3516_v32 = vld [vmem:[%s4103_s21 + $0x16c] sm:$0xf]  ;;  %v2910_v13 = vld [vmem:[%s4103_s21 + $0x170] sm:$0xf] }
 0x121   : > { %1957 = vmatmul.bf16.gmra.mxu3 %v2895_v29  ;;  %v2904_v29 = vld [vmem:[%s4103_s21 + $0x17c] sm:$0xf0] }
 0x122   : > { %3436 = vmatmul.msk.bf16.gmra.mxu0 %vm1373_vm1, %v2899_v54  ;;  %v3519_v54 = vld [vmem:[%s4103_s21 + $0x180] sm:$0xf0]  ;;  %v2907_v24 = vor.u32 %v3516_v32, %v2904_v29  ;;  %v2932_v32 = vld [vmem:[%s4103_s21 + $0x1ac] sm:$0xf0]  ;;  %v2938_v29 = vld [vmem:[%s4103_s21 + $0x1a0] sm:$0xf] }
 0x123   : > { %v1769_v4 = vpop.f32.mrf.mxu2 }
 0x124   : > { %v1918_v50 = vpop.f32.mrf.mxu3  ;;  %v1770_v60 = vadd.f32 %v1769_v4, %v1621_v48  ;;  %v2911_v4 = vor.u32 %v3519_v54, %v2910_v13  ;;  %v3525_v13 = vld [vmem:[%s4103_s21 + $0x1b0] sm:$0xf0] }
 0x125   : > { %v1622_v51 = vpop.f32.mrf.mxu1 }
 0x126   : > { %v1919_v12 = vadd.f32 %v1918_v50, %v1770_v60  ;;  %v1623_v0 = vadd.f32 %v1622_v51, %v1474_v5  ;;  %v2924_v50 = vld [vmem:[%s4103_s21 + $0x1a4] sm:$0xf0]  ;;  %v3524_v51 = vld [vmem:[%s4103_s21 + $0x1a8] sm:$0xf0]  ;;  %v3522_v60 = vld [vmem:[%s4103_s21 + $0x19c] sm:$0xf] }
 0x127   : > { %v2069_v61 = vpop.f32.mrf.mxu0 }
 0x128   : > { %v2068_v26 = vadd.f32 %v2067_v41, %v1919_v12 }
 0x12b   : > { %v1771_v36 = vpop.f32.mrf.mxu2 }
 0x12c   : > { %v1772_v10 = vadd.f32 %v1771_v36, %v1623_v0  ;;  %v1920_v47 = vpop.f32.mrf.mxu3  ;;  %v1477_v36 = vadd.f32 %v4446_v21, %v4295_v42  ;;  %v2207_v0 = vmax.f32 %v2068_v26, 0.0  ;;  %v1479_v42 = vadd.f32 %v4446_v21, %v4304_v46 }
 0x12d   : > { %v1625_v48 = vpop.f32.mrf.mxu1  ;;  %v2935_v26 = vor.u32 %v3522_v60, %v2932_v32  ;;  %v2944_v60 = vld [vmem:[%s4103_s21 + $0x1cc] sm:$0xf0] }
 0x12e   : > { %v1921_v3 = vadd.f32 %v1920_v47, %v1772_v10  ;;  %v1626_v41 = vadd.f32 %v1625_v48, %v1477_v36  ;;  %v2927_v47 = vor.u32 %v3521_v8, %v2924_v50  ;;  %v2939_v36 = vor.u32 %v3525_v13, %v2938_v29  ;;  %v2952_v13 = vld [vmem:[%s4103_s21 + $0x1d4] sm:$0xf0] }
 0x12f   : > { %v2072_v31 = vpop.f32.mrf.mxu0 }
 0x130   : > { %v2070_v9 = vadd.f32 %v2069_v61, %v1921_v3  ;;  %1664 = vmatmul.bf16.gmra.mxu1 %v2907_v24  ;;  %1813 = vmatmul.bf16.gmra.mxu2 %v2911_v4 }
 0x131   : > { %1962 = vmatmul.bf16.gmra.mxu3 %v2915_v6 }
 0x132   : > { %3437 = vmatmul.msk.bf16.gmra.mxu0 %vm1373_vm1, %v2919_v17  ;;  %v2208_v44 = vmax.f32 %v2070_v9, 0.0  ;;  %v2930_v9 = vld [vmem:[%s4103_s21 + $0x198] sm:$0xf] }
 0x133   : > { %v1774_v56 = vpop.f32.mrf.mxu2  ;;  %v2931_v4 = vor.u32 %v3524_v51, %v2930_v9  ;;  %v1484_v9 = vadd.f32 %v4446_v21, %v4329_v2  ;;  %v3526_v51 = vld [vmem:[%s4103_s21 + $0x1bc] sm:$0xf] }
 0x134   : > { %v3654_v12 = vpack.c.bf16 %v2208_v44, %v2207_v0  ;;  %v1923_v24 = vpop.f32.mrf.mxu3  ;;  %v1775_v17 = vadd.f32 %v1774_v56, %v1626_v41 }
 0x135   : > { %v1627_v3 = vpop.f32.mrf.mxu1 }
 0x136   : > { %3655 = vst [vmem:[%s4465_s12] sm:$0xff] %v3654_v12   ;;  %v1924_v61 = vadd.f32 %v1923_v24, %v1775_v17  ;;  %v1628_v5 = vadd.f32 %v1627_v3, %v1479_v42  ;;  %v1482_v12 = vadd.f32 %v4446_v21, %v4320_v62  ;;  %v2950_v62 = vld [vmem:[%s4103_s21 + $0x1c0] sm:$0xf] }
 0x137   : > { %v2074_v6 = vpop.f32.mrf.mxu0 }
 0x138   : > { %v2073_v0 = vadd.f32 %v2072_v31, %v1924_v61  ;;  %v3529_v61 = vld [vmem:[%s4103_s21 + $0x1d0] sm:$0xf0] }
 0x13a   : > { %v2209_v41 = vmax.f32 %v2073_v0, 0.0 }
 0x13b   : > { %v1776_v54 = vpop.f32.mrf.mxu2 }
 0x13c   : > { %v1777_v22 = vadd.f32 %v1776_v54, %v1628_v5  ;;  %v1925_v10 = vpop.f32.mrf.mxu3  ;;  %v3527_v5 = vld [vmem:[%s4103_s21 + $0x1c4] sm:$0xf]  ;;  %v2958_v54 = vld [vmem:[%s4103_s21 + $0x1c8] sm:$0xf] }
 0x13d   : > { %v1630_v48 = vpop.f32.mrf.mxu1  ;;  %v2955_v0 = vor.u32 %v3527_v5, %v2952_v13  ;;  %v3532_v5 = vld [vmem:[%s4103_s21 + $0x1ec] sm:$0xf]  ;;  %v2972_v13 = vld [vmem:[%s4103_s21 + $0x1fc] sm:$0xf0] }
 0x13e   : > { %v1926_v46 = vadd.f32 %v1925_v10, %v1777_v22  ;;  %v1631_v17 = vadd.f32 %v1630_v48, %v1482_v12  ;;  %v3530_v22 = vld [vmem:[%s4103_s21 + $0x1d8] sm:$0xf0]  ;;  %v2947_v48 = vor.u32 %v3526_v51, %v2944_v60  ;;  %v1489_v51 = vadd.f32 %v4446_v21, %v4354_v28  ;;  %v3531_v60 = vld [vmem:[%s4103_s21 + $0x1e4] sm:$0xf] }
 0x13f   : > { %v2077_v44 = vpop.f32.mrf.mxu0 }
 0x140   : > { %v2075_v56 = vadd.f32 %v2074_v6, %v1926_v46  ;;  %1669 = vmatmul.bf16.gmra.mxu1 %v2927_v47  ;;  %1818 = vmatmul.bf16.gmra.mxu2 %v2931_v4  ;;  %v2959_v46 = vor.u32 %v3530_v22, %v2958_v54  ;;  %v2978_v54 = vld [vmem:[%s4103_s21 + $0x1f0] sm:$0xf]  ;;  %v3535_v22 = vld [vmem:[%s4103_s21 + $0x200] sm:$0xf0] }
 0x141   : > { %1967 = vmatmul.bf16.gmra.mxu3 %v2935_v26  ;;  %v2951_v26 = vor.u32 %v3529_v61, %v2950_v62  ;;  %v2964_v62 = vld [vmem:[%s4103_s21 + $0x1f4] sm:$0xf0]  ;;  %v3534_v61 = vld [vmem:[%s4103_s21 + $0x1f8] sm:$0xf0] }
 0x142   : > { %3438 = vmatmul.msk.bf16.gmra.mxu0 %vm1373_vm1, %v2939_v36  ;;  %v2210_v24 = vmax.f32 %v2075_v56, 0.0 }
 0x143   : > { %v1779_v31 = vpop.f32.mrf.mxu2 }
 0x144   : > { %v3659_v3 = vpack.c.bf16 %v2210_v24, %v2209_v41  ;;  %v1928_v6 = vpop.f32.mrf.mxu3  ;;  %v1780_v8 = vadd.f32 %v1779_v31, %v1631_v17  ;;  %v1487_v24 = vadd.f32 %v4446_v21, %v4345_v18  ;;  %v2970_v18 = vld [vmem:[%s4103_s21 + $0x1e8] sm:$0xf] }
 0x145   : > { %v1632_v42 = vpop.f32.mrf.mxu1 }
 0x146   : > { %3791 = vst [vmem:[%s4465_s12 + $0x8] sm:$0xff] %v3659_v3   ;;  %v1929_v32 = vadd.f32 %v1928_v6, %v1780_v8  ;;  %v1633_v29 = vadd.f32 %v1632_v42, %v1484_v9 }
 0x147   : > { %v2079_v50 = vpop.f32.mrf.mxu0 }
 0x148   : > { %v2078_v56 = vadd.f32 %v2077_v44, %v1929_v32 }
 0x14a   : > { %v2211_v31 = vmax.f32 %v2078_v56, 0.0 }
 0x14b   : > { %v1781_v10 = vpop.f32.mrf.mxu2 }
 0x14c   : > { %v1782_v47 = vadd.f32 %v1781_v10, %v1633_v29  ;;  %v1930_v4 = vpop.f32.mrf.mxu3 }
 0x14d   : > { %v1635_v36 = vpop.f32.mrf.mxu1 }
 0x14e   : > { %v1931_v2 = vadd.f32 %v1930_v4, %v1782_v47  ;;  %v1636_v6 = vadd.f32 %v1635_v36, %v1487_v24  ;;  %v1492_v24 = vadd.f32 %v4446_v21, %v4370_v52  ;;  %v2990_v52 = vld [vmem:[%s4103_s21 + $0x210] sm:$0xf] }
 0x14f   : > { %v2082_v12 = vpop.f32.mrf.mxu0 }
 0x150   : > { %v2080_v41 = vadd.f32 %v2079_v50, %v1931_v2  ;;  %1674 = vmatmul.bf16.gmra.mxu1 %v2947_v48  ;;  %1823 = vmatmul.bf16.gmra.mxu2 %v2951_v26  ;;  %v2967_v48 = vor.u32 %v3531_v60, %v2964_v62  ;;  %v2971_v26 = vor.u32 %v3534_v61, %v2970_v18  ;;  %v2984_v60 = vld [vmem:[%s4103_s21 + $0x21c] sm:$0xf0]  ;;  %v3539_v62 = vld [vmem:[%s4103_s21 + $0x220] sm:$0xf0]  ;;  %v3537_v18 = vld [vmem:[%s4103_s21 + $0x214] sm:$0xf] }
 0x151   : > { %1972 = vmatmul.bf16.gmra.mxu3 %v2955_v0  ;;  %v2975_v0 = vor.u32 %v3532_v5, %v2972_v13  ;;  %v3540_v13 = vld [vmem:[%s4103_s21 + $0x228] sm:$0xf0] }
 0x152   : > { %3439 = vmatmul.msk.bf16.gmra.mxu0 %vm1373_vm1, %v2959_v46  ;;  %v2212_v3 = vmax.f32 %v2080_v41, 0.0  ;;  %v2979_v46 = vor.u32 %v3535_v22, %v2978_v54 }
 0x153   : > { %v1784_v44 = vpop.f32.mrf.mxu2 }
 0x154   : > { %v3664_v17 = vpack.c.bf16 %v2212_v3, %v2211_v31  ;;  %v1933_v42 = vpop.f32.mrf.mxu3  ;;  %v1785_v50 = vadd.f32 %v1784_v44, %v1636_v6 }
 0x155   : > { %v1637_v8 = vpop.f32.mrf.mxu1 }
 0x156   : > { %3792 = vst [vmem:[%s4465_s12 + $0x10] sm:$0xff] %v3664_v17   ;;  %v1934_v32 = vadd.f32 %v1933_v42, %v1785_v50  ;;  %v1638_v29 = vadd.f32 %v1637_v8, %v1489_v51  ;;  %v3536_v51 = vld [vmem:[%s4103_s21 + $0x20c] sm:$0xf] }
 0x157   : > { %v2084_v9 = vpop.f32.mrf.mxu0 }
 0x158   : > { %v2083_v56 = vadd.f32 %v2082_v12, %v1934_v32  ;;  %v2992_v32 = vld [vmem:[%s4103_s21 + $0x224] sm:$0xf0] }
 0x15a   : > { %v2213_v31 = vmax.f32 %v2083_v56, 0.0 }
 0x15b   : > { %v1786_v10 = vpop.f32.mrf.mxu2 }
 0x15c   : > { %v1787_v47 = vadd.f32 %v1786_v10, %v1638_v29  ;;  %v1935_v4 = vpop.f32.mrf.mxu3  ;;  %v2998_v29 = vld [vmem:[%s4103_s21 + $0x218] sm:$0xf] }
 0x15d   : > { %v1640_v36 = vpop.f32.mrf.mxu1 }
 0x15e   : > { %v1936_v28 = vadd.f32 %v1935_v4, %v1787_v47  ;;  %v1641_v17 = vadd.f32 %v1640_v36, %v1492_v24  ;;  %v2987_v47 = vor.u32 %v3536_v51, %v2984_v60  ;;  %v2991_v4 = vor.u32 %v3539_v62, %v2990_v52  ;;  %v3542_v51 = vld [vmem:[%s4103_s21 + $0x23c] sm:$0xf]  ;;  %v3012_v62 = vld [vmem:[%s4103_s21 + $0x24c] sm:$0xf0] }
 0x15f   : > { %v2087_v2 = vpop.f32.mrf.mxu0  ;;  %v2999_v36 = vor.u32 %v3540_v13, %v2998_v29 }
 0x160   : > { %v2085_v41 = vadd.f32 %v2084_v9, %v1936_v28  ;;  %1679 = vmatmul.bf16.gmra.mxu1 %v2967_v48  ;;  %1828 = vmatmul.bf16.gmra.mxu2 %v2971_v26  ;;  %v1494_v9 = vadd.f32 %v4446_v21, %v4379_v58  ;;  %v2995_v26 = vor.u32 %v3537_v18, %v2992_v32  ;;  %v3018_v18 = vld [vmem:[%s4103_s21 + $0x240] sm:$0xf] }
 0x161   : > { %1977 = vmatmul.bf16.gmra.mxu3 %v2975_v0  ;;  %v1497_v28 = vadd.f32 %v4446_v21, %v4395_v30  ;;  %v3010_v30 = vld [vmem:[%s4103_s21 + $0x238] sm:$0xf] }
 0x162   : > { %3440 = vmatmul.msk.bf16.gmra.mxu0 %vm1373_vm1, %v2979_v46  ;;  %v2214_v3 = vmax.f32 %v2085_v41, 0.0 }
 0x163   : > { %v1789_v12 = vpop.f32.mrf.mxu2 }
 0x164   : > { %v3669_v44 = vpack.c.bf16 %v2214_v3, %v2213_v31  ;;  %v1938_v6 = vpop.f32.mrf.mxu3  ;;  %v1790_v8 = vadd.f32 %v1789_v12, %v1641_v17 }
 0x165   : > { %v1642_v42 = vpop.f32.mrf.mxu1 }
 0x166   : > { %3793 = vst [vmem:[%s4465_s12 + $0x18] sm:$0xff] %v3669_v44   ;;  %v1939_v61 = vadd.f32 %v1938_v6, %v1790_v8  ;;  %v1643_v5 = vadd.f32 %v1642_v42, %v1494_v9  ;;  %v1499_v42 = vadd.f32 %v4446_v21, %v4404_v34  ;;  %v3541_v8 = vld [vmem:[%s4103_s21 + $0x234] sm:$0xf]  ;;  %v3544_v9 = vld [vmem:[%s4103_s21 + $0x248] sm:$0xf0] }
 0x167   : > { %v2089_v50 = vpop.f32.mrf.mxu0 }
 0x168   : > { %v2088_v0 = vadd.f32 %v2087_v2, %v1939_v61  ;;  %v3545_v61 = vld [vmem:[%s4103_s21 + $0x250] sm:$0xf0] }
 0x16a   : > { %v2215_v41 = vmax.f32 %v2088_v0, 0.0 }
 0x16b   : > { %v1791_v54 = vpop.f32.mrf.mxu2 }
 0x16c   : > { %v1792_v22 = vadd.f32 %v1791_v54, %v1643_v5  ;;  %v1940_v10 = vpop.f32.mrf.mxu3  ;;  %v3011_v54 = vor.u32 %v3544_v9, %v3010_v30  ;;  %v3038_v30 = vld [vmem:[%s4103_s21 + $0x268] sm:$0xf]  ;;  %v3550_v9 = vld [vmem:[%s4103_s21 + $0x278] sm:$0xf0] }
 0x16d   : > { %v1645_v48 = vpop.f32.mrf.mxu1 }
 0x16e   : > { %v1941_v58 = vadd.f32 %v1940_v10, %v1792_v22  ;;  %v1646_v3 = vadd.f32 %v1645_v48, %v1497_v28  ;;  %v3015_v10 = vor.u32 %v3542_v51, %v3012_v62 }
 0x16f   : > { %v2092_v46 = vpop.f32.mrf.mxu0 }
 0x170   : > { %v2090_v56 = vadd.f32 %v2089_v50, %v1941_v58  ;;  %1684 = vmatmul.bf16.gmra.mxu1 %v2987_v47  ;;  %1833 = vmatmul.bf16.gmra.mxu2 %v2991_v4  ;;  %v3004_v50 = vld [vmem:[%s4103_s21 + $0x244] sm:$0xf0]  ;;  %v3019_v47 = vor.u32 %v3545_v61, %v3018_v18 }
 0x171   : > { %1982 = vmatmul.bf16.gmra.mxu3 %v2995_v26  ;;  %v3007_v13 = vor.u32 %v3541_v8, %v3004_v50  ;;  %v3032_v50 = vld [vmem:[%s4103_s21 + $0x274] sm:$0xf0] }
 0x172   : > { %3441 = vmatmul.msk.bf16.gmra.mxu0 %vm1373_vm1, %v2999_v36  ;;  %v2216_v24 = vmax.f32 %v2090_v56, 0.0  ;;  %v1502_v36 = vadd.f32 %v4446_v21, %v4420_v14  ;;  %v3030_v14 = vld [vmem:[%s4103_s21 + $0x260] sm:$0xf] }
 0x173   : > { %v1794_v2 = vpop.f32.mrf.mxu2 }
 0x174   : > { %v3674_v31 = vpack.c.bf16 %v2216_v24, %v2215_v41  ;;  %v1943_v12 = vpop.f32.mrf.mxu3  ;;  %v1795_v17 = vadd.f32 %v1794_v2, %v1646_v3  ;;  %v1504_v3 = vadd.f32 %v4446_v21, %v4429_v38 }
 0x175   : > { %v1647_v44 = vpop.f32.mrf.mxu1 }
 0x176   : > { %3794 = vst [vmem:[%s4465_s12 + $0x20] sm:$0xff] %v3674_v31   ;;  %v1944_v60 = vadd.f32 %v1943_v12, %v1795_v17  ;;  %v1648_v52 = vadd.f32 %v1647_v44, %v1499_v42  ;;  %v3546_v12 = vld [vmem:[%s4103_s21 + $0x25c] sm:$0xf]  ;;  %v3024_v44 = vld [vmem:[%s4103_s21 + $0x26c] sm:$0xf0] }
 0x177   : > { %v2094_v6 = vpop.f32.mrf.mxu0  ;;  %v3549_v17 = vld [vmem:[%s4103_s21 + $0x270] sm:$0xf0]  ;;  %v3027_v62 = vor.u32 %v3546_v12, %v3024_v44  ;;  %v3058_v12 = vld [vmem:[%s4103_s21 + $0x290] sm:$0xf]  ;;  %v3555_v44 = vld [vmem:[%s4103_s21 + $0x2a0] sm:$0xf0] }
 0x178   : > { %v2093_v4 = vadd.f32 %v2092_v46, %v1944_v60  ;;  %v3031_v18 = vor.u32 %v3549_v17, %v3030_v14 }
 0x17a   : > { %v2217_v0 = vmax.f32 %v2093_v4, 0.0 }
 0x17b   : > { %v1796_v5 = vpop.f32.mrf.mxu2 }
 0x17c   : > { %v1797_v32 = vadd.f32 %v1796_v5, %v1648_v52  ;;  %v1945_v29 = vpop.f32.mrf.mxu3 }
 0x17d   : > { %v1650_v22 = vpop.f32.mrf.mxu1 }
 0x17e   : > { %v1946_v34 = vadd.f32 %v1945_v29, %v1797_v32  ;;  %v1651_v28 = vadd.f32 %v1650_v22, %v1502_v36  ;;  %v3039_v32 = vor.u32 %v3550_v9, %v3038_v30  ;;  %v1507_v22 = vadd.f32 %v4446_v21, %v4268_v19  ;;  %v3050_v19 = vld [vmem:[%s4103_s21 + $0x288] sm:$0xf] }
 0x17f   : > { %v2097_v48 = vpop.f32.mrf.mxu0  ;;  %v3059_v9 = vor.u32 %v3555_v44, %v3058_v12 }
 0x180   : > { %v2095_v26 = vadd.f32 %v2094_v6, %v1946_v34  ;;  %1689 = vmatmul.bf16.gmra.mxu1 %v3007_v13  ;;  %1838 = vmatmul.bf16.gmra.mxu2 %v3011_v54  ;;  %v3547_v6 = vld [vmem:[%s4103_s21 + $0x264] sm:$0xf] }
 0x181   : > { %1987 = vmatmul.bf16.gmra.mxu3 %v3015_v10  ;;  %v3035_v5 = vor.u32 %v3547_v6, %v3032_v50 }
 0x182   : > { %3442 = vmatmul.msk.bf16.gmra.mxu0 %vm1373_vm1, %v3019_v47  ;;  %v2218_v58 = vmax.f32 %v2095_v26, 0.0 }
 0x183   : > { %v1799_v46 = vpop.f32.mrf.mxu2 }
 0x184   : > { %v3679_v56 = vpack.c.bf16 %v2218_v58, %v2217_v0  ;;  %v1948_v41 = vpop.f32.mrf.mxu3  ;;  %v1800_v2 = vadd.f32 %v1799_v46, %v1651_v28  ;;  %v1509_v46 = vadd.f32 %v4446_v21, %v4277_v25  ;;  %v3044_v28 = vld [vmem:[%s4103_s21 + $0x294] sm:$0xf0] }
 0x185   : > { %v1652_v24 = vpop.f32.mrf.mxu1 }
 0x186   : > { %3795 = vst [vmem:[%s4465_s12 + $0x28] sm:$0xff] %v3679_v56   ;;  %v1949_v42 = vadd.f32 %v1948_v41, %v1800_v2  ;;  %v1653_v8 = vadd.f32 %v1652_v24, %v1504_v3  ;;  %v3551_v56 = vld [vmem:[%s4103_s21 + $0x284] sm:$0xf]  ;;  %v3554_v41 = vld [vmem:[%s4103_s21 + $0x298] sm:$0xf0] }
 0x187   : > { %v2099_v31 = vpop.f32.mrf.mxu0  ;;  %v3552_v24 = vld [vmem:[%s4103_s21 + $0x28c] sm:$0xf]  ;;  %v3052_v3 = vld [vmem:[%s4103_s21 + $0x29c] sm:$0xf0] }
 0x188   : > { %v2098_v29 = vadd.f32 %v2097_v48, %v1949_v42  ;;  %v3047_v42 = vor.u32 %v3551_v56, %v3044_v28  ;;  %v3055_v30 = vor.u32 %v3552_v24, %v3052_v3 }
 0x18a   : > { %v2219_v10 = vmax.f32 %v2098_v29, 0.0 }
 0x18b   : > { %v1801_v51 = vpop.f32.mrf.mxu2 }
 0x18c   : > { %v1802_v60 = vadd.f32 %v1801_v51, %v1653_v8  ;;  %v1950_v52 = vpop.f32.mrf.mxu3  ;;  %v3051_v8 = vor.u32 %v3554_v41, %v3050_v19 }
 0x18d   : > { %v1655_v61 = vpop.f32.mrf.mxu1 }
 0x18e   : > { %v1951_v38 = vadd.f32 %v1950_v52, %v1802_v60  ;;  %v1656_v48 = vadd.f32 %v1655_v61, %v1507_v22 }
 0x18f   : > { %v2102_v13 = vpop.f32.mrf.mxu0 }
 0x190   : > { %v2100_v54 = vadd.f32 %v2099_v31, %v1951_v38  ;;  %1694 = vmatmul.bf16.gmra.mxu1 %v3027_v62  ;;  %1843 = vmatmul.bf16.gmra.mxu2 %v3031_v18  ;;  %v1512_v62 = vadd.f32 %v4446_v21, %v4293_v39  ;;  %v3070_v39 = vld [vmem:[%s4103_s21 + $0x2b0] sm:$0xf] }
 0x191   : > { %1992 = vmatmul.bf16.gmra.mxu3 %v3035_v5 }
 0x192   : > { %3443 = vmatmul.msk.bf16.gmra.mxu0 %vm1373_vm1, %v3039_v32  ;;  %v2220_v47 = vmax.f32 %v2100_v54, 0.0 }
 0x193   : > { %v1804_v4 = vpop.f32.mrf.mxu2 }
 0x194   : > { %v3684_v34 = vpack.c.bf16 %v2220_v47, %v2219_v10  ;;  %v1953_v26 = vpop.f32.mrf.mxu3  ;;  %v1805_v0 = vadd.f32 %v1804_v4, %v1656_v48  ;;  %v1514_v10 = vadd.f32 %v4446_v21, %v4302_v45  ;;  %v3556_v47 = vld [vmem:[%s4103_s21 + $0x2ac] sm:$0xf]  ;;  %v3064_v4 = vld [vmem:[%s4103_s21 + $0x2bc] sm:$0xf0]  ;;  %v3557_v48 = vld [vmem:[%s4103_s21 + $0x2b4] sm:$0xf] }
 0x195   : > { %v1657_v36 = vpop.f32.mrf.mxu1  ;;  %v3067_v41 = vor.u32 %v3556_v47, %v3064_v4 }
 0x196   : > { %3796 = vst [vmem:[%s4465_s12 + $0x30] sm:$0xff] %v3684_v34   ;;  %v1954_v2 = vadd.f32 %v1953_v26, %v1805_v0  ;;  %v1658_v31 = vadd.f32 %v1657_v36, %v1509_v46  ;;  %v3559_v34 = vld [vmem:[%s4103_s21 + $0x2c0] sm:$0xf0]  ;;  %v3072_v0 = vld [vmem:[%s4103_s21 + $0x2c4] sm:$0xf0] }
 0x197   : > { %v2104_v58 = vpop.f32.mrf.mxu0  ;;  %v3560_v46 = vld [vmem:[%s4103_s21 + $0x2c8] sm:$0xf0]  ;;  %v3071_v24 = vor.u32 %v3559_v34, %v3070_v39 }
 0x198   : > { %v2103_v51 = vadd.f32 %v2102_v13, %v1954_v2 }
 0x19a   : > { %v2221_v18 = vmax.f32 %v2103_v51, 0.0 }
 0x19b   : > { %v1806_v14 = vpop.f32.mrf.mxu2 }
 0x19c   : > { %v1807_v17 = vadd.f32 %v1806_v14, %v1658_v31  ;;  %v1955_v6 = vpop.f32.mrf.mxu3  ;;  %v3075_v31 = vor.u32 %v3557_v48, %v3072_v0 }
 0x19d   : > { %v1660_v50 = vpop.f32.mrf.mxu1 }
 0x19e   : > { %v1956_v25 = vadd.f32 %v1955_v6, %v1807_v17  ;;  %v1661_v29 = vadd.f32 %v1660_v50, %v1512_v62  ;;  %v1517_v17 = vadd.f32 %v4446_v21, %v4318_v59  ;;  %v3561_v62 = vld [vmem:[%s4103_s21 + $0x2d4] sm:$0xf]  ;;  %v3090_v59 = vld [vmem:[%s4103_s21 + $0x2d8] sm:$0xf] }
 0x19f   : > { %v2107_v60 = vpop.f32.mrf.mxu0 }
 0x1a0   : > { %v2105_v52 = vadd.f32 %v2104_v58, %v1956_v25  ;;  %1699 = vmatmul.bf16.gmra.mxu1 %v3047_v42  ;;  %1848 = vmatmul.bf16.gmra.mxu2 %v3051_v8  ;;  %v3078_v58 = vld [vmem:[%s4103_s21 + $0x2b8] sm:$0xf] }
 0x1a1   : > { %1997 = vmatmul.bf16.gmra.mxu3 %v3055_v30  ;;  %v3079_v3 = vor.u32 %v3560_v46, %v3078_v58  ;;  %v1522_v46 = vadd.f32 %v4446_v21, %v4343_v15  ;;  %v3110_v15 = vld [vmem:[%s4103_s21 + $0x300] sm:$0xf] }
 0x1a2   : > { %3444 = vmatmul.msk.bf16.gmra.mxu0 %vm1373_vm1, %v3059_v9  ;;  %v2222_v61 = vmax.f32 %v2105_v52, 0.0  ;;  %v1519_v52 = vadd.f32 %v4446_v21, %v4327_v1 }
 0x1a3   : > { %v1809_v5 = vpop.f32.mrf.mxu2 }
 0x1a4   : > { %v3689_v32 = vpack.c.bf16 %v2222_v61, %v2221_v18  ;;  %v1958_v38 = vpop.f32.mrf.mxu3  ;;  %v1810_v54 = vadd.f32 %v1809_v5, %v1661_v29  ;;  %v3084_v18 = vld [vmem:[%s4103_s21 + $0x2e4] sm:$0xf0]  ;;  %v3564_v61 = vld [vmem:[%s4103_s21 + $0x2e8] sm:$0xf0]  ;;  %v3562_v5 = vld [vmem:[%s4103_s21 + $0x2dc] sm:$0xf] }
 0x1a5   : > { %v1662_v13 = vpop.f32.mrf.mxu1  ;;  %v3087_v4 = vor.u32 %v3561_v62, %v3084_v18  ;;  %v3091_v39 = vor.u32 %v3564_v61, %v3090_v59 }
 0x1a6   : > { %3797 = vst [vmem:[%s4465_s12 + $0x38] sm:$0xff] %v3689_v32   ;;  %v1959_v26 = vadd.f32 %v1958_v38, %v1810_v54  ;;  %v1663_v36 = vadd.f32 %v1662_v13, %v1514_v10  ;;  %v3092_v38 = vld [vmem:[%s4103_s21 + $0x2ec] sm:$0xf0]  ;;  %v3098_v13 = vld [vmem:[%s4103_s21 + $0x2e0] sm:$0xf] }
 0x1a7   : > { %v2109_v22 = vpop.f32.mrf.mxu0  ;;  %v3565_v54 = vld [vmem:[%s4103_s21 + $0x2f0] sm:$0xf0]  ;;  %v3095_v48 = vor.u32 %v3562_v5, %v3092_v38  ;;  %v1527_v38 = vadd.f32 %v4446_v21, %v4368_v49  ;;  %v3130_v49 = vld [vmem:[%s4103_s21 + $0x328] sm:$0xf] }
 0x1a8   : > { %v2108_v12 = vadd.f32 %v2107_v60, %v1959_v26  ;;  %v3099_v26 = vor.u32 %v3565_v54, %v3098_v13 }
 0x1aa   : > { %v2223_v6 = vmax.f32 %v2108_v12, 0.0 }
 0x1ab   : > { %v1811_v56 = vpop.f32.mrf.mxu2 }
 0x1ac   : > { %v1812_v28 = vadd.f32 %v1811_v56, %v1663_v36  ;;  %v1960_v19 = vpop.f32.mrf.mxu3 }
 0x1ad   : > { %v1665_v2 = vpop.f32.mrf.mxu1 }
 0x1ae   : > { %v1961_v45 = vadd.f32 %v1960_v19, %v1812_v28  ;;  %v1666_v30 = vadd.f32 %v1665_v2, %v1517_v17  ;;  %v3569_v17 = vld [vmem:[%s4103_s21 + $0x310] sm:$0xf0] }
 0x1af   : > { %v2112_v44 = vpop.f32.mrf.mxu0  ;;  %v3111_v62 = vor.u32 %v3569_v17, %v3110_v15 }
 0x1b0   : > { %v2110_v14 = vadd.f32 %v2109_v22, %v1961_v45  ;;  %1704 = vmatmul.bf16.gmra.mxu1 %v3067_v41  ;;  %1853 = vmatmul.bf16.gmra.mxu2 %v3071_v24  ;;  %v1524_v45 = vadd.f32 %v4446_v21, %v4352_v27 }
 0x1b1   : > { %2002 = vmatmul.bf16.gmra.mxu3 %v3075_v31 }
 0x1b2   : > { %3445 = vmatmul.msk.bf16.gmra.mxu0 %vm1373_vm1, %v3079_v3  ;;  %v2224_v42 = vmax.f32 %v2110_v14, 0.0  ;;  %v3104_v14 = vld [vmem:[%s4103_s21 + $0x30c] sm:$0xf0] }
 0x1b3   : > { %v1814_v8 = vpop.f32.mrf.mxu2 }
 0x1b4   : > { %v3694_v50 = vpack.c.bf16 %v2224_v42, %v2223_v6  ;;  %v1963_v9 = vpop.f32.mrf.mxu3  ;;  %v1815_v25 = vadd.f32 %v1814_v8, %v1666_v30  ;;  %v3567_v6 = vld [vmem:[%s4103_s21 + $0x304] sm:$0xf]  ;;  %v3118_v30 = vld [vmem:[%s4103_s21 + $0x308] sm:$0xf] }
 0x1b5   : > { %v1667_v51 = vpop.f32.mrf.mxu1 }
 0x1b6   : > { %3798 = vst [vmem:[%s4465_s12 + $0x40] sm:$0xff] %v3694_v50   ;;  %v1964_v32 = vadd.f32 %v1963_v9, %v1815_v25  ;;  %v1668_v29 = vadd.f32 %v1667_v51, %v1519_v52  ;;  %v3112_v50 = vld [vmem:[%s4103_s21 + $0x314] sm:$0xf0]  ;;  %v3570_v9 = vld [vmem:[%s4103_s21 + $0x318] sm:$0xf0] }
 0x1b7   : > { %v2114_v60 = vpop.f32.mrf.mxu0  ;;  %v3115_v59 = vor.u32 %v3567_v6, %v3112_v50  ;;  %v3119_v61 = vor.u32 %v3570_v9, %v3118_v30 }
 0x1b8   : > { %v2113_v36 = vadd.f32 %v2112_v44, %v1964_v32  ;;  %v3566_v44 = vld [vmem:[%s4103_s21 + $0x2fc] sm:$0xf] }
 0x1b9   : > { %v3107_v52 = vor.u32 %v3566_v44, %v3104_v14 }
 0x1ba   : > { %v2225_v56 = vmax.f32 %v2113_v36, 0.0  ;;  %v3571_v36 = vld [vmem:[%s4103_s21 + $0x324] sm:$0xf] }
 0x1bb   : > { %v1816_v22 = vpop.f32.mrf.mxu2 }
 0x1bc   : > { %v1817_v10 = vadd.f32 %v1816_v22, %v1668_v29  ;;  %v1965_v47 = vpop.f32.mrf.mxu3 }
 0x1bd   : > { %v1670_v34 = vpop.f32.mrf.mxu1 }
 0x1be   : > { %v1966_v1 = vadd.f32 %v1965_v47, %v1817_v10  ;;  %v1671_v24 = vadd.f32 %v1670_v34, %v1522_v46 }
 0x1bf   : > { %v2117_v0 = vpop.f32.mrf.mxu0 }
 0x1c0   : > { %v2115_v58 = vadd.f32 %v2114_v60, %v1966_v1  ;;  %1709 = vmatmul.bf16.gmra.mxu1 %v3087_v4  ;;  %1858 = vmatmul.bf16.gmra.mxu2 %v3091_v39  ;;  %v3124_v1 = vld [vmem:[%s4103_s21 + $0x334] sm:$0xf0] }
 0x1c1   : > { %2007 = vmatmul.bf16.gmra.mxu3 %v3095_v48 }
 0x1c2   : > { %3446 = vmatmul.msk.bf16.gmra.mxu0 %vm1373_vm1, %v3099_v26  ;;  %v2226_v28 = vmax.f32 %v2115_v58, 0.0  ;;  %v1529_v26 = vadd.f32 %v4446_v21, %v4377_v57  ;;  %v3572_v58 = vld [vmem:[%s4103_s21 + $0x32c] sm:$0xf] }
 0x1c3   : > { %v1819_v19 = vpop.f32.mrf.mxu2 }
 0x1c4   : > { %v3699_v41 = vpack.c.bf16 %v2226_v28, %v2225_v56  ;;  %v1968_v2 = vpop.f32.mrf.mxu3  ;;  %v1820_v3 = vadd.f32 %v1819_v19, %v1671_v24  ;;  %v3132_v28 = vld [vmem:[%s4103_s21 + $0x33c] sm:$0xf0]  ;;  %v3138_v19 = vld [vmem:[%s4103_s21 + $0x330] sm:$0xf] }
 0x1c5   : > { %v1672_v31 = vpop.f32.mrf.mxu1  ;;  %v3135_v44 = vor.u32 %v3572_v58, %v3132_v28 }
 0x1c6   : > { %3799 = vst [vmem:[%s4465_s12 + $0x48] sm:$0xff] %v3699_v41   ;;  %v1969_v42 = vadd.f32 %v1968_v2, %v1820_v3  ;;  %v1673_v8 = vadd.f32 %v1672_v31, %v1524_v45  ;;  %v3575_v41 = vld [vmem:[%s4103_s21 + $0x340] sm:$0xf0]  ;;  %v3127_v3 = vor.u32 %v3571_v36, %v3124_v1 }
 0x1c7   : > { %v2119_v12 = vpop.f32.mrf.mxu0  ;;  %v3139_v14 = vor.u32 %v3575_v41, %v3138_v19 }
 0x1c8   : > { %v2118_v5 = vadd.f32 %v2117_v0, %v1969_v42  ;;  %v3574_v0 = vld [vmem:[%s4103_s21 + $0x338] sm:$0xf0]  ;;  %v1532_v42 = vadd.f32 %v4446_v21, %v4393_v16  ;;  %v3150_v16 = vld [vmem:[%s4103_s21 + $0x350] sm:$0xf] }
 0x1ca   : > { %v2227_v13 = vmax.f32 %v2118_v5, 0.0  ;;  %v3579_v5 = vld [vmem:[%s4103_s21 + $0x360] sm:$0xf0] }
 0x1cb   : > { %v1821_v51 = vpop.f32.mrf.mxu2 }
 0x1cc   : > { %v1822_v25 = vadd.f32 %v1821_v51, %v1673_v8  ;;  %v1970_v60 = vpop.f32.mrf.mxu3 }
 0x1cd   : > { %v1675_v18 = vpop.f32.mrf.mxu1 }
 0x1ce   : > { %v1971_v27 = vadd.f32 %v1970_v60, %v1822_v25  ;;  %v1676_v47 = vadd.f32 %v1675_v18, %v1527_v38  ;;  %v1534_v18 = vadd.f32 %v4446_v21, %v4402_v33  ;;  %v3152_v38 = vld [vmem:[%s4103_s21 + $0x364] sm:$0xf0] }
 0x1cf   : > { %v2122_v32 = vpop.f32.mrf.mxu0 }
 0x1d0   : > { %v2120_v29 = vadd.f32 %v2119_v12, %v1971_v27  ;;  %1714 = vmatmul.bf16.gmra.mxu1 %v3107_v52  ;;  %1863 = vmatmul.bf16.gmra.mxu2 %v3111_v62  ;;  %v3131_v12 = vor.u32 %v3574_v0, %v3130_v49  ;;  %v3577_v27 = vld [vmem:[%s4103_s21 + $0x354] sm:$0xf]  ;;  %v1537_v0 = vadd.f32 %v4446_v21, %v4418_v7  ;;  %v3170_v7 = vld [vmem:[%s4103_s21 + $0x378] sm:$0xf] }
 0x1d1   : > { %2012 = vmatmul.bf16.gmra.mxu3 %v3115_v59  ;;  %v3576_v59 = vld [vmem:[%s4103_s21 + $0x34c] sm:$0xf] }
 0x1d2   : > { %3447 = vmatmul.msk.bf16.gmra.mxu0 %vm1373_vm1, %v3119_v61  ;;  %v2228_v54 = vmax.f32 %v2120_v29, 0.0  ;;  %v3144_v61 = vld [vmem:[%s4103_s21 + $0x35c] sm:$0xf0] }
 0x1d3   : > { %v1824_v22 = vpop.f32.mrf.mxu2 }
 0x1d4   : > { %v3704_v10 = vpack.c.bf16 %v2228_v54, %v2227_v13  ;;  %v1973_v4 = vpop.f32.mrf.mxu3  ;;  %v1825_v34 = vadd.f32 %v1824_v22, %v1676_v47  ;;  %v3158_v13 = vld [vmem:[%s4103_s21 + $0x358] sm:$0xf]  ;;  %v3580_v54 = vld [vmem:[%s4103_s21 + $0x368] sm:$0xf0] }
 0x1d5   : > { %v1677_v39 = vpop.f32.mrf.mxu1 }
 0x1d6   : > { %3800 = vst [vmem:[%s4465_s12 + $0x50] sm:$0xff] %v3704_v10   ;;  %v1974_v46 = vadd.f32 %v1973_v4, %v1825_v34  ;;  %v1678_v56 = vadd.f32 %v1677_v39, %v1529_v26  ;;  %v3147_v4 = vor.u32 %v3576_v59, %v3144_v61  ;;  %v3151_v39 = vor.u32 %v3579_v5, %v3150_v16  ;;  %v4650_v59 = vld [vmem:[%s4912_s2] ss:$0 sm:$0xff] }
 0x1d7   : > { %v2124_v48 = vpop.f32.mrf.mxu0  ;;  %v3159_v26 = vor.u32 %v3580_v54, %v3158_v13  ;;  %v1542_v61 = vadd.f32 %v4650_v59, %v4273_v23  ;;  %v3190_v23 = vld [vmem:[%s4103_s21 + $0x3a0] sm:$0xf] }
 0x1d8   : > { %v2123_v15 = vadd.f32 %v2122_v32, %v1974_v46 }
 0x1da   : > { %v2229_v8 = vmax.f32 %v2123_v15, 0.0 }
 0x1db   : > { %v1826_v24 = vpop.f32.mrf.mxu2 }
 0x1dc   : > { %v1827_v2 = vadd.f32 %v1826_v24, %v1678_v56  ;;  %v1975_v31 = vpop.f32.mrf.mxu3 }
 0x1dd   : > { %v1680_v45 = vpop.f32.mrf.mxu1 }
 0x1de   : > { %v1976_v57 = vadd.f32 %v1975_v31, %v1827_v2  ;;  %v1681_v51 = vadd.f32 %v1680_v45, %v1532_v42  ;;  %v3164_v45 = vld [vmem:[%s4103_s21 + $0x384] sm:$0xf0]  ;;  %v3585_v42 = vld [vmem:[%s4103_s21 + $0x390] sm:$0xf0] }
 0x1df   : > { %v2127_v17 = vpop.f32.mrf.mxu0 }
 0x1e0   : > { %v2125_v6 = vadd.f32 %v2124_v48, %v1976_v57  ;;  %1719 = vmatmul.bf16.gmra.mxu1 %v3127_v3  ;;  %1868 = vmatmul.bf16.gmra.mxu2 %v3131_v12  ;;  %v3155_v48 = vor.u32 %v3577_v27, %v3152_v38  ;;  %v1539_v3 = vadd.f32 %v4446_v21, %v4427_v37  ;;  %v3581_v12 = vld [vmem:[%s4103_s21 + $0x374] sm:$0xf] }
 0x1e1   : > { %2017 = vmatmul.bf16.gmra.mxu3 %v3135_v44  ;;  %v3584_v44 = vld [vmem:[%s4103_s21 + $0x388] sm:$0xf0] }
 0x1e2   : > { %3448 = vmatmul.msk.bf16.gmra.mxu0 %vm1373_vm1, %v3139_v14  ;;  %v2230_v50 = vmax.f32 %v2125_v6, 0.0  ;;  %v3582_v14 = vld [vmem:[%s4103_s21 + $0x37c] sm:$0xf]  ;;  %v3178_v6 = vld [vmem:[%s4103_s21 + $0x380] sm:$0xf] }
 0x1e3   : > { %v1829_v30 = vpop.f32.mrf.mxu2 }
 0x1e4   : > { %v3709_v9 = vpack.c.bf16 %v2230_v50, %v2229_v8  ;;  %v1978_v25 = vpop.f32.mrf.mxu3  ;;  %v1830_v52 = vadd.f32 %v1829_v30, %v1681_v51  ;;  %v3171_v51 = vor.u32 %v3584_v44, %v3170_v7 }
 0x1e5   : > { %v1682_v60 = vpop.f32.mrf.mxu1 }
 0x1e6   : > { %3801 = vst [vmem:[%s4465_s12 + $0x58] sm:$0xff] %v3709_v9   ;;  %v1979_v32 = vadd.f32 %v1978_v25, %v1830_v52  ;;  %v1683_v29 = vadd.f32 %v1682_v60, %v1534_v18  ;;  %v3167_v9 = vor.u32 %v3581_v12, %v3164_v45  ;;  %v3179_v52 = vor.u32 %v3585_v42, %v3178_v6 }
 0x1e7   : > { %v2129_v62 = vpop.f32.mrf.mxu0  ;;  %v1549_v42 = vadd.f32 %v4650_v59, %v4314_v55 }
 0x1e8   : > { %v2128_v36 = vadd.f32 %v2127_v17, %v1979_v32  ;;  %v3172_v17 = vld [vmem:[%s4103_s21 + $0x38c] sm:$0xf0] }
 0x1e9   : > { %v3175_v60 = vor.u32 %v3582_v14, %v3172_v17 }
 0x1ea   : > { %v2231_v58 = vmax.f32 %v2128_v36, 0.0  ;;  %v3192_v36 = vld [vmem:[%s4103_s21 + $0x3b4] sm:$0xf0] }
 0x1eb   : > { %v1831_v22 = vpop.f32.mrf.mxu2 }
 0x1ec   : > { %v1832_v10 = vadd.f32 %v1831_v22, %v1683_v29  ;;  %v1980_v47 = vpop.f32.mrf.mxu3 }
 0x1ed   : > { %v1685_v34 = vpop.f32.mrf.mxu1 }
 0x1ee   : > { %v1981_v33 = vadd.f32 %v1980_v47, %v1832_v10  ;;  %v1686_v19 = vadd.f32 %v1685_v34, %v1537_v0  ;;  %v1544_v10 = vadd.f32 %v4650_v59, %v4289_v35  ;;  %v3586_v47 = vld [vmem:[%s4103_s21 + $0x39c] sm:$0xf]  ;;  %v3587_v34 = vld [vmem:[%s4103_s21 + $0x3a4] sm:$0xf] }
 0x1ef   : > { %v2132_v1 = vpop.f32.mrf.mxu0 }
 0x1f0   : > { %v2130_v49 = vadd.f32 %v2129_v62, %v1981_v33  ;;  %1724 = vmatmul.bf16.gmra.mxu1 %v3147_v4  ;;  %1873 = vmatmul.bf16.gmra.mxu2 %v3151_v39  ;;  %v3184_v4 = vld [vmem:[%s4103_s21 + $0x3ac] sm:$0xf0]  ;;  %v3589_v39 = vld [vmem:[%s4103_s21 + $0x3b0] sm:$0xf0]  ;;  %v3198_v33 = vld [vmem:[%s4103_s21 + $0x3a8] sm:$0xf] }
 0x1f1   : > { %2022 = vmatmul.bf16.gmra.mxu3 %v3155_v48 }
 0x1f2   : > { %3449 = vmatmul.msk.bf16.gmra.mxu0 %vm1373_vm1, %v3159_v26  ;;  %v2232_v46 = vmax.f32 %v2130_v49, 0.0 }
 0x1f3   : > { %v1834_v56 = vpop.f32.mrf.mxu2 }
 0x1f4   : > { %v3714_v28 = vpack.c.bf16 %v2232_v46, %v2231_v58  ;;  %v1983_v41 = vpop.f32.mrf.mxu3  ;;  %v1835_v2 = vadd.f32 %v1834_v56, %v1686_v19  ;;  %v3187_v46 = vor.u32 %v3586_v47, %v3184_v4  ;;  %v3191_v56 = vor.u32 %v3589_v39, %v3190_v23 }
 0x1f5   : > { %v1687_v24 = vpop.f32.mrf.mxu1  ;;  %v3195_v19 = vor.u32 %v3587_v34, %v3192_v36  ;;  %v1554_v36 = vadd.f32 %v4650_v59, %v4339_v11 }
 0x1f6   : > { %3802 = vst [vmem:[%s4465_s12 + $0x60] sm:$0xff] %v3714_v28   ;;  %v1984_v15 = vadd.f32 %v1983_v41, %v1835_v2  ;;  %v1688_v57 = vadd.f32 %v1687_v24, %v1539_v3  ;;  %v1547_v3 = vadd.f32 %v4650_v59, %v4298_v43  ;;  %v3210_v43 = vld [vmem:[%s4103_s21 + $0x3c8] sm:$0xf] }
 0x1f7   : > { %v2134_v31 = vpop.f32.mrf.mxu0 }
 0x1f8   : > { %v2133_v62 = vadd.f32 %v2132_v1, %v1984_v15  ;;  %v3590_v1 = vld [vmem:[%s4103_s21 + $0x3b8] sm:$0xf0] }
 0x1f9   : > { %v3199_v41 = vor.u32 %v3590_v1, %v3198_v33  ;;  %v3596_v33 = vld [vmem:[%s4103_s21 + $0x3ec] sm:$0xf]  ;;  %v3224_v1 = vld [vmem:[%s4103_s21 + $0x3fc] sm:$0xf0] }
 0x1fa   : > { %v2233_v16 = vmax.f32 %v2133_v62, 0.0  ;;  %v3595_v62 = vld [vmem:[%s4103_s21 + $0x3e0] sm:$0xf0] }
 0x1fb   : > { %v1836_v8 = vpop.f32.mrf.mxu2 }
 0x1fc   : > { %v1837_v50 = vadd.f32 %v1836_v8, %v1688_v57  ;;  %v1985_v30 = vpop.f32.mrf.mxu3  ;;  %v3591_v8 = vld [vmem:[%s4103_s21 + $0x3c4] sm:$0xf] }
 0x1fd   : > { %v1690_v25 = vpop.f32.mrf.mxu1 }
 0x1fe   : > { %v1986_v21 = vadd.f32 %v1985_v30, %v1837_v50  ;;  %v1691_v29 = vadd.f32 %v1690_v25, %v1542_v61  ;;  %v3204_v50 = vld [vmem:[%s4103_s21 + $0x3d4] sm:$0xf0]  ;;  %v3594_v30 = vld [vmem:[%s4103_s21 + $0x3d8] sm:$0xf0] }
 0x1ff   : > { %v2137_v37 = vpop.f32.mrf.mxu0  ;;  %v3207_v61 = vor.u32 %v3591_v8, %v3204_v50 }
 0x200   : > { %v2135_v18 = vadd.f32 %v2134_v31, %v1986_v21  ;;  %1729 = vmatmul.bf16.gmra.mxu1 %v3167_v9  ;;  %1878 = vmatmul.bf16.gmra.mxu2 %v3171_v51  ;;  %v3592_v9 = vld [vmem:[%s4103_s21 + $0x3cc] sm:$0xf] }
 0x201   : > { %2027 = vmatmul.bf16.gmra.mxu3 %v3175_v60  ;;  %v3212_v60 = vld [vmem:[%s4103_s21 + $0x3dc] sm:$0xf0] }
 0x202   : > { %3450 = vmatmul.msk.bf16.gmra.mxu0 %vm1373_vm1, %v3179_v52  ;;  %v2234_v5 = vmax.f32 %v2135_v18, 0.0  ;;  %v3218_v52 = vld [vmem:[%s4103_s21 + $0x3d0] sm:$0xf] }
 0x203   : > { %v1839_v27 = vpop.f32.mrf.mxu2 }
 0x204   : > { %v3719_v32 = vpack.c.bf16 %v2234_v5, %v2233_v16  ;;  %v1988_v38 = vpop.f32.mrf.mxu3  ;;  %v1840_v54 = vadd.f32 %v1839_v27, %v1691_v29  ;;  %v3211_v16 = vor.u32 %v3594_v30, %v3210_v43  ;;  %v3215_v27 = vor.u32 %v3592_v9, %v3212_v60  ;;  %v3244_v60 = vld [vmem:[%s4103_s21 + $0x424] sm:$0xf0] }
 0x205   : > { %v1692_v13 = vpop.f32.mrf.mxu1 }
 0x206   : > { %3803 = vst [vmem:[%s4465_s12 + $0x68] sm:$0xff] %v3719_v32   ;;  %v1989_v48 = vadd.f32 %v1988_v38, %v1840_v54  ;;  %v1693_v26 = vadd.f32 %v1692_v13, %v1544_v10  ;;  %v3219_v32 = vor.u32 %v3595_v62, %v3218_v52  ;;  %v1552_v54 = vadd.f32 %v4650_v59, %v4323_v63  ;;  %v3230_v63 = vld [vmem:[%s4103_s21 + $0x3f0] sm:$0xf]  ;;  %v3604_v52 = vld [vmem:[%s4103_s21 + $0x428] sm:$0xf0] }
 0x207   : > { %v2139_v22 = vpop.f32.mrf.mxu0  ;;  %v3602_v62 = vld [vmem:[%s4103_s21 + $0x41c] sm:$0xf] }
 0x208   : > { %v2138_v24 = vadd.f32 %v2137_v37, %v1989_v48 }
 0x20a   : > { %v2235_v12 = vmax.f32 %v2138_v24, 0.0 }
 0x20b   : > { %v1841_v49 = vpop.f32.mrf.mxu2 }
 0x20c   : > { %v1842_v0 = vadd.f32 %v1841_v49, %v1693_v26  ;;  %v1990_v58 = vpop.f32.mrf.mxu3  ;;  %v3599_v49 = vld [vmem:[%s4103_s21 + $0x400] sm:$0xf0] }
 0x20d   : > { %v1695_v28 = vpop.f32.mrf.mxu1 }
 0x20e   : > { %v1991_v35 = vadd.f32 %v1990_v58, %v1842_v0  ;;  %v1696_v14 = vadd.f32 %v1695_v28, %v1547_v3  ;;  %v3597_v0 = vld [vmem:[%s4103_s21 + $0x3f4] sm:$0xf]  ;;  %v3238_v28 = vld [vmem:[%s4103_s21 + $0x3f8] sm:$0xf] }
 0x20f   : > { %v2142_v2 = vpop.f32.mrf.mxu0 }
 0x210   : > { %v2140_v31 = vadd.f32 %v2139_v22, %v1991_v35  ;;  %1734 = vmatmul.bf16.gmra.mxu1 %v3187_v46  ;;  %1883 = vmatmul.bf16.gmra.mxu2 %v3191_v56  ;;  %v3232_v56 = vld [vmem:[%s4103_s21 + $0x404] sm:$0xf0] }
 0x211   : > { %2032 = vmatmul.bf16.gmra.mxu3 %v3195_v19  ;;  %v3600_v19 = vld [vmem:[%s4103_s21 + $0x408] sm:$0xf0] }
 0x212   : > { %3451 = vmatmul.msk.bf16.gmra.mxu0 %vm1373_vm1, %v3199_v41  ;;  %v2236_v45 = vmax.f32 %v2140_v31, 0.0  ;;  %v3231_v31 = vor.u32 %v3599_v49, %v3230_v63  ;;  %v4934_v49 = vld [vmem:[#allocation12_spill] sm:$0xff] }
 0x213   : > { %v1844_v7 = vpop.f32.mrf.mxu2 }
 0x214   : > { %v3724_v44 = vpack.c.bf16 %v2236_v45, %v2235_v12  ;;  %v1993_v15 = vpop.f32.mrf.mxu3  ;;  %v1845_v17 = vadd.f32 %v1844_v7, %v1696_v14  ;;  %v3235_v12 = vor.u32 %v3597_v0, %v3232_v56  ;;  %v3239_v45 = vor.u32 %v3600_v19, %v3238_v28  ;;  %v3609_v56 = vld [vmem:[%s4103_s21 + $0x450] sm:$0xf0]  ;;  %v3607_v28 = vld [vmem:[%s4103_s21 + $0x444] sm:$0xf] }
 0x215   : > { %v1697_v57 = vpop.f32.mrf.mxu1  ;;  %v1564_v0 = vadd.f32 %v4650_v59, %v4934_v49 }
 0x216   : > { %3804 = vst [vmem:[%s4465_s12 + $0x70] sm:$0xff] %v3724_v44   ;;  %v1994_v51 = vadd.f32 %v1993_v15, %v1845_v17  ;;  %v1698_v25 = vadd.f32 %v1697_v57, %v1549_v42  ;;  %v1557_v15 = vadd.f32 %v4650_v59, %v4348_v20  ;;  %v3250_v20 = vld [vmem:[%s4103_s21 + $0x418] sm:$0xf] }
 0x217   : > { %v2144_v6 = vpop.f32.mrf.mxu0 }
 0x218   : > { %v2143_v29 = vadd.f32 %v2142_v2, %v1994_v51  ;;  %v3227_v2 = vor.u32 %v3596_v33, %v3224_v1  ;;  %v1559_v51 = vadd.f32 %v4650_v59, %v4364_v40 }
 0x21a   : > { %v2237_v22 = vmax.f32 %v2143_v29, 0.0 }
 0x21b   : > { %v1846_v21 = vpop.f32.mrf.mxu2 }
 0x21c   : > { %v1847_v37 = vadd.f32 %v1846_v21, %v1698_v25  ;;  %v1995_v18 = vpop.f32.mrf.mxu3  ;;  %v3601_v25 = vld [vmem:[%s4103_s21 + $0x414] sm:$0xf] }
 0x21d   : > { %v1700_v5 = vpop.f32.mrf.mxu1  ;;  %v3247_v29 = vor.u32 %v3601_v25, %v3244_v60 }
 0x21e   : > { %v1996_v55 = vadd.f32 %v1995_v18, %v1847_v37  ;;  %v1701_v23 = vadd.f32 %v1700_v5, %v1552_v54  ;;  %v3252_v18 = vld [vmem:[%s4103_s21 + $0x42c] sm:$0xf0] }
 0x21f   : > { %v2147_v38 = vpop.f32.mrf.mxu0 }
 0x220   : > { %v2145_v13 = vadd.f32 %v2144_v6, %v1996_v55  ;;  %1739 = vmatmul.bf16.gmra.mxu1 %v3207_v61  ;;  %1888 = vmatmul.bf16.gmra.mxu2 %v3211_v16  ;;  %v3258_v61 = vld [vmem:[%s4103_s21 + $0x420] sm:$0xf]  ;;  %v3605_v16 = vld [vmem:[%s4103_s21 + $0x430] sm:$0xf0]  ;;  %v3251_v55 = vor.u32 %v3604_v52, %v3250_v20 }
 0x221   : > { %2037 = vmatmul.bf16.gmra.mxu3 %v3215_v27  ;;  %v3259_v54 = vor.u32 %v3605_v16, %v3258_v61 }
 0x222   : > { %3452 = vmatmul.msk.bf16.gmra.mxu0 %vm1373_vm1, %v3219_v32  ;;  %v2238_v10 = vmax.f32 %v2145_v13, 0.0  ;;  %v3255_v13 = vor.u32 %v3602_v62, %v3252_v18  ;;  %v4936_v62 = vld [vmem:[#allocation16_spill] sm:$0xff] }
 0x223   : > { %v1849_v47 = vpop.f32.mrf.mxu2 }
 0x224   : > { %v3729_v4 = vpack.c.bf16 %v2238_v10, %v2237_v22  ;;  %v1998_v39 = vpop.f32.mrf.mxu3  ;;  %v1850_v48 = vadd.f32 %v1849_v47, %v1701_v23 }
 0x225   : > { %v1702_v34 = vpop.f32.mrf.mxu1 }
 0x226   : > { %3805 = vst [vmem:[%s4465_s12 + $0x78] sm:$0xff] %v3729_v4   ;;  %v1999_v58 = vadd.f32 %v1998_v39, %v1850_v48  ;;  %v1703_v46 = vadd.f32 %v1702_v34, %v1554_v36  ;;  %v1562_v4 = vadd.f32 %v4650_v59, %v4373_v53  ;;  %v3270_v53 = vld [vmem:[%s4103_s21 + $0x440] sm:$0xf] }
 0x227   : > { %v2149_v26 = vpop.f32.mrf.mxu0 }
 0x228   : > { %v2148_v7 = vadd.f32 %v2147_v38, %v1999_v58  ;;  %v3606_v58 = vld [vmem:[%s4103_s21 + $0x43c] sm:$0xf] }
 0x22a   : > { %v2239_v57 = vmax.f32 %v2148_v7, 0.0  ;;  %v3271_v7 = vor.u32 %v3609_v56, %v3270_v53 }
 0x22b   : > { %v1851_v41 = vpop.f32.mrf.mxu2 }
 0x22c   : > { %v1852_v24 = vadd.f32 %v1851_v41, %v1703_v46  ;;  %v2000_v35 = vpop.f32.mrf.mxu3  ;;  %v3264_v46 = vld [vmem:[%s4103_s21 + $0x44c] sm:$0xf0] }
 0x22d   : > { %v1705_v3 = vpop.f32.mrf.mxu1 }
 0x22e   : > { %v2001_v11 = vadd.f32 %v2000_v35, %v1852_v24  ;;  %v1706_v8 = vadd.f32 %v1705_v3, %v1557_v15  ;;  %v3272_v24 = vld [vmem:[%s4103_s21 + $0x454] sm:$0xf0]  ;;  %v3278_v35 = vld [vmem:[%s4103_s21 + $0x448] sm:$0xf] }
 0x22f   : > { %v2152_v44 = vpop.f32.mrf.mxu0 }
 0x230   : > { %v2150_v14 = vadd.f32 %v2149_v26, %v2001_v11  ;;  %1744 = vmatmul.bf16.gmra.mxu1 %v3227_v2  ;;  %1893 = vmatmul.bf16.gmra.mxu2 %v3231_v31  ;;  %v3610_v2 = vld [vmem:[%s4103_s21 + $0x458] sm:$0xf0]  ;;  %s2383_s21 = ssub.s32 (%p4067_p4), 111, %s4081_s27 }
 0x231   : > { %2042 = vmatmul.bf16.gmra.mxu3 %v3235_v12  ;;  %p2384_p8 = scmp.lt.s32.totalorder (%p4067_p4), %s2383_s21, 56 }
 0x232   : > { %3453 = vmatmul.msk.bf16.gmra.mxu0 %vm1373_vm1, %v3239_v45  ;;  %v2240_v17 = vmax.f32 %v2150_v14, 0.0  ;;  %v3267_v45 = vor.u32 %v3606_v58, %v3264_v46  ;;  %v3279_v14 = vor.u32 %v3610_v2, %v3278_v35 }
 0x233   : > { %v1854_v6 = vpop.f32.mrf.mxu2 }
 0x234   : > { %v3734_v42 = vpack.c.bf16 %v2240_v17, %v2239_v57  ;;  %v2003_v50 = vpop.f32.mrf.mxu3  ;;  %v1855_v30 = vadd.f32 %v1854_v6, %v1706_v8 }
 0x235   : > { %v1707_v43 = vpop.f32.mrf.mxu1 }
 0x236   : > { %3806 = vst [vmem:[%s4465_s12 + $0x80] sm:$0xff] %v3734_v42   ;;  %v2004_v21 = vadd.f32 %v2003_v50, %v1855_v30  ;;  %v1708_v37 = vadd.f32 %v1707_v43, %v1559_v51  ;;  %v4935_v42 = vld [vmem:[#allocation14_spill] sm:$0xff] }
 0x237   : > { %v2154_v9 = vpop.f32.mrf.mxu0  ;;  %v1567_v8 = vadd.f32 %v4650_v59, %v4935_v42 }
 0x238   : > { %v2153_v22 = vadd.f32 %v2152_v44, %v2004_v21  ;;  %v3275_v44 = vor.u32 %v3607_v28, %v3272_v24  ;;  %v1569_v21 = vadd.f32 %v4650_v59, %v4936_v62 }
 0x23a   : > { %v2241_v23 = vmax.f32 %v2153_v22, 0.0 }
 0x23b   : > { %v1856_v5 = vpop.f32.mrf.mxu2 }
 0x23c   : > { %v1857_v27 = vadd.f32 %v1856_v5, %v1708_v37  ;;  %v2005_v32 = vpop.f32.mrf.mxu3 }
 0x23d   : > { %v1710_v38 = vpop.f32.mrf.mxu1 }
 0x23e   : > { %v2006_v40 = vadd.f32 %v2005_v32, %v1857_v27  ;;  %v1711_v26 = vadd.f32 %v1710_v38, %v1562_v4 }
 0x23f   : > { %v2157_v10 = vpop.f32.mrf.mxu0 }
 0x240   : > { %v2155_v47 = vadd.f32 %v2154_v9, %v2006_v40  ;;  %1749 = vmatmul.bf16.gmra.mxu1 %v3247_v29  ;;  %1898 = vmatmul.bf16.gmra.mxu2 %v3251_v55 }
 0x241   : > { %2047 = vmatmul.bf16.gmra.mxu3 %v3255_v13  ;;  %v4937_v13 = vld [vmem:[#allocation18_spill] sm:$0xff] }
 0x242   : > { %3454 = vmatmul.msk.bf16.gmra.mxu0 %vm1373_vm1, %v3259_v54  ;;  %v2242_v39 = vmax.f32 %v2155_v47, 0.0  ;;  %v1572_v54 = vadd.f32 %v4650_v59, %v4937_v13 }
 0x243   : > { %v1859_v34 = vpop.f32.mrf.mxu2 }
 0x244   : > { %v3739_v48 = vpack.c.bf16 %v2242_v39, %v2241_v23  ;;  %v2008_v36 = vpop.f32.mrf.mxu3  ;;  %v1860_v1 = vadd.f32 %v1859_v34, %v1711_v26  ;;  %v4938_v26 = vld [vmem:[#allocation20_spill] sm:$0xff] }
 0x245   : > { %v1712_v33 = vpop.f32.mrf.mxu1 }
 0x246   : > { %3807 = vst [vmem:[%s4465_s12 + $0x88] sm:$0xff] %v3739_v48   ;;  %v2009_v19 = vadd.f32 %v2008_v36, %v1860_v1  ;;  %v1713_v41 = vadd.f32 %v1712_v33, %v1564_v0  ;;  %v1574_v36 = vadd.f32 %v4650_v59, %v4938_v26 }
 0x247   : > { %v2159_v63 = vpop.f32.mrf.mxu0 }
 0x248   : > { %v2158_v15 = vadd.f32 %v2157_v10, %v2009_v19  ;;  %v4939_v19 = vld [vmem:[#allocation3_spill] sm:$0xff] }
 0x24a   : > { %v2243_v50 = vmax.f32 %v2158_v15, 0.0 }
 0x24b   : > { %v1861_v31 = vpop.f32.mrf.mxu2 }
 0x24c   : > { %v1862_v3 = vadd.f32 %v1861_v31, %v1713_v41  ;;  %v2010_v12 = vpop.f32.mrf.mxu3  ;;  %v1577_v41 = vadd.f32 %v4650_v59, %v4939_v19 }
 0x24d   : > { %v1715_v11 = vpop.f32.mrf.mxu1 }
 0x24e   : > { %v2011_v57 = vadd.f32 %v2010_v12, %v1862_v3  ;;  %v1716_v51 = vadd.f32 %v1715_v11, %v1567_v8 }
 0x24f   : > { %v2162_v17 = vpop.f32.mrf.mxu0 }
 0x250   : > { %v2160_v6 = vadd.f32 %v2159_v63, %v2011_v57  ;;  %1754 = vmatmul.bf16.gmra.mxu1 %v3267_v45  ;;  %1903 = vmatmul.bf16.gmra.mxu2 %v3271_v7 }
 0x251   : > { %2052 = vmatmul.bf16.gmra.mxu3 %v3275_v44  ;;  %v4940_v44 = vld [vmem:[#allocation4_spill] sm:$0xff] }
 0x252   : > { %3455 = vmatmul.msk.bf16.gmra.mxu0 %vm1373_vm1, %v3279_v14  ;;  %v2244_v43 = vmax.f32 %v2160_v6, 0.0  ;;  %v1579_v14 = vadd.f32 %v4650_v59, %v4940_v44 }
 0x253   : > { %v1864_v30 = vpop.f32.mrf.mxu2 }
 0x254   : > { %v3744_v9 = vpack.c.bf16 %v2244_v43, %v2243_v50  ;;  %v2013_v25 = vpop.f32.mrf.mxu3  ;;  %v1865_v20 = vadd.f32 %v1864_v30, %v1716_v51  ;;  %v4941_v51 = vld [vmem:[#allocation5_spill] sm:$0xff] }
 0x255   : > { %v1717_v60 = vpop.f32.mrf.mxu1 }
 0x256   : > { %3808 = vst [vmem:[%s4465_s12 + $0x90] sm:$0xff] %v3744_v9   ;;  %v2014_v37 = vadd.f32 %v2013_v25, %v1865_v20  ;;  %v1718_v18 = vadd.f32 %v1717_v60, %v1569_v21  ;;  %v1582_v25 = vadd.f32 %v4650_v59, %v4941_v51 }
 0x257   : > { %v2164_v52 = vpop.f32.mrf.mxu0 }
 0x258   : > { %v2163_v32 = vadd.f32 %v2162_v17, %v2014_v37 }
 0x25a   : > { %v2245_v22 = vmax.f32 %v2163_v32, 0.0 }
 0x25b   : > { %v1866_v61 = vpop.f32.mrf.mxu2 }
 0x25c   : > { %v1867_v16 = vadd.f32 %v1866_v61, %v1718_v18  ;;  %v2015_v5 = vpop.f32.mrf.mxu3 }
 0x25d   : > { %v1720_v27 = vpop.f32.mrf.mxu1 }
 0x25e   : > { %v2016_v29 = vadd.f32 %v2015_v5, %v1867_v16  ;;  %v1721_v4 = vadd.f32 %v1720_v27, %v1572_v54  ;;  %v4942_v5 = vld [vmem:[#allocation6_spill] sm:$0xff] }
 0x25f   : > { %v2167_v55 = vpop.f32.mrf.mxu0  ;;  %v1584_v27 = vadd.f32 %v4650_v59, %v4942_v5 }
 0x260   : > { %v2165_v38 = vadd.f32 %v2164_v52, %v2016_v29 }
 0x262   : > { %v2246_v40 = vmax.f32 %v2165_v38, 0.0 }
 0x263   : > { %v1869_v10 = vpop.f32.mrf.mxu2 }
 0x264   : > { %v3749_v47 = vpack.c.bf16 %v2246_v40, %v2245_v22  ;;  %v2018_v23 = vpop.f32.mrf.mxu3  ;;  %v1870_v34 = vadd.f32 %v1869_v10, %v1721_v4  ;;  %v4943_v4 = vld [vmem:[#allocation7_spill] sm:$0xff] }
 0x265   : > { %v1722_v39 = vpop.f32.mrf.mxu1 }
 0x266   : > { %3809 = vst [vmem:[%s4465_s12 + $0x98] sm:$0xff] %v3749_v47   ;;  %v2019_v33 = vadd.f32 %v2018_v23, %v1870_v34  ;;  %v1723_v1 = vadd.f32 %v1722_v39, %v1574_v36  ;;  %v1587_v23 = vadd.f32 %v4650_v59, %v4943_v4 }
 0x267   : > { %v2169_v48 = vpop.f32.mrf.mxu0 }
 0x268   : > { %v2168_v46 = vadd.f32 %v2167_v55, %v2019_v33 }
 0x26a   : > { %v2247_v24 = vmax.f32 %v2168_v46, 0.0 }
 0x26b   : > { %v1871_v63 = vpop.f32.mrf.mxu2 }
 0x26c   : > { %v1872_v49 = vadd.f32 %v1871_v63, %v1723_v1  ;;  %v2020_v0 = vpop.f32.mrf.mxu3 }
 0x26d   : > { %v1725_v58 = vpop.f32.mrf.mxu1 }
 0x26e   : > { %v2021_v53 = vadd.f32 %v2020_v0, %v1872_v49  ;;  %v1726_v3 = vadd.f32 %v1725_v58, %v1577_v41  ;;  %v4944_v0 = vld [vmem:[#allocation8_spill] sm:$0xff] }
 0x26f   : > { %v2172_v56 = vpop.f32.mrf.mxu0  ;;  %v1589_v58 = vadd.f32 %v4650_v59, %v4944_v0 }
 0x270   : > { %v2170_v28 = vadd.f32 %v2169_v48, %v2021_v53 }
 0x272   : > { %v2248_v35 = vmax.f32 %v2170_v28, 0.0 }
 0x273   : > { %v1874_v2 = vpop.f32.mrf.mxu2 }
 0x274   : > { %v3754_v31 = vpack.c.bf16 %v2248_v35, %v2247_v24  ;;  %v2023_v12 = vpop.f32.mrf.mxu3  ;;  %v1875_v7 = vadd.f32 %v1874_v2, %v1726_v3  ;;  %v4945_v3 = vld [vmem:[#allocation9_spill] sm:$0xff] }
 0x275   : > { %v1727_v45 = vpop.f32.mrf.mxu1 }
 0x276   : > { %3810 = vst [vmem:[%s4465_s12 + $0xa0] sm:$0xff] %v3754_v31   ;;  %v2024_v15 = vadd.f32 %v2023_v12, %v1875_v7  ;;  %v1728_v57 = vadd.f32 %v1727_v45, %v1579_v14  ;;  %v1592_v12 = vadd.f32 %v4650_v59, %v4945_v3 }
 0x277   : > { %v2174_v11 = vpop.f32.mrf.mxu0 }
 0x278   : > { %v2173_v50 = vadd.f32 %v2172_v56, %v2024_v15 }
 0x27a   : > { %v2249_v60 = vmax.f32 %v2173_v50, 0.0 }
 0x27b   : > { %v1876_v17 = vpop.f32.mrf.mxu2 }
 0x27c   : > { %v1877_v6 = vadd.f32 %v1876_v17, %v1728_v57  ;;  %v2025_v42 = vpop.f32.mrf.mxu3 }
 0x27d   : > { %v1730_v8 = vpop.f32.mrf.mxu1 }
 0x27e   : > { %v2026_v43 = vadd.f32 %v2025_v42, %v1877_v6  ;;  %v1731_v21 = vadd.f32 %v1730_v8, %v1582_v25  ;;  %v4946_v42 = vld [vmem:[#allocation10_spill] sm:$0xff] }
 0x27f   : > { %v2177_v30 = vpop.f32.mrf.mxu0  ;;  %v1594_v8 = vadd.f32 %v4650_v59, %v4946_v42 }
 0x280   : > { %v2175_v9 = vadd.f32 %v2174_v11, %v2026_v43 }
 0x282   : > { %v2250_v20 = vmax.f32 %v2175_v9, 0.0 }
 0x283   : > { %v1879_v52 = vpop.f32.mrf.mxu2 }
 0x284   : > { %v3759_v62 = vpack.c.bf16 %v2250_v20, %v2249_v60  ;;  %v2028_v37 = vpop.f32.mrf.mxu3  ;;  %v1880_v61 = vadd.f32 %v1879_v52, %v1731_v21  ;;  %v4947_v21 = vld [vmem:[#allocation11_spill] sm:$0xff] }
 0x285   : > { %v1732_v18 = vpop.f32.mrf.mxu1 }
 0x286   : > { %3811 = vst [vmem:[%s4465_s12 + $0xa8] sm:$0xff] %v3759_v62   ;;  %v2029_v32 = vadd.f32 %v2028_v37, %v1880_v61  ;;  %v1733_v29 = vadd.f32 %v1732_v18, %v1584_v27  ;;  %v1597_v37 = vadd.f32 %v4650_v59, %v4947_v21 }
 0x287   : > { %v2179_v16 = vpop.f32.mrf.mxu0 }
 0x288   : > { %v2178_v22 = vadd.f32 %v2177_v30, %v2029_v32 }
 0x28a   : > { %v2251_v39 = vmax.f32 %v2178_v22, 0.0 }
 0x28b   : > { %v1881_v55 = vpop.f32.mrf.mxu2 }
 0x28c   : > { %v1882_v38 = vadd.f32 %v1881_v55, %v1733_v29  ;;  %v2030_v13 = vpop.f32.mrf.mxu3 }
 0x28d   : > { %v1735_v54 = vpop.f32.mrf.mxu1 }
 0x28e   : > { %v2031_v40 = vadd.f32 %v2030_v13, %v1882_v38  ;;  %v1736_v36 = vadd.f32 %v1735_v54, %v1587_v23  ;;  %v4948_v13 = vld [vmem:[#allocation13_spill] sm:$0xff] }
 0x28f   : > { %v2182_v10 = vpop.f32.mrf.mxu0  ;;  %v1599_v54 = vadd.f32 %v4650_v59, %v4948_v13 }
 0x290   : > { %v2180_v47 = vadd.f32 %v2179_v16, %v2031_v40 }
 0x292   : > { %v2252_v34 = vmax.f32 %v2180_v47, 0.0 }
 0x293   : > { %v1884_v48 = vpop.f32.mrf.mxu2 }
 0x294   : > { %v3764_v26 = vpack.c.bf16 %v2252_v34, %v2251_v39  ;;  %v2033_v33 = vpop.f32.mrf.mxu3  ;;  %v1885_v63 = vadd.f32 %v1884_v48, %v1736_v36  ;;  %v4949_v36 = vld [vmem:[#allocation15_spill] sm:$0xff] }
 0x295   : > { %v1737_v1 = vpop.f32.mrf.mxu1 }
 0x296   : > { %3812 = vst [vmem:[%s4465_s12 + $0xb0] sm:$0xff] %v3764_v26   ;;  %v2034_v46 = vadd.f32 %v2033_v33, %v1885_v63  ;;  %v1738_v53 = vadd.f32 %v1737_v1, %v1589_v58  ;;  %v1602_v33 = vadd.f32 %v4650_v59, %v4949_v36 }
 0x297   : > { %v2184_v49 = vpop.f32.mrf.mxu0 }
 0x298   : > { %v2183_v24 = vadd.f32 %v2182_v10, %v2034_v46 }
 0x29a   : > { %v2253_v45 = vmax.f32 %v2183_v24, 0.0 }
 0x29b   : > { %v1886_v56 = vpop.f32.mrf.mxu2 }
 0x29c   : > { %v1887_v28 = vadd.f32 %v1886_v56, %v1738_v53  ;;  %v2035_v19 = vpop.f32.mrf.mxu3 }
 0x29d   : > { %v1740_v41 = vpop.f32.mrf.mxu1 }
 0x29e   : > { %v2036_v35 = vadd.f32 %v2035_v19, %v1887_v28  ;;  %v1741_v14 = vadd.f32 %v1740_v41, %v1592_v12  ;;  %v4950_v28 = vld [vmem:[#allocation17_spill] sm:$0xff] }
 0x29f   : > { %v2187_v2 = vpop.f32.mrf.mxu0  ;;  %v1604_v19 = vadd.f32 %v4650_v59, %v4950_v28 }
 0x2a0   : > { %v2185_v31 = vadd.f32 %v2184_v49, %v2036_v35 }
 0x2a2   : > { %v2254_v7 = vmax.f32 %v2185_v31, 0.0 }
 0x2a3   : > { %v1889_v11 = vpop.f32.mrf.mxu2 }
 0x2a4   : > { %v3769_v44 = vpack.c.bf16 %v2254_v7, %v2253_v45  ;;  %v2038_v15 = vpop.f32.mrf.mxu3  ;;  %v1890_v17 = vadd.f32 %v1889_v11, %v1741_v14 }
 0x2a5   : > { %v1742_v57 = vpop.f32.mrf.mxu1 }
 0x2a6   : > { %3813 = vst [vmem:[%s4465_s12 + $0xb8] sm:$0xff] %v3769_v44   ;;  %v2039_v50 = vadd.f32 %v2038_v15, %v1890_v17  ;;  %v1743_v43 = vadd.f32 %v1742_v57, %v1594_v8  ;;  %v4951_v44 = vld [vmem:[#allocation19_spill] sm:$0xff] }
 0x2a7   : > { %v2189_v6 = vpop.f32.mrf.mxu0  ;;  %v1607_v14 = vadd.f32 %v4650_v59, %v4951_v44 }
 0x2a8   : > { %v2188_v60 = vadd.f32 %v2187_v2, %v2039_v50 }
 0x2aa   : > { %v2255_v18 = vmax.f32 %v2188_v60, 0.0 }
 0x2ab   : > { %v1891_v30 = vpop.f32.mrf.mxu2 }
 0x2ac   : > { %v1892_v9 = vadd.f32 %v1891_v30, %v1743_v43  ;;  %v2040_v51 = vpop.f32.mrf.mxu3 }
 0x2ad   : > { %v1745_v25 = vpop.f32.mrf.mxu1 }
 0x2ae   : > { %v2041_v20 = vadd.f32 %v2040_v51, %v1892_v9  ;;  %v1746_v27 = vadd.f32 %v1745_v25, %v1597_v37  ;;  %v4952_v9 = vld [vmem:[#allocation21_spill] sm:$0xff] }
 0x2af   : > { %v2192_v52 = vpop.f32.mrf.mxu0  ;;  %v1609_v51 = vadd.f32 %v4650_v59, %v4952_v9 }
 0x2b0   : > { %v2190_v62 = vadd.f32 %v2189_v6, %v2041_v20 }
 0x2b2   : > { %v2256_v61 = vmax.f32 %v2190_v62, 0.0 }
 0x2b3   : > { %v1894_v16 = vpop.f32.mrf.mxu2 }
 0x2b4   : > { %v3774_v5 = vpack.c.bf16 %v2256_v61, %v2255_v18  ;;  %v2043_v32 = vpop.f32.mrf.mxu3  ;;  %v1895_v55 = vadd.f32 %v1894_v16, %v1746_v27 }
 0x2b5   : > { %v1747_v29 = vpop.f32.mrf.mxu1 }
 0x2b6   : > { %3814 = vst [vmem:[%s4465_s12 + $0xc0] sm:$0xff] %v3774_v5   ;;  %v2044_v22 = vadd.f32 %v2043_v32, %v1895_v55  ;;  %v1748_v40 = vadd.f32 %v1747_v29, %v1599_v54 }
 0x2b7   : > { %v2194_v38 = vpop.f32.mrf.mxu0 }
 0x2b8   : > { %v2193_v39 = vadd.f32 %v2192_v52, %v2044_v22 }
 0x2ba   : > { %v2257_v1 = vmax.f32 %v2193_v39, 0.0 }
 0x2bb   : > { %v1896_v10 = vpop.f32.mrf.mxu2 }
 0x2bc   : > { %v1897_v47 = vadd.f32 %v1896_v10, %v1748_v40  ;;  %v2045_v4 = vpop.f32.mrf.mxu3 }
 0x2bd   : > { %v1750_v23 = vpop.f32.mrf.mxu1 }
 0x2be   : > { %v2046_v34 = vadd.f32 %v2045_v4, %v1897_v47  ;;  %v1751_v58 = vadd.f32 %v1750_v23, %v1602_v33 }
 0x2bf   : > { %v2197_v26 = vpop.f32.mrf.mxu0 }
 0x2c0   : > { %v2195_v48 = vadd.f32 %v2194_v38, %v2046_v34 }
 0x2c2   : > { %v2258_v63 = vmax.f32 %v2195_v48, 0.0 }
 0x2c3   : > { %v1899_v49 = vpop.f32.mrf.mxu2 }
 0x2c4   : > { %v3779_v0 = vpack.c.bf16 %v2258_v63, %v2257_v1  ;;  %v2048_v46 = vpop.f32.mrf.mxu3  ;;  %v1900_v56 = vadd.f32 %v1899_v49, %v1751_v58 }
 0x2c5   : > { %v1752_v53 = vpop.f32.mrf.mxu1 }
 0x2c6   : > { %3815 = vst [vmem:[%s4465_s12 + $0xc8] sm:$0xff] %v3779_v0   ;;  %v2049_v41 = vadd.f32 %v2048_v46, %v1900_v56  ;;  %v1753_v24 = vadd.f32 %v1752_v53, %v1604_v19 }
 0x2c7   : > { %v2199_v35 = vpop.f32.mrf.mxu0 }
 0x2c8   : > { %v2198_v45 = vadd.f32 %v2197_v26, %v2049_v41 }
 0x2ca   : > { %v2259_v15 = vmax.f32 %v2198_v45, 0.0 }
 0x2cb   : > { %v1901_v2 = vpop.f32.mrf.mxu2 }
 0x2cc   : > { %v1902_v31 = vadd.f32 %v1901_v2, %v1753_v24  ;;  %v2050_v3 = vpop.f32.mrf.mxu3 }
 0x2cd   : > { %v1755_v12 = vpop.f32.mrf.mxu1 }
 0x2ce   : > { %v2051_v7 = vadd.f32 %v2050_v3, %v1902_v31  ;;  %v1756_v42 = vadd.f32 %v1755_v12, %v1607_v14 }
 0x2cf   : > { %v2202_v50 = vpop.f32.mrf.mxu0 }
 0x2d0   : > { %v2200_v11 = vadd.f32 %v2199_v35, %v2051_v7 }
 0x2d2   : > { %v2260_v57 = vmax.f32 %v2200_v11, 0.0 }
 0x2d3   : > { %v1904_v17 = vpop.f32.mrf.mxu2 }
 0x2d4   : > { %v3784_v6 = vpack.c.bf16 %v2260_v57, %v2259_v15  ;;  %v2053_v8 = vpop.f32.mrf.mxu3  ;;  %v1905_v43 = vadd.f32 %v1904_v17, %v1756_v42 }
 0x2d5   : > { %v1757_v30 = vpop.f32.mrf.mxu1 }
 0x2d6   : > { %3816 = vst [vmem:[%s4465_s12 + $0xd0] sm:$0xff] %v3784_v6   ;;  %v2054_v25 = vadd.f32 %v2053_v8, %v1905_v43  ;;  %v1758_v60 = vadd.f32 %v1757_v30, %v1609_v51 }
 0x2d7   : > { %v2204_v18 = vpop.f32.mrf.mxu0 }
 0x2d8   : > { %v2203_v21 = vadd.f32 %v2202_v50, %v2054_v25 }
 0x2da   : > { %v2261_v16 = vmax.f32 %v2203_v21, 0.0 }
 0x2db   : > { %v1906_v20 = vpop.f32.mrf.mxu2 }
 0x2dc   : > { %v1907_v52 = vadd.f32 %v1906_v20, %v1758_v60  ;;  %v2055_v62 = vpop.f32.mrf.mxu3 }
 0x2de   : > { %v2056_v37 = vadd.f32 %v2055_v62, %v1907_v52 }
 0x2e0   : > { %v2205_v61 = vadd.f32 %v2204_v18, %v2056_v37 }
 0x2e2   : > { %v2262_v5 = vmax.f32 %v2205_v61, 0.0  ;;  %2381 = sbr.rel (!%p4067_p4) target bundleno = 807 (0x327), region = 36 }
 0x2e4   : > { %v3789_v27 = vpack.c.bf16 %v2262_v5, %v2261_v16 }
 0x2e6   : > { %3817 = vst [vmem:[%s4465_s12 + $0xd8] sm:$0xff] %v3789_v27  }
 0x2e7   : > { %s4962_s21 = smov (!%p2384_p8, %s2383_s21), 56 }
 0x2e8   : > { %s3456_s9 = sshll.u32 %s4962_s21, 2 }
 0x2e9   : > { %p3459_p9 = scmp.eq.s32.totalorder %s3456_s9, 0 }
 0x2ea   : > { %s4781_s10 = sshrl.u32 (!%p3459_p9), %s4962_s21, 5 }
 0x2eb   : > { %2392 = sbr.rel (%p3459_p9) target bundleno = 807 (0x327), region = 40  ;;  %p3460_p10 = scmp.le.s32.totalorder (!%p3459_p9), %s4781_s10, 0 }
 0x2f0   : > { %2671 = sbr.rel (%p3460_p10) target bundleno = 790 (0x316), region = 112  ;;  %s4953_s15 = smov (!%p3460_p10), %s4775_s8 }
 0x2f1   : > { %s4954_s20 = smov (!%p3460_p10), %s4465_s12  ;;  %s4790_s27 = smov (!%p3460_p10), 0  }
 0x2f2   : > { %s4792_s11 = smov (!%p3460_p10), 0  }
 0x2f5 LB: >> { %v2409_v59 = vld [vmem:[%s3996_s20] sm:$0xf]  ;;  %v2411_v32 = vld [vmem:[%s3996_s20 + $0x4] sm:$0xf]  ;;  %v2413_v29 = vld [vmem:[%s3996_s20 + $0x8] sm:$0xf]  ;;  %s4004_s11 = sphi %s4792_s11, %s2403_s11   ;;  %s4000_s27 = sphi %s4790_s27, %s4957_s27   ;;  %s3996_s20 = sphi %s4954_s20, %s4956_s20   ;;  %s3992_s15 = sphi %s4953_s15, %s4955_s15  }
 0x2f6   : >> { %2410 = vst [vmem:[%s3992_s15] sm:$0xf] %v2409_v59  ;;  %v2415_v55 = vld [vmem:[%s3996_s20 + $0xc] sm:$0xf]  ;;  %v2417_v38 = vld [vmem:[%s3996_s20 + $0x10] sm:$0xf]  ;;  %s2473_s14 = sadd.s32 1, %s4000_s27 }
 0x2f7   : >> { %2412 = vst [vmem:[%s3992_s15 + $0x4] sm:$0xf] %v2411_v32  ;;  %v2419_v13 = vld [vmem:[%s3996_s20 + $0x14] sm:$0xf]  ;;  %v2421_v54 = vld [vmem:[%s3996_s20 + $0x18] sm:$0xf]  ;;  %p2474_p11 = scmp.ge.s32.totalorder %s2473_s14, %s4781_s10 }
 0x2f8   : >> { %2414 = vst [vmem:[%s3992_s15 + $0x8] sm:$0xf] %v2413_v29  ;;  %v2423_v22 = vld [vmem:[%s3996_s20 + $0x1c] sm:$0xf]  ;;  %v2425_v40 = vld [vmem:[%s3996_s20 + $0x20] sm:$0xf] }
 0x2f9   : >> { %2416 = vst [vmem:[%s3992_s15 + $0xc] sm:$0xf] %v2415_v55  ;;  %v2427_v10 = vld [vmem:[%s3996_s20 + $0x24] sm:$0xf]  ;;  %v2429_v47 = vld [vmem:[%s3996_s20 + $0x28] sm:$0xf] }
 0x2fa   : >> { %2418 = vst [vmem:[%s3992_s15 + $0x10] sm:$0xf] %v2417_v38  ;;  %v2431_v4 = vld [vmem:[%s3996_s20 + $0x2c] sm:$0xf]  ;;  %v2433_v23 = vld [vmem:[%s3996_s20 + $0x30] sm:$0xf] }
 0x2fb   : >> { %2420 = vst [vmem:[%s3992_s15 + $0x14] sm:$0xf] %v2419_v13  ;;  %v2435_v39 = vld [vmem:[%s3996_s20 + $0x34] sm:$0xf]  ;;  %v2437_v34 = vld [vmem:[%s3996_s20 + $0x38] sm:$0xf] }
 0x2fc   : >> { %2422 = vst [vmem:[%s3992_s15 + $0x18] sm:$0xf] %v2421_v54  ;;  %v2439_v48 = vld [vmem:[%s3996_s20 + $0x3c] sm:$0xf]  ;;  %v2441_v26 = vld [vmem:[%s3996_s20 + $0x40] sm:$0xf] }
 0x2fd   : >> { %2424 = vst [vmem:[%s3992_s15 + $0x1c] sm:$0xf] %v2423_v22  ;;  %v2443_v36 = vld [vmem:[%s3996_s20 + $0x44] sm:$0xf]  ;;  %s4964_s14 = smov (%p2474_p11, %s2473_s14), 0  ;;  %s2403_s11 = sadd.s32 1, %s4004_s11  }
 0x2fe   : >> { %2426 = vst [vmem:[%s3992_s15 + $0x20] sm:$0xf] %v2425_v40  ;;  %v2445_v33 = vld [vmem:[%s3996_s20 + $0x48] sm:$0xf]  ;;  %v2447_v1 = vld [vmem:[%s3996_s20 + $0x4c] sm:$0xf]  ;;  %p2402_p12 = scmp.ge.s32.totalorder %s2403_s11, %s4781_s10  ;;  %s4957_s27 = smov %s4964_s14 }
 0x2ff   : >> { %2428 = vst [vmem:[%s3992_s15 + $0x24] sm:$0xf] %v2427_v10  ;;  %s3461_s17 = sshll.u32 %s4964_s14, 7  ;;  %v2449_v63 = vld [vmem:[%s3996_s20 + $0x50] sm:$0xf] }
 0x300   : >> { %2430 = vst [vmem:[%s3992_s15 + $0x28] sm:$0xf] %v2429_v47  ;;  %s4851_s18 = scalar_lea.vmem %s4465_s12, %s3461_s17 [#allocation2]   ;;  %s2479_s22 = scalar_lea.vmem %s4775_s8, %s3461_s17   ;;  %v2451_v49 = vld [vmem:[%s3996_s20 + $0x54] sm:$0xf]  ;;  %v2453_v0 = vld [vmem:[%s3996_s20 + $0x58] sm:$0xf] }
 0x301   : >> { %2432 = vst [vmem:[%s3992_s15 + $0x2c] sm:$0xf] %v2431_v4  ;;  %v2455_v58 = vld [vmem:[%s3996_s20 + $0x5c] sm:$0xf]  ;;  %v2457_v46 = vld [vmem:[%s3996_s20 + $0x60] sm:$0xf] }
 0x302   : >> { %2434 = vst [vmem:[%s3992_s15 + $0x30] sm:$0xf] %v2433_v23  ;;  %v2459_v53 = vld [vmem:[%s3996_s20 + $0x64] sm:$0xf]  ;;  %v2461_v56 = vld [vmem:[%s3996_s20 + $0x68] sm:$0xf] }
 0x303   : >> { %2436 = vst [vmem:[%s3992_s15 + $0x34] sm:$0xf] %v2435_v39  ;;  %v2463_v28 = vld [vmem:[%s3996_s20 + $0x6c] sm:$0xf]  ;;  %v2465_v19 = vld [vmem:[%s3996_s20 + $0x70] sm:$0xf] }
 0x304   : >> { %2438 = vst [vmem:[%s3992_s15 + $0x38] sm:$0xf] %v2437_v34  ;;  %v2467_v41 = vld [vmem:[%s3996_s20 + $0x74] sm:$0xf]  ;;  %v2469_v24 = vld [vmem:[%s3996_s20 + $0x78] sm:$0xf] }
 0x305   : >> { %2440 = vst [vmem:[%s3992_s15 + $0x3c] sm:$0xf] %v2439_v48  ;;  %v2471_v35 = vld [vmem:[%s3996_s20 + $0x7c] sm:$0xf]  ;;  %s4956_s20 = smov %s4851_s18 }
 0x306   : >> { %2442 = vst [vmem:[%s3992_s15 + $0x40] sm:$0xf] %v2441_v26 }
 0x307   : >> { %2444 = vst [vmem:[%s3992_s15 + $0x44] sm:$0xf] %v2443_v36 }
 0x308   : >> { %2446 = vst [vmem:[%s3992_s15 + $0x48] sm:$0xf] %v2445_v33 }
 0x309   : >> { %2448 = vst [vmem:[%s3992_s15 + $0x4c] sm:$0xf] %v2447_v1 }
 0x30a   : >> { %2450 = vst [vmem:[%s3992_s15 + $0x50] sm:$0xf] %v2449_v63 }
 0x30b   : >> { %2452 = vst [vmem:[%s3992_s15 + $0x54] sm:$0xf] %v2451_v49 }
 0x30c   : >> { %2454 = vst [vmem:[%s3992_s15 + $0x58] sm:$0xf] %v2453_v0 }
 0x30d   : >> { %2456 = vst [vmem:[%s3992_s15 + $0x5c] sm:$0xf] %v2455_v58 }
 0x30e   : >> { %2458 = vst [vmem:[%s3992_s15 + $0x60] sm:$0xf] %v2457_v46 }
 0x30f   : >> { %2460 = vst [vmem:[%s3992_s15 + $0x64] sm:$0xf] %v2459_v53 }
 0x310   : >> { %2462 = vst [vmem:[%s3992_s15 + $0x68] sm:$0xf] %v2461_v56 }
 0x311   : >> { %2464 = vst [vmem:[%s3992_s15 + $0x6c] sm:$0xf] %v2463_v28  ;;  %2405 = sbr.rel (!%p2402_p12) target bundleno = 757 (0x2f5), region = 118 }
 0x312   : >> { %2466 = vst [vmem:[%s3992_s15 + $0x70] sm:$0xf] %v2465_v19 }
 0x313   : >> { %2468 = vst [vmem:[%s3992_s15 + $0x74] sm:$0xf] %v2467_v41 }
 0x314   : >> { %2470 = vst [vmem:[%s3992_s15 + $0x78] sm:$0xf] %v2469_v24 }
 0x315   : >> { %2472 = vst [vmem:[%s3992_s15 + $0x7c] sm:$0xf] %v2471_v35  ;;  %s4955_s15 = smov %s2479_s22 }
 0x316 PF: > { %s4892_s23 = sand.u32 31, %s4962_s21   ;;  %s3649_s24 = sshll.u32 %s4781_s10, 7 }
 0x317   : > { %s2484_s25 = scalar_lea.vmem %s4465_s12, %s3649_s24 [#allocation2]   ;;  %s2486_s26 = scalar_lea.vmem %s4775_s8, %s3649_s24  }
 0x318   : > { %p3466_p13 = scmp.le.s32.totalorder %s4892_s23, 0 }
 0x319   : > { %s4006_s28 = smov (!%p3466_p13), %s2486_s26   ;;  %s4010_s29 = smov (!%p3466_p13), %s2484_s25  }
 0x31a   : > { %2685 = sbr.rel (%p3466_p13) target bundleno = 807 (0x327), region = 123  ;;  %s4014_s30 = smov (!%p3466_p13), 0  }
 0x31b   : > { %s4018_s4 = smov (!%p3466_p13), 0  }
 0x31f LB: >> { %v2496_v2 = vld [vmem:[%s4012_s29] sm:$0xf]  ;;  %s2498_s21 = sadd.s32 1, %s4016_s30  ;;  %s2490_s4 = sadd.s32 1, %s4020_s4   ;;  %s4020_s4 = sphi %s4018_s4, %s2490_s4   ;;  %s4016_s30 = sphi %s4014_s30, %s4015_s30   ;;  %s4012_s29 = sphi %s4010_s29, %s2503_s29   ;;  %s4008_s28 = sphi %s4006_s28, %s2504_s28  }
 0x320   : >> { %2497 = vst [vmem:[%s4008_s28] sm:$0xf] %v2496_v2  ;;  %p2499_p0 = scmp.ge.s32.totalorder %s2498_s21, %s4892_s23  ;;  %p2489_p1 = scmp.ge.s32.totalorder %s2490_s4, %s4892_s23 }
 0x322   : >> { %s4966_s21 = smov (%p2499_p0, %s2498_s21), 0  ;;  %2492 = sbr.rel (!%p2489_p1) target bundleno = 799 (0x31f), region = 129 }
 0x323   : >> { %s3467_s12 = sshll.u32 %s4966_s21, 2  ;;  %s4015_s30 = smov %s4966_s21  }
 0x324   : >> { %s2503_s29 = scalar_lea.vmem %s2484_s25, %s3467_s12 [#allocation2]   ;;  %s2504_s28 = scalar_lea.vmem %s2486_s26, %s3467_s12  }
 0x327 PF: > { %p10_p2 = scmp.ge.s32.totalorder %s4057_s16, 4   ;;  %s4958_s12 = smov %s3984_s13 }
 0x328   : > { %s4959_s13 = smov %s4065_s19  ;;  %s4960_s14 = smov %s4057_s16 }
 0x329   :  { %12 = sbr.rel (!%p10_p2) target bundleno = 2 (0x2), region = 140 }

// kernel: forward.4
= control target key start
LH: loop header
LB: loop body
LE: loop exit
PB: predicated region body
PF: predicated region fallthrough
CT: control target
= control target key end

     0   :  { %s3597_s12 = smov 0   ;;  %s3599_s13 = smov 0   ;;  %s4338_s0 = inlined_call_operand.vmem [shape: bf16[196,1600], index: 0, kind: input, shape index: {}]   ;;  %s4339_s1 = inlined_call_operand.vmem [shape: bf16[1600,128], index: 1, kind: input, shape index: {}]   ;;  %s4340_s2 = inlined_call_operand.vmem [shape: f32[1,128], index: 2, kind: input, shape index: {}]   ;;  %s4341_s3 = inlined_call_operand.vmem [shape: bf16[196,128], index: 3, kind: output, shape index: {}]  }
   0x1   :  { %s3601_s14 = smov 0  }
   0x2 LB: > { %s3610_s15 = sadd.s32 4294967295, %s3543_s14   ;;  %s3612_s16 = sadd.s32 1, %s3543_s14   ;;  %s3543_s14 = sphi %s3601_s14, %s4349_s14   ;;  %s3539_s13 = sphi %s3599_s13, %s4348_s13   ;;  %s3535_s12 = sphi %s3597_s12, %s4347_s12  }
   0x3   : > { %s85_s17 = ssub.s32 %s3543_s14, %s3612_s16  ;;  %s88_s18 = sadd.s32 1, %s3539_s13 }
   0x4   : > { %p86_p0 = scmp.eq.s32.totalorder %s85_s17, 0  ;;  %p98_p1 = scmp.ne.s32.totalorder %s3539_s13, %s3535_s12 }
   0x5   : > { %p99_p2 = scmp.eq.s32.totalorder %s3610_s15, 1  ;;  %p2420_p3 = scmp.ge.s32.totalorder %s3543_s14, 1 }
   0x6   : > { %s3620_s19 = scalar_select %p86_p0, %s3539_s13, %s88_s18  }
   0x7   : > { %p3622_p4 = por %p99_p2, %p98_p1  ;;  %p149_p5 = scmp.lt.s32.totalorder %s3543_s14, 3 }
   0x9   : > { %p150_p6 = pnand %p2420_p3, %p149_p5 }
   0xa   : > { %s3636_s27 = smul.u32 (!%p150_p6), 13, %s3610_s15 }
   0xb   : > { %153 = sbr.rel (%p150_p6) target bundleno = 603 (0x25b), region = 32 }
   0xc   : > { %p184_p7 = scmp.lt.s32.totalorder (!%p150_p6), %s3636_s27, 24 }
  0x10   : > { %v3238_v0 = vld [vmem:[%s4339_s1 + $0x38] sm:$0xff]  ;;  %v3237_v1 = vld [vmem:[%s4339_s1 + $0x30] sm:$0xff]  ;;  %v3236_v2 = vld [vmem:[%s4339_s1 + $0x28] sm:$0xff]  ;;  %s185_s5 = scalar_select %p184_p7, %s3636_s27, 24  ;;  %vm1531_vm0 = vcmask 523264  }
  0x11   : > { %3367 = vmatpush.bf16.msra.mxu1 %v3238_v0  ;;  %3368 = vmatpush.bf16.msra.mxu2 %v3238_v0  ;;  %v3235_v3 = vld [vmem:[%s4339_s1 + $0x20] sm:$0xff]  ;;  %v3234_v4 = vld [vmem:[%s4339_s1 + $0x18] sm:$0xff]  ;;  %v3233_v5 = vld [vmem:[%s4339_s1 + $0x10] sm:$0xff]  ;;  %s3331_s18 = smul.u32 (%p3622_p4), 52, %s3610_s15 }
  0x12   : > { %3369 = vmatpush.bf16.msra.mxu3 %v3238_v0  ;;  %1553 = vmatpush.bf16.msra.mxu0 %v3238_v0  ;;  %s3392_s8 = smul.u32 52, %s185_s5  ;;  %v3232_v6 = vld [vmem:[%s4339_s1 + $0x8] sm:$0xff]  ;;  %v3231_v8 = vld [vmem:[%s4339_s1] sm:$0xff]  ;;  %v3262_v16 = vld [vmem:[%s4339_s1 + $0xf8] sm:$0xff] }
  0x13   : > { %v3254_v17 = vld [vmem:[%s4339_s1 + $0xb8] sm:$0xff]  ;;  %v3261_v24 = vld [vmem:[%s4339_s1 + $0xf0] sm:$0xff]  ;;  %v3260_v28 = vld [vmem:[%s4339_s1 + $0xe8] sm:$0xff]  ;;  %s4267_s23 = scalar_lea.vmem (%p3622_p4), %s4341_s3, %s3331_s18  }
  0x14   : > { %s3655_s17 = scalar_lea.vmem %s4338_s0, %s3392_s8  ;;  %v3246_v21 = vld [vmem:[%s4339_s1 + $0x78] sm:$0xff]  ;;  %v3253_v25 = vld [vmem:[%s4339_s1 + $0xb0] sm:$0xff]  ;;  %v3252_v29 = vld [vmem:[%s4339_s1 + $0xa8] sm:$0xff] }
  0x15   : > { %3370 = vmatpush.bf16.msra.mxu1 %v3237_v1  ;;  %3371 = vmatpush.bf16.msra.mxu2 %v3237_v1  ;;  %v3658_v7 = vld [vmem:[%s3655_s17 + $0x270] sm:$0xff]  ;;  %v3185_v10 = vld [vmem:[%s3655_s17 + $0x100] sm:$0xf0]  ;;  %v2632_v11 = vld [vmem:[%s3655_s17 + $0x1a0] sm:$0xf] }
  0x16   : > { %3372 = vmatpush.bf16.msra.mxu3 %v3237_v1  ;;  %1554 = vmatpush.bf16.msra.mxu0 %v3237_v1  ;;  %v2528_v9 = vld [vmem:[%s3655_s17 + $0xd0] sm:$0xf]  ;;  %v3211_v12 = vld [vmem:[%s3655_s17 + $0x1d0] sm:$0xf0]  ;;  %v2424_v13 = vld [vmem:[%s3655_s17] sm:$0xf]  ;;  %v743_v15 = vunpack.c.l.b16 %v3658_v7 }
  0x17   : > { %v3159_v14 = vld [vmem:[%s3655_s17 + $0x30] sm:$0xf0]  ;;  %v2529_v18 = vor.u32 %v3185_v10, %v2528_v9  ;;  %v2633_v19 = vor.u32 %v3211_v12, %v2632_v11  ;;  %v3270_v22 = vld [vmem:[%s4339_s1 + $0x138] sm:$0xff]  ;;  %v3244_v30 = vld [vmem:[%s4339_s1 + $0x68] sm:$0xff] }
  0x18   : > { %v2425_v20 = vor.u32 %v3159_v14, %v2424_v13  ;;  %v834_v23 = vpack.c.b16 %v743_v15, %v743_v15  ;;  %v3245_v26 = vld [vmem:[%s4339_s1 + $0x70] sm:$0xff]  ;;  %v3268_v31 = vld [vmem:[%s4339_s1 + $0x128] sm:$0xff]  ;;  %v3259_v32 = vld [vmem:[%s4339_s1 + $0xe0] sm:$0xff] }
  0x19   : > { %3373 = vmatpush.bf16.msra.mxu1 %v3236_v2  ;;  %3374 = vmatpush.bf16.msra.mxu2 %v3236_v2  ;;  %v3269_v27 = vld [vmem:[%s4339_s1 + $0x130] sm:$0xff]  ;;  %v3251_v33 = vld [vmem:[%s4339_s1 + $0xa0] sm:$0xff]  ;;  %v2580_v35 = vld [vmem:[%s3655_s17 + $0x138] sm:$0xf] }
  0x1a   : > { %3375 = vmatpush.bf16.msra.mxu3 %v3236_v2  ;;  %1555 = vmatpush.bf16.msra.mxu0 %v3236_v2  ;;  %v3243_v34 = vld [vmem:[%s4339_s1 + $0x60] sm:$0xff]  ;;  %v3198_v36 = vld [vmem:[%s3655_s17 + $0x168] sm:$0xf0]  ;;  %v2684_v37 = vld [vmem:[%s3655_s17 + $0x208] sm:$0xf] }
  0x1b   : > { %v3224_v38 = vld [vmem:[%s3655_s17 + $0x238] sm:$0xf0]  ;;  %v3267_v39 = vld [vmem:[%s4339_s1 + $0x120] sm:$0xff]  ;;  %v2476_v40 = vld [vmem:[%s3655_s17 + $0x68] sm:$0xf]  ;;  %v2581_v44 = vor.u32 %v3198_v36, %v2580_v35 }
  0x1c   : > { %v3172_v41 = vld [vmem:[%s3655_s17 + $0x98] sm:$0xf0]  ;;  %v2685_v45 = vor.u32 %v3224_v38, %v2684_v37  ;;  %v3257_v49 = vld [vmem:[%s4339_s1 + $0xd0] sm:$0xff]  ;;  %v3256_v53 = vld [vmem:[%s4339_s1 + $0xc8] sm:$0xff] }
  0x1d   : > { %3376 = vmatpush.bf16.msra.mxu1 %v3235_v3  ;;  %3377 = vmatpush.bf16.msra.mxu2 %v3235_v3  ;;  %v3258_v42 = vld [vmem:[%s4339_s1 + $0xd8] sm:$0xff]  ;;  %v2477_v46 = vor.u32 %v3172_v41, %v2476_v40  ;;  %v3249_v50 = vld [vmem:[%s4339_s1 + $0x90] sm:$0xff]  ;;  %v3248_v54 = vld [vmem:[%s4339_s1 + $0x88] sm:$0xff] }
  0x1e   : > { %3378 = vmatpush.bf16.msra.mxu3 %v3235_v3  ;;  %1556 = vmatpush.bf16.msra.mxu0 %v3235_v3  ;;  %v3250_v43 = vld [vmem:[%s4339_s1 + $0x98] sm:$0xff]  ;;  %v3241_v51 = vld [vmem:[%s4339_s1 + $0x50] sm:$0xff]  ;;  %v3240_v55 = vld [vmem:[%s4339_s1 + $0x48] sm:$0xff] }
  0x1f   : > { %v3242_v47 = vld [vmem:[%s4339_s1 + $0x58] sm:$0xff]  ;;  %v3265_v52 = vld [vmem:[%s4339_s1 + $0x110] sm:$0xff]  ;;  %v3255_v56 = vld [vmem:[%s4339_s1 + $0xc0] sm:$0xff] }
  0x20   : > { %v3266_v48 = vld [vmem:[%s4339_s1 + $0x118] sm:$0xff]  ;;  %v3264_v57 = vld [vmem:[%s4339_s1 + $0x108] sm:$0xff]  ;;  %v3247_v58 = vld [vmem:[%s4339_s1 + $0x80] sm:$0xff] }
  0x21   : > { %3379 = vmatpush.bf16.msra.mxu1 %v3234_v4  ;;  %3380 = vmatpush.bf16.msra.mxu2 %v3234_v4  ;;  %v3239_v59 = vld [vmem:[%s4339_s1 + $0x40] sm:$0xff]  ;;  %v3154_v60 = vld [vmem:[%s3655_s17 + $0xc] sm:$0xf]  ;;  %v3286_v63 = vld [vmem:[%s4339_s1 + $0x1b8] sm:$0xff] }
  0x22   : > { %3381 = vmatpush.bf16.msra.mxu3 %v3234_v4  ;;  %1557 = vmatpush.bf16.msra.mxu0 %v3234_v4  ;;  %v2434_v61 = vld [vmem:[%s3655_s17 + $0x3c] sm:$0xf0]  ;;  %v3153_v62 = vld [vmem:[%s3655_s17 + $0x4] sm:$0xf]  ;;  %v3294_v0 = vld [vmem:[%s4339_s1 + $0x1f8] sm:$0xff] }
  0x23   : > { %v2426_v1 = vld [vmem:[%s3655_s17 + $0x34] sm:$0xf0]  ;;  %v2432_v2 = vld [vmem:[%s3655_s17 + $0x8] sm:$0xf]  ;;  %v3160_v3 = vld [vmem:[%s3655_s17 + $0x38] sm:$0xf0]  ;;  %v2437_v4 = vor.u32 %v3154_v60, %v2434_v61 }
  0x24   : > { %v3278_v9 = vld [vmem:[%s4339_s1 + $0x178] sm:$0xff]  ;;  %v2429_v11 = vor.u32 %v3153_v62, %v2426_v1  ;;  %v2433_v12 = vor.u32 %v3160_v3, %v2432_v2  ;;  %v3285_v14 = vld [vmem:[%s4339_s1 + $0x1b0] sm:$0xff]  ;;  %v3275_v36 = vld [vmem:[%s4339_s1 + $0x160] sm:$0xff] }
  0x25   : > { %3382 = vmatpush.bf16.msra.mxu1 %v3233_v5  ;;  %3383 = vmatpush.bf16.msra.mxu2 %v3233_v5  ;;  %v3302_v10 = vld [vmem:[%s4339_s1 + $0x238] sm:$0xff]  ;;  %v3293_v15 = vld [vmem:[%s4339_s1 + $0x1f0] sm:$0xff]  ;;  %v3299_v37 = vld [vmem:[%s4339_s1 + $0x220] sm:$0xff] }
  0x26   : > { %3384 = vmatpush.bf16.msra.mxu3 %v3233_v5  ;;  %1558 = vmatpush.bf16.msra.mxu0 %v3233_v5  ;;  %v3263_v5 = vld [vmem:[%s4339_s1 + $0x100] sm:$0xff]  ;;  %v3282_v38 = vld [vmem:[%s4339_s1 + $0x198] sm:$0xff]  ;;  %v2582_v60 = vld [vmem:[%s3655_s17 + $0x16c] sm:$0xf0] }
  0x27   : > { %v3274_v40 = vld [vmem:[%s4339_s1 + $0x158] sm:$0xff]  ;;  %v2588_v61 = vld [vmem:[%s3655_s17 + $0x140] sm:$0xf]  ;;  %v3199_v62 = vld [vmem:[%s3655_s17 + $0x170] sm:$0xf0] }
  0x28   : > { %v3180_v41 = vld [vmem:[%s3655_s17 + $0xdc] sm:$0xf]  ;;  %v2589_v3 = vor.u32 %v3199_v62, %v2588_v61 }
  0x29   : > { %3385 = vmatpush.bf16.msra.mxu1 %v3232_v6  ;;  %3386 = vmatpush.bf16.msra.mxu2 %v3232_v6  ;;  %v3200_v1 = vld [vmem:[%s3655_s17 + $0x178] sm:$0xf0] }
  0x2a   : > { %3387 = vmatpush.bf16.msra.mxu3 %v3232_v6  ;;  %1559 = vmatpush.bf16.msra.mxu0 %v3232_v6  ;;  %v2440_v6 = vld [vmem:[%s3655_s17 + $0x10] sm:$0xf] }
  0x2d   : > { %3388 = vmatpush.bf16.msra.mxu1 %v3231_v8  ;;  %3389 = vmatpush.bf16.msra.mxu2 %v3231_v8 }
  0x2e   : > { %3390 = vmatpush.bf16.msra.mxu3 %v3231_v8  ;;  %1560 = vmatpush.bf16.msra.mxu0 %v3231_v8  ;;  %v3161_v8 = vld [vmem:[%s3655_s17 + $0x40] sm:$0xf0] }
  0x2f   : > { %v2441_v13 = vor.u32 %v3161_v8, %v2440_v6  ;;  %v3280_v6 = vld [vmem:[%s4339_s1 + $0x188] sm:$0xff] }
  0x30   : > { %1571 = vmatmul.bf16.vlgmr.msra.gmra.mxu1 %v2529_v18  ;;  %1581 = vmatmul.bf16.vlgmr.msra.gmra.mxu2 %v2633_v19  ;;  %v3284_v18 = vld [vmem:[%s4339_s1 + $0x1a8] sm:$0xff] }
  0x31   : > { %1639 = vmatpush.bf16.msrb.mxu2 %v3254_v17  ;;  %1561 = vmatmul.bf16.vlgmr.msra.gmra.mxu0 %v2425_v20  ;;  %v3301_v17 = vld [vmem:[%s4339_s1 + $0x230] sm:$0xff]  ;;  %v3292_v19 = vld [vmem:[%s4339_s1 + $0x1e8] sm:$0xff] }
  0x32   : > { %1682 = vmatpush.bf16.msrb.mxu3 %v3262_v16  ;;  %1596 = vmatpush.bf16.msrb.mxu1 %v3246_v21  ;;  %v3277_v16 = vld [vmem:[%s4339_s1 + $0x170] sm:$0xff]  ;;  %v3276_v20 = vld [vmem:[%s4339_s1 + $0x168] sm:$0xff] }
  0x33   : > { %1725 = vmatpush.bf16.msrb.mxu0 %v3270_v22  ;;  %1591 = vmatmul.bf16.vlgmr.msra.gmra.mxu3 %v834_v23  ;;  %v3300_v21 = vld [vmem:[%s4339_s1 + $0x228] sm:$0xff]  ;;  %v3283_v22 = vld [vmem:[%s4339_s1 + $0x1a0] sm:$0xff] }
  0x34   : > { %v3291_v23 = vld [vmem:[%s4339_s1 + $0x1e0] sm:$0xff]  ;;  %v3288_v8 = vld [vmem:[%s4339_s1 + $0x1c8] sm:$0xff] }
  0x35   : > { %1640 = vmatpush.bf16.msrb.mxu2 %v3253_v25  ;;  %v2486_v25 = vld [vmem:[%s3655_s17 + $0xa4] sm:$0xf0] }
  0x36   : > { %1683 = vmatpush.bf16.msrb.mxu3 %v3261_v24  ;;  %1597 = vmatpush.bf16.msrb.mxu1 %v3245_v26  ;;  %v3167_v24 = vld [vmem:[%s3655_s17 + $0x74] sm:$0xf]  ;;  %v3166_v26 = vld [vmem:[%s3655_s17 + $0x6c] sm:$0xf] }
  0x37   : > { %1726 = vmatpush.bf16.msrb.mxu0 %v3269_v27  ;;  %v2478_v27 = vld [vmem:[%s3655_s17 + $0x9c] sm:$0xf0] }
  0x39   : > { %1641 = vmatpush.bf16.msrb.mxu2 %v3252_v29  ;;  %v3173_v29 = vld [vmem:[%s3655_s17 + $0xa0] sm:$0xf0] }
  0x3a   : > { %1684 = vmatpush.bf16.msrb.mxu3 %v3260_v28  ;;  %1598 = vmatpush.bf16.msrb.mxu1 %v3244_v30  ;;  %v2484_v28 = vld [vmem:[%s3655_s17 + $0x70] sm:$0xf]  ;;  %v2489_v30 = vor.u32 %v3167_v24, %v2486_v25  ;;  %v3287_v24 = vld [vmem:[%s4339_s1 + $0x1c0] sm:$0xff]  ;;  %v3219_v25 = vld [vmem:[%s3655_s17 + $0x214] sm:$0xf] }
  0x3b   : > { %1727 = vmatpush.bf16.msrb.mxu0 %v3268_v31  ;;  %v2492_v31 = vld [vmem:[%s3655_s17 + $0x78] sm:$0xf] }
  0x3d   : > { %1642 = vmatpush.bf16.msrb.mxu2 %v3251_v33  ;;  %v2481_v33 = vor.u32 %v3166_v26, %v2478_v27  ;;  %v2694_v26 = vld [vmem:[%s3655_s17 + $0x244] sm:$0xf0]  ;;  %v3271_v27 = vld [vmem:[%s4339_s1 + $0x140] sm:$0xff] }
  0x3e   : > { %1685 = vmatpush.bf16.msrb.mxu3 %v3259_v32  ;;  %1599 = vmatpush.bf16.msrb.mxu1 %v3243_v34  ;;  %v3174_v32 = vld [vmem:[%s3655_s17 + $0xa8] sm:$0xf0]  ;;  %v2485_v34 = vor.u32 %v3173_v29, %v2484_v28  ;;  %v2686_v29 = vld [vmem:[%s3655_s17 + $0x23c] sm:$0xf0] }
  0x3f   : > { %1728 = vmatpush.bf16.msrb.mxu0 %v3267_v39  ;;  %v2493_v35 = vor.u32 %v3174_v32, %v2492_v31  ;;  %v3290_v39 = vld [vmem:[%s4339_s1 + $0x1d8] sm:$0xff]  ;;  %v3218_v28 = vld [vmem:[%s3655_s17 + $0x20c] sm:$0xf]  ;;  %v3225_v31 = vld [vmem:[%s3655_s17 + $0x240] sm:$0xf0]  ;;  %v2697_v32 = vor.u32 %v3219_v25, %v2694_v26 }
  0x40   : > { %1576 = vmatmul.bf16.gmra.mxu1 %v2581_v44  ;;  %1586 = vmatmul.bf16.gmra.mxu2 %v2685_v45  ;;  %v2530_v44 = vld [vmem:[%s3655_s17 + $0x104] sm:$0xf0]  ;;  %v2536_v45 = vld [vmem:[%s3655_s17 + $0xd8] sm:$0xf]  ;;  %v3329_v25 = vld [vmem:[%s4339_s1 + $0x310] sm:$0xff] }
  0x41   : > { %1643 = vmatpush.bf16.msrb.mxu2 %v3250_v43  ;;  %1566 = vmatmul.bf16.gmra.mxu0 %v2477_v46  ;;  %v3179_v43 = vld [vmem:[%s3655_s17 + $0xd4] sm:$0xf]  ;;  %v3186_v46 = vld [vmem:[%s3655_s17 + $0x108] sm:$0xf0]  ;;  %v3169_v26 = vld [vmem:[%s3655_s17 + $0x84] sm:$0xf] }
  0x42   : > { %1686 = vmatpush.bf16.msrb.mxu3 %v3258_v42  ;;  %1600 = vmatpush.bf16.msrb.mxu1 %v3242_v47  ;;  %v2538_v42 = vld [vmem:[%s3655_s17 + $0x10c] sm:$0xf0] }
  0x43   : > { %1729 = vmatpush.bf16.msrb.mxu0 %v3266_v48  ;;  %v2541_v47 = vor.u32 %v3180_v41, %v2538_v42  ;;  %v2544_v48 = vld [vmem:[%s3655_s17 + $0xe0] sm:$0xf]  ;;  %v286_v41 = vld [vmem:[%s3655_s17 + $0x278] sm:$0xff] }
  0x44   : > { %v3310_v42 = vld [vmem:[%s4339_s1 + $0x278] sm:$0xff] }
  0x45   : > { %1644 = vmatpush.bf16.msrb.mxu2 %v3249_v50  ;;  %v2533_v50 = vor.u32 %v3179_v43, %v2530_v44  ;;  %v746_v43 = vunpack.c.h.b16 %v286_v41  ;;  %v3927_v44 = vld [vmem:[%s3655_s17 + $0x280] sm:$0xff] }
  0x46   : > { %1687 = vmatpush.bf16.msrb.mxu3 %v3257_v49  ;;  %1601 = vmatpush.bf16.msrb.mxu1 %v3241_v51  ;;  %v3187_v49 = vld [vmem:[%s3655_s17 + $0x110] sm:$0xf0]  ;;  %v2537_v51 = vor.u32 %v3186_v46, %v2536_v45  ;;  %v3330_v45 = vld [vmem:[%s4339_s1 + $0x318] sm:$0xff]  ;;  %v744_v46 = vunpack.c.h.b16 %v3658_v7 }
  0x47   : > { %1730 = vmatpush.bf16.msrb.mxu0 %v3265_v52  ;;  %v2545_v52 = vor.u32 %v3187_v49, %v2544_v48  ;;  %v747_v48 = vunpack.c.l.b16 %v3927_v44  ;;  %v837_v49 = vpack.c.b16 %v746_v43, %v746_v43  ;;  %v3325_v7 = vld [vmem:[%s4339_s1 + $0x2f0] sm:$0xff] }
  0x49   : > { %1645 = vmatpush.bf16.msrb.mxu2 %v3248_v54  ;;  %v3281_v54 = vld [vmem:[%s4339_s1 + $0x190] sm:$0xff] }
  0x4a   : > { %1688 = vmatpush.bf16.msrb.mxu3 %v3256_v53  ;;  %1602 = vmatpush.bf16.msrb.mxu1 %v3240_v55  ;;  %v3298_v53 = vld [vmem:[%s4339_s1 + $0x218] sm:$0xff]  ;;  %v3289_v55 = vld [vmem:[%s4339_s1 + $0x1d0] sm:$0xff] }
  0x4b   : > { %1731 = vmatpush.bf16.msrb.mxu0 %v3264_v57  ;;  %v3193_v57 = vld [vmem:[%s3655_s17 + $0x144] sm:$0xf] }
  0x4d   : > { %1646 = vmatpush.bf16.msrb.mxu2 %v3247_v58  ;;  %v2590_v58 = vld [vmem:[%s3655_s17 + $0x174] sm:$0xf0] }
  0x4e   : > { %1689 = vmatpush.bf16.msrb.mxu3 %v3255_v56  ;;  %1603 = vmatpush.bf16.msrb.mxu1 %v3239_v59  ;;  %v3273_v56 = vld [vmem:[%s4339_s1 + $0x150] sm:$0xff]  ;;  %v3192_v59 = vld [vmem:[%s3655_s17 + $0x13c] sm:$0xf] }
  0x4f   : > { %1732 = vmatpush.bf16.msrb.mxu0 %v3263_v5  ;;  %v2585_v2 = vor.u32 %v3192_v59, %v2582_v60  ;;  %v3297_v5 = vld [vmem:[%s4339_s1 + $0x210] sm:$0xff] }
  0x50   : > { %1647 = vmatmul.bf16.vlgmr.msrb.gmra.mxu2 %v2433_v12  ;;  %v3205_v12 = vld [vmem:[%s3655_s17 + $0x1a4] sm:$0xf] }
  0x51   : > { %1811 = vmatpush.bf16.msra.mxu2 %v3286_v63  ;;  %1690 = vmatmul.bf16.vlgmr.msrb.gmra.mxu3 %v2437_v4  ;;  %v2593_v63 = vor.u32 %v3193_v57, %v2590_v58  ;;  %v3948_v57 = vld [vmem:[%s4340_s2] ss:$0 sm:$0xff] }
  0x52   : > { %1854 = vmatpush.bf16.msra.mxu3 %v3294_v0  ;;  %1768 = vmatpush.bf16.msra.mxu1 %v3278_v9  ;;  %v2596_v0 = vld [vmem:[%s3655_s17 + $0x148] sm:$0xf] }
  0x53   : > { %1897 = vmatpush.bf16.msra.mxu0 %v3302_v10  ;;  %1604 = vmatmul.bf16.vlgmr.msrb.gmra.mxu1 %v2429_v11  ;;  %v2597_v4 = vor.u32 %v3200_v1, %v2596_v0  ;;  %v3272_v9 = vld [vmem:[%s4339_s1 + $0x148] sm:$0xff]  ;;  %v2642_v11 = vld [vmem:[%s3655_s17 + $0x1dc] sm:$0xf0]  ;;  %v3156_v0 = vld [vmem:[%s3655_s17 + $0x1c] sm:$0xf] }
  0x54   : > { %1733 = vmatmul.bf16.vlgmr.msrb.gmra.mxu0 %v2441_v13  ;;  %v3206_v10 = vld [vmem:[%s3655_s17 + $0x1ac] sm:$0xf]  ;;  %v2634_v13 = vld [vmem:[%s3655_s17 + $0x1d4] sm:$0xf0]  ;;  %v2450_v1 = vld [vmem:[%s3655_s17 + $0x4c] sm:$0xf0] }
  0x55   : > { %1812 = vmatpush.bf16.msra.mxu2 %v3285_v14  ;;  %v2640_v14 = vld [vmem:[%s3655_s17 + $0x1a8] sm:$0xf] }
  0x56   : > { %1855 = vmatpush.bf16.msra.mxu3 %v3293_v15  ;;  %1769 = vmatpush.bf16.msra.mxu1 %v3277_v16  ;;  %v3212_v15 = vld [vmem:[%s3655_s17 + $0x1d8] sm:$0xf0]  ;;  %v2645_v16 = vor.u32 %v3206_v10, %v2642_v11 }
  0x57   : > { %1898 = vmatpush.bf16.msra.mxu0 %v3301_v17  ;;  %v2648_v17 = vld [vmem:[%s3655_s17 + $0x1b0] sm:$0xf] }
  0x59   : > { %1813 = vmatpush.bf16.msra.mxu2 %v3284_v18  ;;  %v3213_v18 = vld [vmem:[%s3655_s17 + $0x1e0] sm:$0xf0] }
  0x5a   : > { %1856 = vmatpush.bf16.msra.mxu3 %v3292_v19  ;;  %1770 = vmatpush.bf16.msra.mxu1 %v3276_v20  ;;  %v2637_v19 = vor.u32 %v3205_v12, %v2634_v13  ;;  %v2641_v20 = vor.u32 %v3212_v15, %v2640_v14 }
  0x5b   : > { %1899 = vmatpush.bf16.msra.mxu0 %v3300_v21  ;;  %v2649_v21 = vor.u32 %v3213_v18, %v2648_v17  ;;  %v3316_v18 = vld [vmem:[%s4339_s1 + $0x2a8] sm:$0xff] }
  0x5d   : > { %1814 = vmatpush.bf16.msra.mxu2 %v3283_v22  ;;  %v3296_v22 = vld [vmem:[%s4339_s1 + $0x208] sm:$0xff] }
  0x5e   : > { %1857 = vmatpush.bf16.msra.mxu3 %v3291_v23  ;;  %1771 = vmatpush.bf16.msra.mxu1 %v3275_v36  ;;  %v3279_v23 = vld [vmem:[%s4339_s1 + $0x180] sm:$0xff] }
  0x5f   : > { %1900 = vmatpush.bf16.msra.mxu0 %v3299_v37  ;;  %v3295_v37 = vld [vmem:[%s4339_s1 + $0x200] sm:$0xff] }
  0x60   : > { %1652 = vmatmul.bf16.gmra.mxu2 %v2485_v34  ;;  %v3226_v34 = vld [vmem:[%s3655_s17 + $0x248] sm:$0xf0] }
  0x61   : > { %1695 = vmatmul.bf16.gmra.mxu3 %v2489_v30  ;;  %1815 = vmatpush.bf16.msra.mxu2 %v3282_v38  ;;  %v2692_v30 = vld [vmem:[%s3655_s17 + $0x210] sm:$0xf] }
  0x62   : > { %1858 = vmatpush.bf16.msra.mxu3 %v3290_v39  ;;  %1772 = vmatpush.bf16.msra.mxu1 %v3274_v40  ;;  %v2693_v36 = vor.u32 %v3225_v31, %v2692_v30  ;;  %v3318_v39 = vld [vmem:[%s4339_s1 + $0x2b8] sm:$0xff]  ;;  %v2500_v30 = vld [vmem:[%s3655_s17 + $0x80] sm:$0xf]  ;;  %v3175_v31 = vld [vmem:[%s3655_s17 + $0xb0] sm:$0xf0] }
  0x63   : > { %1609 = vmatmul.bf16.gmra.mxu1 %v2481_v33  ;;  %1901 = vmatpush.bf16.msra.mxu0 %v3298_v53  ;;  %v2700_v33 = vld [vmem:[%s3655_s17 + $0x218] sm:$0xf]  ;;  %v838_v53 = vpack.c.b16 %v747_v48, %v747_v48 }
  0x64   : > { %1738 = vmatmul.bf16.gmra.mxu0 %v2493_v35  ;;  %v2689_v35 = vor.u32 %v3218_v28, %v2686_v29  ;;  %v2701_v38 = vor.u32 %v3226_v34, %v2700_v33  ;;  %v3326_v40 = vld [vmem:[%s4339_s1 + $0x2f8] sm:$0xff]  ;;  %v2494_v29 = vld [vmem:[%s3655_s17 + $0xac] sm:$0xf0]  ;;  %v2508_v34 = vld [vmem:[%s3655_s17 + $0x88] sm:$0xf] }
  0x65   : > { %1816 = vmatpush.bf16.msra.mxu2 %v3281_v54  ;;  %v3168_v28 = vld [vmem:[%s3655_s17 + $0x7c] sm:$0xf] }
  0x66   : > { %1859 = vmatpush.bf16.msra.mxu3 %v3289_v55  ;;  %1773 = vmatpush.bf16.msra.mxu1 %v3273_v56  ;;  %v3317_v55 = vld [vmem:[%s4339_s1 + $0x2b0] sm:$0xff] }
  0x67   : > { %1902 = vmatpush.bf16.msra.mxu0 %v3297_v5  ;;  %v3309_v56 = vld [vmem:[%s4339_s1 + $0x270] sm:$0xff]  ;;  %v3162_v5 = vld [vmem:[%s3655_s17 + $0x48] sm:$0xf0] }
  0x69   : > { %1817 = vmatpush.bf16.msra.mxu2 %v3280_v6  ;;  %v2453_v6 = vor.u32 %v3156_v0, %v2450_v1  ;;  %v2546_v0 = vld [vmem:[%s3655_s17 + $0x114] sm:$0xf0]  ;;  %v2552_v1 = vld [vmem:[%s3655_s17 + $0xe8] sm:$0xf] }
  0x6a   : > { %1860 = vmatpush.bf16.msra.mxu3 %v3288_v8  ;;  %1774 = vmatpush.bf16.msra.mxu1 %v3272_v9  ;;  %v2456_v8 = vld [vmem:[%s3655_s17 + $0x20] sm:$0xf]  ;;  %v3163_v9 = vld [vmem:[%s3655_s17 + $0x50] sm:$0xf0] }
  0x6b   : > { %1903 = vmatpush.bf16.msra.mxu0 %v3296_v22  ;;  %v2457_v15 = vor.u32 %v3163_v9, %v2456_v8  ;;  %v2560_v8 = vld [vmem:[%s3655_s17 + $0xf0] sm:$0xf]  ;;  %v3189_v9 = vld [vmem:[%s3655_s17 + $0x120] sm:$0xf0] }
  0x6d   : > { %1818 = vmatpush.bf16.msra.mxu2 %v3279_v23 }
  0x6e   : > { %1861 = vmatpush.bf16.msra.mxu3 %v3287_v24  ;;  %1775 = vmatpush.bf16.msra.mxu1 %v3271_v27  ;;  %v2502_v27 = vld [vmem:[%s3655_s17 + $0xb4] sm:$0xf0] }
  0x6f   : > { %1904 = vmatpush.bf16.msra.mxu0 %v3295_v37  ;;  %v2505_v33 = vor.u32 %v3169_v26, %v2502_v27  ;;  %v3306_v26 = vld [vmem:[%s4339_s1 + $0x258] sm:$0xff] }
  0x70   : > { %1657 = vmatmul.bf16.gmra.mxu2 %v2537_v51 }
  0x71   : > { %1700 = vmatmul.bf16.gmra.mxu3 %v2541_v47  ;;  %1983 = vmatpush.bf16.msrb.mxu2 %v3318_v39  ;;  %v745_v47 = vunpack.c.l.b16 %v286_v41  ;;  %v2497_v39 = vor.u32 %v3168_v28, %v2494_v29  ;;  %v3328_v28 = vld [vmem:[%s4339_s1 + $0x308] sm:$0xff] }
  0x72   : > { %2026 = vmatpush.bf16.msrb.mxu3 %v3326_v40  ;;  %1940 = vmatpush.bf16.msrb.mxu1 %v3310_v42  ;;  %v2501_v40 = vor.u32 %v3175_v31, %v2500_v30 }
  0x73   : > { %1614 = vmatmul.bf16.gmra.mxu1 %v2533_v50  ;;  %2073 = vmatpush.bf16.msrb.mxu0 %v3330_v45  ;;  %v835_v50 = vpack.c.b16 %v744_v46, %v744_v46  ;;  %v836_v51 = vpack.c.b16 %v745_v47, %v745_v47  ;;  %v3323_v46 = vld [vmem:[%s4339_s1 + $0x2e0] sm:$0xff] }
  0x74   : > { %1743 = vmatmul.bf16.gmra.mxu0 %v2545_v52  ;;  %v3307_v47 = vld [vmem:[%s4339_s1 + $0x260] sm:$0xff] }
  0x75   : > { %1984 = vmatpush.bf16.msrb.mxu2 %v3317_v55 }
  0x76   : > { %2027 = vmatpush.bf16.msrb.mxu3 %v3325_v7  ;;  %1941 = vmatpush.bf16.msrb.mxu1 %v3309_v56  ;;  %v3182_v56 = vld [vmem:[%s3655_s17 + $0xec] sm:$0xf] }
  0x77   : > { %2074 = vmatpush.bf16.msrb.mxu0 %v3329_v25 }
  0x79   : > { %1985 = vmatpush.bf16.msrb.mxu2 %v3316_v18 }
  0x7b   : > { %2075 = vmatpush.bf16.msrb.mxu0 %v3328_v28  ;;  %v2664_v28 = vld [vmem:[%s3655_s17 + $0x1c0] sm:$0xf] }
  0x80   : > { %1662 = vmatmul.bf16.gmra.mxu2 %v2589_v3  ;;  %v2442_v3 = vld [vmem:[%s3655_s17 + $0x44] sm:$0xf0] }
  0x81   : > { %1705 = vmatmul.bf16.gmra.mxu3 %v2593_v63 }
  0x83   : > { %1619 = vmatmul.bf16.gmra.mxu1 %v2585_v2  ;;  %v3155_v2 = vld [vmem:[%s3655_s17 + $0x14] sm:$0xf] }
  0x84   : > { %1748 = vmatmul.bf16.gmra.mxu0 %v2597_v4  ;;  %v2448_v4 = vld [vmem:[%s3655_s17 + $0x18] sm:$0xf]  ;;  %v2445_v12 = vor.u32 %v3155_v2, %v2442_v3 }
  0x85   : > { %v2449_v13 = vor.u32 %v3162_v5, %v2448_v4  ;;  %v3188_v4 = vld [vmem:[%s3655_s17 + $0x118] sm:$0xf0] }
  0x86   : > { %v3322_v5 = vld [vmem:[%s4339_s1 + $0x2d8] sm:$0xff] }
  0x90   : > { %1667 = vmatmul.bf16.gmra.mxu2 %v2641_v20  ;;  %v3308_v20 = vld [vmem:[%s4339_s1 + $0x268] sm:$0xff] }
  0x91   : > { %1710 = vmatmul.bf16.gmra.mxu3 %v2645_v16  ;;  %1942 = vmatpush.bf16.msrb.mxu1 %v3308_v20 }
  0x93   : > { %1624 = vmatmul.bf16.gmra.mxu1 %v2637_v19  ;;  %v3324_v19 = vld [vmem:[%s4339_s1 + $0x2e8] sm:$0xff] }
  0x94   : > { %1753 = vmatmul.bf16.gmra.mxu0 %v2649_v21  ;;  %2028 = vmatpush.bf16.msrb.mxu3 %v3324_v19  ;;  %v2561_v19 = vor.u32 %v3189_v9, %v2560_v8 }
  0x95   : > { %1943 = vmatpush.bf16.msrb.mxu1 %v3307_v47  ;;  %v3305_v47 = vld [vmem:[%s4339_s1 + $0x250] sm:$0xff] }
  0x98   : > { %2029 = vmatpush.bf16.msrb.mxu3 %v3323_v46  ;;  %v3321_v46 = vld [vmem:[%s4339_s1 + $0x2d0] sm:$0xff] }
  0x99   : > { %1944 = vmatpush.bf16.msrb.mxu1 %v3306_v26  ;;  %v3304_v26 = vld [vmem:[%s4339_s1 + $0x248] sm:$0xff] }
  0x9c   : > { %2030 = vmatpush.bf16.msrb.mxu3 %v3322_v5 }
  0x9d   : > { %1945 = vmatpush.bf16.msrb.mxu1 %v3305_v47 }
  0xa0   : > { %1672 = vmatmul.bf16.gmra.mxu2 %v2693_v36  ;;  %2031 = vmatpush.bf16.msrb.mxu3 %v3321_v46 }
  0xa1   : > { %1715 = vmatmul.bf16.gmra.mxu3 %v2697_v32  ;;  %v3315_v32 = vld [vmem:[%s4339_s1 + $0x2a0] sm:$0xff]  ;;  %1946 = vmatpush.bf16.msrb.mxu1 %v3304_v26 }
  0xa2   : > { %1986 = vmatpush.bf16.msrb.mxu2 %v3315_v32 }
  0xa3   : > { %1629 = vmatmul.bf16.gmra.mxu1 %v2689_v35  ;;  %v3176_v35 = vld [vmem:[%s3655_s17 + $0xb8] sm:$0xf0] }
  0xa4   : > { %1758 = vmatmul.bf16.gmra.mxu0 %v2701_v38  ;;  %v2509_v42 = vor.u32 %v3176_v35, %v2508_v34 }
  0xad   : > { %v3934_v52 = vpop.f32.mrf.mxu1 }
  0xae   : > { %v1562_v54 = vpop.f32.mrf.mxu0 }
  0xaf   : > { %v1563_v37 = vadd.f32 %v3948_v57, %v1562_v54 }
  0xb0   : > { %1677 = vmatmul.bf16.gmra.mxu2 %v836_v51 }
  0xb1   : > { %1720 = vmatmul.bf16.gmra.mxu3 %v837_v49 }
  0xb3   : > { %1634 = vmatmul.bf16.gmra.mxu1 %v835_v50  ;;  %v1582_v58 = vpop.f32.mrf.mxu2 }
  0xb4   : > { %1763 = vmatmul.bf16.gmra.mxu0 %v838_v53  ;;  %v3951_v59 = vadd.f32 %v3948_v57, %v1582_v58  ;;  %v2554_v58 = vld [vmem:[%s3655_s17 + $0x11c] sm:$0xf0] }
  0xb5   : > { %v3953_v60 = vpop.f32.mrf.mxu1 }
  0xb6   : > { %v1592_v61 = vpop.f32.mrf.mxu3  ;;  %v3955_v62 = vpop.f32.mrf.mxu0 }
  0xb7   : > { %v3958_v63 = vadd.f32 %v3948_v57, %v1592_v61  ;;  %v1565_v50 = vadd.f32 %v3948_v57, %v3955_v62  ;;  %v3181_v61 = vld [vmem:[%s3655_s17 + $0xe4] sm:$0xf]  ;;  %v3314_v62 = vld [vmem:[%s4339_s1 + $0x298] sm:$0xff] }
  0xb8   : > { %1987 = vmatpush.bf16.msrb.mxu2 %v3314_v62  ;;  %v1575_v62 = vadd.f32 %v3948_v57, %v3953_v60  ;;  %v3207_v60 = vld [vmem:[%s3655_s17 + $0x1b4] sm:$0xf] }
  0xbb   : > { %v1584_v10 = vpop.f32.mrf.mxu2 }
  0xbc   : > { %v3969_v11 = vadd.f32 %v3948_v57, %v1584_v10 }
  0xbd   : > { %v3971_v14 = vpop.f32.mrf.mxu1 }
  0xbe   : > { %v1594_v16 = vpop.f32.mrf.mxu3  ;;  %v3973_v17 = vpop.f32.mrf.mxu0 }
  0xbf   : > { %v2553_v16 = vor.u32 %v3188_v4, %v2552_v1 }
  0xc0   : > { %1819 = vmatmul.bf16.vlgmr.msra.gmra.mxu2 %v2449_v13 }
  0xc1   : > { %1862 = vmatmul.bf16.vlgmr.msra.gmra.mxu3 %v2453_v6  ;;  %v2557_v6 = vor.u32 %v3182_v56, %v2554_v58 }
  0xc3   : > { %1776 = vmatmul.bf16.vlgmr.msra.gmra.mxu1 %v2445_v12  ;;  %v1587_v21 = vpop.f32.mrf.mxu2  ;;  %v1568_v12 = vadd.f32 %v3948_v57, %v3973_v17 }
  0xc4   : > { %1905 = vmatmul.bf16.vlgmr.msra.gmra.mxu0 %v2457_v15  ;;  %v3985_v22 = vadd.f32 %v3948_v57, %v1587_v21  ;;  %v2549_v15 = vor.u32 %v3181_v61, %v2546_v0 }
  0xc5   : > { %v3987_v23 = vpop.f32.mrf.mxu1 }
  0xc6   : > { %v3989_v24 = vpop.f32.mrf.mxu0  ;;  %v1580_v46 = vadd.f32 %v3948_v57, %v3987_v23 }
  0xc7   : > { %v1570_v30 = vadd.f32 %v3948_v57, %v3989_v24 }
  0xcb   : > { %v1589_v36 = vpop.f32.mrf.mxu2 }
  0xcc   : > { %v4007_v38 = vadd.f32 %v3948_v57, %v1589_v36  ;;  %v3313_v36 = vld [vmem:[%s4339_s1 + $0x290] sm:$0xff] }
  0xcd   : > { %1988 = vmatpush.bf16.msrb.mxu2 %v3313_v36 }
  0xd0   : > { %v1605_v41 = vpop.f32.mrf.mxu1  ;;  %1824 = vmatmul.bf16.gmra.mxu2 %v2501_v40  ;;  %v3194_v40 = vld [vmem:[%s3655_s17 + $0x14c] sm:$0xf] }
  0xd1   : > { %v1606_v43 = vadd.f32 %v1605_v41, %v1563_v37  ;;  %1867 = vmatmul.bf16.gmra.mxu3 %v2505_v33  ;;  %v1734_v45 = vpop.f32.mrf.mxu0  ;;  %v3195_v37 = vld [vmem:[%s3655_s17 + $0x154] sm:$0xf]  ;;  %v2598_v41 = vld [vmem:[%s3655_s17 + $0x17c] sm:$0xf0] }
  0xd3   : > { %1781 = vmatmul.bf16.gmra.mxu1 %v2497_v39  ;;  %v1648_v49 = vpop.f32.mrf.mxu2  ;;  %v2606_v39 = vld [vmem:[%s3655_s17 + $0x184] sm:$0xf0] }
  0xd4   : > { %v1691_v48 = vpop.f32.mrf.mxu3  ;;  %1910 = vmatmul.bf16.gmra.mxu0 %v2509_v42  ;;  %v1649_v51 = vadd.f32 %v1648_v49, %v1606_v43  ;;  %v2604_v42 = vld [vmem:[%s3655_s17 + $0x150] sm:$0xf]  ;;  %v2612_v49 = vld [vmem:[%s3655_s17 + $0x158] sm:$0xf] }
  0xd6   : > { %v1692_v54 = vadd.f32 %v1691_v48, %v1649_v51  ;;  %v2609_v48 = vor.u32 %v3195_v37, %v2606_v39 }
  0xd8   : > { %v1607_v53 = vpop.f32.mrf.mxu1  ;;  %v4022_v2 = vadd.f32 %v1734_v45, %v1692_v54  ;;  %v3201_v45 = vld [vmem:[%s3655_s17 + $0x180] sm:$0xf0] }
  0xd9   : > { %v1608_v55 = vadd.f32 %v1607_v53, %v1565_v50  ;;  %v1736_v7 = vpop.f32.mrf.mxu0  ;;  %v3202_v50 = vld [vmem:[%s3655_s17 + $0x188] sm:$0xf0]  ;;  %v1573_v53 = vadd.f32 %v3948_v57, %v3934_v52 }
  0xda   : > { %v2613_v58 = vor.u32 %v3202_v50, %v2612_v49 }
  0xdb   : > { %v1650_v10 = vpop.f32.mrf.mxu2 }
  0xdc   : > { %v1693_v3 = vpop.f32.mrf.mxu3  ;;  %v1651_v13 = vadd.f32 %v1650_v10, %v1608_v55  ;;  %v2601_v55 = vor.u32 %v3194_v40, %v2598_v41  ;;  %v3327_v41 = vld [vmem:[%s4339_s1 + $0x300] sm:$0xff] }
  0xdd   : > { %2076 = vmatpush.bf16.msrb.mxu0 %v3327_v41 }
  0xde   : > { %v1694_v20 = vadd.f32 %v1693_v3, %v1651_v13  ;;  %v3320_v13 = vld [vmem:[%s4339_s1 + $0x2c8] sm:$0xff] }
  0xdf   : > { %2032 = vmatpush.bf16.msrb.mxu3 %v3320_v13 }
  0xe0   : > { %v1610_v18 = vpop.f32.mrf.mxu1  ;;  %1829 = vmatmul.bf16.gmra.mxu2 %v2553_v16  ;;  %v4038_v27 = vadd.f32 %v1736_v7, %v1694_v20  ;;  %v2605_v7 = vor.u32 %v3201_v45, %v2604_v42  ;;  %v2658_v16 = vld [vmem:[%s3655_s17 + $0x1ec] sm:$0xf0] }
  0xe1   : > { %v1611_v21 = vadd.f32 %v1610_v18, %v1568_v12  ;;  %1872 = vmatmul.bf16.gmra.mxu3 %v2557_v6  ;;  %v1739_v25 = vpop.f32.mrf.mxu0  ;;  %v3312_v12 = vld [vmem:[%s4339_s1 + $0x288] sm:$0xff] }
  0xe2   : > { %v2650_v18 = vld [vmem:[%s3655_s17 + $0x1e4] sm:$0xf0]  ;;  %1989 = vmatpush.bf16.msrb.mxu2 %v3312_v12 }
  0xe3   : > { %1786 = vmatmul.bf16.gmra.mxu1 %v2549_v15  ;;  %v1653_v29 = vpop.f32.mrf.mxu2  ;;  %v3208_v15 = vld [vmem:[%s3655_s17 + $0x1bc] sm:$0xf] }
  0xe4   : > { %v1696_v17 = vpop.f32.mrf.mxu3  ;;  %1915 = vmatmul.bf16.gmra.mxu0 %v2561_v19  ;;  %v1654_v31 = vadd.f32 %v1653_v29, %v1611_v21  ;;  %v2656_v21 = vld [vmem:[%s3655_s17 + $0x1b8] sm:$0xf]  ;;  %v3215_v29 = vld [vmem:[%s3655_s17 + $0x1f0] sm:$0xf0] }
  0xe5   : > { %v2665_v36 = vor.u32 %v3215_v29, %v2664_v28 }
  0xe6   : > { %v1697_v33 = vadd.f32 %v1696_v17, %v1654_v31  ;;  %v2661_v17 = vor.u32 %v3208_v15, %v2658_v16  ;;  %v1578_v31 = vadd.f32 %v3948_v57, %v3971_v14  ;;  %v3220_v57 = vld [vmem:[%s3655_s17 + $0x21c] sm:$0xf] }
  0xe8   : > { %v1612_v32 = vpop.f32.mrf.mxu1  ;;  %v4053_v43 = vadd.f32 %v1739_v25, %v1697_v33  ;;  %v3214_v25 = vld [vmem:[%s3655_s17 + $0x1e8] sm:$0xf0]  ;;  %v2653_v33 = vor.u32 %v3207_v60, %v2650_v18 }
  0xe9   : > { %v1613_v34 = vadd.f32 %v1612_v32, %v1570_v30  ;;  %v1741_v35 = vpop.f32.mrf.mxu0 }
  0xeb   : > { %v1655_v51 = vpop.f32.mrf.mxu2 }
  0xec   : > { %v1698_v24 = vpop.f32.mrf.mxu3  ;;  %v1656_v54 = vadd.f32 %v1655_v51, %v1613_v34  ;;  %v2657_v34 = vor.u32 %v3214_v25, %v2656_v21 }
  0xee   : > { %v1699_v61 = vadd.f32 %v1698_v24, %v1656_v54  ;;  %v3311_v24 = vld [vmem:[%s4339_s1 + $0x280] sm:$0xff] }
  0xef   : > { %1990 = vmatpush.bf16.msrb.mxu2 %v3311_v24  ;;  %v3303_v54 = vld [vmem:[%s4339_s1 + $0x240] sm:$0xff] }
  0xf0   : > { %v1615_v56 = vpop.f32.mrf.mxu1  ;;  %1834 = vmatmul.bf16.gmra.mxu2 %v2605_v7  ;;  %v4066_v3 = vadd.f32 %v1741_v35, %v1699_v61  ;;  %v2710_v7 = vld [vmem:[%s3655_s17 + $0x254] sm:$0xf0]  ;;  %1947 = vmatpush.bf16.msrb.mxu1 %v3303_v54  ;;  %v2708_v61 = vld [vmem:[%s3655_s17 + $0x220] sm:$0xf] }
  0xf1   : > { %v1616_v0 = vadd.f32 %v1615_v56, %v1573_v53  ;;  %1877 = vmatmul.bf16.gmra.mxu3 %v2609_v48  ;;  %v1744_v1 = vpop.f32.mrf.mxu0  ;;  %v3319_v53 = vld [vmem:[%s4339_s1 + $0x2c0] sm:$0xff] }
  0xf2   : > { %2033 = vmatpush.bf16.msrb.mxu3 %v3319_v53  ;;  %v3158_v53 = vld [vmem:[%s3655_s17 + $0x2c] sm:$0xf]  ;;  %v2466_v54 = vld [vmem:[%s3655_s17 + $0x5c] sm:$0xf0] }
  0xf3   : > { %1791 = vmatmul.bf16.gmra.mxu1 %v2601_v55  ;;  %v1658_v52 = vpop.f32.mrf.mxu2  ;;  %v3221_v55 = vld [vmem:[%s3655_s17 + $0x224] sm:$0xf] }
  0xf4   : > { %v1701_v4 = vpop.f32.mrf.mxu3  ;;  %1920 = vmatmul.bf16.gmra.mxu0 %v2613_v58  ;;  %v1659_v5 = vadd.f32 %v1658_v52, %v1616_v0  ;;  %v2702_v58 = vld [vmem:[%s3655_s17 + $0x24c] sm:$0xf0]  ;;  %v3227_v0 = vld [vmem:[%s3655_s17 + $0x250] sm:$0xf0]  ;;  %v3228_v52 = vld [vmem:[%s3655_s17 + $0x258] sm:$0xf0] }
  0xf6   : > { %v1702_v8 = vadd.f32 %v1701_v4, %v1659_v5  ;;  %v2716_v4 = vld [vmem:[%s3655_s17 + $0x228] sm:$0xf] }
  0xf8   : > { %v1617_v6 = vpop.f32.mrf.mxu1  ;;  %v4080_v19 = vadd.f32 %v1744_v1, %v1702_v8  ;;  %v2713_v1 = vor.u32 %v3221_v55, %v2710_v7  ;;  %v2709_v8 = vor.u32 %v3227_v0, %v2708_v61  ;;  %v3157_v55 = vld [vmem:[%s3655_s17 + $0x24] sm:$0xf]  ;;  %v3164_v61 = vld [vmem:[%s3655_s17 + $0x58] sm:$0xf0]  ;;  %v2469_v0 = vor.u32 %v3158_v53, %v2466_v54  ;;  %v3183_v53 = vld [vmem:[%s3655_s17 + $0xf4] sm:$0xf] }
  0xf9   : > { %v1618_v9 = vadd.f32 %v1617_v6, %v1575_v62  ;;  %v1746_v10 = vpop.f32.mrf.mxu0  ;;  %v2705_v6 = vor.u32 %v3220_v57, %v2702_v58  ;;  %v2464_v58 = vld [vmem:[%s3655_s17 + $0x28] sm:$0xf] }
  0xfb   : > { %v1660_v30 = vpop.f32.mrf.mxu2 }
  0xfc   : > { %v1703_v20 = vpop.f32.mrf.mxu3  ;;  %v1661_v32 = vadd.f32 %v1660_v30, %v1618_v9  ;;  %v4123_v30 = vld [vmem:[%s3655_s17 + $0x290] sm:$0xff] }
  0xfe   : > { %v1704_v37 = vadd.f32 %v1703_v20, %v1661_v32  ;;  %v288_v20 = vld [vmem:[%s3655_s17 + $0x288] sm:$0xff] }
  0xff   : > { %v750_v29 = vunpack.c.h.b16 %v288_v20 }
 0x100   : > { %v1620_v35 = vpop.f32.mrf.mxu1  ;;  %1839 = vmatmul.bf16.gmra.mxu2 %v2657_v34  ;;  %v4094_v42 = vadd.f32 %v1746_v10, %v1704_v37  ;;  %v2717_v10 = vor.u32 %v3228_v52, %v2716_v4  ;;  %v751_v34 = vunpack.c.l.b16 %v4123_v30  ;;  %v3165_v4 = vld [vmem:[%s3655_s17 + $0x60] sm:$0xf0] }
 0x101   : > { %v1621_v39 = vadd.f32 %v1620_v35, %v1578_v31  ;;  %1882 = vmatmul.bf16.gmra.mxu3 %v2661_v17  ;;  %v1749_v40 = vpop.f32.mrf.mxu0  ;;  %v749_v31 = vunpack.c.l.b16 %v288_v20  ;;  %v841_v35 = vpack.c.b16 %v750_v29, %v750_v29 }
 0x103   : > { %1796 = vmatmul.bf16.gmra.mxu1 %v2653_v33  ;;  %v1663_v45 = vpop.f32.mrf.mxu2 }
 0x104   : > { %v1706_v14 = vpop.f32.mrf.mxu3  ;;  %1925 = vmatmul.bf16.gmra.mxu0 %v2665_v36  ;;  %v1664_v47 = vadd.f32 %v1663_v45, %v1621_v39 }
 0x106   : > { %v1707_v49 = vadd.f32 %v1706_v14, %v1664_v47  ;;  %v842_v14 = vpack.c.b16 %v751_v34, %v751_v34 }
 0x108   : > { %v1622_v48 = vpop.f32.mrf.mxu1  ;;  %v4110_v23 = vadd.f32 %v1749_v40, %v1707_v49  ;;  %v840_v40 = vpack.c.b16 %v749_v31, %v749_v31  ;;  %v2516_v31 = vld [vmem:[%s3655_s17 + $0x90] sm:$0xf] }
 0x109   : > { %v1623_v50 = vadd.f32 %v1622_v48, %v1580_v46  ;;  %v1751_v51 = vpop.f32.mrf.mxu0 }
 0x10b   : > { %v1665_v62 = vpop.f32.mrf.mxu2 }
 0x10c   : > { %v1708_v56 = vpop.f32.mrf.mxu3  ;;  %v1666_v5 = vadd.f32 %v1665_v62, %v1623_v50 }
 0x10e   : > { %v1709_v12 = vadd.f32 %v1708_v56, %v1666_v5  ;;  %v2458_v56 = vld [vmem:[%s3655_s17 + $0x54] sm:$0xf0] }
 0x10f   : > { %v2461_v5 = vor.u32 %v3157_v55, %v2458_v56  ;;  %v2568_v56 = vld [vmem:[%s3655_s17 + $0xf8] sm:$0xf] }
 0x110   : > { %v1625_v9 = vpop.f32.mrf.mxu1  ;;  %1844 = vmatmul.bf16.gmra.mxu2 %v2709_v8  ;;  %v4118_v16 = vadd.f32 %v1751_v51, %v1709_v12 }
 0x111   : > { %v1626_v13 = vadd.f32 %v1625_v9, %v3951_v59  ;;  %1887 = vmatmul.bf16.gmra.mxu3 %v2713_v1  ;;  %v1754_v15 = vpop.f32.mrf.mxu0  ;;  %v748_v59 = vunpack.c.h.b16 %v3927_v44  ;;  %v2472_v1 = vld [vmem:[%s3655_s17 + $0x30] sm:$0xf] }
 0x112   : > { %v2473_v9 = vor.u32 %v3165_v4, %v2472_v1  ;;  %v3191_v1 = vld [vmem:[%s3655_s17 + $0x130] sm:$0xf0] }
 0x113   : > { %1801 = vmatmul.bf16.gmra.mxu1 %v2705_v6  ;;  %v1668_v18 = vpop.f32.mrf.mxu2  ;;  %v839_v39 = vpack.c.b16 %v748_v59, %v748_v59  ;;  %v2465_v6 = vor.u32 %v3164_v61, %v2464_v58  ;;  %v2510_v59 = vld [vmem:[%s3655_s17 + $0xbc] sm:$0xf0]  ;;  %v3190_v58 = vld [vmem:[%s3655_s17 + $0x128] sm:$0xf0] }
 0x114   : > { %v1711_v60 = vpop.f32.mrf.mxu3  ;;  %1930 = vmatmul.bf16.gmra.mxu0 %v2717_v10  ;;  %v1669_v21 = vadd.f32 %v1668_v18, %v1626_v13 }
 0x116   : > { %v1712_v26 = vadd.f32 %v1711_v60, %v1669_v21 }
 0x118   : > { %v1627_v25 = vpop.f32.mrf.mxu1  ;;  %v4126_v32 = vadd.f32 %v1754_v15, %v1712_v26  ;;  %v2518_v26 = vld [vmem:[%s3655_s17 + $0xc4] sm:$0xf0] }
 0x119   : > { %v1628_v17 = vadd.f32 %v1627_v25, %v3969_v11  ;;  %v1756_v28 = vpop.f32.mrf.mxu0  ;;  %v3171_v25 = vld [vmem:[%s3655_s17 + $0x94] sm:$0xf] }
 0x11a   : > { %v2521_v34 = vor.u32 %v3171_v25, %v2518_v26  ;;  %v2622_v25 = vld [vmem:[%s3655_s17 + $0x194] sm:$0xf0]  ;;  %v3196_v26 = vld [vmem:[%s3655_s17 + $0x15c] sm:$0xf] }
 0x11b   : > { %v1670_v36 = vpop.f32.mrf.mxu2 }
 0x11c   : > { %v1713_v33 = vpop.f32.mrf.mxu3  ;;  %v1671_v37 = vadd.f32 %v1670_v36, %v1628_v17  ;;  %v3170_v17 = vld [vmem:[%s3655_s17 + $0x8c] sm:$0xf] }
 0x11d   : > { %v3178_v36 = vld [vmem:[%s3655_s17 + $0xc8] sm:$0xf0] }
 0x11e   : > { %v1714_v11 = vadd.f32 %v1713_v33, %v1671_v37  ;;  %v3177_v33 = vld [vmem:[%s3655_s17 + $0xc0] sm:$0xf0] }
 0x120   : > { %v1630_v41 = vpop.f32.mrf.mxu1  ;;  %1849 = vmatmul.bf16.gmra.mxu2 %v840_v40  ;;  %v4130_v45 = vadd.f32 %v1756_v28, %v1714_v11  ;;  %v2517_v40 = vor.u32 %v3177_v33, %v2516_v31  ;;  %v2620_v31 = vld [vmem:[%s3655_s17 + $0x160] sm:$0xf]  ;;  %v3203_v33 = vld [vmem:[%s3655_s17 + $0x190] sm:$0xf0] }
 0x121   : > { %v1631_v24 = vadd.f32 %v1630_v41, %v3985_v22  ;;  %1892 = vmatmul.bf16.gmra.mxu3 %v841_v35  ;;  %v1759_v44 = vpop.f32.mrf.mxu0  ;;  %v2524_v35 = vld [vmem:[%s3655_s17 + $0x98] sm:$0xf] }
 0x123   : > { %1806 = vmatmul.bf16.gmra.mxu1 %v839_v39  ;;  %v1673_v47 = vpop.f32.mrf.mxu2  ;;  %v2513_v39 = vor.u32 %v3170_v17, %v2510_v59  ;;  %v2614_v59 = vld [vmem:[%s3655_s17 + $0x18c] sm:$0xf0] }
 0x124   : > { %v1716_v46 = vpop.f32.mrf.mxu3  ;;  %1935 = vmatmul.bf16.gmra.mxu0 %v842_v14  ;;  %v1674_v48 = vadd.f32 %v1673_v47, %v1631_v24  ;;  %v2525_v14 = vor.u32 %v3178_v36, %v2524_v35  ;;  %v2628_v35 = vld [vmem:[%s3655_s17 + $0x168] sm:$0xf]  ;;  %v3204_v36 = vld [vmem:[%s3655_s17 + $0x198] sm:$0xf0] }
 0x126   : > { %v1717_v50 = vadd.f32 %v1716_v46, %v1674_v48 }
 0x128   : > { %v1632_v49 = vpop.f32.mrf.mxu1  ;;  %v4136_v7 = vadd.f32 %v1759_v44, %v1717_v50 }
 0x129   : > { %v1633_v22 = vadd.f32 %v1632_v49, %v4007_v38  ;;  %v1761_v51 = vpop.f32.mrf.mxu0 }
 0x12b   : > { %v1675_v52 = vpop.f32.mrf.mxu2 }
 0x12c   : > { %v1718_v57 = vpop.f32.mrf.mxu3  ;;  %v1676_v62 = vadd.f32 %v1675_v52, %v1633_v22 }
 0x12e   : > { %v1719_v38 = vadd.f32 %v1718_v57, %v1676_v62  ;;  %v2562_v57 = vld [vmem:[%s3655_s17 + $0x124] sm:$0xf0] }
 0x12f   : > { %v2565_v62 = vor.u32 %v3183_v53, %v2562_v57  ;;  %v2674_v53 = vld [vmem:[%s3655_s17 + $0x1fc] sm:$0xf0] }
 0x130   : > { %v1635_v8 = vpop.f32.mrf.mxu1  ;;  %1991 = vmatmul.bf16.vlgmr.msrb.gmra.mxu2 %v2465_v6  ;;  %v4144_v13 = vadd.f32 %v1761_v51, %v1719_v38  ;;  %v2570_v51 = vld [vmem:[%s3655_s17 + $0x12c] sm:$0xf0] }
 0x131   : > { %v1636_v10 = vadd.f32 %v1635_v8, %v3958_v63  ;;  %2034 = vmatmul.bf16.vlgmr.msrb.gmra.mxu3 %v2469_v0  ;;  %v1764_v12 = vpop.f32.mrf.mxu0  ;;  %v2576_v0 = vld [vmem:[%s3655_s17 + $0x100] sm:$0xf] }
 0x132   : > { %v2577_v8 = vor.u32 %v3191_v1, %v2576_v0  ;;  %v3216_v0 = vld [vmem:[%s3655_s17 + $0x1f8] sm:$0xf0] }
 0x133   : > { %1948 = vmatmul.bf16.vlgmr.msrb.gmra.mxu1 %v2461_v5  ;;  %v1678_v60 = vpop.f32.mrf.mxu2  ;;  %v2569_v5 = vor.u32 %v3190_v58, %v2568_v56  ;;  %v2666_v58 = vld [vmem:[%s3655_s17 + $0x1f4] sm:$0xf0] }
 0x134   : > { %v1721_v15 = vpop.f32.mrf.mxu3  ;;  %3134 = vmatmul.msk.bf16.vlgmr.msrb.gmra.mxu0 %vm1531_vm0, %v2473_v9  ;;  %v1679_v18 = vadd.f32 %v1678_v60, %v1636_v10 }
 0x136   : > { %v1722_v63 = vadd.f32 %v1721_v15, %v1679_v18 }
 0x138   : > { %v1637_v20 = vpop.f32.mrf.mxu1  ;;  %v4150_v28 = vadd.f32 %v1764_v12, %v1722_v63 }
 0x139   : > { %v1766_v21 = vpop.f32.mrf.mxu0 }
 0x13a   : > { %v3197_v21 = vld [vmem:[%s3655_s17 + $0x164] sm:$0xf] }
 0x13b   : > { %v1680_v37 = vpop.f32.mrf.mxu2 }
 0x13c   : > { %v1723_v29 = vpop.f32.mrf.mxu3 }
 0x140   : > { %v1777_v41 = vpop.f32.mrf.mxu1  ;;  %1996 = vmatmul.bf16.gmra.mxu2 %v2517_v40  ;;  %v2617_v40 = vor.u32 %v3196_v26, %v2614_v59  ;;  %v2726_v26 = vld [vmem:[%s3655_s17 + $0x264] sm:$0xf0] }
 0x141   : > { %v1778_v11 = vadd.f32 %v1777_v41, %v4022_v2  ;;  %2039 = vmatmul.bf16.gmra.mxu3 %v2521_v34  ;;  %v1906_v24 = vpop.f32.mrf.mxu0  ;;  %v3184_v2 = vld [vmem:[%s3655_s17 + $0xfc] sm:$0xf]  ;;  %v2625_v34 = vor.u32 %v3197_v21, %v2622_v25  ;;  %v2621_v41 = vor.u32 %v3203_v33, %v2620_v31  ;;  %v3223_v25 = vld [vmem:[%s3655_s17 + $0x234] sm:$0xf]  ;;  %v2718_v33 = vld [vmem:[%s3655_s17 + $0x25c] sm:$0xf0] }
 0x142   : > { %v2573_v61 = vor.u32 %v3184_v2, %v2570_v51  ;;  %v3210_v51 = vld [vmem:[%s3655_s17 + $0x1cc] sm:$0xf] }
 0x143   : > { %1953 = vmatmul.bf16.gmra.mxu1 %v2513_v39  ;;  %v1820_v46 = vpop.f32.mrf.mxu2  ;;  %v2677_v1 = vor.u32 %v3210_v51, %v2674_v53 }
 0x144   : > { %v1863_v44 = vpop.f32.mrf.mxu3  ;;  %3135 = vmatmul.msk.bf16.gmra.mxu0 %vm1531_vm0, %v2525_v14  ;;  %v1821_v47 = vadd.f32 %v1820_v46, %v1778_v11  ;;  %v2629_v11 = vor.u32 %v3204_v36, %v2628_v35  ;;  %v3229_v35 = vld [vmem:[%s3655_s17 + $0x260] sm:$0xf0]  ;;  %v2729_v36 = vor.u32 %v3223_v25, %v2726_v26 }
 0x146   : > { %v1864_v49 = vadd.f32 %v1863_v44, %v1821_v47 }
 0x148   : > { %v1779_v48 = vpop.f32.mrf.mxu1  ;;  %v4163_v54 = vadd.f32 %v1906_v24, %v1864_v49 }
 0x149   : > { %v1780_v50 = vadd.f32 %v1779_v48, %v4038_v27  ;;  %v1908_v22 = vpop.f32.mrf.mxu0 }
 0x14b   : > { %v1822_v4 = vpop.f32.mrf.mxu2 }
 0x14c   : > { %v1865_v55 = vpop.f32.mrf.mxu3  ;;  %v1823_v52 = vadd.f32 %v1822_v4, %v1780_v50  ;;  %v2680_v4 = vld [vmem:[%s3655_s17 + $0x1d0] sm:$0xf] }
 0x14e   : > { %v1866_v27 = vadd.f32 %v1865_v55, %v1823_v52  ;;  %v3209_v55 = vld [vmem:[%s3655_s17 + $0x1c4] sm:$0xf] }
 0x14f   : > { %v3217_v52 = vld [vmem:[%s3655_s17 + $0x200] sm:$0xf0] }
 0x150   : > { %v1782_v6 = vpop.f32.mrf.mxu1  ;;  %2001 = vmatmul.bf16.gmra.mxu2 %v2569_v5  ;;  %v4171_v10 = vadd.f32 %v1908_v22, %v1866_v27 }
 0x151   : > { %v1783_v9 = vadd.f32 %v1782_v6, %v4053_v43  ;;  %2044 = vmatmul.bf16.gmra.mxu3 %v2573_v61  ;;  %v1911_v38 = vpop.f32.mrf.mxu0  ;;  %v2672_v61 = vld [vmem:[%s3655_s17 + $0x1c8] sm:$0xf]  ;;  %v2669_v6 = vor.u32 %v3209_v55, %v2666_v58  ;;  %v752_v58 = vunpack.c.h.b16 %v4123_v30 }
 0x153   : > { %1958 = vmatmul.bf16.gmra.mxu1 %v2565_v62  ;;  %v1825_v15 = vpop.f32.mrf.mxu2 }
 0x154   : > { %v1868_v12 = vpop.f32.mrf.mxu3  ;;  %3136 = vmatmul.msk.bf16.gmra.mxu0 %vm1531_vm0, %v2577_v8  ;;  %v1826_v60 = vadd.f32 %v1825_v15, %v1783_v9  ;;  %v2673_v8 = vor.u32 %v3216_v0, %v2672_v61  ;;  %v2681_v9 = vor.u32 %v3217_v52, %v2680_v4 }
 0x156   : > { %v1869_v20 = vadd.f32 %v1868_v12, %v1826_v60 }
 0x158   : > { %v1784_v18 = vpop.f32.mrf.mxu1  ;;  %v4178_v17 = vadd.f32 %v1911_v38, %v1869_v20 }
 0x159   : > { %v1785_v43 = vadd.f32 %v1784_v18, %v4066_v3  ;;  %v1913_v63 = vpop.f32.mrf.mxu0 }
 0x15b   : > { %v1827_v37 = vpop.f32.mrf.mxu2 }
 0x15c   : > { %v1870_v29 = vpop.f32.mrf.mxu3  ;;  %v1828_v39 = vadd.f32 %v1827_v37, %v1785_v43  ;;  %v2732_v37 = vld [vmem:[%s3655_s17 + $0x238] sm:$0xf] }
 0x15e   : > { %v1871_v3 = vadd.f32 %v1870_v29, %v1828_v39  ;;  %v3222_v29 = vld [vmem:[%s3655_s17 + $0x22c] sm:$0xf] }
 0x15f   : > { %v3230_v39 = vld [vmem:[%s3655_s17 + $0x268] sm:$0xf0] }
 0x160   : > { %v1787_v14 = vpop.f32.mrf.mxu1  ;;  %2006 = vmatmul.bf16.gmra.mxu2 %v2621_v41  ;;  %v4186_v46 = vadd.f32 %v1913_v63, %v1871_v3 }
 0x161   : > { %v1788_v24 = vadd.f32 %v1787_v14, %v4080_v19  ;;  %2049 = vmatmul.bf16.gmra.mxu3 %v2625_v34  ;;  %v1916_v44 = vpop.f32.mrf.mxu0  ;;  %v2724_v34 = vld [vmem:[%s3655_s17 + $0x230] sm:$0xf]  ;;  %v2721_v14 = vor.u32 %v3222_v29, %v2718_v33 }
 0x163   : > { %1963 = vmatmul.bf16.gmra.mxu1 %v2617_v40  ;;  %v1830_v48 = vpop.f32.mrf.mxu2 }
 0x164   : > { %v1873_v47 = vpop.f32.mrf.mxu3  ;;  %3137 = vmatmul.msk.bf16.gmra.mxu0 %vm1531_vm0, %v2629_v11  ;;  %v1831_v49 = vadd.f32 %v1830_v48, %v1788_v24  ;;  %v2725_v11 = vor.u32 %v3229_v35, %v2724_v34 }
 0x166   : > { %v1874_v22 = vadd.f32 %v1873_v47, %v1831_v49 }
 0x168   : > { %v1789_v50 = vpop.f32.mrf.mxu1  ;;  %v4193_v57 = vadd.f32 %v1916_v44, %v1874_v22  ;;  %v290_v22 = vld [vmem:[%s3655_s17 + $0x298] sm:$0xff] }
 0x169   : > { %v1790_v19 = vadd.f32 %v1789_v50, %v4094_v42  ;;  %v1918_v2 = vpop.f32.mrf.mxu0  ;;  %v753_v61 = vunpack.c.l.b16 %v290_v22 }
 0x16b   : > { %v1832_v62 = vpop.f32.mrf.mxu2 }
 0x16c   : > { %v1875_v56 = vpop.f32.mrf.mxu3  ;;  %v1833_v5 = vadd.f32 %v1832_v62, %v1790_v19 }
 0x16e   : > { %v1876_v42 = vadd.f32 %v1875_v56, %v1833_v5  ;;  %v754_v56 = vunpack.c.h.b16 %v290_v22 }
 0x170   : > { %v1792_v27 = vpop.f32.mrf.mxu1  ;;  %2011 = vmatmul.bf16.gmra.mxu2 %v2673_v8  ;;  %v4201_v15 = vadd.f32 %v1918_v2, %v1876_v42  ;;  %v845_v52 = vpack.c.b16 %v754_v56, %v754_v56  ;;  %v844_v8 = vpack.c.b16 %v753_v61, %v753_v61 }
 0x171   : > { %v1793_v38 = vadd.f32 %v1792_v27, %v4110_v23  ;;  %2054 = vmatmul.bf16.gmra.mxu3 %v2677_v1  ;;  %v1921_v12 = vpop.f32.mrf.mxu0 }
 0x173   : > { %1968 = vmatmul.bf16.gmra.mxu1 %v2669_v6  ;;  %v1835_v18 = vpop.f32.mrf.mxu2  ;;  %v843_v6 = vpack.c.b16 %v752_v58, %v752_v58 }
 0x174   : > { %v1878_v60 = vpop.f32.mrf.mxu3  ;;  %3138 = vmatmul.msk.bf16.gmra.mxu0 %vm1531_vm0, %v2681_v9  ;;  %v1836_v20 = vadd.f32 %v1835_v18, %v1793_v38 }
 0x176   : > { %v1879_v63 = vadd.f32 %v1878_v60, %v1836_v20 }
 0x178   : > { %v1794_v43 = vpop.f32.mrf.mxu1  ;;  %v4208_v59 = vadd.f32 %v1921_v12, %v1879_v63 }
 0x179   : > { %v1795_v23 = vadd.f32 %v1794_v43, %v4118_v16  ;;  %v1923_v21 = vpop.f32.mrf.mxu0  ;;  %v2733_v16 = vor.u32 %v3230_v39, %v2732_v37 }
 0x17b   : > { %v1837_v40 = vpop.f32.mrf.mxu2 }
 0x17c   : > { %v1880_v31 = vpop.f32.mrf.mxu3  ;;  %v1838_v41 = vadd.f32 %v1837_v40, %v1795_v23 }
 0x17e   : > { %v1881_v24 = vadd.f32 %v1880_v31, %v1838_v41 }
 0x180   : > { %v1797_v3 = vpop.f32.mrf.mxu1  ;;  %2016 = vmatmul.bf16.gmra.mxu2 %v2725_v11  ;;  %v4216_v48 = vadd.f32 %v1923_v21, %v1881_v24 }
 0x181   : > { %v1798_v44 = vadd.f32 %v1797_v3, %v4126_v32  ;;  %2059 = vmatmul.bf16.gmra.mxu3 %v2729_v36  ;;  %v1926_v47 = vpop.f32.mrf.mxu0  ;;  %v291_v32 = vld [vmem:[%s3655_s17 + $0x2a0] sm:$0xf]  ;;  %s175_s17 = sand.u32 1, %s3535_s12   ;;  %s2159_s12 = ssub.s32 (%p3622_p4), 25, %s3636_s27 }
 0x182   : > { %v755_v4 = vunpack.c.l.b16 %v291_v32  ;;  %s3391_s11 = smul.u32 52, %s175_s17  ;;  %p2160_p8 = scmp.lt.s32.totalorder (%p3622_p4), %s2159_s12, 13 }
 0x183   : > { %1973 = vmatmul.bf16.gmra.mxu1 %v2721_v14  ;;  %v1840_v50 = vpop.f32.mrf.mxu2 }
 0x184   : > { %v1883_v49 = vpop.f32.mrf.mxu3  ;;  %3139 = vmatmul.msk.bf16.gmra.mxu0 %vm1531_vm0, %v2733_v16  ;;  %v1841_v19 = vadd.f32 %v1840_v50, %v1798_v44  ;;  %v846_v9 = vpack.c.b16 %v755_v4, %v755_v4  ;;  %s4241_s14 = scalar_lea.vmem [#allocation2], %s3391_s11  }
 0x186   : > { %v1884_v51 = vadd.f32 %v1883_v49, %v1841_v19 }
 0x188   : > { %v1799_v2 = vpop.f32.mrf.mxu1  ;;  %v4223_v0 = vadd.f32 %v1926_v47, %v1884_v51 }
 0x189   : > { %v1800_v53 = vadd.f32 %v1799_v2, %v4130_v45  ;;  %v1928_v55 = vpop.f32.mrf.mxu0 }
 0x18b   : > { %v1842_v62 = vpop.f32.mrf.mxu2 }
 0x18c   : > { %v1885_v1 = vpop.f32.mrf.mxu3  ;;  %v1843_v5 = vadd.f32 %v1842_v62, %v1800_v53 }
 0x18e   : > { %v1886_v42 = vadd.f32 %v1885_v1, %v1843_v5 }
 0x190   : > { %v1802_v27 = vpop.f32.mrf.mxu1  ;;  %2021 = vmatmul.bf16.gmra.mxu2 %v844_v8  ;;  %v4226_v30 = vadd.f32 %v1928_v55, %v1886_v42 }
 0x191   : > { %v1803_v45 = vadd.f32 %v1802_v27, %v4136_v7  ;;  %2064 = vmatmul.bf16.gmra.mxu3 %v845_v52  ;;  %v1931_v38 = vpop.f32.mrf.mxu0 }
 0x193   : > { %1978 = vmatmul.bf16.gmra.mxu1 %v843_v6  ;;  %v1845_v60 = vpop.f32.mrf.mxu2 }
 0x194   : > { %v1888_v12 = vpop.f32.mrf.mxu3  ;;  %3140 = vmatmul.msk.bf16.gmra.mxu0 %vm1531_vm0, %v846_v9  ;;  %v1846_v18 = vadd.f32 %v1845_v60, %v1803_v45 }
 0x196   : > { %v1889_v43 = vadd.f32 %v1888_v12, %v1846_v18 }
 0x198   : > { %v1804_v20 = vpop.f32.mrf.mxu1  ;;  %v4230_v21 = vadd.f32 %v1931_v38, %v1889_v43 }
 0x199   : > { %v1805_v63 = vadd.f32 %v1804_v20, %v4144_v13  ;;  %v1933_v23 = vpop.f32.mrf.mxu0 }
 0x19b   : > { %v1847_v7 = vpop.f32.mrf.mxu2 }
 0x19c   : > { %v1890_v25 = vpop.f32.mrf.mxu3  ;;  %v1848_v26 = vadd.f32 %v1847_v7, %v1805_v63 }
 0x19e   : > { %v1891_v31 = vadd.f32 %v1890_v25, %v1848_v26 }
 0x1a0   : > { %v1807_v29 = vpop.f32.mrf.mxu1  ;;  %v4233_v35 = vadd.f32 %v1933_v23, %v1891_v31 }
 0x1a1   : > { %v1808_v33 = vadd.f32 %v1807_v29, %v4150_v28  ;;  %v1936_v34 = vpop.f32.mrf.mxu0 }
 0x1a3   : > { %v1850_v37 = vpop.f32.mrf.mxu2 }
 0x1a4   : > { %v1893_v36 = vpop.f32.mrf.mxu3  ;;  %v1851_v39 = vadd.f32 %v1850_v37, %v1808_v33 }
 0x1a6   : > { %v1894_v41 = vadd.f32 %v1893_v36, %v1851_v39 }
 0x1a8   : > { %v1809_v40 = vpop.f32.mrf.mxu1  ;;  %v4235_v13 = vadd.f32 %v1936_v34, %v1894_v41 }
 0x1a9   : > { %v1938_v14 = vpop.f32.mrf.mxu0 }
 0x1ab   : > { %v1852_v3 = vpop.f32.mrf.mxu2 }
 0x1ac   : > { %v1895_v11 = vpop.f32.mrf.mxu3 }
 0x1b0   : > { %v1949_v16 = vpop.f32.mrf.mxu1 }
 0x1b1   : > { %v2078_v24 = vpop.f32.mrf.mxu0  ;;  %v1950_v28 = vadd.f32 %v1949_v16, %v4163_v54 }
 0x1b3   : > { %v1992_v47 = vpop.f32.mrf.mxu2 }
 0x1b4   : > { %v2035_v44 = vpop.f32.mrf.mxu3  ;;  %v1993_v50 = vadd.f32 %v1992_v47, %v1950_v28 }
 0x1b6   : > { %v2036_v2 = vadd.f32 %v2035_v44, %v1993_v50 }
 0x1b8   : > { %v1951_v49 = vpop.f32.mrf.mxu1  ;;  %v2079_v32 = vadd.f32 %v2078_v24, %v2036_v2 }
 0x1b9   : > { %v2080_v22 = vpop.f32.mrf.mxu0  ;;  %v1952_v51 = vadd.f32 %v1951_v49, %v4171_v10 }
 0x1ba   : > { %v2112_v52 = vmax.f32 %v2079_v32, 0.0 }
 0x1bb   : > { %v1994_v53 = vpop.f32.mrf.mxu2 }
 0x1bc   : > { %v2037_v19 = vpop.f32.mrf.mxu3  ;;  %v1995_v55 = vadd.f32 %v1994_v53, %v1952_v51 }
 0x1be   : > { %v2038_v58 = vadd.f32 %v2037_v19, %v1995_v55 }
 0x1c0   : > { %v1954_v56 = vpop.f32.mrf.mxu1  ;;  %v2081_v1 = vadd.f32 %v2080_v22, %v2038_v58 }
 0x1c1   : > { %v2083_v61 = vpop.f32.mrf.mxu0  ;;  %v1955_v6 = vadd.f32 %v1954_v56, %v4178_v17 }
 0x1c2   : > { %v2113_v62 = vmax.f32 %v2081_v1, 0.0 }
 0x1c3   : > { %v1997_v54 = vpop.f32.mrf.mxu2 }
 0x1c4   : > { %v2040_v4 = vpop.f32.mrf.mxu3  ;;  %v3335_v5 = vpack.c.bf16 %v2113_v62, %v2112_v52  ;;  %v1998_v10 = vadd.f32 %v1997_v54, %v1955_v6 }
 0x1c6   : > { %3336 = vst [vmem:[%s4241_s14] sm:$0xff] %v3335_v5   ;;  %v2041_v42 = vadd.f32 %v2040_v4, %v1998_v10 }
 0x1c8   : > { %v1956_v8 = vpop.f32.mrf.mxu1  ;;  %v2084_v18 = vadd.f32 %v2083_v61, %v2041_v42 }
 0x1c9   : > { %v2085_v27 = vpop.f32.mrf.mxu0  ;;  %v1957_v45 = vadd.f32 %v1956_v8, %v4186_v46 }
 0x1ca   : > { %v2114_v23 = vmax.f32 %v2084_v18, 0.0 }
 0x1cb   : > { %v1999_v38 = vpop.f32.mrf.mxu2 }
 0x1cc   : > { %v2042_v9 = vpop.f32.mrf.mxu3  ;;  %v2000_v12 = vadd.f32 %v1999_v38, %v1957_v45 }
 0x1ce   : > { %v2043_v20 = vadd.f32 %v2042_v9, %v2000_v12 }
 0x1d0   : > { %v1959_v60 = vpop.f32.mrf.mxu1  ;;  %v2086_v63 = vadd.f32 %v2085_v27, %v2043_v20 }
 0x1d1   : > { %v2088_v43 = vpop.f32.mrf.mxu0  ;;  %v1960_v29 = vadd.f32 %v1959_v60, %v4193_v57 }
 0x1d2   : > { %v2115_v25 = vmax.f32 %v2086_v63, 0.0 }
 0x1d3   : > { %v2002_v7 = vpop.f32.mrf.mxu2 }
 0x1d4   : > { %v2045_v17 = vpop.f32.mrf.mxu3  ;;  %v3340_v26 = vpack.c.bf16 %v2115_v25, %v2114_v23  ;;  %v2003_v33 = vadd.f32 %v2002_v7, %v1960_v29 }
 0x1d6   : > { %3362 = vst [vmem:[%s4241_s14 + $0x8] sm:$0xff] %v3340_v26   ;;  %v2046_v46 = vadd.f32 %v2045_v17, %v2003_v33 }
 0x1d8   : > { %v1961_v31 = vpop.f32.mrf.mxu1  ;;  %v2089_v14 = vadd.f32 %v2088_v43, %v2046_v46 }
 0x1d9   : > { %v2090_v34 = vpop.f32.mrf.mxu0  ;;  %v1962_v37 = vadd.f32 %v1961_v31, %v4201_v15 }
 0x1da   : > { %v2116_v44 = vmax.f32 %v2089_v14, 0.0 }
 0x1db   : > { %v2004_v39 = vpop.f32.mrf.mxu2 }
 0x1dc   : > { %v2047_v36 = vpop.f32.mrf.mxu3  ;;  %v2005_v40 = vadd.f32 %v2004_v39, %v1962_v37 }
 0x1de   : > { %v2048_v11 = vadd.f32 %v2047_v36, %v2005_v40 }
 0x1e0   : > { %v1964_v41 = vpop.f32.mrf.mxu1  ;;  %v2091_v16 = vadd.f32 %v2090_v34, %v2048_v11 }
 0x1e1   : > { %v2093_v3 = vpop.f32.mrf.mxu0  ;;  %v1965_v49 = vadd.f32 %v1964_v41, %v4208_v59 }
 0x1e2   : > { %v2117_v47 = vmax.f32 %v2091_v16, 0.0 }
 0x1e3   : > { %v2007_v57 = vpop.f32.mrf.mxu2 }
 0x1e4   : > { %v2050_v24 = vpop.f32.mrf.mxu3  ;;  %v3345_v28 = vpack.c.bf16 %v2117_v47, %v2116_v44  ;;  %v2008_v22 = vadd.f32 %v2007_v57, %v1965_v49 }
 0x1e6   : > { %3363 = vst [vmem:[%s4241_s14 + $0x10] sm:$0xff] %v3345_v28   ;;  %v2051_v15 = vadd.f32 %v2050_v24, %v2008_v22 }
 0x1e8   : > { %v1966_v50 = vpop.f32.mrf.mxu1  ;;  %v2094_v32 = vadd.f32 %v2093_v3, %v2051_v15 }
 0x1e9   : > { %v2095_v19 = vpop.f32.mrf.mxu0  ;;  %v1967_v51 = vadd.f32 %v1966_v50, %v4216_v48 }
 0x1ea   : > { %v2118_v52 = vmax.f32 %v2094_v32, 0.0 }
 0x1eb   : > { %v2009_v53 = vpop.f32.mrf.mxu2 }
 0x1ec   : > { %v2052_v2 = vpop.f32.mrf.mxu3  ;;  %v2010_v55 = vadd.f32 %v2009_v53, %v1967_v51 }
 0x1ee   : > { %v2053_v58 = vadd.f32 %v2052_v2, %v2010_v55 }
 0x1f0   : > { %v1969_v56 = vpop.f32.mrf.mxu1  ;;  %v2096_v1 = vadd.f32 %v2095_v19, %v2053_v58 }
 0x1f1   : > { %v2098_v61 = vpop.f32.mrf.mxu0  ;;  %v1970_v5 = vadd.f32 %v1969_v56, %v4223_v0 }
 0x1f2   : > { %v2119_v62 = vmax.f32 %v2096_v1, 0.0 }
 0x1f3   : > { %v2012_v59 = vpop.f32.mrf.mxu2 }
 0x1f4   : > { %v2055_v4 = vpop.f32.mrf.mxu3  ;;  %v3350_v54 = vpack.c.bf16 %v2119_v62, %v2118_v52  ;;  %v2013_v8 = vadd.f32 %v2012_v59, %v1970_v5 }
 0x1f6   : > { %3364 = vst [vmem:[%s4241_s14 + $0x18] sm:$0xff] %v3350_v54   ;;  %v2056_v48 = vadd.f32 %v2055_v4, %v2013_v8 }
 0x1f8   : > { %v1971_v6 = vpop.f32.mrf.mxu1  ;;  %v2099_v12 = vadd.f32 %v2098_v61, %v2056_v48 }
 0x1f9   : > { %v2100_v10 = vpop.f32.mrf.mxu0  ;;  %v1972_v9 = vadd.f32 %v1971_v6, %v4226_v30 }
 0x1fa   : > { %v2120_v63 = vmax.f32 %v2099_v12, 0.0 }
 0x1fb   : > { %v2014_v42 = vpop.f32.mrf.mxu2 }
 0x1fc   : > { %v2057_v27 = vpop.f32.mrf.mxu3  ;;  %v2015_v45 = vadd.f32 %v2014_v42, %v1972_v9 }
 0x1fe   : > { %v2058_v60 = vadd.f32 %v2057_v27, %v2015_v45 }
 0x200   : > { %v1974_v38 = vpop.f32.mrf.mxu1  ;;  %v2101_v20 = vadd.f32 %v2100_v10, %v2058_v60 }
 0x201   : > { %v2103_v18 = vpop.f32.mrf.mxu0  ;;  %v1975_v25 = vadd.f32 %v1974_v38, %v4230_v21 }
 0x202   : > { %v2121_v17 = vmax.f32 %v2101_v20, 0.0 }
 0x203   : > { %v2017_v0 = vpop.f32.mrf.mxu2 }
 0x204   : > { %v2060_v43 = vpop.f32.mrf.mxu3  ;;  %v3355_v23 = vpack.c.bf16 %v2121_v17, %v2120_v63  ;;  %v2018_v26 = vadd.f32 %v2017_v0, %v1975_v25 }
 0x206   : > { %3365 = vst [vmem:[%s4241_s14 + $0x20] sm:$0xff] %v3355_v23   ;;  %v2061_v30 = vadd.f32 %v2060_v43, %v2018_v26 }
 0x208   : > { %v1976_v7 = vpop.f32.mrf.mxu1  ;;  %v2104_v37 = vadd.f32 %v2103_v18, %v2061_v30 }
 0x209   : > { %v2105_v29 = vpop.f32.mrf.mxu0  ;;  %v1977_v33 = vadd.f32 %v1976_v7, %v4233_v35 }
 0x20a   : > { %v2122_v11 = vmax.f32 %v2104_v37, 0.0 }
 0x20b   : > { %v2019_v34 = vpop.f32.mrf.mxu2 }
 0x20c   : > { %v2062_v31 = vpop.f32.mrf.mxu3  ;;  %v2020_v36 = vadd.f32 %v2019_v34, %v1977_v33 }
 0x20e   : > { %v2063_v39 = vadd.f32 %v2062_v31, %v2020_v36 }
 0x210   : > { %v1979_v46 = vpop.f32.mrf.mxu1  ;;  %v2106_v41 = vadd.f32 %v2105_v29, %v2063_v39 }
 0x211   : > { %v2108_v40 = vpop.f32.mrf.mxu0  ;;  %v1980_v3 = vadd.f32 %v1979_v46, %v4235_v13 }
 0x212   : > { %v2123_v21 = vmax.f32 %v2106_v41, 0.0 }
 0x213   : > { %v2022_v16 = vpop.f32.mrf.mxu2 }
 0x214   : > { %v2065_v14 = vpop.f32.mrf.mxu3  ;;  %v3360_v24 = vpack.c.bf16 %v2123_v21, %v2122_v11  ;;  %v2023_v44 = vadd.f32 %v2022_v16, %v1980_v3 }
 0x216   : > { %3366 = vst [vmem:[%s4241_s14 + $0x28] sm:$0xff] %v3360_v24   ;;  %v2066_v35 = vadd.f32 %v2065_v14, %v2023_v44 }
 0x218   : > { %v1981_v47 = vpop.f32.mrf.mxu1  ;;  %v2109_v28 = vadd.f32 %v2108_v40, %v2066_v35 }
 0x219   : > { %v2110_v57 = vpop.f32.mrf.mxu0 }
 0x21a   : > { %v2124_v50 = vmax.f32 %v2109_v28, 0.0  ;;  %2157 = sbr.rel (!%p3622_p4) target bundleno = 603 (0x25b), region = 36 }
 0x21b   : > { %v2024_v22 = vpop.f32.mrf.mxu2 }
 0x21c   : > { %v2067_v49 = vpop.f32.mrf.mxu3  ;;  %v2137_v19 = vpack.c.bf16 %v2124_v50, %v2124_v50 }
 0x21e   : > { %2150 = vst [vmem:[%s4241_s14 + $0x30] sm:$0xf] %v2137_v19 }
 0x21f   : > { %s4351_s12 = smov (!%p2160_p8, %s2159_s12), 13 }
 0x220   : > { %s3141_s24 = sshll.u32 %s4351_s12, 2 }
 0x221   : > { %p3144_p9 = scmp.eq.s32.totalorder %s3141_s24, 0 }
 0x222   : > { %3483 = sdivrem.u32 (!%p3144_p9), %s4351_s12, 13 }
 0x223   : > { %2168 = sbr.rel (%p3144_p9) target bundleno = 603 (0x25b), region = 40 }
 0x22b   : > { %s4273_s20 = spop.drf %3483 }
 0x22c   : > { %s3485_s25 = spop.drf %3483  ;;  %p3145_p10 = scmp.le.s32.totalorder %s4273_s20, 0 }
 0x22d   : > { %s4343_s15 = smov (!%p3145_p10), %s4267_s23  ;;  %s4344_s27 = smov (!%p3145_p10), %s4241_s14 }
 0x22e   : > { %2373 = sbr.rel (%p3145_p10) target bundleno = 577 (0x241), region = 112  ;;  %s4282_s26 = smov (!%p3145_p10), 0  }
 0x22f   : > { %s4284_s28 = smov (!%p3145_p10), 0  }
 0x233 LB: >> { %v2186_v13 = vld [vmem:[%s3551_s27] sm:$0xf]  ;;  %v2188_v2 = vld [vmem:[%s3551_s27 + $0x4] sm:$0xf]  ;;  %v2190_v15 = vld [vmem:[%s3551_s27 + $0x8] sm:$0xf]  ;;  %s3559_s28 = sphi %s4284_s28, %s2180_s28   ;;  %s3555_s26 = sphi %s4282_s26, %s4346_s26   ;;  %s3551_s27 = sphi %s4344_s27, %s2217_s27   ;;  %s3547_s15 = sphi %s4343_s15, %s4345_s15  }
 0x234   : >> { %2187 = vst [vmem:[%s3547_s15] sm:$0xf] %v2186_v13  ;;  %v2192_v51 = vld [vmem:[%s3551_s27 + $0xc] sm:$0xf]  ;;  %s2212_s29 = sadd.s32 1, %s3555_s26  ;;  %v2194_v53 = vld [vmem:[%s3551_s27 + $0x10] sm:$0xf] }
 0x235   : >> { %2189 = vst [vmem:[%s3547_s15 + $0x4] sm:$0xf] %v2188_v2  ;;  %p2213_p11 = scmp.ge.s32.totalorder %s2212_s29, %s4273_s20  ;;  %v2196_v55 = vld [vmem:[%s3551_s27 + $0x14] sm:$0xf]  ;;  %v2198_v56 = vld [vmem:[%s3551_s27 + $0x18] sm:$0xf] }
 0x236   : >> { %2191 = vst [vmem:[%s3547_s15 + $0x8] sm:$0xf] %v2190_v15  ;;  %v2200_v32 = vld [vmem:[%s3551_s27 + $0x1c] sm:$0xf]  ;;  %v2202_v58 = vld [vmem:[%s3551_s27 + $0x20] sm:$0xf] }
 0x237   : >> { %2193 = vst [vmem:[%s3547_s15 + $0xc] sm:$0xf] %v2192_v51  ;;  %s4353_s29 = smov (%p2213_p11, %s2212_s29), 0  ;;  %v2204_v61 = vld [vmem:[%s3551_s27 + $0x24] sm:$0xf]  ;;  %s2180_s28 = sadd.s32 1, %s3559_s28  }
 0x238   : >> { %2195 = vst [vmem:[%s3547_s15 + $0x10] sm:$0xf] %v2194_v53  ;;  %v2206_v1 = vld [vmem:[%s3551_s27 + $0x28] sm:$0xf]  ;;  %s2215_s30 = smul.u32 52, %s4353_s29  ;;  %p2179_p12 = scmp.ge.s32.totalorder %s2180_s28, %s4273_s20 }
 0x239   : >> { %2197 = vst [vmem:[%s3547_s15 + $0x14] sm:$0xf] %v2196_v55  ;;  %v2208_v4 = vld [vmem:[%s3551_s27 + $0x2c] sm:$0xf]  ;;  %v2210_v52 = vld [vmem:[%s3551_s27 + $0x30] sm:$0xf]  ;;  %s4346_s26 = smov %s4353_s29 }
 0x23a   : >> { %2199 = vst [vmem:[%s3547_s15 + $0x18] sm:$0xf] %v2198_v56  ;;  %s2217_s27 = scalar_lea.vmem %s4241_s14, %s2215_s30 [#allocation2]   ;;  %s2218_s4 = scalar_lea.vmem %s4267_s23, %s2215_s30  }
 0x23b   : >> { %2201 = vst [vmem:[%s3547_s15 + $0x1c] sm:$0xf] %v2200_v32 }
 0x23c   : >> { %2203 = vst [vmem:[%s3547_s15 + $0x20] sm:$0xf] %v2202_v58  ;;  %2182 = sbr.rel (!%p2179_p12) target bundleno = 563 (0x233), region = 118 }
 0x23d   : >> { %2205 = vst [vmem:[%s3547_s15 + $0x24] sm:$0xf] %v2204_v61 }
 0x23e   : >> { %2207 = vst [vmem:[%s3547_s15 + $0x28] sm:$0xf] %v2206_v1 }
 0x23f   : >> { %2209 = vst [vmem:[%s3547_s15 + $0x2c] sm:$0xf] %v2208_v4 }
 0x240   : >> { %2211 = vst [vmem:[%s3547_s15 + $0x30] sm:$0xf] %v2210_v52  ;;  %s4345_s15 = smov %s2218_s4 }
 0x241 PF: > { %3486 = sdivrem.u32 %s4351_s12, 13 }
 0x242   : > { %s3146_s5 = smul.u32 52, %s4273_s20 }
 0x244   : > { %s4323_s6 = scalar_lea.vmem %s4241_s14, %s3146_s5 [#allocation2]   ;;  %s2225_s7 = scalar_lea.vmem %s4267_s23, %s3146_s5  }
 0x24a   : > { %s3487_s8 = spop.drf %3486 }
 0x24b   : > { %s3488_s9 = spop.drf %3486 }
 0x24c   : > { %p3148_p13 = scmp.le.s32.totalorder %s3488_s9, 0 }
 0x24d   : > { %s3561_s10 = smov (!%p3148_p13), %s2225_s7   ;;  %s3565_s17 = smov (!%p3148_p13), %s4323_s6  }
 0x24e   : > { %2387 = sbr.rel (%p3148_p13) target bundleno = 603 (0x25b), region = 123  ;;  %s3569_s11 = smov (!%p3148_p13), 0  }
 0x24f   : > { %s3573_s18 = smov (!%p3148_p13), 0  }
 0x253 LB: >> { %v2235_v62 = vld [vmem:[%s3567_s17] sm:$0xf]  ;;  %s2237_s14 = sadd.s32 1, %s3571_s11  ;;  %s2229_s18 = sadd.s32 1, %s3575_s18   ;;  %s3575_s18 = sphi %s3573_s18, %s2229_s18   ;;  %s3571_s11 = sphi %s3569_s11, %s3570_s11   ;;  %s3567_s17 = sphi %s3565_s17, %s2242_s17   ;;  %s3563_s10 = sphi %s3561_s10, %s2243_s10  }
 0x254   : >> { %2236 = vst [vmem:[%s3563_s10] sm:$0xf] %v2235_v62  ;;  %p2238_p0 = scmp.ge.s32.totalorder %s2237_s14, %s3488_s9  ;;  %p2228_p1 = scmp.ge.s32.totalorder %s2229_s18, %s3488_s9 }
 0x256   : >> { %s4355_s14 = smov (%p2238_p0, %s2237_s14), 0  ;;  %2231 = sbr.rel (!%p2228_p1) target bundleno = 595 (0x253), region = 129 }
 0x257   : >> { %s3149_s12 = sshll.u32 %s4355_s14, 2  ;;  %s3570_s11 = smov %s4355_s14  }
 0x258   : >> { %s2242_s17 = scalar_lea.vmem %s4323_s6, %s3149_s12 [#allocation2]   ;;  %s2243_s10 = scalar_lea.vmem %s2225_s7, %s3149_s12  }
 0x25b PF: > { %p10_p2 = scmp.ge.s32.totalorder %s3612_s16, 4   ;;  %s4347_s12 = smov %s3539_s13 }
 0x25c   : > { %s4348_s13 = smov %s3620_s19  ;;  %s4349_s14 = smov %s3612_s16 }
 0x25d   :  { %12 = sbr.rel (!%p10_p2) target bundleno = 2 (0x2), region = 140 }

// kernel: forward.5
= control target key start
LH: loop header
LB: loop body
LE: loop exit
PB: predicated region body
PF: predicated region fallthrough
CT: control target
= control target key end

     0   :  { %vm3532_vm0 = vcmask 261120   ;;  %vm3514_vm1 = vcmask 523264   ;;  %vm3654_vm2 = vcmask 1046528   ;;  %vm3594_vm3 = vsmask.f32 7424  ;;  %s10828_s1 = inlined_call_operand.vmem [shape: bf16[3200,256], index: 1, kind: input, shape index: {}]   ;;  %s10829_s0 = inlined_call_operand.vmem [shape: bf16[16,3200], index: 0, kind: input, shape index: {}]   ;;  %s10830_s2 = inlined_call_operand.vmem [shape: f32[1,256], index: 2, kind: input, shape index: {}]   ;;  %s10831_s3 = inlined_call_operand.vmem [shape: bf16[256,64], index: 3, kind: input, shape index: {}]   ;;  %s10832_s4 = inlined_call_operand.vmem [shape: f32[1,64], index: 4, kind: input, shape index: {}]   ;;  %s10833_s5 = inlined_call_operand.vmem [shape: bf16[64,32], index: 5, kind: input, shape index: {}]   ;;  %s10834_s6 = inlined_call_operand.vmem [shape: f32[1,32], index: 6, kind: input, shape index: {}]   ;;  %s10835_s7 = inlined_call_operand.vmem [shape: bf16[5,32,16], index: 7, kind: input, shape index: {}]   ;;  %s10836_s8 = inlined_call_operand.vmem [shape: f32[1,16], index: 8, kind: input, shape index: {}]   ;;  %s10837_s10 = inlined_call_operand.vmem [shape: f32[1,16], index: 10, kind: input, shape index: {}]   ;;  %s10838_s9 = inlined_call_operand.vmem [shape: bf16[5,16,16], index: 9, kind: input, shape index: {}]   ;;  %s10839_s12 = inlined_call_operand.vmem [shape: f32[1,16], index: 12, kind: input, shape index: {}]   ;;  %s10840_s11 = inlined_call_operand.vmem [shape: bf16[5,16,16], index: 11, kind: input, shape index: {}]   ;;  %s10841_s14 = inlined_call_operand.vmem [shape: f32[1,6], index: 14, kind: input, shape index: {}]   ;;  %s10842_s13 = inlined_call_operand.vmem [shape: bf16[5,16,6], index: 13, kind: input, shape index: {}]   ;;  %s10843_s15 = inlined_call_operand.vmem [shape: f32[2,8,6], index: 15, kind: output, shape index: {}]  }
   0x1   :  { %v5173_v0 = vld [vmem:[%s10828_s1 + $0x70] sm:$0xf]  ;;  %v7167_v1 = vld [vmem:[%s10828_s1 + $0x74] sm:$0xf0]  ;;  %v5165_v11 = vld [vmem:[%s10828_s1 + $0x60] sm:$0xf] }
   0x2   :  { %v5237_v2 = vld [vmem:[%s10828_s1 + $0xf0] sm:$0xf]  ;;  %v5174_v3 = vor.u32 %v7167_v1, %v5173_v0  ;;  %v7183_v4 = vld [vmem:[%s10828_s1 + $0xf4] sm:$0xf0]  ;;  %v7165_v13 = vld [vmem:[%s10828_s1 + $0x64] sm:$0xf0] }
   0x3   :  { %v5301_v5 = vld [vmem:[%s10828_s1 + $0x170] sm:$0xf]  ;;  %v7199_v6 = vld [vmem:[%s10828_s1 + $0x174] sm:$0xf0]  ;;  %v5238_v7 = vor.u32 %v7183_v4, %v5237_v2  ;;  %v5229_v14 = vld [vmem:[%s10828_s1 + $0xe0] sm:$0xf]  ;;  %v5166_v16 = vor.u32 %v7165_v13, %v5165_v11 }
   0x4   :  { %v5302_v8 = vor.u32 %v7199_v6, %v5301_v5  ;;  %v5365_v9 = vld [vmem:[%s10828_s1 + $0x1f0] sm:$0xf]  ;;  %v7215_v10 = vld [vmem:[%s10828_s1 + $0x1f4] sm:$0xf0]  ;;  %2609 = vmatpush.bf16.msra.mxu0 %v5174_v3  ;;  %v7181_v15 = vld [vmem:[%s10828_s1 + $0xe4] sm:$0xf0] }
   0x5   :  { %v5366_v12 = vor.u32 %v7215_v10, %v5365_v9  ;;  %2623 = vmatpush.bf16.msra.mxu1 %v5238_v7  ;;  %v5230_v17 = vor.u32 %v7181_v15, %v5229_v14  ;;  %v5293_v18 = vld [vmem:[%s10828_s1 + $0x160] sm:$0xf]  ;;  %v7197_v19 = vld [vmem:[%s10828_s1 + $0x164] sm:$0xf0]  ;;  %v5157_v23 = vld [vmem:[%s10828_s1 + $0x50] sm:$0xf] }
   0x6   :  { %2637 = vmatpush.bf16.msra.mxu2 %v5302_v8  ;;  %v5357_v20 = vld [vmem:[%s10828_s1 + $0x1e0] sm:$0xf]  ;;  %v5294_v21 = vor.u32 %v7197_v19, %v5293_v18  ;;  %v7213_v22 = vld [vmem:[%s10828_s1 + $0x1e4] sm:$0xf0]  ;;  %v7163_v24 = vld [vmem:[%s10828_s1 + $0x54] sm:$0xf0] }
   0x7   :  { %2651 = vmatpush.bf16.msra.mxu3 %v5366_v12  ;;  %v5358_v25 = vor.u32 %v7213_v22, %v5357_v20  ;;  %v5221_v26 = vld [vmem:[%s10828_s1 + $0xd0] sm:$0xf]  ;;  %v7179_v27 = vld [vmem:[%s10828_s1 + $0xd4] sm:$0xf0]  ;;  %v5158_v29 = vor.u32 %v7163_v24, %v5157_v23  ;;  %v5149_v35 = vld [vmem:[%s10828_s1 + $0x40] sm:$0xf] }
   0x8   :  { %v5285_v28 = vld [vmem:[%s10828_s1 + $0x150] sm:$0xf]  ;;  %2610 = vmatpush.bf16.msra.mxu0 %v5166_v16  ;;  %v7195_v30 = vld [vmem:[%s10828_s1 + $0x154] sm:$0xf0]  ;;  %v5222_v33 = vor.u32 %v7179_v27, %v5221_v26  ;;  %v7161_v36 = vld [vmem:[%s10828_s1 + $0x44] sm:$0xf0] }
   0x9   :  { %v5349_v31 = vld [vmem:[%s10828_s1 + $0x1d0] sm:$0xf]  ;;  %v7211_v32 = vld [vmem:[%s10828_s1 + $0x1d4] sm:$0xf0]  ;;  %2624 = vmatpush.bf16.msra.mxu1 %v5230_v17  ;;  %v5286_v34 = vor.u32 %v7195_v30, %v5285_v28  ;;  %v5213_v37 = vld [vmem:[%s10828_s1 + $0xc0] sm:$0xf]  ;;  %v5150_v44 = vor.u32 %v7161_v36, %v5149_v35 }
   0xa   :  { %2638 = vmatpush.bf16.msra.mxu2 %v5294_v21  ;;  %v5350_v38 = vor.u32 %v7211_v32, %v5349_v31  ;;  %v7177_v39 = vld [vmem:[%s10828_s1 + $0xc4] sm:$0xf0]  ;;  %v5277_v40 = vld [vmem:[%s10828_s1 + $0x140] sm:$0xf]  ;;  %v5141_v47 = vld [vmem:[%s10828_s1 + $0x30] sm:$0xf] }
   0xb   :  { %2652 = vmatpush.bf16.msra.mxu3 %v5358_v25  ;;  %v7193_v41 = vld [vmem:[%s10828_s1 + $0x144] sm:$0xf0]  ;;  %v5341_v42 = vld [vmem:[%s10828_s1 + $0x1c0] sm:$0xf]  ;;  %v5214_v45 = vor.u32 %v7177_v39, %v5213_v37  ;;  %v7159_v48 = vld [vmem:[%s10828_s1 + $0x34] sm:$0xf0] }
   0xc   :  { %v7209_v43 = vld [vmem:[%s10828_s1 + $0x1c4] sm:$0xf0]  ;;  %2611 = vmatpush.bf16.msra.mxu0 %v5158_v29  ;;  %v5278_v46 = vor.u32 %v7193_v41, %v5277_v40  ;;  %v5205_v49 = vld [vmem:[%s10828_s1 + $0xb0] sm:$0xf]  ;;  %v7175_v51 = vld [vmem:[%s10828_s1 + $0xb4] sm:$0xf0]  ;;  %v5142_v56 = vor.u32 %v7159_v48, %v5141_v47 }
   0xd   :  { %2625 = vmatpush.bf16.msra.mxu1 %v5222_v33  ;;  %v5342_v50 = vor.u32 %v7209_v43, %v5341_v42  ;;  %v5269_v52 = vld [vmem:[%s10828_s1 + $0x130] sm:$0xf]  ;;  %v7191_v53 = vld [vmem:[%s10828_s1 + $0x134] sm:$0xf0]  ;;  %v5206_v57 = vor.u32 %v7175_v51, %v5205_v49  ;;  %v5133_v59 = vld [vmem:[%s10828_s1 + $0x20] sm:$0xf] }
   0xe   :  { %2639 = vmatpush.bf16.msra.mxu2 %v5286_v34  ;;  %v5333_v54 = vld [vmem:[%s10828_s1 + $0x1b0] sm:$0xf]  ;;  %v7207_v55 = vld [vmem:[%s10828_s1 + $0x1b4] sm:$0xf0]  ;;  %v5270_v58 = vor.u32 %v7191_v53, %v5269_v52  ;;  %v7157_v60 = vld [vmem:[%s10828_s1 + $0x24] sm:$0xf0] }
   0xf   :  { %2653 = vmatpush.bf16.msra.mxu3 %v5350_v38  ;;  %v5197_v61 = vld [vmem:[%s10828_s1 + $0xa0] sm:$0xf]  ;;  %v5334_v62 = vor.u32 %v7207_v55, %v5333_v54  ;;  %v7173_v63 = vld [vmem:[%s10828_s1 + $0xa4] sm:$0xf0]  ;;  %v5134_v4 = vor.u32 %v7157_v60, %v5133_v59  ;;  %v5125_v7 = vld [vmem:[%s10828_s1 + $0x10] sm:$0xf] }
  0x10   :  { %2612 = vmatpush.bf16.msra.mxu0 %v5150_v44  ;;  %v5261_v0 = vld [vmem:[%s10828_s1 + $0x120] sm:$0xf]  ;;  %v7189_v1 = vld [vmem:[%s10828_s1 + $0x124] sm:$0xf0]  ;;  %v5198_v5 = vor.u32 %v7173_v63, %v5197_v61  ;;  %v7155_v8 = vld [vmem:[%s10828_s1 + $0x14] sm:$0xf0] }
  0x11   :  { %2626 = vmatpush.bf16.msra.mxu1 %v5214_v45  ;;  %v5325_v2 = vld [vmem:[%s10828_s1 + $0x1a0] sm:$0xf]  ;;  %v7205_v3 = vld [vmem:[%s10828_s1 + $0x1a4] sm:$0xf0]  ;;  %v5262_v6 = vor.u32 %v7189_v1, %v5261_v0  ;;  %v5189_v9 = vld [vmem:[%s10828_s1 + $0x90] sm:$0xf]  ;;  %v5126_v16 = vor.u32 %v7155_v8, %v5125_v7 }
  0x12   :  { %2640 = vmatpush.bf16.msra.mxu2 %v5278_v46  ;;  %v5326_v10 = vor.u32 %v7205_v3, %v5325_v2  ;;  %v7171_v11 = vld [vmem:[%s10828_s1 + $0x94] sm:$0xf0]  ;;  %v5253_v12 = vld [vmem:[%s10828_s1 + $0x110] sm:$0xf]  ;;  %v5117_v17 = vld [vmem:[%s10828_s1] sm:$0xf] }
  0x13   :  { %2654 = vmatpush.bf16.msra.mxu3 %v5342_v50  ;;  %v7187_v13 = vld [vmem:[%s10828_s1 + $0x114] sm:$0xf0]  ;;  %v5317_v14 = vld [vmem:[%s10828_s1 + $0x190] sm:$0xf]  ;;  %v7153_v18 = vld [vmem:[%s10828_s1 + $0x4] sm:$0xf0]  ;;  %v5190_v19 = vor.u32 %v7171_v11, %v5189_v9 }
  0x14   :  { %2613 = vmatpush.bf16.msra.mxu0 %v5142_v56  ;;  %v7203_v15 = vld [vmem:[%s10828_s1 + $0x194] sm:$0xf0]  ;;  %v5254_v20 = vor.u32 %v7187_v13, %v5253_v12  ;;  %v5181_v21 = vld [vmem:[%s10828_s1 + $0x80] sm:$0xf]  ;;  %v7169_v22 = vld [vmem:[%s10828_s1 + $0x84] sm:$0xf0]  ;;  %v5118_v31 = vor.u32 %v7153_v18, %v5117_v17 }
  0x15   :  { %2627 = vmatpush.bf16.msra.mxu1 %v5206_v57  ;;  %v5245_v23 = vld [vmem:[%s10828_s1 + $0x100] sm:$0xf]  ;;  %v5318_v24 = vor.u32 %v7203_v15, %v5317_v14  ;;  %v7185_v25 = vld [vmem:[%s10828_s1 + $0x104] sm:$0xf0]  ;;  %v5429_v26 = vld [vmem:[%s10828_s1 + $0x270] sm:$0xf]  ;;  %v5182_v35 = vor.u32 %v7169_v22, %v5181_v21 }
  0x16   :  { %2641 = vmatpush.bf16.msra.mxu2 %v5270_v58  ;;  %v7231_v27 = vld [vmem:[%s10828_s1 + $0x274] sm:$0xf0]  ;;  %v5493_v28 = vld [vmem:[%s10828_s1 + $0x2f0] sm:$0xf]  ;;  %v5309_v33 = vld [vmem:[%s10828_s1 + $0x180] sm:$0xf]  ;;  %v5246_v36 = vor.u32 %v7185_v25, %v5245_v23 }
  0x17   :  { %2655 = vmatpush.bf16.msra.mxu3 %v5334_v62  ;;  %v7247_v29 = vld [vmem:[%s10828_s1 + $0x2f4] sm:$0xf0]  ;;  %v5557_v30 = vld [vmem:[%s10828_s1 + $0x370] sm:$0xf]  ;;  %v7201_v34 = vld [vmem:[%s10828_s1 + $0x184] sm:$0xf0]  ;;  %v5430_v39 = vor.u32 %v7231_v27, %v5429_v26 }
  0x18   :  { %2614 = vmatpush.bf16.msra.mxu0 %v5134_v4  ;;  %v7263_v32 = vld [vmem:[%s10828_s1 + $0x374] sm:$0xf0]  ;;  %v5621_v37 = vld [vmem:[%s10828_s1 + $0x3f0] sm:$0xf]  ;;  %v5494_v40 = vor.u32 %v7247_v29, %v5493_v28  ;;  %v5421_v41 = vld [vmem:[%s10828_s1 + $0x260] sm:$0xf]  ;;  %v5310_v44 = vor.u32 %v7201_v34, %v5309_v33 }
  0x19   :  { %2628 = vmatpush.bf16.msra.mxu1 %v5198_v5  ;;  %v7279_v38 = vld [vmem:[%s10828_s1 + $0x3f4] sm:$0xf0]  ;;  %v7229_v42 = vld [vmem:[%s10828_s1 + $0x264] sm:$0xf0]  ;;  %v5558_v43 = vor.u32 %v7263_v32, %v5557_v30  ;;  %v5485_v45 = vld [vmem:[%s10828_s1 + $0x2e0] sm:$0xf] }
  0x1a   :  { %2642 = vmatpush.bf16.msra.mxu2 %v5262_v6  ;;  %v7245_v46 = vld [vmem:[%s10828_s1 + $0x2e4] sm:$0xf0]  ;;  %v5549_v47 = vld [vmem:[%s10828_s1 + $0x360] sm:$0xf]  ;;  %v5622_v48 = vor.u32 %v7279_v38, %v5621_v37  ;;  %v5413_v52 = vld [vmem:[%s10828_s1 + $0x250] sm:$0xf]  ;;  %v5422_v56 = vor.u32 %v7229_v42, %v5421_v41 }
  0x1b   :  { %2656 = vmatpush.bf16.msra.mxu3 %v5326_v10  ;;  %v7261_v49 = vld [vmem:[%s10828_s1 + $0x364] sm:$0xf0]  ;;  %v5613_v50 = vld [vmem:[%s10828_s1 + $0x3e0] sm:$0xf]  ;;  %v7139_v54 = vld [vmem:[%s10829_s0 + $0x60] sm:$0xf0]  ;;  %v5486_v57 = vor.u32 %v7245_v46, %v5485_v45 }
  0x1c   :  { %2615 = vmatpush.bf16.msra.mxu0 %v5126_v16  ;;  %v7277_v51 = vld [vmem:[%s10828_s1 + $0x3e4] sm:$0xf0]  ;;  %v5017_v53 = vld [vmem:[%s10829_s0] sm:$0xf]  ;;  %v7227_v58 = vld [vmem:[%s10828_s1 + $0x254] sm:$0xf0]  ;;  %v5550_v62 = vor.u32 %v7261_v49, %v5549_v47 }
  0x1d   :  { %2629 = vmatpush.bf16.msra.mxu1 %v5190_v19  ;;  %v5025_v55 = vld [vmem:[%s10829_s0 + $0x8] sm:$0xf]  ;;  %v5477_v59 = vld [vmem:[%s10828_s1 + $0x2d0] sm:$0xf]  ;;  %v7972_v60 = vor.u32 %v7139_v54, %v5017_v53  ;;  %v7140_v61 = vld [vmem:[%s10829_s0 + $0x68] sm:$0xf0]  ;;  %v5614_v3 = vor.u32 %v7277_v51, %v5613_v50  ;;  %v5414_v11 = vor.u32 %v7227_v58, %v5413_v52 }
  0x1e   :  { %2643 = vmatpush.bf16.msra.mxu2 %v5254_v20  ;;  %v7243_v63 = vld [vmem:[%s10828_s1 + $0x2d4] sm:$0xf0]  ;;  %v5541_v0 = vld [vmem:[%s10828_s1 + $0x350] sm:$0xf]  ;;  %v7986_v2 = vor.u32 %v7140_v61, %v5025_v55  ;;  %v7127_v5 = vld [vmem:[%s10829_s0 + $0x4] sm:$0xf] }
  0x1f   :  { %2657 = vmatpush.bf16.msra.mxu3 %v5318_v24  ;;  %v7259_v1 = vld [vmem:[%s10828_s1 + $0x354] sm:$0xf0]  ;;  %v5605_v4 = vld [vmem:[%s10828_s1 + $0x3d0] sm:$0xf]  ;;  %v5019_v6 = vld [vmem:[%s10829_s0 + $0x64] sm:$0xf0]  ;;  %v5478_v12 = vor.u32 %v7243_v63, %v5477_v59 }
  0x20   :  { %2616 = vmatpush.bf16.msra.mxu0 %v5118_v31  ;;  %v7275_v7 = vld [vmem:[%s10828_s1 + $0x3d4] sm:$0xf0]  ;;  %v8002_v8 = vor.u32 %v7127_v5, %v5019_v6  ;;  %v7128_v9 = vld [vmem:[%s10829_s0 + $0xc] sm:$0xf]  ;;  %v5027_v10 = vld [vmem:[%s10829_s0 + $0x6c] sm:$0xf0]  ;;  %v5542_v15 = vor.u32 %v7259_v1, %v5541_v0 }
  0x21   :  { %2630 = vmatpush.bf16.msra.mxu1 %v5182_v35  ;;  %v5405_v13 = vld [vmem:[%s10828_s1 + $0x240] sm:$0xf]  ;;  %v8013_v14 = vor.u32 %v7128_v9, %v5027_v10  ;;  %v7225_v16 = vld [vmem:[%s10828_s1 + $0x244] sm:$0xf0]  ;;  %v5606_v19 = vor.u32 %v7275_v7, %v5605_v4  ;;  %v5397_v26 = vld [vmem:[%s10828_s1 + $0x230] sm:$0xf] }
  0x22   :  { %2644 = vmatpush.bf16.msra.mxu2 %v5246_v36  ;;  %v5469_v17 = vld [vmem:[%s10828_s1 + $0x2c0] sm:$0xf]  ;;  %v7241_v18 = vld [vmem:[%s10828_s1 + $0x2c4] sm:$0xf0]  ;;  %v5406_v24 = vor.u32 %v7225_v16, %v5405_v13  ;;  %v7223_v28 = vld [vmem:[%s10828_s1 + $0x234] sm:$0xf0] }
  0x23   :  { %2658 = vmatpush.bf16.msra.mxu3 %v5310_v44  ;;  %2617 = vmatmul.bf16.vlgmr.msra.gmra.mxu0 %v7972_v60  ;;  %v5533_v20 = vld [vmem:[%s10828_s1 + $0x340] sm:$0xf]  ;;  %v7257_v21 = vld [vmem:[%s10828_s1 + $0x344] sm:$0xf0]  ;;  %v5470_v25 = vor.u32 %v7241_v18, %v5469_v17  ;;  %v5461_v29 = vld [vmem:[%s10828_s1 + $0x2b0] sm:$0xf]  ;;  %v5398_v36 = vor.u32 %v7223_v28, %v5397_v26 }
  0x24   :  { %2665 = vmatpush.bf16.msrb.mxu0 %v5430_v39  ;;  %2631 = vmatmul.bf16.vlgmr.msra.gmra.mxu1 %v8002_v8  ;;  %v5597_v22 = vld [vmem:[%s10828_s1 + $0x3c0] sm:$0xf]  ;;  %v7273_v23 = vld [vmem:[%s10828_s1 + $0x3c4] sm:$0xf0]  ;;  %v5534_v27 = vor.u32 %v7257_v21, %v5533_v20  ;;  %v7239_v30 = vld [vmem:[%s10828_s1 + $0x2b4] sm:$0xf0] }
  0x25   :  { %2679 = vmatpush.bf16.msrb.mxu1 %v5494_v40  ;;  %2645 = vmatmul.bf16.vlgmr.msra.gmra.mxu2 %v7986_v2  ;;  %v5598_v31 = vor.u32 %v7273_v23, %v5597_v22  ;;  %v5525_v32 = vld [vmem:[%s10828_s1 + $0x330] sm:$0xf]  ;;  %v7255_v33 = vld [vmem:[%s10828_s1 + $0x334] sm:$0xf0]  ;;  %v5462_v37 = vor.u32 %v7239_v30, %v5461_v29  ;;  %v5389_v38 = vld [vmem:[%s10828_s1 + $0x220] sm:$0xf] }
  0x26   :  { %2693 = vmatpush.bf16.msrb.mxu2 %v5558_v43  ;;  %2659 = vmatmul.bf16.vlgmr.msra.gmra.mxu3 %v8013_v14  ;;  %v5589_v34 = vld [vmem:[%s10828_s1 + $0x3b0] sm:$0xf]  ;;  %v7271_v35 = vld [vmem:[%s10828_s1 + $0x3b4] sm:$0xf0]  ;;  %v5526_v39 = vor.u32 %v7255_v33, %v5525_v32  ;;  %v7221_v40 = vld [vmem:[%s10828_s1 + $0x224] sm:$0xf0] }
  0x27   :  { %2707 = vmatpush.bf16.msrb.mxu3 %v5622_v48  ;;  %v5453_v41 = vld [vmem:[%s10828_s1 + $0x2a0] sm:$0xf]  ;;  %v7237_v42 = vld [vmem:[%s10828_s1 + $0x2a4] sm:$0xf0]  ;;  %v5590_v43 = vor.u32 %v7271_v35, %v5589_v34  ;;  %v5390_v48 = vor.u32 %v7221_v40, %v5389_v38  ;;  %v5381_v50 = vld [vmem:[%s10828_s1 + $0x210] sm:$0xf] }
  0x28   :  { %2666 = vmatpush.bf16.msrb.mxu0 %v5422_v56  ;;  %v5517_v44 = vld [vmem:[%s10828_s1 + $0x320] sm:$0xf]  ;;  %v7253_v45 = vld [vmem:[%s10828_s1 + $0x324] sm:$0xf0]  ;;  %v5454_v49 = vor.u32 %v7237_v42, %v5453_v41  ;;  %v7219_v51 = vld [vmem:[%s10828_s1 + $0x214] sm:$0xf0] }
  0x29   :  { %2680 = vmatpush.bf16.msrb.mxu1 %v5486_v57  ;;  %v5581_v46 = vld [vmem:[%s10828_s1 + $0x3a0] sm:$0xf]  ;;  %v7269_v47 = vld [vmem:[%s10828_s1 + $0x3a4] sm:$0xf0]  ;;  %v5518_v52 = vor.u32 %v7253_v45, %v5517_v44  ;;  %v5445_v53 = vld [vmem:[%s10828_s1 + $0x290] sm:$0xf]  ;;  %v5382_v1 = vor.u32 %v7219_v51, %v5381_v50 }
  0x2a   :  { %2694 = vmatpush.bf16.msrb.mxu2 %v5550_v62  ;;  %v7235_v54 = vld [vmem:[%s10828_s1 + $0x294] sm:$0xf0]  ;;  %v5509_v55 = vld [vmem:[%s10828_s1 + $0x310] sm:$0xf]  ;;  %v5582_v56 = vor.u32 %v7269_v47, %v5581_v46  ;;  %v5373_v61 = vld [vmem:[%s10828_s1 + $0x200] sm:$0xf] }
  0x2b   :  { %2708 = vmatpush.bf16.msrb.mxu3 %v5614_v3  ;;  %v7251_v57 = vld [vmem:[%s10828_s1 + $0x314] sm:$0xf0]  ;;  %v5573_v58 = vld [vmem:[%s10828_s1 + $0x390] sm:$0xf]  ;;  %v7217_v62 = vld [vmem:[%s10828_s1 + $0x204] sm:$0xf0]  ;;  %v5446_v3 = vor.u32 %v7235_v54, %v5445_v53 }
  0x2c   :  { %2667 = vmatpush.bf16.msrb.mxu0 %v5414_v11  ;;  %v7267_v59 = vld [vmem:[%s10828_s1 + $0x394] sm:$0xf0]  ;;  %v5437_v63 = vld [vmem:[%s10828_s1 + $0x280] sm:$0xf]  ;;  %v7233_v0 = vld [vmem:[%s10828_s1 + $0x284] sm:$0xf0]  ;;  %v5510_v7 = vor.u32 %v7251_v57, %v5509_v55  ;;  %v5374_v20 = vor.u32 %v7217_v62, %v5373_v61 }
  0x2d   :  { %2681 = vmatpush.bf16.msrb.mxu1 %v5478_v12  ;;  %v5501_v4 = vld [vmem:[%s10828_s1 + $0x300] sm:$0xf]  ;;  %v7249_v5 = vld [vmem:[%s10828_s1 + $0x304] sm:$0xf0]  ;;  %v5685_v6 = vld [vmem:[%s10828_s1 + $0x470] sm:$0xf]  ;;  %v5574_v12 = vor.u32 %v7267_v59, %v5573_v58  ;;  %v5438_v21 = vor.u32 %v7233_v0, %v5437_v63 }
  0x2e   :  { %2695 = vmatpush.bf16.msrb.mxu2 %v5542_v15  ;;  %v7295_v9 = vld [vmem:[%s10828_s1 + $0x474] sm:$0xf0]  ;;  %v5749_v10 = vld [vmem:[%s10828_s1 + $0x4f0] sm:$0xf]  ;;  %v5565_v16 = vld [vmem:[%s10828_s1 + $0x380] sm:$0xf] }
  0x2f   :  { %2709 = vmatpush.bf16.msrb.mxu3 %v5606_v19  ;;  %v7311_v11 = vld [vmem:[%s10828_s1 + $0x4f4] sm:$0xf0]  ;;  %v5813_v13 = vld [vmem:[%s10828_s1 + $0x570] sm:$0xf]  ;;  %v7265_v17 = vld [vmem:[%s10828_s1 + $0x384] sm:$0xf0]  ;;  %v5686_v26 = vor.u32 %v7295_v9, %v5685_v6 }
  0x30   :  { %2668 = vmatpush.bf16.msrb.mxu0 %v5406_v24  ;;  %v7327_v15 = vld [vmem:[%s10828_s1 + $0x574] sm:$0xf0]  ;;  %v5033_v18 = vld [vmem:[%s10829_s0 + $0x10] sm:$0xf]  ;;  %v7141_v19 = vld [vmem:[%s10829_s0 + $0x70] sm:$0xf0]  ;;  %v5750_v30 = vor.u32 %v7311_v11, %v5749_v10  ;;  %v5566_v35 = vor.u32 %v7265_v17, %v5565_v16 }
  0x31   :  { %2682 = vmatpush.bf16.msrb.mxu1 %v5470_v25  ;;  %v5041_v22 = vld [vmem:[%s10829_s0 + $0x18] sm:$0xf]  ;;  %v7142_v23 = vld [vmem:[%s10829_s0 + $0x78] sm:$0xf0]  ;;  %v5877_v24 = vld [vmem:[%s10828_s1 + $0x5f0] sm:$0xf]  ;;  %v5502_v25 = vor.u32 %v7249_v5, %v5501_v4 }
  0x32   :  { %2696 = vmatpush.bf16.msrb.mxu2 %v5534_v27  ;;  %v7343_v27 = vld [vmem:[%s10828_s1 + $0x5f4] sm:$0xf0]  ;;  %v7129_v28 = vld [vmem:[%s10829_s0 + $0x14] sm:$0xf]  ;;  %v7130_v32 = vld [vmem:[%s10829_s0 + $0x1c] sm:$0xf]  ;;  %v8196_v40 = vor.u32 %v7142_v23, %v5041_v22 }
  0x33   :  { %2710 = vmatpush.bf16.msrb.mxu3 %v5598_v31  ;;  %v5035_v29 = vld [vmem:[%s10829_s0 + $0x74] sm:$0xf0]  ;;  %v5814_v31 = vor.u32 %v7327_v15, %v5813_v13  ;;  %v5677_v33 = vld [vmem:[%s10828_s1 + $0x460] sm:$0xf]  ;;  %v7293_v34 = vld [vmem:[%s10828_s1 + $0x464] sm:$0xf0]  ;;  %v5878_v41 = vor.u32 %v7343_v27, %v5877_v24 }
  0x34   :  { %2669 = vmatpush.bf16.msrb.mxu0 %v5398_v36  ;;  %v8185_v36 = vor.u32 %v7141_v19, %v5033_v18  ;;  %v5741_v38 = vld [vmem:[%s10828_s1 + $0x4e0] sm:$0xf]  ;;  %v8204_v44 = vor.u32 %v7129_v28, %v5035_v29  ;;  %v5678_v45 = vor.u32 %v7293_v34, %v5677_v33  ;;  %v7341_v47 = vld [vmem:[%s10828_s1 + $0x5e4] sm:$0xf0]  ;;  %v5669_v50 = vld [vmem:[%s10828_s1 + $0x450] sm:$0xf] }
  0x35   :  { %2683 = vmatpush.bf16.msrb.mxu1 %v5462_v37  ;;  %v5043_v37 = vld [vmem:[%s10829_s0 + $0x7c] sm:$0xf0]  ;;  %v7291_v51 = vld [vmem:[%s10828_s1 + $0x454] sm:$0xf0]  ;;  %v5733_v53 = vld [vmem:[%s10828_s1 + $0x4d0] sm:$0xf] }
  0x36   :  { %2697 = vmatpush.bf16.msrb.mxu2 %v5526_v39  ;;  %v7309_v39 = vld [vmem:[%s10828_s1 + $0x4e4] sm:$0xf0]  ;;  %v5805_v42 = vld [vmem:[%s10828_s1 + $0x560] sm:$0xf]  ;;  %v7307_v54 = vld [vmem:[%s10828_s1 + $0x4d4] sm:$0xf0]  ;;  %v5670_v58 = vor.u32 %v7291_v51, %v5669_v50 }
  0x37   :  { %2711 = vmatpush.bf16.msrb.mxu3 %v5590_v43  ;;  %v7325_v43 = vld [vmem:[%s10828_s1 + $0x564] sm:$0xf0]  ;;  %v5869_v46 = vld [vmem:[%s10828_s1 + $0x5e0] sm:$0xf]  ;;  %v7323_v57 = vld [vmem:[%s10828_s1 + $0x554] sm:$0xf0]  ;;  %v5734_v62 = vor.u32 %v7307_v54, %v5733_v53 }
  0x38   :  { %2670 = vmatpush.bf16.msrb.mxu0 %v5390_v48  ;;  %v8212_v48 = vor.u32 %v7130_v32, %v5043_v37  ;;  %v5870_v55 = vor.u32 %v7341_v47, %v5869_v46  ;;  %v5861_v59 = vld [vmem:[%s10828_s1 + $0x5d0] sm:$0xf]  ;;  %v7339_v61 = vld [vmem:[%s10828_s1 + $0x5d4] sm:$0xf0]  ;;  %v5661_v63 = vld [vmem:[%s10828_s1 + $0x440] sm:$0xf] }
  0x39   :  { %2684 = vmatpush.bf16.msrb.mxu1 %v5454_v49  ;;  %v5742_v49 = vor.u32 %v7309_v39, %v5741_v38  ;;  %v7289_v0 = vld [vmem:[%s10828_s1 + $0x444] sm:$0xf0]  ;;  %v5862_v5 = vor.u32 %v7339_v61, %v5861_v59  ;;  %v5789_v6 = vld [vmem:[%s10828_s1 + $0x540] sm:$0xf]  ;;  %v5653_v13 = vld [vmem:[%s10828_s1 + $0x430] sm:$0xf] }
  0x3a   :  { %2698 = vmatpush.bf16.msrb.mxu2 %v5518_v52  ;;  %v5806_v52 = vor.u32 %v7325_v43, %v5805_v42  ;;  %v7305_v4 = vld [vmem:[%s10828_s1 + $0x4c4] sm:$0xf0]  ;;  %v5662_v9 = vor.u32 %v7289_v0, %v5661_v63  ;;  %v5853_v10 = vld [vmem:[%s10828_s1 + $0x5c0] sm:$0xf]  ;;  %v7287_v15 = vld [vmem:[%s10828_s1 + $0x434] sm:$0xf0] }
  0x3b   :  { %2712 = vmatpush.bf16.msrb.mxu3 %v5582_v56  ;;  %v5797_v56 = vld [vmem:[%s10828_s1 + $0x550] sm:$0xf]  ;;  %v7337_v11 = vld [vmem:[%s10828_s1 + $0x5c4] sm:$0xf0]  ;;  %v7303_v18 = vld [vmem:[%s10828_s1 + $0x4b4] sm:$0xf0]  ;;  %v5654_v22 = vor.u32 %v7287_v15, %v5653_v13 }
  0x3c   :  { %2671 = vmatpush.bf16.msrb.mxu0 %v5382_v1  ;;  %v5798_v1 = vor.u32 %v7323_v57, %v5797_v56  ;;  %v5717_v17 = vld [vmem:[%s10828_s1 + $0x4b0] sm:$0xf]  ;;  %v5854_v19 = vor.u32 %v7337_v11, %v5853_v10  ;;  %v7335_v24 = vld [vmem:[%s10828_s1 + $0x5b4] sm:$0xf0]  ;;  %v7285_v27 = vld [vmem:[%s10828_s1 + $0x424] sm:$0xf0] }
  0x3d   :  { %2685 = vmatpush.bf16.msrb.mxu1 %v5446_v3  ;;  %v5725_v3 = vld [vmem:[%s10828_s1 + $0x4c0] sm:$0xf]  ;;  %v5845_v23 = vld [vmem:[%s10828_s1 + $0x5b0] sm:$0xf]  ;;  %v7317_v33 = vld [vmem:[%s10828_s1 + $0x524] sm:$0xf0] }
  0x3e   :  { %2699 = vmatpush.bf16.msrb.mxu2 %v5510_v7  ;;  %v7321_v7 = vld [vmem:[%s10828_s1 + $0x544] sm:$0xf0]  ;;  %v5709_v29 = vld [vmem:[%s10828_s1 + $0x4a0] sm:$0xf]  ;;  %v5637_v39 = vld [vmem:[%s10828_s1 + $0x410] sm:$0xf] }
  0x3f   :  { %2713 = vmatpush.bf16.msrb.mxu3 %v5574_v12  ;;  %v5726_v12 = vor.u32 %v7305_v4, %v5725_v3  ;;  %v5790_v16 = vor.u32 %v7321_v7, %v5789_v6  ;;  %v5773_v32 = vld [vmem:[%s10828_s1 + $0x520] sm:$0xf]  ;;  %v7333_v37 = vld [vmem:[%s10828_s1 + $0x5a4] sm:$0xf0]  ;;  %v5701_v42 = vld [vmem:[%s10828_s1 + $0x490] sm:$0xf] }
  0x40   :  { %2672 = vmatpush.bf16.msrb.mxu0 %v5374_v20  ;;  %v5781_v20 = vld [vmem:[%s10828_s1 + $0x530] sm:$0xf]  ;;  %v5774_v43 = vor.u32 %v7317_v33, %v5773_v32  ;;  %v7315_v47 = vld [vmem:[%s10828_s1 + $0x514] sm:$0xf0]  ;;  %v7281_v54 = vld [vmem:[%s10828_s1 + $0x404] sm:$0xf0] }
  0x41   :  { %2686 = vmatpush.bf16.msrb.mxu1 %v5438_v21  ;;  %v7319_v21 = vld [vmem:[%s10828_s1 + $0x534] sm:$0xf0]  ;;  %v5765_v46 = vld [vmem:[%s10828_s1 + $0x510] sm:$0xf]  ;;  %v7297_v56 = vld [vmem:[%s10828_s1 + $0x484] sm:$0xf0] }
  0x42   :  { %2700 = vmatpush.bf16.msrb.mxu2 %v5502_v25  ;;  %v5718_v25 = vor.u32 %v7303_v18, %v5717_v17  ;;  %v5782_v28 = vor.u32 %v7319_v21, %v5781_v20  ;;  %v5829_v50 = vld [vmem:[%s10828_s1 + $0x590] sm:$0xf]  ;;  %v7331_v51 = vld [vmem:[%s10828_s1 + $0x594] sm:$0xf0]  ;;  %v7313_v59 = vld [vmem:[%s10828_s1 + $0x504] sm:$0xf0]  ;;  %v5766_v0 = vor.u32 %v7315_v47, %v5765_v46 }
  0x43   :  { %2714 = vmatpush.bf16.msrb.mxu3 %v5566_v35  ;;  %2673 = vmatmul.bf16.vlgmr.msrb.gmra.mxu0 %v8185_v36  ;;  %v5837_v35 = vld [vmem:[%s10828_s1 + $0x5a0] sm:$0xf]  ;;  %v5941_v61 = vld [vmem:[%s10828_s1 + $0x670] sm:$0xf]  ;;  %v7391_v4 = vld [vmem:[%s10828_s1 + $0x774] sm:$0xf0] }
  0x44   :  { %2721 = vmatpush.bf16.msra.mxu0 %v5686_v26  ;;  %2687 = vmatmul.bf16.vlgmr.msrb.gmra.mxu1 %v8204_v44  ;;  %v5645_v26 = vld [vmem:[%s10828_s1 + $0x420] sm:$0xf]  ;;  %v6005_v63 = vld [vmem:[%s10828_s1 + $0x6f0] sm:$0xf]  ;;  %v7329_v7 = vld [vmem:[%s10828_s1 + $0x584] sm:$0xf0] }
  0x45   :  { %2735 = vmatpush.bf16.msra.mxu1 %v5750_v30  ;;  %2701 = vmatmul.bf16.vlgmr.msrb.gmra.mxu2 %v8196_v40  ;;  %v7301_v30 = vld [vmem:[%s10828_s1 + $0x4a4] sm:$0xf0]  ;;  %v5646_v34 = vor.u32 %v7285_v27, %v5645_v26  ;;  %v6069_v3 = vld [vmem:[%s10828_s1 + $0x770] sm:$0xf]  ;;  %v5821_v6 = vld [vmem:[%s10828_s1 + $0x580] sm:$0xf] }
  0x46   :  { %2749 = vmatpush.bf16.msra.mxu2 %v5814_v31  ;;  %2715 = vmatmul.bf16.vlgmr.msrb.gmra.mxu3 %v8212_v48  ;;  %v5846_v31 = vor.u32 %v7335_v24, %v5845_v23  ;;  %v5710_v38 = vor.u32 %v7301_v30, %v5709_v29  ;;  %v7143_v11 = vld [vmem:[%s10829_s0 + $0x80] sm:$0xf0]  ;;  %v7144_v13 = vld [vmem:[%s10829_s0 + $0x88] sm:$0xf0]  ;;  %v6133_v17 = vld [vmem:[%s10828_s1 + $0x7f0] sm:$0xf]  ;;  %v5822_v26 = vor.u32 %v7329_v7, %v5821_v6 }
  0x47   :  { %2763 = vmatpush.bf16.msra.mxu3 %v5878_v41  ;;  %v7283_v41 = vld [vmem:[%s10828_s1 + $0x414] sm:$0xf0]  ;;  %v7132_v23 = vld [vmem:[%s10829_s0 + $0x2c] sm:$0xf]  ;;  %v5059_v24 = vld [vmem:[%s10829_s0 + $0x8c] sm:$0xf0] }
  0x48   :  { %2722 = vmatpush.bf16.msra.mxu0 %v5678_v45  ;;  %v7299_v45 = vld [vmem:[%s10828_s1 + $0x494] sm:$0xf0]  ;;  %v5638_v53 = vor.u32 %v7283_v41, %v5637_v39  ;;  %v5933_v27 = vld [vmem:[%s10828_s1 + $0x660] sm:$0xf]  ;;  %v7373_v32 = vld [vmem:[%s10828_s1 + $0x6e4] sm:$0xf0]  ;;  %v8440_v41 = vor.u32 %v7132_v23, %v5059_v24 }
  0x49   :  { %2736 = vmatpush.bf16.msra.mxu1 %v5742_v49  ;;  %v5838_v49 = vor.u32 %v7333_v37, %v5837_v35  ;;  %v5702_v57 = vor.u32 %v7299_v45, %v5701_v42  ;;  %v7407_v18 = vld [vmem:[%s10828_s1 + $0x7f4] sm:$0xf0]  ;;  %v5997_v29 = vld [vmem:[%s10828_s1 + $0x6e0] sm:$0xf]  ;;  %v7405_v39 = vld [vmem:[%s10828_s1 + $0x7e4] sm:$0xf0] }
  0x4a   :  { %2750 = vmatpush.bf16.msra.mxu2 %v5806_v52  ;;  %v5629_v52 = vld [vmem:[%s10828_s1 + $0x400] sm:$0xf]  ;;  %v5925_v46 = vld [vmem:[%s10828_s1 + $0x650] sm:$0xf]  ;;  %v7355_v47 = vld [vmem:[%s10828_s1 + $0x654] sm:$0xf0] }
  0x4b   :  { %2764 = vmatpush.bf16.msra.mxu3 %v5870_v55  ;;  %v5693_v55 = vld [vmem:[%s10828_s1 + $0x480] sm:$0xf]  ;;  %v5630_v10 = vor.u32 %v7281_v54, %v5629_v52  ;;  %v6053_v52 = vld [vmem:[%s10828_s1 + $0x750] sm:$0xf]  ;;  %v7349_v24 = vld [vmem:[%s10828_s1 + $0x624] sm:$0xf0] }
  0x4c   :  { %2723 = vmatpush.bf16.msra.mxu0 %v5670_v58  ;;  %v5757_v58 = vld [vmem:[%s10828_s1 + $0x500] sm:$0xf]  ;;  %v5694_v15 = vor.u32 %v7297_v56, %v5693_v55  ;;  %v6117_v54 = vld [vmem:[%s10828_s1 + $0x7d0] sm:$0xf]  ;;  %v7403_v55 = vld [vmem:[%s10828_s1 + $0x7d4] sm:$0xf0]  ;;  %v5926_v56 = vor.u32 %v7355_v47, %v5925_v46 }
  0x4d   :  { %2737 = vmatpush.bf16.msra.mxu1 %v5734_v62  ;;  %v7359_v62 = vld [vmem:[%s10828_s1 + $0x674] sm:$0xf0]  ;;  %v5758_v20 = vor.u32 %v7313_v59, %v5757_v58  ;;  %v6061_v33 = vld [vmem:[%s10828_s1 + $0x760] sm:$0xf]  ;;  %v6021_v47 = vld [vmem:[%s10828_s1 + $0x710] sm:$0xf] }
  0x4e   :  { %2751 = vmatpush.bf16.msra.mxu2 %v5798_v1  ;;  %v7375_v1 = vld [vmem:[%s10828_s1 + $0x6f4] sm:$0xf0]  ;;  %v5917_v59 = vld [vmem:[%s10828_s1 + $0x640] sm:$0xf]  ;;  %vm3702_vm4 = vsmask.f32 6400 }
  0x4f   :  { %2765 = vmatpush.bf16.msra.mxu3 %v5862_v5  ;;  %v5830_v5 = vor.u32 %v7331_v51, %v5829_v50  ;;  %v6006_v21 = vor.u32 %v7375_v1, %v6005_v63  ;;  %v7371_v51 = vld [vmem:[%s10828_s1 + $0x6d4] sm:$0xf0]  ;;  %v6118_v63 = vor.u32 %v7403_v55, %v6117_v54  ;;  %v6045_v1 = vld [vmem:[%s10828_s1 + $0x740] sm:$0xf]  ;;  %vm3754_vm5 = vcmask 1045504  }
  0x50   :  { %2724 = vmatpush.bf16.msra.mxu0 %v5662_v9  ;;  %v5049_v9 = vld [vmem:[%s10829_s0 + $0x20] sm:$0xf]  ;;  %vm3810_vm6 = vcmask 130048   ;;  %vm4282_vm7 = vcmask 48128  }
  0x51   :  { %2738 = vmatpush.bf16.msra.mxu1 %v5726_v12  ;;  %v5057_v12 = vld [vmem:[%s10829_s0 + $0x28] sm:$0xf]  ;;  %v8419_v30 = vor.u32 %v7143_v11, %v5049_v9  ;;  %v7351_v11 = vld [vmem:[%s10828_s1 + $0x634] sm:$0xf0]  ;;  %v5901_v23 = vld [vmem:[%s10828_s1 + $0x620] sm:$0xf] }
  0x52   :  { %2752 = vmatpush.bf16.msra.mxu2 %v5790_v16  ;;  %v5942_v16 = vor.u32 %v7359_v62, %v5941_v61  ;;  %v8430_v35 = vor.u32 %v7144_v13, %v5057_v12  ;;  %v7353_v61 = vld [vmem:[%s10828_s1 + $0x644] sm:$0xf0]  ;;  %v5981_v62 = vld [vmem:[%s10828_s1 + $0x6c0] sm:$0xf]  ;;  %v5973_v12 = vld [vmem:[%s10828_s1 + $0x6b0] sm:$0xf] }
  0x53   :  { %2766 = vmatpush.bf16.msra.mxu3 %v5854_v19  ;;  %v7131_v19 = vld [vmem:[%s10829_s0 + $0x24] sm:$0xf]  ;;  %v5918_v6 = vor.u32 %v7353_v61, %v5917_v59  ;;  %v5949_v55 = vld [vmem:[%s10828_s1 + $0x680] sm:$0xf] }
  0x54   :  { %2725 = vmatpush.bf16.msra.mxu0 %v5654_v22  ;;  %v5051_v22 = vld [vmem:[%s10829_s0 + $0x84] sm:$0xf0] }
  0x55   :  { %2739 = vmatpush.bf16.msra.mxu1 %v5718_v25  ;;  %v6070_v25 = vor.u32 %v7391_v4, %v6069_v3  ;;  %v8432_v37 = vor.u32 %v7131_v19, %v5051_v22  ;;  %v7385_v3 = vld [vmem:[%s10828_s1 + $0x744] sm:$0xf0]  ;;  %v6109_v4 = vld [vmem:[%s10828_s1 + $0x7c0] sm:$0xf]  ;;  %v7399_v19 = vld [vmem:[%s10828_s1 + $0x7b4] sm:$0xf0] }
  0x56   :  { %2753 = vmatpush.bf16.msra.mxu2 %v5782_v28  ;;  %v7357_v28 = vld [vmem:[%s10828_s1 + $0x664] sm:$0xf0]  ;;  %v6046_v9 = vor.u32 %v7385_v3, %v6045_v1  ;;  %v7439_v3 = vld [vmem:[%s10828_s1 + $0x8f4] sm:$0xf0] }
  0x57   :  { %2767 = vmatpush.bf16.msra.mxu3 %v5846_v31  ;;  %v6134_v31 = vor.u32 %v7407_v18, %v6133_v17  ;;  %v5934_v42 = vor.u32 %v7357_v28, %v5933_v27  ;;  %v7383_v17 = vld [vmem:[%s10828_s1 + $0x734] sm:$0xf0]  ;;  %v6101_v18 = vld [vmem:[%s10828_s1 + $0x7b0] sm:$0xf]  ;;  %v7365_v27 = vld [vmem:[%s10828_s1 + $0x6a4] sm:$0xf0] }
  0x58   :  { %2726 = vmatpush.bf16.msra.mxu0 %v5646_v34  ;;  %v7389_v34 = vld [vmem:[%s10828_s1 + $0x764] sm:$0xf0]  ;;  %v6029_v28 = vld [vmem:[%s10828_s1 + $0x720] sm:$0xf] }
  0x59   :  { %2740 = vmatpush.bf16.msra.mxu1 %v5710_v38  ;;  %v6125_v38 = vld [vmem:[%s10828_s1 + $0x7e0] sm:$0xf]  ;;  %v6062_v45 = vor.u32 %v7389_v34, %v6061_v33  ;;  %v5902_v33 = vor.u32 %v7349_v24, %v5901_v23  ;;  %v5893_v34 = vld [vmem:[%s10828_s1 + $0x610] sm:$0xf]  ;;  %v7134_v23 = vld [vmem:[%s10829_s0 + $0x3c] sm:$0xf] }
  0x5a   :  { %2754 = vmatpush.bf16.msra.mxu2 %v5774_v43  ;;  %v5998_v43 = vor.u32 %v7373_v32, %v5997_v29  ;;  %v6126_v50 = vor.u32 %v7405_v39, %v6125_v38  ;;  %v7381_v29 = vld [vmem:[%s10828_s1 + $0x724] sm:$0xf0]  ;;  %v5075_v24 = vld [vmem:[%s10829_s0 + $0x9c] sm:$0xf0] }
  0x5b   :  { %2768 = vmatpush.bf16.msra.mxu3 %v5838_v49  ;;  %v5989_v49 = vld [vmem:[%s10828_s1 + $0x6d0] sm:$0xf]  ;;  %v7397_v32 = vld [vmem:[%s10828_s1 + $0x7a4] sm:$0xf0]  ;;  %v6030_v39 = vor.u32 %v7381_v29, %v6029_v28  ;;  %v6253_v29 = vld [vmem:[%s10828_s1 + $0x8e0] sm:$0xf] }
  0x5c   :  { %2727 = vmatpush.bf16.msra.mxu0 %v5638_v53  ;;  %v7387_v53 = vld [vmem:[%s10828_s1 + $0x754] sm:$0xf0]  ;;  %v7421_v28 = vld [vmem:[%s10828_s1 + $0x864] sm:$0xf0] }
  0x5d   :  { %2741 = vmatpush.bf16.msra.mxu1 %v5702_v57  ;;  %v5990_v57 = vor.u32 %v7371_v51, %v5989_v49  ;;  %v6054_v58 = vor.u32 %v7387_v53, %v6053_v52  ;;  %v7379_v49 = vld [vmem:[%s10828_s1 + $0x714] sm:$0xf0]  ;;  %v5885_v52 = vld [vmem:[%s10828_s1 + $0x600] sm:$0xf]  ;;  %v7345_v53 = vld [vmem:[%s10828_s1 + $0x604] sm:$0xf0] }
  0x5e   :  { %2755 = vmatpush.bf16.msra.mxu2 %v5766_v0  ;;  %v7369_v0 = vld [vmem:[%s10828_s1 + $0x6c4] sm:$0xf0]  ;;  %v7395_v51 = vld [vmem:[%s10828_s1 + $0x794] sm:$0xf0]  ;;  %v6022_v61 = vor.u32 %v7379_v49, %v6021_v47 }
  0x5f   :  { %2769 = vmatpush.bf16.msra.mxu3 %v5830_v5  ;;  %v7401_v5 = vld [vmem:[%s10828_s1 + $0x7c4] sm:$0xf0]  ;;  %v5982_v7 = vor.u32 %v7369_v0, %v5981_v62  ;;  %v6197_v62 = vld [vmem:[%s10828_s1 + $0x870] sm:$0xf] }
  0x60   :  { %2728 = vmatpush.bf16.msra.mxu0 %v5630_v10  ;;  %v5909_v10 = vld [vmem:[%s10828_s1 + $0x630] sm:$0xf]  ;;  %v6110_v13 = vor.u32 %v7401_v5, %v6109_v4  ;;  %v7455_v5 = vld [vmem:[%s10828_s1 + $0x974] sm:$0xf0]  ;;  %v7469_v47 = vld [vmem:[%s10828_s1 + $0x9e4] sm:$0xf0] }
  0x61   :  { %2742 = vmatpush.bf16.msra.mxu1 %v5694_v15  ;;  %v7367_v15 = vld [vmem:[%s10828_s1 + $0x6b4] sm:$0xf0]  ;;  %v6261_v0 = vld [vmem:[%s10828_s1 + $0x8f0] sm:$0xf] }
  0x62   :  { %2756 = vmatpush.bf16.msra.mxu2 %v5758_v20  ;;  %v5910_v20 = vor.u32 %v7351_v11, %v5909_v10  ;;  %v6325_v4 = vld [vmem:[%s10828_s1 + $0x970] sm:$0xf]  ;;  %v5886_v10 = vor.u32 %v7345_v53, %v5885_v52  ;;  %v7145_v11 = vld [vmem:[%s10829_s0 + $0x90] sm:$0xf0]  ;;  %v7419_v52 = vld [vmem:[%s10828_s1 + $0x854] sm:$0xf0] }
  0x63   :  { %2770 = vmatpush.bf16.msra.mxu3 %v5822_v26  ;;  %2729 = vmatmul.bf16.vlgmr.msra.gmra.mxu0 %v8419_v30  ;;  %v6102_v26 = vor.u32 %v7399_v19, %v6101_v18  ;;  %v7471_v18 = vld [vmem:[%s10828_s1 + $0x9f4] sm:$0xf0]  ;;  %v7133_v19 = vld [vmem:[%s10829_s0 + $0x34] sm:$0xf]  ;;  %v6245_v53 = vld [vmem:[%s10828_s1 + $0x8d0] sm:$0xf] }
  0x64   :  { %2777 = vmatpush.bf16.msrb.mxu0 %v5942_v16  ;;  %2743 = vmatmul.bf16.vlgmr.msra.gmra.mxu1 %v8432_v37  ;;  %v6037_v16 = vld [vmem:[%s10828_s1 + $0x730] sm:$0xf] }
  0x65   :  { %2791 = vmatpush.bf16.msrb.mxu1 %v6006_v21  ;;  %2757 = vmatmul.bf16.vlgmr.msra.gmra.mxu2 %v8430_v35  ;;  %v5974_v21 = vor.u32 %v7367_v15, %v5973_v12  ;;  %v6038_v22 = vor.u32 %v7383_v17, %v6037_v16  ;;  %v5073_v12 = vld [vmem:[%s10829_s0 + $0x38] sm:$0xf]  ;;  %v6389_v17 = vld [vmem:[%s10828_s1 + $0x9f0] sm:$0xf] }
  0x66   :  { %2805 = vmatpush.bf16.msrb.mxu2 %v6070_v25  ;;  %2771 = vmatmul.bf16.vlgmr.msra.gmra.mxu3 %v8440_v41  ;;  %v5965_v25 = vld [vmem:[%s10828_s1 + $0x6a0] sm:$0xf] }
  0x67   :  { %2819 = vmatpush.bf16.msrb.mxu3 %v6134_v31  ;;  %v6093_v31 = vld [vmem:[%s10828_s1 + $0x7a0] sm:$0xf]  ;;  %v5966_v38 = vor.u32 %v7365_v27, %v5965_v25  ;;  %v6326_v25 = vor.u32 %v7455_v5, %v6325_v4  ;;  %v7433_v4 = vld [vmem:[%s10828_s1 + $0x8c4] sm:$0xf0] }
  0x68   :  { %2778 = vmatpush.bf16.msrb.mxu0 %v5934_v42  ;;  %v7347_v42 = vld [vmem:[%s10828_s1 + $0x614] sm:$0xf0]  ;;  %v6094_v46 = vor.u32 %v7397_v32, %v6093_v31  ;;  %v6189_v27 = vld [vmem:[%s10828_s1 + $0x860] sm:$0xf] }
  0x69   :  { %2792 = vmatpush.bf16.msrb.mxu1 %v5998_v43  ;;  %v5957_v43 = vld [vmem:[%s10828_s1 + $0x690] sm:$0xf]  ;;  %v5894_v54 = vor.u32 %v7347_v42, %v5893_v34  ;;  %v6317_v34 = vld [vmem:[%s10828_s1 + $0x960] sm:$0xf] }
  0x6a   :  { %2806 = vmatpush.bf16.msrb.mxu2 %v6062_v45  ;;  %v7363_v45 = vld [vmem:[%s10828_s1 + $0x694] sm:$0xf0]  ;;  %v6301_v5 = vld [vmem:[%s10828_s1 + $0x940] sm:$0xf] }
  0x6b   :  { %2820 = vmatpush.bf16.msrb.mxu3 %v6126_v50  ;;  %v6085_v50 = vld [vmem:[%s10828_s1 + $0x790] sm:$0xf]  ;;  %v5958_v59 = vor.u32 %v7363_v45, %v5957_v43  ;;  %v8662_v43 = vor.u32 %v7134_v23, %v5075_v24  ;;  %v6190_v45 = vor.u32 %v7421_v28, %v6189_v27  ;;  %v7463_v24 = vld [vmem:[%s10828_s1 + $0x9b4] sm:$0xf0]  ;;  %v6157_v27 = vld [vmem:[%s10828_s1 + $0x820] sm:$0xf] }
  0x6c   :  { %2779 = vmatpush.bf16.msrb.mxu0 %v5926_v56  ;;  %v7361_v56 = vld [vmem:[%s10828_s1 + $0x684] sm:$0xf0]  ;;  %v6086_v1 = vor.u32 %v7395_v51, %v6085_v50  ;;  %v6181_v51 = vld [vmem:[%s10828_s1 + $0x850] sm:$0xf] }
  0x6d   :  { %2793 = vmatpush.bf16.msrb.mxu1 %v5990_v57  ;;  %v6013_v57 = vld [vmem:[%s10828_s1 + $0x700] sm:$0xf]  ;;  %v5950_v15 = vor.u32 %v7361_v56, %v5949_v55  ;;  %v6309_v55 = vld [vmem:[%s10828_s1 + $0x950] sm:$0xf]  ;;  %v7451_v56 = vld [vmem:[%s10828_s1 + $0x954] sm:$0xf0] }
  0x6e   :  { %2807 = vmatpush.bf16.msrb.mxu2 %v6054_v58  ;;  %v7377_v58 = vld [vmem:[%s10828_s1 + $0x704] sm:$0xf0]  ;;  %v6357_v23 = vld [vmem:[%s10828_s1 + $0x9b0] sm:$0xf] }
  0x6f   :  { %2821 = vmatpush.bf16.msrb.mxu3 %v6118_v63  ;;  %v7423_v63 = vld [vmem:[%s10828_s1 + $0x874] sm:$0xf0]  ;;  %v6014_v16 = vor.u32 %v7377_v58, %v6013_v57  ;;  %v6182_v58 = vor.u32 %v7419_v52, %v6181_v51  ;;  %v7413_v28 = vld [vmem:[%s10828_s1 + $0x824] sm:$0xf0] }
  0x70   :  { %2780 = vmatpush.bf16.msrb.mxu0 %v5918_v6  ;;  %v6077_v6 = vld [vmem:[%s10828_s1 + $0x780] sm:$0xf]  ;;  %v7411_v52 = vld [vmem:[%s10828_s1 + $0x814] sm:$0xf0] }
  0x71   :  { %2794 = vmatpush.bf16.msrb.mxu1 %v5982_v7  ;;  %v7393_v7 = vld [vmem:[%s10828_s1 + $0x784] sm:$0xf0] }
  0x72   :  { %2808 = vmatpush.bf16.msrb.mxu2 %v6046_v9  ;;  %v5065_v9 = vld [vmem:[%s10829_s0 + $0x30] sm:$0xf] }
  0x73   :  { %2822 = vmatpush.bf16.msrb.mxu3 %v6110_v13  ;;  %v7146_v13 = vld [vmem:[%s10829_s0 + $0x98] sm:$0xf0]  ;;  %v8647_v31 = vor.u32 %v7145_v11, %v5065_v9  ;;  %v7465_v11 = vld [vmem:[%s10828_s1 + $0x9c4] sm:$0xf0] }
  0x74   :  { %2781 = vmatpush.bf16.msrb.mxu0 %v5910_v20  ;;  %v6198_v20 = vor.u32 %v7423_v63, %v6197_v62  ;;  %v8649_v32 = vor.u32 %v7146_v13, %v5073_v12  ;;  %v6310_v63 = vor.u32 %v7451_v56, %v6309_v55  ;;  %v6277_v55 = vld [vmem:[%s10828_s1 + $0x910] sm:$0xf]  ;;  %v7443_v56 = vld [vmem:[%s10828_s1 + $0x914] sm:$0xf0] }
  0x75   :  { %2795 = vmatpush.bf16.msrb.mxu1 %v5974_v21  ;;  %v6262_v21 = vor.u32 %v7439_v3, %v6261_v0  ;;  %v6173_v0 = vld [vmem:[%s10828_s1 + $0x840] sm:$0xf] }
  0x76   :  { %2809 = vmatpush.bf16.msrb.mxu2 %v6038_v22  ;;  %v5067_v22 = vld [vmem:[%s10829_s0 + $0x94] sm:$0xf0]  ;;  %v6237_v3 = vld [vmem:[%s10828_s1 + $0x8c0] sm:$0xf] }
  0x77   :  { %2823 = vmatpush.bf16.msrb.mxu3 %v6102_v26  ;;  %v6078_v26 = vor.u32 %v7393_v7, %v6077_v6  ;;  %v8660_v42 = vor.u32 %v7133_v19, %v5067_v22  ;;  %v7449_v6 = vld [vmem:[%s10828_s1 + $0x944] sm:$0xf0]  ;;  %v6238_v12 = vor.u32 %v7433_v4, %v6237_v3  ;;  %v6293_v19 = vld [vmem:[%s10828_s1 + $0x930] sm:$0xf]  ;;  %v6269_v3 = vld [vmem:[%s10828_s1 + $0x900] sm:$0xf] }
  0x78   :  { %2782 = vmatpush.bf16.msrb.mxu0 %v5902_v33  ;;  %v7437_v33 = vld [vmem:[%s10828_s1 + $0x8e4] sm:$0xf0]  ;;  %v6302_v13 = vor.u32 %v7449_v6, %v6301_v5  ;;  %v6278_v6 = vor.u32 %v7443_v56, %v6277_v55 }
  0x79   :  { %2796 = vmatpush.bf16.msrb.mxu1 %v5966_v38  ;;  %v7453_v38 = vld [vmem:[%s10828_s1 + $0x964] sm:$0xf0]  ;;  %v6254_v49 = vor.u32 %v7437_v33, %v6253_v29  ;;  %v6221_v29 = vld [vmem:[%s10828_s1 + $0x8a0] sm:$0xf] }
  0x7a   :  { %2810 = vmatpush.bf16.msrb.mxu2 %v6030_v39  ;;  %v6390_v39 = vor.u32 %v7471_v18, %v6389_v17  ;;  %v6318_v50 = vor.u32 %v7453_v38, %v6317_v34  ;;  %v6229_v17 = vld [vmem:[%s10828_s1 + $0x8b0] sm:$0xf]  ;;  %v7431_v18 = vld [vmem:[%s10828_s1 + $0x8b4] sm:$0xf0]  ;;  %v7429_v33 = vld [vmem:[%s10828_s1 + $0x8a4] sm:$0xf0] }
  0x7b   :  { %2824 = vmatpush.bf16.msrb.mxu3 %v6094_v46  ;;  %v6381_v46 = vld [vmem:[%s10828_s1 + $0x9e0] sm:$0xf]  ;;  %v7445_v38 = vld [vmem:[%s10828_s1 + $0x924] sm:$0xf0] }
  0x7c   :  { %2783 = vmatpush.bf16.msrb.mxu0 %v5894_v54  ;;  %v7435_v54 = vld [vmem:[%s10828_s1 + $0x8d4] sm:$0xf0]  ;;  %v6382_v57 = vor.u32 %v7469_v47, %v6381_v46  ;;  %v6285_v34 = vld [vmem:[%s10828_s1 + $0x920] sm:$0xf]  ;;  %v7461_v47 = vld [vmem:[%s10828_s1 + $0x9a4] sm:$0xf0] }
  0x7d   :  { %2797 = vmatpush.bf16.msrb.mxu1 %v5958_v59  ;;  %v6373_v59 = vld [vmem:[%s10828_s1 + $0x9d0] sm:$0xf]  ;;  %v6246_v62 = vor.u32 %v7435_v54, %v6245_v53  ;;  %v6349_v46 = vld [vmem:[%s10828_s1 + $0x9a0] sm:$0xf]  ;;  %v6286_v51 = vor.u32 %v7445_v38, %v6285_v34  ;;  %v7427_v54 = vld [vmem:[%s10828_s1 + $0x894] sm:$0xf0] }
  0x7e   :  { %2811 = vmatpush.bf16.msrb.mxu2 %v6022_v61  ;;  %v7467_v61 = vld [vmem:[%s10828_s1 + $0x9d4] sm:$0xf0]  ;;  %v6213_v53 = vld [vmem:[%s10828_s1 + $0x890] sm:$0xf]  ;;  %v7441_v4 = vld [vmem:[%s10828_s1 + $0x904] sm:$0xf0] }
  0x7f   :  { %2825 = vmatpush.bf16.msrb.mxu3 %v6086_v1  ;;  %v7417_v1 = vld [vmem:[%s10828_s1 + $0x844] sm:$0xf0]  ;;  %v6374_v7 = vor.u32 %v7467_v61, %v6373_v59  ;;  %v7459_v59 = vld [vmem:[%s10828_s1 + $0x994] sm:$0xf0]  ;;  %v6141_v61 = vld [vmem:[%s10828_s1 + $0x800] sm:$0xf]  ;;  %v6214_v5 = vor.u32 %v7427_v54, %v6213_v53 }
  0x80   :  { %2784 = vmatpush.bf16.msrb.mxu0 %v5886_v10  ;;  %v6174_v9 = vor.u32 %v7417_v1, %v6173_v0  ;;  %v6365_v10 = vld [vmem:[%s10828_s1 + $0x9c0] sm:$0xf]  ;;  %v7425_v1 = vld [vmem:[%s10828_s1 + $0x884] sm:$0xf0]  ;;  %v7136_v34 = vld [vmem:[%s10829_s0 + $0x4c] sm:$0xf] }
  0x81   :  { %2798 = vmatpush.bf16.msrb.mxu1 %v5950_v15  ;;  %v6165_v15 = vld [vmem:[%s10828_s1 + $0x830] sm:$0xf]  ;;  %v6205_v0 = vld [vmem:[%s10828_s1 + $0x880] sm:$0xf]  ;;  %v7517_v54 = vld [vmem:[%s10828_s1 + $0xb64] sm:$0xf0] }
  0x82   :  { %2812 = vmatpush.bf16.msrb.mxu2 %v6014_v16  ;;  %v7415_v16 = vld [vmem:[%s10828_s1 + $0x834] sm:$0xf0]  ;;  %v5091_v38 = vld [vmem:[%s10829_s0 + $0xac] sm:$0xf0]  ;;  %v6573_v53 = vld [vmem:[%s10828_s1 + $0xb60] sm:$0xf] }
  0x83   :  { %2826 = vmatpush.bf16.msrb.mxu3 %v6078_v26  ;;  %2785 = vmatmul.bf16.vlgmr.msrb.gmra.mxu0 %v8647_v31  ;;  %v6166_v22 = vor.u32 %v7415_v16, %v6165_v15  ;;  %v6333_v16 = vld [vmem:[%s10828_s1 + $0x980] sm:$0xf] }
  0x84   :  { %2833 = vmatpush.bf16.msra.mxu0 %v6198_v20  ;;  %2799 = vmatmul.bf16.vlgmr.msrb.gmra.mxu1 %v8660_v42  ;;  %v7447_v20 = vld [vmem:[%s10828_s1 + $0x934] sm:$0xf0] }
  0x85   :  { %2847 = vmatpush.bf16.msra.mxu1 %v6262_v21  ;;  %2813 = vmatmul.bf16.vlgmr.msrb.gmra.mxu2 %v8649_v32  ;;  %v6366_v21 = vor.u32 %v7465_v11, %v6365_v10  ;;  %v6294_v26 = vor.u32 %v7447_v20, %v6293_v19  ;;  %v6517_v10 = vld [vmem:[%s10828_s1 + $0xaf0] sm:$0xf]  ;;  %v7503_v11 = vld [vmem:[%s10828_s1 + $0xaf4] sm:$0xf0]  ;;  %v7147_v20 = vld [vmem:[%s10829_s0 + $0xa0] sm:$0xf0] }
  0x86   :  { %2861 = vmatpush.bf16.msra.mxu2 %v6326_v25  ;;  %2827 = vmatmul.bf16.vlgmr.msrb.gmra.mxu3 %v8662_v43  ;;  %v6230_v25 = vor.u32 %v7431_v18, %v6229_v17  ;;  %v7457_v17 = vld [vmem:[%s10828_s1 + $0x984] sm:$0xf0]  ;;  %v5081_v18 = vld [vmem:[%s10829_s0 + $0x40] sm:$0xf] }
  0x87   :  { %2875 = vmatpush.bf16.msra.mxu3 %v6390_v39  ;;  %v6358_v39 = vor.u32 %v7463_v24, %v6357_v23  ;;  %v6206_v23 = vor.u32 %v7425_v1, %v6205_v0  ;;  %v6270_v24 = vor.u32 %v7441_v4, %v6269_v3  ;;  %v6437_v0 = vld [vmem:[%s10828_s1 + $0xa50] sm:$0xf]  ;;  %v7483_v1 = vld [vmem:[%s10828_s1 + $0xa54] sm:$0xf0] }
  0x88   :  { %2834 = vmatpush.bf16.msra.mxu0 %v6190_v45  ;;  %v6158_v45 = vor.u32 %v7413_v28, %v6157_v27  ;;  %v7135_v27 = vld [vmem:[%s10829_s0 + $0x44] sm:$0xf]  ;;  %v6501_v3 = vld [vmem:[%s10828_s1 + $0xad0] sm:$0xf]  ;;  %v7499_v4 = vld [vmem:[%s10828_s1 + $0xad4] sm:$0xf0] }
  0x89   :  { %2848 = vmatpush.bf16.msra.mxu1 %v6254_v49  ;;  %v6149_v49 = vld [vmem:[%s10828_s1 + $0x810] sm:$0xf] }
  0x8a   :  { %2862 = vmatpush.bf16.msra.mxu2 %v6318_v50  ;;  %v6222_v50 = vor.u32 %v7429_v33, %v6221_v29  ;;  %v6518_v29 = vor.u32 %v7503_v11, %v6517_v10  ;;  %v5083_v33 = vld [vmem:[%s10829_s0 + $0xa4] sm:$0xf0]  ;;  %v6629_v10 = vld [vmem:[%s10828_s1 + $0xbd0] sm:$0xf]  ;;  %v7531_v11 = vld [vmem:[%s10828_s1 + $0xbd4] sm:$0xf0] }
  0x8b   :  { %2876 = vmatpush.bf16.msra.mxu3 %v6382_v57  ;;  %v6341_v57 = vld [vmem:[%s10828_s1 + $0x990] sm:$0xf]  ;;  %v8888_v56 = vor.u32 %v7135_v27, %v5083_v33  ;;  %v7495_v33 = vld [vmem:[%s10828_s1 + $0xab4] sm:$0xf0] }
  0x8c   :  { %2835 = vmatpush.bf16.msra.mxu0 %v6182_v58  ;;  %v6350_v58 = vor.u32 %v7461_v47, %v6349_v46  ;;  %v6342_v15 = vor.u32 %v7459_v59, %v6341_v57  ;;  %v6445_v46 = vld [vmem:[%s10828_s1 + $0xa60] sm:$0xf]  ;;  %v7485_v47 = vld [vmem:[%s10828_s1 + $0xa64] sm:$0xf0]  ;;  %v8890_v57 = vor.u32 %v7136_v34, %v5091_v38  ;;  %v6421_v27 = vld [vmem:[%s10828_s1 + $0xa30] sm:$0xf] }
  0x8d   :  { %2849 = vmatpush.bf16.msra.mxu1 %v6246_v62  ;;  %v7409_v62 = vld [vmem:[%s10828_s1 + $0x804] sm:$0xf0]  ;;  %v6637_v59 = vld [vmem:[%s10828_s1 + $0xbe0] sm:$0xf]  ;;  %v6549_v34 = vld [vmem:[%s10828_s1 + $0xb30] sm:$0xf] }
  0x8e   :  { %2863 = vmatpush.bf16.msra.mxu2 %v6310_v63  ;;  %v6150_v63 = vor.u32 %v7411_v52, %v6149_v49  ;;  %v6142_v19 = vor.u32 %v7409_v62, %v6141_v61  ;;  %v6509_v49 = vld [vmem:[%s10828_s1 + $0xae0] sm:$0xf]  ;;  %v7501_v52 = vld [vmem:[%s10828_s1 + $0xae4] sm:$0xf0]  ;;  %v7511_v38 = vld [vmem:[%s10828_s1 + $0xb34] sm:$0xf0] }
  0x8f   :  { %2877 = vmatpush.bf16.msra.mxu3 %v6374_v7  ;;  %v6453_v7 = vld [vmem:[%s10828_s1 + $0xa70] sm:$0xf]  ;;  %v7533_v61 = vld [vmem:[%s10828_s1 + $0xbe4] sm:$0xf0]  ;;  %v6510_v62 = vor.u32 %v7501_v52, %v6509_v49  ;;  %v6550_v52 = vor.u32 %v7511_v38, %v6549_v34  ;;  %v6589_v38 = vld [vmem:[%s10828_s1 + $0xb80] sm:$0xf] }
  0x90   :  { %2836 = vmatpush.bf16.msra.mxu0 %v6174_v9  ;;  %v7487_v9 = vld [vmem:[%s10828_s1 + $0xa74] sm:$0xf0] }
  0x91   :  { %2850 = vmatpush.bf16.msra.mxu1 %v6238_v12  ;;  %v6581_v12 = vld [vmem:[%s10828_s1 + $0xb70] sm:$0xf]  ;;  %v6454_v28 = vor.u32 %v7487_v9, %v6453_v7  ;;  %v6638_v7 = vor.u32 %v7533_v61, %v6637_v59  ;;  %v6438_v9 = vor.u32 %v7483_v1, %v6437_v0  ;;  %v6541_v59 = vld [vmem:[%s10828_s1 + $0xb20] sm:$0xf]  ;;  %v7509_v61 = vld [vmem:[%s10828_s1 + $0xb24] sm:$0xf0] }
  0x92   :  { %2864 = vmatpush.bf16.msra.mxu2 %v6302_v13  ;;  %v7519_v13 = vld [vmem:[%s10828_s1 + $0xb74] sm:$0xf0]  ;;  %v6605_v0 = vld [vmem:[%s10828_s1 + $0xba0] sm:$0xf]  ;;  %v7525_v1 = vld [vmem:[%s10828_s1 + $0xba4] sm:$0xf0] }
  0x93   :  { %2878 = vmatpush.bf16.msra.mxu3 %v6366_v21  ;;  %v5089_v21 = vld [vmem:[%s10829_s0 + $0x48] sm:$0xf] }
  0x94   :  { %2837 = vmatpush.bf16.msra.mxu0 %v6166_v22  ;;  %v7148_v22 = vld [vmem:[%s10829_s0 + $0xa8] sm:$0xf0] }
  0x95   :  { %2851 = vmatpush.bf16.msra.mxu1 %v6230_v25  ;;  %v6645_v25 = vld [vmem:[%s10828_s1 + $0xbf0] sm:$0xf] }
  0x96   :  { %2865 = vmatpush.bf16.msra.mxu2 %v6294_v26  ;;  %v7535_v26 = vld [vmem:[%s10828_s1 + $0xbf4] sm:$0xf0] }
  0x97   :  { %2879 = vmatpush.bf16.msra.mxu3 %v6358_v39  ;;  %v6582_v39 = vor.u32 %v7519_v13, %v6581_v12  ;;  %v6646_v55 = vor.u32 %v7535_v26, %v6645_v25  ;;  %v6502_v12 = vor.u32 %v7499_v4, %v6501_v3  ;;  %v6405_v3 = vld [vmem:[%s10828_s1 + $0xa10] sm:$0xf] }
  0x98   :  { %2838 = vmatpush.bf16.msra.mxu0 %v6158_v45  ;;  %v6334_v45 = vor.u32 %v7457_v17, %v6333_v16  ;;  %v7481_v16 = vld [vmem:[%s10828_s1 + $0xa44] sm:$0xf0]  ;;  %v6493_v17 = vld [vmem:[%s10828_s1 + $0xac0] sm:$0xf] }
  0x99   :  { %2852 = vmatpush.bf16.msra.mxu1 %v6222_v50  ;;  %v8875_v50 = vor.u32 %v7147_v20, %v5081_v18  ;;  %v7497_v18 = vld [vmem:[%s10828_s1 + $0xac4] sm:$0xf0] }
  0x9a   :  { %2866 = vmatpush.bf16.msra.mxu2 %v6286_v51  ;;  %v8877_v51 = vor.u32 %v7148_v22, %v5089_v21  ;;  %v7513_v20 = vld [vmem:[%s10828_s1 + $0xb44] sm:$0xf0]  ;;  %v6630_v21 = vor.u32 %v7531_v11, %v6629_v10  ;;  %v6494_v25 = vor.u32 %v7497_v18, %v6493_v17  ;;  %v6533_v10 = vld [vmem:[%s10828_s1 + $0xb10] sm:$0xf]  ;;  %v7507_v11 = vld [vmem:[%s10828_s1 + $0xb14] sm:$0xf0] }
  0x9b   :  { %2880 = vmatpush.bf16.msra.mxu3 %v6350_v58  ;;  %v6446_v58 = vor.u32 %v7485_v47, %v6445_v46  ;;  %v6613_v46 = vld [vmem:[%s10828_s1 + $0xbb0] sm:$0xf]  ;;  %v7527_v47 = vld [vmem:[%s10828_s1 + $0xbb4] sm:$0xf0]  ;;  %v7473_v17 = vld [vmem:[%s10828_s1 + $0xa04] sm:$0xf0] }
  0x9c   :  { %2839 = vmatpush.bf16.msra.mxu0 %v6150_v63  ;;  %v6574_v63 = vor.u32 %v7517_v54, %v6573_v53  ;;  %v6413_v53 = vld [vmem:[%s10828_s1 + $0xa20] sm:$0xf]  ;;  %v7477_v54 = vld [vmem:[%s10828_s1 + $0xa24] sm:$0xf0] }
  0x9d   :  { %2853 = vmatpush.bf16.msra.mxu1 %v6214_v5  ;;  %v6565_v5 = vld [vmem:[%s10828_s1 + $0xb50] sm:$0xf] }
  0x9e   :  { %2867 = vmatpush.bf16.msra.mxu2 %v6278_v6  ;;  %v7515_v6 = vld [vmem:[%s10828_s1 + $0xb54] sm:$0xf0] }
  0x9f   :  { %2881 = vmatpush.bf16.msra.mxu3 %v6342_v15  ;;  %v6566_v13 = vor.u32 %v7515_v6, %v6565_v5  ;;  %v6429_v15 = vld [vmem:[%s10828_s1 + $0xa40] sm:$0xf]  ;;  %v6542_v5 = vor.u32 %v7509_v61, %v6541_v59  ;;  %v7475_v6 = vld [vmem:[%s10828_s1 + $0xa14] sm:$0xf0]  ;;  %v7137_v59 = vld [vmem:[%s10829_s0 + $0x54] sm:$0xf] }
  0xa0   :  { %2840 = vmatpush.bf16.msra.mxu0 %v6142_v19  ;;  %v6557_v19 = vld [vmem:[%s10828_s1 + $0xb40] sm:$0xf]  ;;  %v6430_v22 = vor.u32 %v7481_v16, %v6429_v15  ;;  %v7523_v15 = vld [vmem:[%s10828_s1 + $0xb94] sm:$0xf0]  ;;  %v6406_v18 = vor.u32 %v7475_v6, %v6405_v3  ;;  %v7549_v6 = vld [vmem:[%s10828_s1 + $0xc64] sm:$0xf0] }
  0xa1   :  { %2854 = vmatpush.bf16.msra.mxu1 %v6206_v23  ;;  %v6621_v23 = vld [vmem:[%s10828_s1 + $0xbc0] sm:$0xf]  ;;  %v6558_v26 = vor.u32 %v7513_v20, %v6557_v19  ;;  %v7489_v20 = vld [vmem:[%s10828_s1 + $0xa84] sm:$0xf0] }
  0xa2   :  { %2868 = vmatpush.bf16.msra.mxu2 %v6270_v24  ;;  %v7529_v24 = vld [vmem:[%s10828_s1 + $0xbc4] sm:$0xf0]  ;;  %v6397_v16 = vld [vmem:[%s10828_s1 + $0xa00] sm:$0xf] }
  0xa3   :  { %2882 = vmatpush.bf16.msra.mxu3 %v6334_v45  ;;  %2841 = vmatmul.bf16.vlgmr.msra.gmra.mxu0 %v8875_v50  ;;  %v6461_v19 = vld [vmem:[%s10828_s1 + $0xa80] sm:$0xf] }
  0xa4   :  { %2889 = vmatpush.bf16.msrb.mxu0 %v6454_v28  ;;  %2855 = vmatmul.bf16.vlgmr.msra.gmra.mxu1 %v8888_v56  ;;  %v7479_v28 = vld [vmem:[%s10828_s1 + $0xa34] sm:$0xf0] }
  0xa5   :  { %2903 = vmatpush.bf16.msrb.mxu1 %v6518_v29  ;;  %2869 = vmatmul.bf16.vlgmr.msra.gmra.mxu2 %v8877_v51  ;;  %v6485_v29 = vld [vmem:[%s10828_s1 + $0xab0] sm:$0xf]  ;;  %v6422_v45 = vor.u32 %v7479_v28, %v6421_v27  ;;  %v7166_v27 = vld [vmem:[%s10828_s1 + $0x74] sm:$0xf]  ;;  %v5175_v28 = vld [vmem:[%s10828_s1 + $0x78] sm:$0xf0] }
  0xa6   :  { %2917 = vmatpush.bf16.msrb.mxu2 %v6582_v39  ;;  %2883 = vmatmul.bf16.vlgmr.msra.gmra.mxu3 %v8890_v57  ;;  %v6622_v39 = vor.u32 %v7529_v24, %v6621_v23  ;;  %v6486_v49 = vor.u32 %v7495_v33, %v6485_v29  ;;  %v6534_v24 = vor.u32 %v7507_v11, %v6533_v10  ;;  %v7182_v29 = vld [vmem:[%s10828_s1 + $0xf4] sm:$0xf]  ;;  %v5239_v33 = vld [vmem:[%s10828_s1 + $0xf8] sm:$0xf0]  ;;  %v5167_v11 = vld [vmem:[%s10828_s1 + $0x68] sm:$0xf0] }
  0xa7   :  { %2931 = vmatpush.bf16.msrb.mxu3 %v6646_v55  ;;  %v6477_v55 = vld [vmem:[%s10828_s1 + $0xaa0] sm:$0xf]  ;;  %v5242_v3 = vor.u32 %v7182_v29, %v5239_v33 }
  0xa8   :  { %2890 = vmatpush.bf16.msrb.mxu0 %v6446_v58  ;;  %v7493_v58 = vld [vmem:[%s10828_s1 + $0xaa4] sm:$0xf0] }
  0xa9   :  { %2904 = vmatpush.bf16.msrb.mxu1 %v6510_v62  ;;  %v6614_v62 = vor.u32 %v7527_v47, %v6613_v46  ;;  %v6478_v4 = vor.u32 %v7493_v58, %v6477_v55  ;;  %v6398_v46 = vor.u32 %v7473_v17, %v6397_v16  ;;  %v7149_v47 = vld [vmem:[%s10829_s0 + $0xb0] sm:$0xf0]  ;;  %v5303_v58 = vld [vmem:[%s10828_s1 + $0x178] sm:$0xf0] }
  0xaa   :  { %2918 = vmatpush.bf16.msrb.mxu2 %v6574_v63  ;;  %v6414_v63 = vor.u32 %v7477_v54, %v6413_v53  ;;  %v6462_v53 = vor.u32 %v7489_v20, %v6461_v19  ;;  %v7198_v55 = vld [vmem:[%s10828_s1 + $0x174] sm:$0xf]  ;;  %v7196_v19 = vld [vmem:[%s10828_s1 + $0x164] sm:$0xf]  ;;  %v5295_v20 = vld [vmem:[%s10828_s1 + $0x168] sm:$0xf0] }
  0xab   :  { %2932 = vmatpush.bf16.msrb.mxu3 %v6638_v7  ;;  %v6469_v7 = vld [vmem:[%s10828_s1 + $0xa90] sm:$0xf]  ;;  %v5298_v29 = vor.u32 %v7196_v19, %v5295_v20  ;;  %v6669_v19 = vld [vmem:[%s10828_s1 + $0xc20] sm:$0xf]  ;;  %v7541_v20 = vld [vmem:[%s10828_s1 + $0xc24] sm:$0xf0] }
  0xac   :  { %2891 = vmatpush.bf16.msrb.mxu0 %v6438_v9  ;;  %v7491_v9 = vld [vmem:[%s10828_s1 + $0xa94] sm:$0xf0] }
  0xad   :  { %2905 = vmatpush.bf16.msrb.mxu1 %v6502_v12  ;;  %v6597_v12 = vld [vmem:[%s10828_s1 + $0xb90] sm:$0xf]  ;;  %v6470_v23 = vor.u32 %v7491_v9, %v6469_v7  ;;  %v7164_v7 = vld [vmem:[%s10828_s1 + $0x64] sm:$0xf] }
  0xae   :  { %2919 = vmatpush.bf16.msrb.mxu2 %v6566_v13  ;;  %v6606_v13 = vor.u32 %v7525_v1, %v6605_v0  ;;  %v6598_v34 = vor.u32 %v7523_v15, %v6597_v12  ;;  %v7138_v0 = vld [vmem:[%s10829_s0 + $0x5c] sm:$0xf]  ;;  %v5107_v1 = vld [vmem:[%s10829_s0 + $0xbc] sm:$0xf0]  ;;  %v7180_v12 = vld [vmem:[%s10828_s1 + $0xe4] sm:$0xf]  ;;  %v5306_v15 = vor.u32 %v7198_v55, %v5303_v58 }
  0xaf   :  { %2933 = vmatpush.bf16.msrb.mxu3 %v6630_v21  ;;  %v6525_v21 = vld [vmem:[%s10828_s1 + $0xb00] sm:$0xf]  ;;  %v9118_v17 = vor.u32 %v7138_v0, %v5107_v1  ;;  %v6677_v0 = vld [vmem:[%s10828_s1 + $0xc30] sm:$0xf]  ;;  %v7543_v1 = vld [vmem:[%s10828_s1 + $0xc34] sm:$0xf0] }
  0xb0   :  { %2892 = vmatpush.bf16.msrb.mxu0 %v6430_v22  ;;  %v7505_v22 = vld [vmem:[%s10828_s1 + $0xb04] sm:$0xf0] }
  0xb1   :  { %2906 = vmatpush.bf16.msrb.mxu1 %v6494_v25  ;;  %v6709_v25 = vld [vmem:[%s10828_s1 + $0xc70] sm:$0xf]  ;;  %v6526_v54 = vor.u32 %v7505_v22, %v6525_v21  ;;  %v5170_v21 = vor.u32 %v7164_v7, %v5167_v11  ;;  %v6678_v11 = vor.u32 %v7543_v1, %v6677_v0  ;;  %v7168_v0 = vld [vmem:[%s10828_s1 + $0x84] sm:$0xf]  ;;  %v5183_v1 = vld [vmem:[%s10828_s1 + $0x88] sm:$0xf0] }
  0xb2   :  { %2920 = vmatpush.bf16.msrb.mxu2 %v6558_v26  ;;  %v7551_v26 = vld [vmem:[%s10828_s1 + $0xc74] sm:$0xf0] }
  0xb3   :  { %2934 = vmatpush.bf16.msrb.mxu3 %v6622_v39  ;;  %v7521_v39 = vld [vmem:[%s10828_s1 + $0xb84] sm:$0xf0]  ;;  %v6710_v61 = vor.u32 %v7551_v26, %v6709_v25  ;;  %v7162_v25 = vld [vmem:[%s10828_s1 + $0x54] sm:$0xf]  ;;  %v5159_v26 = vld [vmem:[%s10828_s1 + $0x58] sm:$0xf0] }
  0xb4   :  { %2893 = vmatpush.bf16.msrb.mxu0 %v6422_v45  ;;  %v5097_v45 = vld [vmem:[%s10829_s0 + $0x50] sm:$0xf] }
  0xb5   :  { %2907 = vmatpush.bf16.msrb.mxu1 %v6486_v49  ;;  %v5105_v49 = vld [vmem:[%s10829_s0 + $0x58] sm:$0xf]  ;;  %v9103_v9 = vor.u32 %v7149_v47, %v5097_v45  ;;  %v7545_v47 = vld [vmem:[%s10828_s1 + $0xc44] sm:$0xf0] }
  0xb6   :  { %2921 = vmatpush.bf16.msrb.mxu2 %v6550_v52  ;;  %v7150_v52 = vld [vmem:[%s10829_s0 + $0xb8] sm:$0xf0] }
  0xb7   :  { %2935 = vmatpush.bf16.msrb.mxu3 %v6614_v62  ;;  %v5178_v62 = vor.u32 %v7166_v27, %v5175_v28  ;;  %v9105_v10 = vor.u32 %v7150_v52, %v5105_v49  ;;  %v7178_v27 = vld [vmem:[%s10828_s1 + $0xd4] sm:$0xf]  ;;  %v5223_v28 = vld [vmem:[%s10828_s1 + $0xd8] sm:$0xf0]  ;;  %v7160_v49 = vld [vmem:[%s10828_s1 + $0x44] sm:$0xf] }
  0xb8   :  { %2894 = vmatpush.bf16.msrb.mxu0 %v6414_v63  ;;  %v5099_v63 = vld [vmem:[%s10829_s0 + $0xb4] sm:$0xf0]  ;;  %v5226_v45 = vor.u32 %v7178_v27, %v5223_v28  ;;  %v5151_v52 = vld [vmem:[%s10828_s1 + $0x48] sm:$0xf0]  ;;  %v7188_v27 = vld [vmem:[%s10828_s1 + $0x124] sm:$0xf] }
  0xb9   :  { %2908 = vmatpush.bf16.msrb.mxu1 %v6478_v4  ;;  %v6590_v4 = vor.u32 %v7521_v39, %v6589_v38  ;;  %v9116_v16 = vor.u32 %v7137_v59, %v5099_v63  ;;  %v5287_v38 = vld [vmem:[%s10828_s1 + $0x158] sm:$0xf0]  ;;  %v5162_v39 = vor.u32 %v7162_v25, %v5159_v26  ;;  %v7192_v59 = vld [vmem:[%s10828_s1 + $0x144] sm:$0xf]  ;;  %v6670_v26 = vor.u32 %v7541_v20, %v6669_v19  ;;  %v5263_v28 = vld [vmem:[%s10828_s1 + $0x128] sm:$0xf0] }
  0xba   :  { %2922 = vmatpush.bf16.msrb.mxu2 %v6542_v5  ;;  %v6701_v5 = vld [vmem:[%s10828_s1 + $0xc60] sm:$0xf] }
  0xbb   :  { %2936 = vmatpush.bf16.msrb.mxu3 %v6606_v13  ;;  %v5231_v13 = vld [vmem:[%s10828_s1 + $0xe8] sm:$0xf0]  ;;  %v5113_v19 = vld [vmem:[%s10829_s0 + $0x60] sm:$0xf] }
  0xbc   :  { %2895 = vmatpush.bf16.msrb.mxu0 %v6406_v18  ;;  %v6702_v18 = vor.u32 %v7549_v6, %v6701_v5  ;;  %v5234_v22 = vor.u32 %v7180_v12, %v5231_v13  ;;  %v7174_v5 = vld [vmem:[%s10828_s1 + $0xb4] sm:$0xf]  ;;  %v5207_v6 = vld [vmem:[%s10828_s1 + $0xb8] sm:$0xf0] }
  0xbd   :  { %2909 = vmatpush.bf16.msrb.mxu1 %v6470_v23  ;;  %v6693_v23 = vld [vmem:[%s10828_s1 + $0xc50] sm:$0xf]  ;;  %v7190_v12 = vld [vmem:[%s10828_s1 + $0x134] sm:$0xf]  ;;  %v5271_v13 = vld [vmem:[%s10828_s1 + $0x138] sm:$0xf0] }
  0xbe   :  { %2923 = vmatpush.bf16.msrb.mxu2 %v6534_v24  ;;  %v7547_v24 = vld [vmem:[%s10828_s1 + $0xc54] sm:$0xf0]  ;;  %v5274_v25 = vor.u32 %v7190_v12, %v5271_v13  ;;  %v5495_v12 = vld [vmem:[%s10828_s1 + $0x2f8] sm:$0xf0] }
  0xbf   :  { %2937 = vmatpush.bf16.msrb.mxu3 %v6598_v34  ;;  %v6694_v33 = vor.u32 %v7547_v24, %v6693_v23  ;;  %v7194_v34 = vld [vmem:[%s10828_s1 + $0x154] sm:$0xf]  ;;  %v7172_v23 = vld [vmem:[%s10828_s1 + $0xa4] sm:$0xf]  ;;  %v5199_v24 = vld [vmem:[%s10828_s1 + $0xa8] sm:$0xf0] }
  0xc0   :  { %2896 = vmatpush.bf16.msrb.mxu0 %v6398_v46  ;;  %v6685_v46 = vld [vmem:[%s10828_s1 + $0xc40] sm:$0xf]  ;;  %v5290_v55 = vor.u32 %v7194_v34, %v5287_v38  ;;  %v6661_v34 = vld [vmem:[%s10828_s1 + $0xc10] sm:$0xf]  ;;  %v7539_v38 = vld [vmem:[%s10828_s1 + $0xc14] sm:$0xf0] }
  0xc1   :  { %2910 = vmatpush.bf16.msrb.mxu1 %v6462_v53  ;;  %v7176_v53 = vld [vmem:[%s10828_s1 + $0xc4] sm:$0xf]  ;;  %v6686_v58 = vor.u32 %v7545_v47, %v6685_v46  ;;  %v7170_v46 = vld [vmem:[%s10828_s1 + $0x94] sm:$0xf]  ;;  %v5191_v47 = vld [vmem:[%s10828_s1 + $0x98] sm:$0xf0] }
  0xc2   :  { %2924 = vmatpush.bf16.msrb.mxu2 %v6526_v54  ;;  %v5215_v54 = vld [vmem:[%s10828_s1 + $0xc8] sm:$0xf0] }
  0xc3   :  { %2938 = vmatpush.bf16.msrb.mxu3 %v6590_v4  ;;  %2897 = vmatmul.bf16.vlgmr.msrb.gmra.mxu0 %v9103_v9  ;;  %v5218_v63 = vor.u32 %v7176_v53, %v5215_v54  ;;  %v5143_v4 = vld [vmem:[%s10828_s1 + $0x38] sm:$0xf0]  ;;  %v6662_v54 = vor.u32 %v7539_v38, %v6661_v34  ;;  %v7228_v34 = vld [vmem:[%s10828_s1 + $0x264] sm:$0xf]  ;;  %v5423_v38 = vld [vmem:[%s10828_s1 + $0x268] sm:$0xf0] }
  0xc4   :  { %2945 = vmatpush.bf16.msra.mxu0 %v6710_v61  ;;  %2911 = vmatmul.bf16.vlgmr.msrb.gmra.mxu1 %v9116_v16  ;;  %v5279_v61 = vld [vmem:[%s10828_s1 + $0x148] sm:$0xf0]  ;;  %v5255_v53 = vld [vmem:[%s10828_s1 + $0x118] sm:$0xf0] }
  0xc5   :  { %2959 = vmatpush.bf16.msra.mxu1 %v5178_v62  ;;  %2925 = vmatmul.bf16.vlgmr.msrb.gmra.mxu2 %v9105_v10  ;;  %v5154_v62 = vor.u32 %v7160_v49, %v5151_v52  ;;  %v5282_v7 = vor.u32 %v7192_v59, %v5279_v61  ;;  %v5266_v49 = vor.u32 %v7188_v27, %v5263_v28  ;;  %v7186_v52 = vld [vmem:[%s10828_s1 + $0x114] sm:$0xf]  ;;  %v7152_v59 = vld [vmem:[%s10828_s1 + $0x4] sm:$0xf] }
  0xc6   :  { %2973 = vmatpush.bf16.msra.mxu2 %v5242_v3  ;;  %2939 = vmatmul.bf16.vlgmr.msrb.gmra.mxu3 %v9118_v17  ;;  %v7158_v3 = vld [vmem:[%s10828_s1 + $0x34] sm:$0xf]  ;;  %v7212_v27 = vld [vmem:[%s10828_s1 + $0x1e4] sm:$0xf] }
  0xc7   :  { %2987 = vmatpush.bf16.msra.mxu3 %v5306_v15  ;;  %v5146_v15 = vor.u32 %v7158_v3, %v5143_v4  ;;  %v7214_v3 = vld [vmem:[%s10828_s1 + $0x1f4] sm:$0xf]  ;;  %v5367_v4 = vld [vmem:[%s10828_s1 + $0x1f8] sm:$0xf0] }
  0xc8   :  { %2946 = vmatpush.bf16.msra.mxu0 %v6702_v18  ;;  %v5210_v18 = vor.u32 %v7174_v5, %v5207_v6  ;;  %v7230_v5 = vld [vmem:[%s10828_s1 + $0x274] sm:$0xf]  ;;  %v5258_v6 = vor.u32 %v7186_v52, %v5255_v53  ;;  %v5551_v52 = vld [vmem:[%s10828_s1 + $0x368] sm:$0xf0] }
  0xc9   :  { %2960 = vmatpush.bf16.msra.mxu1 %v5170_v21  ;;  %v7156_v21 = vld [vmem:[%s10828_s1 + $0x24] sm:$0xf] }
  0xca   :  { %2974 = vmatpush.bf16.msra.mxu2 %v5234_v22  ;;  %v5135_v22 = vld [vmem:[%s10828_s1 + $0x28] sm:$0xf0] }
  0xcb   :  { %2988 = vmatpush.bf16.msra.mxu3 %v5298_v29  ;;  %v5138_v29 = vor.u32 %v7156_v21, %v5135_v22  ;;  %v5186_v21 = vor.u32 %v7168_v0, %v5183_v1  ;;  %v7151_v22 = vld [vmem:[%s10829_s0 + $0xc0] sm:$0xf0]  ;;  %v7242_v0 = vld [vmem:[%s10828_s1 + $0x2d4] sm:$0xf]  ;;  %v5479_v1 = vld [vmem:[%s10828_s1 + $0x2d8] sm:$0xf0] }
  0xcc   :  { %2947 = vmatpush.bf16.msra.mxu0 %v6694_v33  ;;  %v5202_v33 = vor.u32 %v7172_v23, %v5199_v24  ;;  %v7262_v23 = vld [vmem:[%s10828_s1 + $0x374] sm:$0xf]  ;;  %v5559_v24 = vld [vmem:[%s10828_s1 + $0x378] sm:$0xf0] }
  0xcd   :  { %2961 = vmatpush.bf16.msra.mxu1 %v5162_v39  ;;  %v7154_v39 = vld [vmem:[%s10828_s1 + $0x14] sm:$0xf] }
  0xce   :  { %2975 = vmatpush.bf16.msra.mxu2 %v5226_v45  ;;  %v5127_v45 = vld [vmem:[%s10828_s1 + $0x18] sm:$0xf0] }
  0xcf   :  { %2989 = vmatpush.bf16.msra.mxu3 %v5290_v55  ;;  %v6653_v55 = vld [vmem:[%s10828_s1 + $0xc00] sm:$0xf]  ;;  %v5130_v61 = vor.u32 %v7154_v39, %v5127_v45  ;;  %v9316_v39 = vor.u32 %v7151_v22, %v5113_v19  ;;  %v5562_v45 = vor.u32 %v7262_v23, %v5559_v24  ;;  %v7256_v19 = vld [vmem:[%s10828_s1 + $0x344] sm:$0xf]  ;;  %v7206_v22 = vld [vmem:[%s10828_s1 + $0x1b4] sm:$0xf] }
  0xd0   :  { %2948 = vmatpush.bf16.msra.mxu0 %v6686_v58  ;;  %v7537_v58 = vld [vmem:[%s10828_s1 + $0xc04] sm:$0xf0]  ;;  %v5335_v24 = vld [vmem:[%s10828_s1 + $0x1b8] sm:$0xf0] }
  0xd1   :  { %2962 = vmatpush.bf16.msra.mxu1 %v5154_v62  ;;  %v5194_v62 = vor.u32 %v7170_v46, %v5191_v47  ;;  %v6654_v13 = vor.u32 %v7537_v58, %v6653_v55  ;;  %v7244_v46 = vld [vmem:[%s10828_s1 + $0x2e4] sm:$0xf]  ;;  %v5487_v47 = vld [vmem:[%s10828_s1 + $0x2e8] sm:$0xf0]  ;;  %v7210_v55 = vld [vmem:[%s10828_s1 + $0x1d4] sm:$0xf] }
  0xd2   :  { %2976 = vmatpush.bf16.msra.mxu2 %v5218_v63  ;;  %v5119_v63 = vld [vmem:[%s10828_s1 + $0x8] sm:$0xf0]  ;;  %v5490_v58 = vor.u32 %v7244_v46, %v5487_v47  ;;  %v7204_v46 = vld [vmem:[%s10828_s1 + $0x1a4] sm:$0xf] }
  0xd3   :  { %2990 = vmatpush.bf16.msra.mxu3 %v5282_v7  ;;  %v5431_v7 = vld [vmem:[%s10828_s1 + $0x278] sm:$0xf0]  ;;  %v5122_v20 = vor.u32 %v7152_v59, %v5119_v63 }
  0xd4   :  { %2949 = vmatpush.bf16.msra.mxu0 %v6678_v11  ;;  %v7246_v11 = vld [vmem:[%s10828_s1 + $0x2f4] sm:$0xf]  ;;  %v5351_v59 = vld [vmem:[%s10828_s1 + $0x1d8] sm:$0xf0] }
  0xd5   :  { %2963 = vmatpush.bf16.msra.mxu1 %v5146_v15  ;;  %v7184_v15 = vld [vmem:[%s10828_s1 + $0x104] sm:$0xf]  ;;  %v5498_v28 = vor.u32 %v7246_v11, %v5495_v12  ;;  %v5482_v11 = vor.u32 %v7242_v0, %v5479_v1  ;;  %v5343_v12 = vld [vmem:[%s10828_s1 + $0x1c8] sm:$0xf0]  ;;  %v7202_v0 = vld [vmem:[%s10828_s1 + $0x194] sm:$0xf] }
  0xd6   :  { %2977 = vmatpush.bf16.msra.mxu2 %v5210_v18  ;;  %v5247_v18 = vld [vmem:[%s10828_s1 + $0x108] sm:$0xf0] }
  0xd7   :  { %2991 = vmatpush.bf16.msra.mxu3 %v5274_v25  ;;  %v5370_v25 = vor.u32 %v7214_v3, %v5367_v4  ;;  %v7258_v3 = vld [vmem:[%s10828_s1 + $0x354] sm:$0xf]  ;;  %v5543_v4 = vld [vmem:[%s10828_s1 + $0x358] sm:$0xf0] }
  0xd8   :  { %2950 = vmatpush.bf16.msra.mxu0 %v6670_v26  ;;  %v5434_v26 = vor.u32 %v7230_v5, %v5431_v7  ;;  %v5354_v5 = vor.u32 %v7210_v55, %v5351_v59  ;;  %v7208_v7 = vld [vmem:[%s10828_s1 + $0x1c4] sm:$0xf] }
  0xd9   :  { %2964 = vmatpush.bf16.msra.mxu1 %v5138_v29  ;;  %v5250_v29 = vor.u32 %v7184_v15, %v5247_v18  ;;  %v7240_v15 = vld [vmem:[%s10828_s1 + $0x2c4] sm:$0xf]  ;;  %v5471_v18 = vld [vmem:[%s10828_s1 + $0x2c8] sm:$0xf0] }
  0xda   :  { %2978 = vmatpush.bf16.msra.mxu2 %v5202_v33  ;;  %v5359_v33 = vld [vmem:[%s10828_s1 + $0x1e8] sm:$0xf0]  ;;  %v5474_v23 = vor.u32 %v7240_v15, %v5471_v18  ;;  %v7236_v55 = vld [vmem:[%s10828_s1 + $0x2a4] sm:$0xf] }
  0xdb   :  { %2992 = vmatpush.bf16.msra.mxu3 %v5266_v49  ;;  %v7260_v49 = vld [vmem:[%s10828_s1 + $0x364] sm:$0xf]  ;;  %v5362_v53 = vor.u32 %v7212_v27, %v5359_v33  ;;  %v7254_v33 = vld [vmem:[%s10828_s1 + $0x334] sm:$0xf]  ;;  %v5311_v18 = vld [vmem:[%s10828_s1 + $0x188] sm:$0xf0] }
  0xdc   :  { %2951 = vmatpush.bf16.msra.mxu0 %v6662_v54  ;;  %v5426_v54 = vor.u32 %v7228_v34, %v5423_v38  ;;  %v5554_v63 = vor.u32 %v7260_v49, %v5551_v52  ;;  %v5527_v34 = vld [vmem:[%s10828_s1 + $0x338] sm:$0xf0]  ;;  %v5338_v38 = vor.u32 %v7206_v22, %v5335_v24  ;;  %v5327_v49 = vld [vmem:[%s10828_s1 + $0x1a8] sm:$0xf0]  ;;  %v7220_v52 = vld [vmem:[%s10828_s1 + $0x224] sm:$0xf] }
  0xdd   :  { %2965 = vmatpush.bf16.msra.mxu1 %v5130_v61  ;;  %v7226_v61 = vld [vmem:[%s10828_s1 + $0x254] sm:$0xf]  ;;  %v7252_v59 = vld [vmem:[%s10828_s1 + $0x324] sm:$0xf]  ;;  %v5439_v22 = vld [vmem:[%s10828_s1 + $0x288] sm:$0xf0] }
  0xde   :  { %2979 = vmatpush.bf16.msra.mxu2 %v5194_v62  ;;  %v5415_v62 = vld [vmem:[%s10828_s1 + $0x258] sm:$0xf0]  ;;  %v7200_v15 = vld [vmem:[%s10828_s1 + $0x184] sm:$0xf]  ;;  %v7278_v24 = vld [vmem:[%s10828_s1 + $0x3f4] sm:$0xf] }
  0xdf   :  { %2993 = vmatpush.bf16.msra.mxu3 %v5258_v6  ;;  %v5418_v6 = vor.u32 %v7226_v61, %v5415_v62  ;;  %v5519_v61 = vld [vmem:[%s10828_s1 + $0x328] sm:$0xf0]  ;;  %v5330_v62 = vor.u32 %v7204_v46, %v5327_v49  ;;  %v7326_v49 = vld [vmem:[%s10828_s1 + $0x574] sm:$0xf] }
  0xe0   :  { %2952 = vmatpush.bf16.msra.mxu0 %v6654_v13  ;;  %v5546_v13 = vor.u32 %v7258_v3, %v5543_v4  ;;  %v5319_v3 = vld [vmem:[%s10828_s1 + $0x198] sm:$0xf0]  ;;  %v7218_v4 = vld [vmem:[%s10828_s1 + $0x214] sm:$0xf] }
  0xe1   :  { %2966 = vmatpush.bf16.msra.mxu1 %v5122_v20  ;;  %v5535_v20 = vld [vmem:[%s10828_s1 + $0x348] sm:$0xf0] }
  0xe2   :  { %2980 = vmatpush.bf16.msra.mxu2 %v5186_v21  ;;  %v5538_v27 = vor.u32 %v7256_v19, %v5535_v20  ;;  %v7216_v19 = vld [vmem:[%s10828_s1 + $0x204] sm:$0xf] }
  0xe3   :  { %2994 = vmatpush.bf16.msra.mxu3 %v5250_v29  ;;  %2953 = vmatmul.bf16.vlgmr.msra.gmra.mxu0 %v9316_v39  ;;  %v5463_v29 = vld [vmem:[%s10828_s1 + $0x2b8] sm:$0xf0] }
  0xe4   :  { %3001 = vmatpush.bf16.msrb.mxu0 %v5370_v25  ;;  %2967 = vmatmul.bf16.vlgmr.msra.gmra.mxu1 %v7972_v60  ;;  %v5407_v60 = vld [vmem:[%s10828_s1 + $0x248] sm:$0xf0]  ;;  %v7222_v25 = vld [vmem:[%s10828_s1 + $0x234] sm:$0xf] }
  0xe5   :  { %3015 = vmatpush.bf16.msrb.mxu1 %v5434_v26  ;;  %2981 = vmatmul.bf16.vlgmr.msra.gmra.mxu2 %v8002_v8  ;;  %v7224_v8 = vld [vmem:[%s10828_s1 + $0x244] sm:$0xf]  ;;  %v5399_v26 = vld [vmem:[%s10828_s1 + $0x238] sm:$0xf0] }
  0xe6   :  { %3029 = vmatpush.bf16.msrb.mxu2 %v5498_v28  ;;  %2995 = vmatmul.bf16.vlgmr.msra.gmra.mxu3 %v7986_v2  ;;  %v5346_v2 = vor.u32 %v7208_v7, %v5343_v12  ;;  %v5410_v21 = vor.u32 %v7224_v8, %v5407_v60  ;;  %v7238_v28 = vld [vmem:[%s10828_s1 + $0x2b4] sm:$0xf]  ;;  %v5511_v8 = vld [vmem:[%s10828_s1 + $0x318] sm:$0xf0]  ;;  %v5322_v60 = vor.u32 %v7202_v0, %v5319_v3  ;;  %v7308_v0 = vld [vmem:[%s10828_s1 + $0x4e4] sm:$0xf] }
  0xe7   :  { %3043 = vmatpush.bf16.msrb.mxu3 %v5562_v45  ;;  %v5402_v45 = vor.u32 %v7222_v25, %v5399_v26  ;;  %v5466_v47 = vor.u32 %v7238_v28, %v5463_v29  ;;  %v7234_v7 = vld [vmem:[%s10828_s1 + $0x294] sm:$0xf]  ;;  %v5623_v25 = vld [vmem:[%s10828_s1 + $0x3f8] sm:$0xf0] }
  0xe8   :  { %3002 = vmatpush.bf16.msrb.mxu0 %v5362_v53  ;;  %v5391_v53 = vld [vmem:[%s10828_s1 + $0x228] sm:$0xf0]  ;;  %v7250_v12 = vld [vmem:[%s10828_s1 + $0x314] sm:$0xf]  ;;  %v5751_v29 = vld [vmem:[%s10828_s1 + $0x4f8] sm:$0xf0] }
  0xe9   :  { %3016 = vmatpush.bf16.msrb.mxu1 %v5426_v54  ;;  %v5530_v54 = vor.u32 %v7254_v33, %v5527_v34  ;;  %v7294_v26 = vld [vmem:[%s10828_s1 + $0x474] sm:$0xf]  ;;  %v5314_v33 = vor.u32 %v7200_v15, %v5311_v18 }
  0xea   :  { %3030 = vmatpush.bf16.msrb.mxu2 %v5490_v58  ;;  %v5455_v58 = vld [vmem:[%s10828_s1 + $0x2a8] sm:$0xf0]  ;;  %v7310_v28 = vld [vmem:[%s10828_s1 + $0x4f4] sm:$0xf] }
  0xeb   :  { %3044 = vmatpush.bf16.msrb.mxu3 %v5554_v63  ;;  %v5394_v63 = vor.u32 %v7220_v52, %v5391_v53  ;;  %v5458_v1 = vor.u32 %v7236_v55, %v5455_v58  ;;  %v5815_v52 = vld [vmem:[%s10828_s1 + $0x578] sm:$0xf0]  ;;  %v7276_v55 = vld [vmem:[%s10828_s1 + $0x3e4] sm:$0xf]  ;;  %v5615_v58 = vld [vmem:[%s10828_s1 + $0x3e8] sm:$0xf0] }
  0xec   :  { %3003 = vmatpush.bf16.msrb.mxu0 %v5354_v5  ;;  %v5383_v5 = vld [vmem:[%s10828_s1 + $0x218] sm:$0xf0]  ;;  %v5618_v3 = vor.u32 %v7276_v55, %v5615_v58  ;;  %v7306_v15 = vld [vmem:[%s10828_s1 + $0x4d4] sm:$0xf] }
  0xed   :  { %3017 = vmatpush.bf16.msrb.mxu1 %v5418_v6  ;;  %v5522_v6 = vor.u32 %v7252_v59, %v5519_v61  ;;  %v7292_v61 = vld [vmem:[%s10828_s1 + $0x464] sm:$0xf]  ;;  %v5783_v55 = vld [vmem:[%s10828_s1 + $0x538] sm:$0xf0] }
  0xee   :  { %3031 = vmatpush.bf16.msrb.mxu2 %v5482_v11  ;;  %v5447_v11 = vld [vmem:[%s10828_s1 + $0x298] sm:$0xf0] }
  0xef   :  { %3045 = vmatpush.bf16.msrb.mxu3 %v5546_v13  ;;  %v5386_v13 = vor.u32 %v7218_v4, %v5383_v5  ;;  %v5450_v20 = vor.u32 %v7234_v7, %v5447_v11  ;;  %v7324_v4 = vld [vmem:[%s10828_s1 + $0x564] sm:$0xf]  ;;  %v5807_v5 = vld [vmem:[%s10828_s1 + $0x568] sm:$0xf0]  ;;  %v7274_v7 = vld [vmem:[%s10828_s1 + $0x3d4] sm:$0xf] }
  0xf0   :  { %3004 = vmatpush.bf16.msrb.mxu0 %v5346_v2  ;;  %v5375_v2 = vld [vmem:[%s10828_s1 + $0x208] sm:$0xf0]  ;;  %v5607_v11 = vld [vmem:[%s10828_s1 + $0x3d8] sm:$0xf0] }
  0xf1   :  { %3018 = vmatpush.bf16.msrb.mxu1 %v5410_v21  ;;  %v7232_v21 = vld [vmem:[%s10828_s1 + $0x284] sm:$0xf]  ;;  %v5378_v34 = vor.u32 %v7216_v19, %v5375_v2  ;;  %v5610_v18 = vor.u32 %v7274_v7, %v5607_v11  ;;  %v7322_v19 = vld [vmem:[%s10828_s1 + $0x554] sm:$0xf]  ;;  %v5775_v7 = vld [vmem:[%s10828_s1 + $0x528] sm:$0xf0] }
  0xf2   :  { %3032 = vmatpush.bf16.msrb.mxu2 %v5474_v23  ;;  %v5514_v23 = vor.u32 %v7250_v12, %v5511_v8  ;;  %v5442_v46 = vor.u32 %v7232_v21, %v5439_v22  ;;  %v7290_v8 = vld [vmem:[%s10828_s1 + $0x454] sm:$0xf]  ;;  %v7272_v2 = vld [vmem:[%s10828_s1 + $0x3c4] sm:$0xf] }
  0xf3   :  { %3046 = vmatpush.bf16.msrb.mxu3 %v5538_v27  ;;  %v5687_v27 = vld [vmem:[%s10828_s1 + $0x478] sm:$0xf0]  ;;  %v7288_v22 = vld [vmem:[%s10828_s1 + $0x444] sm:$0xf] }
  0xf4   :  { %3005 = vmatpush.bf16.msrb.mxu0 %v5338_v38  ;;  %v7248_v38 = vld [vmem:[%s10828_s1 + $0x304] sm:$0xf]  ;;  %v5690_v53 = vor.u32 %v7294_v26, %v5687_v27 }
  0xf5   :  { %3019 = vmatpush.bf16.msrb.mxu1 %v5402_v45  ;;  %v5503_v45 = vld [vmem:[%s10828_s1 + $0x308] sm:$0xf0]  ;;  %v7320_v27 = vld [vmem:[%s10828_s1 + $0x544] sm:$0xf] }
  0xf6   :  { %3033 = vmatpush.bf16.msrb.mxu2 %v5466_v47  ;;  %v5626_v47 = vor.u32 %v7278_v24, %v5623_v25  ;;  %v5506_v59 = vor.u32 %v7248_v38, %v5503_v45  ;;  %v7304_v24 = vld [vmem:[%s10828_s1 + $0x4c4] sm:$0xf]  ;;  %v5727_v25 = vld [vmem:[%s10828_s1 + $0x4c8] sm:$0xf0]  ;;  %v7286_v45 = vld [vmem:[%s10828_s1 + $0x434] sm:$0xf] }
  0xf7   :  { %3047 = vmatpush.bf16.msrb.mxu3 %v5530_v54  ;;  %v5754_v54 = vor.u32 %v7310_v28, %v5751_v29  ;;  %v5791_v28 = vld [vmem:[%s10828_s1 + $0x548] sm:$0xf0]  ;;  %v5730_v38 = vor.u32 %v7304_v24, %v5727_v25  ;;  %v7296_v25 = vld [vmem:[%s10828_s1 + $0x484] sm:$0xf] }
  0xf8   :  { %3006 = vmatpush.bf16.msrb.mxu0 %v5330_v62  ;;  %v5679_v62 = vld [vmem:[%s10828_s1 + $0x468] sm:$0xf0] }
  0xf9   :  { %3020 = vmatpush.bf16.msrb.mxu1 %v5394_v63  ;;  %v5818_v63 = vor.u32 %v7326_v49, %v5815_v52  ;;  %v7302_v49 = vld [vmem:[%s10828_s1 + $0x4b4] sm:$0xf]  ;;  %v5719_v52 = vld [vmem:[%s10828_s1 + $0x4b8] sm:$0xf0]  ;;  %v5631_v24 = vld [vmem:[%s10828_s1 + $0x408] sm:$0xf0] }
  0xfa   :  { %3034 = vmatpush.bf16.msrb.mxu2 %v5458_v1  ;;  %v5743_v1 = vld [vmem:[%s10828_s1 + $0x4e8] sm:$0xf0] }
  0xfb   :  { %3048 = vmatpush.bf16.msrb.mxu3 %v5522_v6  ;;  %v5682_v6 = vor.u32 %v7292_v61, %v5679_v62  ;;  %v5746_v12 = vor.u32 %v7308_v0, %v5743_v1  ;;  %v5583_v61 = vld [vmem:[%s10828_s1 + $0x3a8] sm:$0xf0]  ;;  %v5722_v62 = vor.u32 %v7302_v49, %v5719_v52  ;;  %v7312_v49 = vld [vmem:[%s10828_s1 + $0x504] sm:$0xf] }
  0xfc   :  { %3007 = vmatpush.bf16.msrb.mxu0 %v5322_v60  ;;  %v5671_v60 = vld [vmem:[%s10828_s1 + $0x458] sm:$0xf0]  ;;  %v5647_v0 = vld [vmem:[%s10828_s1 + $0x428] sm:$0xf0] }
  0xfd   :  { %3021 = vmatpush.bf16.msrb.mxu1 %v5386_v13  ;;  %v5810_v13 = vor.u32 %v7324_v4, %v5807_v5  ;;  %v5711_v4 = vld [vmem:[%s10828_s1 + $0x4a8] sm:$0xf0] }
  0xfe   :  { %3035 = vmatpush.bf16.msrb.mxu2 %v5450_v20  ;;  %v5674_v20 = vor.u32 %v7290_v8, %v5671_v60  ;;  %v5575_v8 = vld [vmem:[%s10828_s1 + $0x398] sm:$0xf0]  ;;  %v5759_v52 = vld [vmem:[%s10828_s1 + $0x508] sm:$0xf0] }
  0xff   :  { %3049 = vmatpush.bf16.msrb.mxu3 %v5514_v23 }
 0x100   :  { %3008 = vmatpush.bf16.msrb.mxu0 %v5314_v33  ;;  %v7270_v33 = vld [vmem:[%s10828_s1 + $0x3b4] sm:$0xf] }
 0x101   :  { %3022 = vmatpush.bf16.msrb.mxu1 %v5378_v34  ;;  %v5591_v34 = vld [vmem:[%s10828_s1 + $0x3b8] sm:$0xf0] }
 0x102   :  { %3036 = vmatpush.bf16.msrb.mxu2 %v5442_v46  ;;  %v5655_v46 = vld [vmem:[%s10828_s1 + $0x438] sm:$0xf0] }
 0x103   :  { %3050 = vmatpush.bf16.msrb.mxu3 %v5506_v59  ;;  %3009 = vmatmul.bf16.vlgmr.msrb.gmra.mxu0 %v8013_v14  ;;  %v5735_v14 = vld [vmem:[%s10828_s1 + $0x4d8] sm:$0xf0]  ;;  %v5658_v58 = vor.u32 %v7286_v45, %v5655_v46  ;;  %v7268_v59 = vld [vmem:[%s10828_s1 + $0x3a4] sm:$0xf]  ;;  %v7374_v45 = vld [vmem:[%s10828_s1 + $0x6f4] sm:$0xf] }
 0x104   :  { %3057 = vmatpush.bf16.msra.mxu0 %v5626_v47  ;;  %3023 = vmatmul.bf16.vlgmr.msrb.gmra.mxu1 %v8185_v36  ;;  %v5599_v36 = vld [vmem:[%s10828_s1 + $0x3c8] sm:$0xf0]  ;;  %v5738_v21 = vor.u32 %v7306_v15, %v5735_v14  ;;  %v5794_v47 = vor.u32 %v7320_v27, %v5791_v28  ;;  %v5586_v5 = vor.u32 %v7268_v59, %v5583_v61  ;;  %v5639_v15 = vld [vmem:[%s10828_s1 + $0x418] sm:$0xf0]  ;;  %v9638_v14 = vpop.f32.mrf.mxu0  ;;  %v7342_v28 = vld [vmem:[%s10828_s1 + $0x5f4] sm:$0xf] }
 0x105   :  { %3071 = vmatpush.bf16.msra.mxu1 %v5690_v53  ;;  %3037 = vmatmul.bf16.vlgmr.msrb.gmra.mxu2 %v8204_v44  ;;  %v5799_v44 = vld [vmem:[%s10828_s1 + $0x558] sm:$0xf0]  ;;  %v5602_v26 = vor.u32 %v7272_v2, %v5599_v36  ;;  %v5594_v53 = vor.u32 %v7270_v33, %v5591_v34  ;;  %v5695_v27 = vld [vmem:[%s10828_s1 + $0x488] sm:$0xf0]  ;;  %v7358_v34 = vld [vmem:[%s10828_s1 + $0x674] sm:$0xf] }
 0x106   :  { %3085 = vmatpush.bf16.msra.mxu2 %v5754_v54  ;;  %3051 = vmatmul.bf16.vlgmr.msrb.gmra.mxu3 %v8196_v40  ;;  %v5663_v40 = vld [vmem:[%s10828_s1 + $0x448] sm:$0xf0]  ;;  %v5802_v23 = vor.u32 %v7322_v19, %v5799_v44  ;;  %v7318_v54 = vld [vmem:[%s10828_s1 + $0x534] sm:$0xf]  ;;  %v5703_v44 = vld [vmem:[%s10828_s1 + $0x498] sm:$0xf0]  ;;  %v5698_v59 = vor.u32 %v7296_v25, %v5695_v27  ;;  %v9758_v25 = vpop.f32.mrf.mxu3 }
 0x107   :  { %3099 = vmatpush.bf16.msra.mxu3 %v5818_v63  ;;  %v5666_v29 = vor.u32 %v7288_v22, %v5663_v40  ;;  %v7284_v63 = vld [vmem:[%s10828_s1 + $0x424] sm:$0xf]  ;;  %v5786_v1 = vor.u32 %v7318_v54, %v5783_v55  ;;  %v7298_v19 = vld [vmem:[%s10828_s1 + $0x494] sm:$0xf]  ;;  %v5767_v36 = vld [vmem:[%s10828_s1 + $0x518] sm:$0xf0] }
 0x108   :  { %3058 = vmatpush.bf16.msra.mxu0 %v5618_v3  ;;  %v7300_v3 = vld [vmem:[%s10828_s1 + $0x4a4] sm:$0xf]  ;;  %v5650_v11 = vor.u32 %v7284_v63, %v5647_v0  ;;  %v5567_v22 = vld [vmem:[%s10828_s1 + $0x388] sm:$0xf0]  ;;  %v7390_v55 = vld [vmem:[%s10828_s1 + $0x774] sm:$0xf]  ;;  %v5762_v63 = vor.u32 %v7312_v49, %v5759_v52 }
 0x109   :  { %3072 = vmatpush.bf16.msra.mxu1 %v5682_v6  ;;  %v7316_v6 = vld [vmem:[%s10828_s1 + $0x524] sm:$0xf]  ;;  %v5714_v60 = vor.u32 %v7300_v3, %v5711_v4  ;;  %v5855_v27 = vld [vmem:[%s10828_s1 + $0x5c8] sm:$0xf0] }
 0x10a   :  { %3086 = vmatpush.bf16.msra.mxu2 %v5746_v12  ;;  %v7266_v12 = vld [vmem:[%s10828_s1 + $0x394] sm:$0xf]  ;;  %v7340_v0 = vld [vmem:[%s10828_s1 + $0x5e4] sm:$0xf] }
 0x10b   :  { %3100 = vmatpush.bf16.msra.mxu3 %v5810_v13  ;;  %v7282_v13 = vld [vmem:[%s10828_s1 + $0x414] sm:$0xf]  ;;  %v5578_v2 = vor.u32 %v7266_v12, %v5575_v8  ;;  %v7356_v3 = vld [vmem:[%s10828_s1 + $0x664] sm:$0xf] }
 0x10c   :  { %3059 = vmatpush.bf16.msra.mxu0 %v5610_v18  ;;  %v5778_v18 = vor.u32 %v7316_v6, %v5775_v7  ;;  %v5642_v40 = vor.u32 %v7282_v13, %v5639_v15  ;;  %v7372_v6 = vld [vmem:[%s10828_s1 + $0x6e4] sm:$0xf]  ;;  %v5999_v7 = vld [vmem:[%s10828_s1 + $0x6e8] sm:$0xf0]  ;;  %v9720_v12 = vpop.f32.mrf.mxu0  ;;  %v9728_v15 = vpop.f32.mrf.mxu2 }
 0x10d   :  { %3073 = vmatpush.bf16.msra.mxu1 %v5674_v20  ;;  %v7314_v20 = vld [vmem:[%s10828_s1 + $0x514] sm:$0xf]  ;;  %v7388_v8 = vld [vmem:[%s10828_s1 + $0x764] sm:$0xf] }
 0x10e   :  { %3087 = vmatpush.bf16.msra.mxu2 %v5738_v21  ;;  %v7264_v21 = vld [vmem:[%s10828_s1 + $0x384] sm:$0xf]  ;;  %v5770_v33 = vor.u32 %v7314_v20, %v5767_v36  ;;  %v5863_v20 = vld [vmem:[%s10828_s1 + $0x5d8] sm:$0xf0] }
 0x10f   :  { %3101 = vmatpush.bf16.msra.mxu3 %v5802_v23  ;;  %v7280_v23 = vld [vmem:[%s10828_s1 + $0x404] sm:$0xf]  ;;  %v5570_v46 = vor.u32 %v7264_v21, %v5567_v22  ;;  %v5927_v21 = vld [vmem:[%s10828_s1 + $0x658] sm:$0xf0]  ;;  %v7370_v22 = vld [vmem:[%s10828_s1 + $0x6d4] sm:$0xf] }
 0x110   :  { %3060 = vmatpush.bf16.msra.mxu0 %v5602_v26  ;;  %v5706_v26 = vor.u32 %v7298_v19, %v5703_v44  ;;  %v6002_v19 = vor.u32 %v7372_v6, %v5999_v7  ;;  %v7338_v44 = vld [vmem:[%s10828_s1 + $0x5d4] sm:$0xf]  ;;  %v7332_v7 = vld [vmem:[%s10828_s1 + $0x5a4] sm:$0xf] }
 0x111   :  { %3074 = vmatpush.bf16.msra.mxu1 %v5666_v29  ;;  %v5879_v29 = vld [vmem:[%s10828_s1 + $0x5f8] sm:$0xf0] }
 0x112   :  { %3088 = vmatpush.bf16.msra.mxu2 %v5730_v38  ;;  %v5943_v38 = vld [vmem:[%s10828_s1 + $0x678] sm:$0xf0]  ;;  %v5882_v54 = vor.u32 %v7342_v28, %v5879_v29  ;;  %v5919_v29 = vld [vmem:[%s10828_s1 + $0x648] sm:$0xf0] }
 0x113   :  { %3102 = vmatpush.bf16.msra.mxu3 %v5794_v47  ;;  %v6007_v47 = vld [vmem:[%s10828_s1 + $0x6f8] sm:$0xf0]  ;;  %v5946_v61 = vor.u32 %v7358_v34, %v5943_v38  ;;  %v5983_v34 = vld [vmem:[%s10828_s1 + $0x6c8] sm:$0xf0]  ;;  %v7384_v38 = vld [vmem:[%s10828_s1 + $0x744] sm:$0xf] }
 0x114   :  { %3061 = vmatpush.bf16.msra.mxu0 %v5594_v53  ;;  %v5634_v53 = vor.u32 %v7280_v23, %v5631_v24  ;;  %v6055_v23 = vld [vmem:[%s10828_s1 + $0x758] sm:$0xf0]  ;;  %v5866_v24 = vor.u32 %v7338_v44, %v5863_v20  ;;  %v9786_v49 = vpop.f32.mrf.mxu0  ;;  %v5967_v44 = vld [vmem:[%s10828_s1 + $0x6a8] sm:$0xf0]  ;;  %v9832_v20 = vpop.f32.mrf.mxu3 }
 0x115   :  { %3075 = vmatpush.bf16.msra.mxu1 %v5658_v58  ;;  %v6071_v58 = vld [vmem:[%s10828_s1 + $0x778] sm:$0xf0] }
 0x116   :  { %3089 = vmatpush.bf16.msra.mxu2 %v5722_v62  ;;  %v6010_v62 = vor.u32 %v7374_v45, %v6007_v47  ;;  %v6074_v4 = vor.u32 %v7390_v55, %v6071_v58  ;;  %v6047_v45 = vld [vmem:[%s10828_s1 + $0x748] sm:$0xf0]  ;;  %v5847_v55 = vld [vmem:[%s10828_s1 + $0x5b8] sm:$0xf0]  ;;  %v7350_v58 = vld [vmem:[%s10828_s1 + $0x634] sm:$0xf] }
 0x117   :  { %3103 = vmatpush.bf16.msra.mxu3 %v5786_v1  ;;  %v5871_v1 = vld [vmem:[%s10828_s1 + $0x5e8] sm:$0xf0] }
 0x118   :  { %3062 = vmatpush.bf16.msra.mxu0 %v5586_v5  ;;  %v5935_v5 = vld [vmem:[%s10828_s1 + $0x668] sm:$0xf0]  ;;  %v5874_v13 = vor.u32 %v7340_v0, %v5871_v1  ;;  %v9806_v0 = vpop.f32.mrf.mxu2  ;;  %v7382_v1 = vld [vmem:[%s10828_s1 + $0x734] sm:$0xf] }
 0x119   :  { %3076 = vmatpush.bf16.msra.mxu1 %v5650_v11  ;;  %v9718_v11 = vpop.f32.mrf.mxu1 }
 0x11a   :  { %3090 = vmatpush.bf16.msra.mxu2 %v5714_v60  ;;  %v6063_v60 = vld [vmem:[%s10828_s1 + $0x768] sm:$0xf0] }
 0x11b   :  { %3104 = vmatpush.bf16.msra.mxu3 %v5778_v18  ;;  %v5938_v18 = vor.u32 %v7356_v3, %v5935_v5  ;;  %v6066_v36 = vor.u32 %v7388_v8, %v6063_v60  ;;  %v6039_v3 = vld [vmem:[%s10828_s1 + $0x738] sm:$0xf0]  ;;  %v5839_v8 = vld [vmem:[%s10828_s1 + $0x5a8] sm:$0xf0]  ;;  %v7348_v60 = vld [vmem:[%s10828_s1 + $0x624] sm:$0xf] }
 0x11c   :  { %3063 = vmatpush.bf16.msra.mxu0 %v5578_v2  ;;  %v7354_v2 = vld [vmem:[%s10828_s1 + $0x654] sm:$0xf] }
 0x11d   :  { %3077 = vmatpush.bf16.msra.mxu1 %v5642_v40  ;;  %v5991_v40 = vld [vmem:[%s10828_s1 + $0x6d8] sm:$0xf0] }
 0x11e   :  { %3091 = vmatpush.bf16.msra.mxu2 %v5706_v26  ;;  %v5930_v26 = vor.u32 %v7354_v2, %v5927_v21  ;;  %v7380_v2 = vld [vmem:[%s10828_s1 + $0x724] sm:$0xf]  ;;  %v5842_v21 = vor.u32 %v7332_v7, %v5839_v8  ;;  %v6015_v8 = vld [vmem:[%s10828_s1 + $0x708] sm:$0xf0] }
 0x11f   :  { %3105 = vmatpush.bf16.msra.mxu3 %v5770_v33  ;;  %v7368_v33 = vld [vmem:[%s10828_s1 + $0x6c4] sm:$0xf] }
 0x120   :  { %3064 = vmatpush.bf16.msra.mxu0 %v5570_v46  ;;  %v7376_v7 = vld [vmem:[%s10828_s1 + $0x704] sm:$0xf] }
 0x121   :  { %3078 = vmatpush.bf16.msra.mxu1 %v5634_v53  ;;  %v9784_v47 = vpop.f32.mrf.mxu1  ;;  %v5986_v53 = vor.u32 %v7368_v33, %v5983_v34  ;;  %v6023_v33 = vld [vmem:[%s10828_s1 + $0x718] sm:$0xf0] }
 0x122   :  { %3092 = vmatpush.bf16.msra.mxu2 %v5698_v59  ;;  %v6050_v59 = vor.u32 %v7384_v38, %v6047_v45  ;;  %v7328_v38 = vld [vmem:[%s10828_s1 + $0x584] sm:$0xf]  ;;  %v5823_v45 = vld [vmem:[%s10828_s1 + $0x588] sm:$0xf0] }
 0x123   :  { %3106 = vmatpush.bf16.msra.mxu3 %v5762_v63  ;;  %3065 = vmatmul.bf16.vlgmr.msra.gmra.mxu0 %v8212_v48  ;;  %v7386_v48 = vld [vmem:[%s10828_s1 + $0x754] sm:$0xf]  ;;  %v5975_v63 = vld [vmem:[%s10828_s1 + $0x6b8] sm:$0xf0] }
 0x124   :  { %3113 = vmatpush.bf16.msrb.mxu0 %v5882_v54  ;;  %3079 = vmatmul.bf16.vlgmr.msra.gmra.mxu1 %v8419_v30  ;;  %v7336_v30 = vld [vmem:[%s10828_s1 + $0x5c4] sm:$0xf]  ;;  %v6058_v28 = vor.u32 %v7386_v48, %v6055_v23  ;;  %v7334_v54 = vld [vmem:[%s10828_s1 + $0x5b4] sm:$0xf]  ;;  %v5831_v23 = vld [vmem:[%s10828_s1 + $0x598] sm:$0xf0] }
 0x125   :  { %3127 = vmatpush.bf16.msrb.mxu1 %v5946_v61  ;;  %3093 = vmatmul.bf16.vlgmr.msra.gmra.mxu2 %v8432_v37  ;;  %v5994_v37 = vor.u32 %v7370_v22, %v5991_v40  ;;  %v5858_v46 = vor.u32 %v7336_v30, %v5855_v27  ;;  %v5911_v61 = vld [vmem:[%s10828_s1 + $0x638] sm:$0xf0]  ;;  %v7330_v48 = vld [vmem:[%s10828_s1 + $0x594] sm:$0xf] }
 0x126   :  { %3141 = vmatpush.bf16.msrb.mxu2 %v6010_v62  ;;  %3107 = vmatmul.bf16.vlgmr.msra.gmra.mxu3 %v8430_v35  ;;  %v7352_v35 = vld [vmem:[%s10828_s1 + $0x644] sm:$0xf]  ;;  %v7366_v62 = vld [vmem:[%s10828_s1 + $0x6b4] sm:$0xf]  ;;  %v5914_v5 = vor.u32 %v7350_v58, %v5911_v61  ;;  %v5959_v27 = vld [vmem:[%s10828_s1 + $0x698] sm:$0xf0]  ;;  %v5834_v34 = vor.u32 %v7330_v48, %v5831_v23  ;;  %v6018_v48 = vor.u32 %v7376_v7, %v6015_v8 }
 0x127   :  { %3155 = vmatpush.bf16.msrb.mxu3 %v6074_v4  ;;  %v5922_v52 = vor.u32 %v7352_v35, %v5919_v29  ;;  %v5850_v4 = vor.u32 %v7334_v54, %v5847_v55  ;;  %v5978_v6 = vor.u32 %v7366_v62, %v5975_v63  ;;  %v7362_v30 = vld [vmem:[%s10828_s1 + $0x694] sm:$0xf]  ;;  %v7344_v54 = vld [vmem:[%s10828_s1 + $0x604] sm:$0xf]  ;;  %v5887_v55 = vld [vmem:[%s10828_s1 + $0x608] sm:$0xf0] }
 0x128   :  { %3114 = vmatpush.bf16.msrb.mxu0 %v5874_v13  ;;  %v6042_v13 = vor.u32 %v7382_v1, %v6039_v3  ;;  %v7378_v29 = vld [vmem:[%s10828_s1 + $0x714] sm:$0xf]  ;;  %v7360_v58 = vld [vmem:[%s10828_s1 + $0x684] sm:$0xf]  ;;  %v5951_v61 = vld [vmem:[%s10828_s1 + $0x688] sm:$0xf0] }
 0x129   :  { %3128 = vmatpush.bf16.msrb.mxu1 %v5938_v18  ;;  %v5903_v18 = vld [vmem:[%s10828_s1 + $0x628] sm:$0xf0]  ;;  %v9858_v35 = vpop.f32.mrf.mxu1  ;;  %v7406_v62 = vld [vmem:[%s10828_s1 + $0x7f4] sm:$0xf]  ;;  %v6135_v63 = vld [vmem:[%s10828_s1 + $0x7f8] sm:$0xf0] }
 0x12a   :  { %3142 = vmatpush.bf16.msrb.mxu2 %v6002_v19  ;;  %v7364_v19 = vld [vmem:[%s10828_s1 + $0x6a4] sm:$0xf]  ;;  %v5906_v22 = vor.u32 %v7348_v60, %v5903_v18  ;;  %v7422_v1 = vld [vmem:[%s10828_s1 + $0x874] sm:$0xf]  ;;  %v6199_v3 = vld [vmem:[%s10828_s1 + $0x878] sm:$0xf0]  ;;  %v9912_v60 = vpop.f32.mrf.mxu3  ;;  %v5954_v18 = vor.u32 %v7360_v58, %v5951_v61 }
 0x12b   :  { %3156 = vmatpush.bf16.msrb.mxu3 %v6066_v36  ;;  %v6031_v36 = vld [vmem:[%s10828_s1 + $0x728] sm:$0xf0]  ;;  %v5970_v40 = vor.u32 %v7364_v19, %v5967_v44  ;;  %v9917_v19 = vld [vmem:[%s10830_s2] sm:$0x3]  ;;  %v6138_v44 = vor.u32 %v7406_v62, %v6135_v63  ;;  %v7404_v23 = vld [vmem:[%s10828_s1 + $0x7e4] sm:$0xf] }
 0x12c   :  { %3115 = vmatpush.bf16.msrb.mxu0 %v5866_v24  ;;  %v7346_v24 = vld [vmem:[%s10828_s1 + $0x614] sm:$0xf]  ;;  %v6183_v62 = vld [vmem:[%s10828_s1 + $0x858] sm:$0xf0]  ;;  %v7416_v8 = vld [vmem:[%s10828_s1 + $0x844] sm:$0xf] }
 0x12d   :  { %3129 = vmatpush.bf16.msrb.mxu1 %v5930_v26  ;;  %v6034_v26 = vor.u32 %v7380_v2, %v6031_v36  ;;  %v6202_v2 = vor.u32 %v7422_v1, %v6199_v3  ;;  %v7454_v36 = vld [vmem:[%s10828_s1 + $0x974] sm:$0xf]  ;;  %v6247_v1 = vld [vmem:[%s10828_s1 + $0x8d8] sm:$0xf0] }
 0x12e   :  { %3143 = vmatpush.bf16.msrb.mxu2 %v5994_v37  ;;  %v5895_v37 = vld [vmem:[%s10828_s1 + $0x618] sm:$0xf0]  ;;  %v7402_v58 = vld [vmem:[%s10828_s1 + $0x7d4] sm:$0xf] }
 0x12f   :  { %3157 = vmatpush.bf16.msrb.mxu3 %v6058_v28  ;;  %v9860_v28 = vpop.f32.mrf.mxu0  ;;  %v7418_v61 = vld [vmem:[%s10828_s1 + $0x854] sm:$0xf] }
 0x130   :  { %3116 = vmatpush.bf16.msrb.mxu0 %v5858_v46  ;;  %v9874_v46 = vpop.f32.mrf.mxu2  ;;  %v7434_v63 = vld [vmem:[%s10828_s1 + $0x8d4] sm:$0xf] }
 0x131   :  { %3130 = vmatpush.bf16.msrb.mxu1 %v5922_v52  ;;  %v5898_v52 = vor.u32 %v7346_v24, %v5895_v37  ;;  %v6127_v24 = vld [vmem:[%s10828_s1 + $0x7e8] sm:$0xf0]  ;;  %v6250_v7 = vor.u32 %v7434_v63, %v6247_v1 }
 0x132   :  { %3144 = vmatpush.bf16.msrb.mxu2 %v5986_v53  ;;  %v5962_v53 = vor.u32 %v7362_v30, %v5959_v27  ;;  %v6191_v37 = vld [vmem:[%s10828_s1 + $0x868] sm:$0xf0]  ;;  %v7436_v30 = vld [vmem:[%s10828_s1 + $0x8e4] sm:$0xf] }
 0x133   :  { %3158 = vmatpush.bf16.msrb.mxu3 %v6050_v59  ;;  %v6026_v59 = vor.u32 %v7378_v29, %v6023_v33  ;;  %v6255_v27 = vld [vmem:[%s10828_s1 + $0x8e8] sm:$0xf0]  ;;  %v9945_v29 = vpop.f32.mrf.mxu1 }
 0x134   :  { %3117 = vmatpush.bf16.msrb.mxu0 %v5850_v4  ;;  %v7438_v4 = vld [vmem:[%s10828_s1 + $0x8f4] sm:$0xf]  ;;  %v6095_v1 = vld [vmem:[%s10828_s1 + $0x7a8] sm:$0xf0] }
 0x135   :  { %3131 = vmatpush.bf16.msrb.mxu1 %v5914_v5  ;;  %v5826_v5 = vor.u32 %v7328_v38, %v5823_v45  ;;  %v6130_v38 = vor.u32 %v7404_v23, %v6127_v24  ;;  %v7452_v45 = vld [vmem:[%s10828_s1 + $0x964] sm:$0xf]  ;;  %v6303_v24 = vld [vmem:[%s10828_s1 + $0x948] sm:$0xf0] }
 0x136   :  { %3145 = vmatpush.bf16.msrb.mxu2 %v5978_v6  ;;  %v6263_v6 = vld [vmem:[%s10828_s1 + $0x8f8] sm:$0xf0]  ;;  %v7448_v23 = vld [vmem:[%s10828_s1 + $0x944] sm:$0xf] }
 0x137   :  { %3159 = vmatpush.bf16.msrb.mxu3 %v6042_v13  ;;  %v5890_v13 = vor.u32 %v7344_v54, %v5887_v55  ;;  %v6258_v55 = vor.u32 %v7436_v30, %v6255_v27  ;;  %v6103_v27 = vld [vmem:[%s10828_s1 + $0x7b8] sm:$0xf0] }
 0x138   :  { %3118 = vmatpush.bf16.msrb.mxu0 %v5842_v21  ;;  %v6327_v21 = vld [vmem:[%s10828_s1 + $0x978] sm:$0xf0] }
 0x139   :  { %3132 = vmatpush.bf16.msrb.mxu1 %v5906_v22  ;;  %v9925_v22 = vpop.f32.mrf.mxu0  ;;  %v6330_v33 = vor.u32 %v7454_v36, %v6327_v21 }
 0x13a   :  { %3146 = vmatpush.bf16.msrb.mxu2 %v5970_v40  ;;  %v6266_v40 = vor.u32 %v7438_v4, %v6263_v6  ;;  %v6311_v4 = vld [vmem:[%s10828_s1 + $0x958] sm:$0xf0]  ;;  %v6186_v6 = vor.u32 %v7418_v61, %v6183_v62 }
 0x13b   :  { %3160 = vmatpush.bf16.msrb.mxu3 %v6034_v26  ;;  %v7420_v26 = vld [vmem:[%s10828_s1 + $0x864] sm:$0xf]  ;;  %v10005_v36 = vpop.f32.mrf.mxu1 }
 0x13c   :  { %3119 = vmatpush.bf16.msrb.mxu0 %v5834_v34  ;;  %v479_v34 = vperm.slane %v9917_v19, 0  ;;  %v6194_v54 = vor.u32 %v7420_v26, %v6191_v37 }
 0x13d   :  { %3133 = vmatpush.bf16.msrb.mxu1 %v5898_v52  ;;  %v6319_v52 = vld [vmem:[%s10828_s1 + $0x968] sm:$0xf0] }
 0x13e   :  { %3147 = vmatpush.bf16.msrb.mxu2 %v5962_v53  ;;  %v9954_v53 = vpop.f32.mrf.mxu2  ;;  %v6322_v3 = vor.u32 %v7452_v45, %v6319_v52  ;;  %v7430_v45 = vld [vmem:[%s10828_s1 + $0x8b4] sm:$0xf]  ;;  %v6231_v52 = vld [vmem:[%s10828_s1 + $0x8b8] sm:$0xf0] }
 0x13f   :  { %3161 = vmatpush.bf16.msrb.mxu3 %v6026_v59  ;;  %v6119_v59 = vld [vmem:[%s10828_s1 + $0x7d8] sm:$0xf0]  ;;  %v6234_v63 = vor.u32 %v7430_v45, %v6231_v52  ;;  %v6079_v45 = vld [vmem:[%s10828_s1 + $0x788] sm:$0xf0] }
 0x140   :  { %3120 = vmatpush.bf16.msrb.mxu0 %v5826_v5  ;;  %v9984_v5 = vpop.f32.mrf.mxu3 }
 0x141   :  { %3134 = vmatpush.bf16.msrb.mxu1 %v5890_v13  ;;  %v2619_v13 = vadd.f32 %v9638_v14, %v479_v34  ;;  %v10007_v21 = vpop.f32.mrf.mxu0  ;;  %v2621_v14 = vadd.f32 %v9720_v12, %v479_v34  ;;  %v7398_v12 = vld [vmem:[%s10828_s1 + $0x7b4] sm:$0xf] }
 0x142   :  { %3148 = vmatpush.bf16.msrb.mxu2 %v5954_v18  ;;  %v6175_v18 = vld [vmem:[%s10828_s1 + $0x848] sm:$0xf0] }
 0x143   :  { %3162 = vmatpush.bf16.msrb.mxu3 %v6018_v48  ;;  %3121 = vmatmul.bf16.vlgmr.msrb.gmra.mxu0 %v8440_v41  ;;  %v6122_v41 = vor.u32 %v7402_v58, %v6119_v59  ;;  %v6178_v37 = vor.u32 %v7416_v8, %v6175_v18  ;;  %v2633_v34 = vadd.f32 %v9718_v11, %v2619_v13  ;;  %v7446_v11 = vld [vmem:[%s10828_s1 + $0x934] sm:$0xf]  ;;  %v6295_v59 = vld [vmem:[%s10828_s1 + $0x938] sm:$0xf0]  ;;  %v7444_v8 = vld [vmem:[%s10828_s1 + $0x924] sm:$0xf]  ;;  %v10074_v18 = vpop.f32.mrf.mxu1 }
 0x144   :  { %3169 = vmatpush.bf16.msra.mxu0 %v6138_v44  ;;  %3135 = vmatmul.bf16.vlgmr.msrb.gmra.mxu1 %v8647_v31  ;;  %v7400_v31 = vld [vmem:[%s10828_s1 + $0x7c4] sm:$0xf]  ;;  %v6106_v58 = vor.u32 %v7398_v12, %v6103_v27  ;;  %v6287_v13 = vld [vmem:[%s10828_s1 + $0x928] sm:$0xf0] }
 0x145   :  { %3183 = vmatpush.bf16.msra.mxu1 %v6202_v2  ;;  %3149 = vmatmul.bf16.vlgmr.msrb.gmra.mxu2 %v8660_v42  ;;  %v7450_v42 = vld [vmem:[%s10828_s1 + $0x954] sm:$0xf]  ;;  %v7432_v44 = vld [vmem:[%s10828_s1 + $0x8c4] sm:$0xf]  ;;  %v6239_v2 = vld [vmem:[%s10828_s1 + $0x8c8] sm:$0xf0]  ;;  %v6290_v12 = vor.u32 %v7444_v8, %v6287_v13 }
 0x146   :  { %3197 = vmatpush.bf16.msra.mxu2 %v6266_v40  ;;  %3163 = vmatmul.bf16.vlgmr.msrb.gmra.mxu3 %v8649_v32  ;;  %v6111_v32 = vld [vmem:[%s10828_s1 + $0x7c8] sm:$0xf0]  ;;  %v6314_v40 = vor.u32 %v7450_v42, %v6311_v4  ;;  %v10016_v26 = vpop.f32.mrf.mxu2  ;;  %v6242_v30 = vor.u32 %v7432_v44, %v6239_v2  ;;  %v7428_v4 = vld [vmem:[%s10828_s1 + $0x8a4] sm:$0xf] }
 0x147   :  { %3211 = vmatpush.bf16.msra.mxu3 %v6330_v33  ;;  %v6114_v48 = vor.u32 %v7400_v31, %v6111_v32  ;;  %v7414_v33 = vld [vmem:[%s10828_s1 + $0x834] sm:$0xf]  ;;  %v6159_v42 = vld [vmem:[%s10828_s1 + $0x828] sm:$0xf0]  ;;  %v6298_v31 = vor.u32 %v7446_v11, %v6295_v59 }
 0x148   :  { %3170 = vmatpush.bf16.msra.mxu0 %v6130_v38  ;;  %v6167_v38 = vld [vmem:[%s10828_s1 + $0x838] sm:$0xf0]  ;;  %v10044_v61 = vpop.f32.mrf.mxu3 }
 0x149   :  { %3184 = vmatpush.bf16.msra.mxu1 %v6194_v54  ;;  %v6306_v54 = vor.u32 %v7448_v23, %v6303_v24  ;;  %v6170_v62 = vor.u32 %v7414_v33, %v6167_v38  ;;  %v6151_v23 = vld [vmem:[%s10828_s1 + $0x818] sm:$0xf0]  ;;  %v7426_v24 = vld [vmem:[%s10828_s1 + $0x894] sm:$0xf]  ;;  %v7392_v38 = vld [vmem:[%s10828_s1 + $0x784] sm:$0xf] }
 0x14a   :  { %3198 = vmatpush.bf16.msra.mxu2 %v6258_v55  ;;  %v2635_v55 = vadd.f32 %v9784_v47, %v2621_v14  ;;  %v7396_v47 = vld [vmem:[%s10828_s1 + $0x7a4] sm:$0xf]  ;;  %v7410_v14 = vld [vmem:[%s10828_s1 + $0x814] sm:$0xf] }
 0x14b   :  { %3212 = vmatpush.bf16.msra.mxu3 %v6322_v3  ;;  %v7412_v3 = vld [vmem:[%s10828_s1 + $0x824] sm:$0xf]  ;;  %v6154_v52 = vor.u32 %v7410_v14, %v6151_v23  ;;  %v7518_v14 = vld [vmem:[%s10828_s1 + $0xb74] sm:$0xf] }
 0x14c   :  { %3171 = vmatpush.bf16.msra.mxu0 %v6122_v41  ;;  %v2647_v41 = vadd.f32 %v9728_v15, %v2633_v34  ;;  %v2649_v32 = vadd.f32 %v9806_v0, %v2635_v55  ;;  %v6098_v15 = vor.u32 %v7396_v47, %v6095_v1  ;;  %v6162_v44 = vor.u32 %v7412_v3, %v6159_v42  ;;  %v7394_v0 = vld [vmem:[%s10828_s1 + $0x794] sm:$0xf]  ;;  %v6279_v34 = vld [vmem:[%s10828_s1 + $0x918] sm:$0xf0]  ;;  %v6143_v55 = vld [vmem:[%s10828_s1 + $0x808] sm:$0xf0] }
 0x14d   :  { %3185 = vmatpush.bf16.msra.mxu1 %v6186_v6  ;;  %v6223_v6 = vld [vmem:[%s10828_s1 + $0x8a8] sm:$0xf0]  ;;  %v6391_v47 = vld [vmem:[%s10828_s1 + $0x9f8] sm:$0xf0]  ;;  %v6082_v42 = vor.u32 %v7392_v38, %v6079_v45 }
 0x14e   :  { %3199 = vmatpush.bf16.msra.mxu2 %v6250_v7  ;;  %v10065_v7 = vpop.f32.mrf.mxu0  ;;  %v6226_v2 = vor.u32 %v7428_v4, %v6223_v6  ;;  %v2663_v27 = vadd.f32 %v9832_v20, %v2649_v32  ;;  %v7408_v20 = vld [vmem:[%s10828_s1 + $0x804] sm:$0xf]  ;;  %v6519_v4 = vld [vmem:[%s10828_s1 + $0xaf8] sm:$0xf0]  ;;  %v10150_v32 = vpop.f32.mrf.mxu1 }
 0x14f   :  { %3213 = vmatpush.bf16.msra.mxu3 %v6314_v40  ;;  %v6087_v40 = vld [vmem:[%s10828_s1 + $0x798] sm:$0xf0]  ;;  %v7440_v6 = vld [vmem:[%s10828_s1 + $0x904] sm:$0xf]  ;;  %v6146_v8 = vor.u32 %v7408_v20, %v6143_v55 }
 0x150   :  { %3172 = vmatpush.bf16.msra.mxu0 %v6114_v48  ;;  %v2661_v48 = vadd.f32 %v9758_v25, %v2647_v41  ;;  %v7442_v25 = vld [vmem:[%s10828_s1 + $0x914] sm:$0xf]  ;;  %v6090_v33 = vor.u32 %v7394_v0, %v6087_v40  ;;  %v2677_v59 = vadd.f32 %v9860_v28, %v2663_v27  ;;  %v10130_v1 = vpop.f32.mrf.mxu3  ;;  %v6455_v28 = vld [vmem:[%s10828_s1 + $0xa78] sm:$0xf0]  ;;  %v6447_v27 = vld [vmem:[%s10828_s1 + $0xa68] sm:$0xf0] }
 0x151   :  { %3186 = vmatpush.bf16.msra.mxu1 %v6178_v37  ;;  %v6215_v37 = vld [vmem:[%s10828_s1 + $0x898] sm:$0xf0]  ;;  %v6282_v3 = vor.u32 %v7442_v25, %v6279_v34  ;;  %v7502_v41 = vld [vmem:[%s10828_s1 + $0xaf4] sm:$0xf]  ;;  %v6511_v34 = vld [vmem:[%s10828_s1 + $0xae8] sm:$0xf0] }
 0x152   :  { %3200 = vmatpush.bf16.msra.mxu2 %v6242_v30  ;;  %v10095_v30 = vpop.f32.mrf.mxu2  ;;  %v2675_v11 = vadd.f32 %v9786_v49, %v2661_v48  ;;  %v7486_v49 = vld [vmem:[%s10828_s1 + $0xa74] sm:$0xf]  ;;  %v6583_v48 = vld [vmem:[%s10828_s1 + $0xb78] sm:$0xf0] }
 0x153   :  { %3214 = vmatpush.bf16.msra.mxu3 %v6306_v54  ;;  %v6218_v54 = vor.u32 %v7426_v24, %v6215_v37  ;;  %v6458_v40 = vor.u32 %v7486_v49, %v6455_v28  ;;  %v6522_v24 = vor.u32 %v7502_v41, %v6519_v4  ;;  %v6586_v38 = vor.u32 %v7518_v14, %v6583_v48  ;;  %v7514_v41 = vld [vmem:[%s10828_s1 + $0xb54] sm:$0xf]  ;;  %v7512_v14 = vld [vmem:[%s10828_s1 + $0xb44] sm:$0xf]  ;;  %v6559_v48 = vld [vmem:[%s10828_s1 + $0xb48] sm:$0xf0] }
 0x154   :  { %3173 = vmatpush.bf16.msra.mxu0 %v6106_v58  ;;  %v7424_v58 = vld [vmem:[%s10828_s1 + $0x884] sm:$0xf] }
 0x155   :  { %3187 = vmatpush.bf16.msra.mxu1 %v6170_v62  ;;  %v6207_v62 = vld [vmem:[%s10828_s1 + $0x888] sm:$0xf0] }
 0x156   :  { %3201 = vmatpush.bf16.msra.mxu2 %v6234_v63  ;;  %v7470_v63 = vld [vmem:[%s10828_s1 + $0x9f4] sm:$0xf]  ;;  %v6210_v13 = vor.u32 %v7424_v58, %v6207_v62  ;;  %v10225_v4 = vpop.f32.mrf.mxu1 }
 0x157   :  { %3215 = vmatpush.bf16.msra.mxu3 %v6298_v31  ;;  %v6271_v31 = vld [vmem:[%s10828_s1 + $0x908] sm:$0xf0]  ;;  %v6394_v0 = vor.u32 %v7470_v63, %v6391_v47  ;;  %v6439_v63 = vld [vmem:[%s10828_s1 + $0xa58] sm:$0xf0]  ;;  %v7498_v47 = vld [vmem:[%s10828_s1 + $0xad4] sm:$0xf] }
 0x158   :  { %3174 = vmatpush.bf16.msra.mxu0 %v6098_v15  ;;  %v10152_v15 = vpop.f32.mrf.mxu0  ;;  %v6274_v37 = vor.u32 %v7440_v6, %v6271_v31  ;;  %v10190_v20 = vpop.f32.mrf.mxu3  ;;  %v7480_v6 = vld [vmem:[%s10828_s1 + $0xa44] sm:$0xf] }
 0x159   :  { %3188 = vmatpush.bf16.msra.mxu1 %v6162_v44  ;;  %v2689_v44 = vadd.f32 %v9858_v35, %v2675_v11  ;;  %v7468_v35 = vld [vmem:[%s10828_s1 + $0x9e4] sm:$0xf]  ;;  %v6375_v11 = vld [vmem:[%s10828_s1 + $0x9d8] sm:$0xf0] }
 0x15a   :  { %3202 = vmatpush.bf16.msra.mxu2 %v6226_v2  ;;  %v2691_v2 = vadd.f32 %v9945_v29, %v2677_v59  ;;  %v10162_v23 = vpop.f32.mrf.mxu2  ;;  %v6383_v29 = vld [vmem:[%s10828_s1 + $0x9e8] sm:$0xf0]  ;;  %v7482_v59 = vld [vmem:[%s10828_s1 + $0xa54] sm:$0xf] }
 0x15b   :  { %3216 = vmatpush.bf16.msra.mxu3 %v6290_v12  ;;  %v7484_v12 = vld [vmem:[%s10828_s1 + $0xa64] sm:$0xf]  ;;  %v2703_v45 = vadd.f32 %v9874_v46, %v2689_v44  ;;  %v7466_v46 = vld [vmem:[%s10828_s1 + $0x9d4] sm:$0xf]  ;;  %v6495_v44 = vld [vmem:[%s10828_s1 + $0xac8] sm:$0xf0] }
 0x15c   :  { %3175 = vmatpush.bf16.msra.mxu0 %v6090_v33  ;;  %v2705_v25 = vadd.f32 %v9954_v53, %v2691_v2  ;;  %v7500_v33 = vld [vmem:[%s10828_s1 + $0xae4] sm:$0xf]  ;;  %v6386_v53 = vor.u32 %v7468_v35, %v6383_v29  ;;  %v6450_v55 = vor.u32 %v7484_v12, %v6447_v27  ;;  %v6378_v28 = vor.u32 %v7466_v46, %v6375_v11  ;;  %v7462_v35 = vld [vmem:[%s10828_s1 + $0x9b4] sm:$0xf]  ;;  %v6423_v27 = vld [vmem:[%s10828_s1 + $0xa38] sm:$0xf0] }
 0x15d   :  { %3189 = vmatpush.bf16.msra.mxu1 %v6154_v52  ;;  %v7516_v52 = vld [vmem:[%s10828_s1 + $0xb64] sm:$0xf]  ;;  %v6514_v58 = vor.u32 %v7500_v33, %v6511_v34  ;;  %v7478_v29 = vld [vmem:[%s10828_s1 + $0xa34] sm:$0xf]  ;;  %v6487_v34 = vld [vmem:[%s10828_s1 + $0xab8] sm:$0xf0] }
 0x15e   :  { %3203 = vmatpush.bf16.msra.mxu2 %v6218_v54  ;;  %v6575_v54 = vld [vmem:[%s10828_s1 + $0xb68] sm:$0xf0]  ;;  %v2719_v62 = vadd.f32 %v9984_v5, %v2705_v25  ;;  %v7494_v33 = vld [vmem:[%s10828_s1 + $0xab4] sm:$0xf] }
 0x15f   :  { %3217 = vmatpush.bf16.msra.mxu3 %v6282_v3  ;;  %v6503_v3 = vld [vmem:[%s10828_s1 + $0xad8] sm:$0xf0]  ;;  %v6490_v46 = vor.u32 %v7494_v33, %v6487_v34  ;;  %v6351_v11 = vld [vmem:[%s10828_s1 + $0x9a8] sm:$0xf0]  ;;  %v7534_v33 = vld [vmem:[%s10828_s1 + $0xbf4] sm:$0xf] }
 0x160   :  { %3176 = vmatpush.bf16.msra.mxu0 %v6082_v42  ;;  %v10213_v49 = vpop.f32.mrf.mxu0  ;;  %v2733_v5 = vadd.f32 %v10007_v21, %v2719_v62  ;;  %v6567_v42 = vld [vmem:[%s10828_s1 + $0xb58] sm:$0xf0]  ;;  %v6367_v21 = vld [vmem:[%s10828_s1 + $0x9c8] sm:$0xf0] }
 0x161   :  { %3190 = vmatpush.bf16.msra.mxu1 %v6146_v8  ;;  %v6431_v8 = vld [vmem:[%s10828_s1 + $0xa48] sm:$0xf0] }
 0x162   :  { %3204 = vmatpush.bf16.msra.mxu2 %v6210_v13  ;;  %v7496_v13 = vld [vmem:[%s10828_s1 + $0xac4] sm:$0xf]  ;;  %v10246_v2 = vpop.f32.mrf.mxu2 }
 0x163   :  { %3218 = vmatpush.bf16.msra.mxu3 %v6274_v37  ;;  %3177 = vmatmul.bf16.vlgmr.msra.gmra.mxu0 %v8662_v43  ;;  %v6578_v43 = vor.u32 %v7516_v52, %v6575_v54  ;;  %v6498_v37 = vor.u32 %v7496_v13, %v6495_v44  ;;  %v6551_v52 = vld [vmem:[%s10828_s1 + $0xb38] sm:$0xf0]  ;;  %v10284_v54 = vpop.f32.mrf.mxu1 }
 0x164   :  { %3225 = vmatpush.bf16.msrb.mxu0 %v6394_v0  ;;  %3191 = vmatmul.bf16.vlgmr.msra.gmra.mxu1 %v8875_v50  ;;  %v6442_v50 = vor.u32 %v7482_v59, %v6439_v63  ;;  %v6570_v0 = vor.u32 %v7514_v41, %v6567_v42  ;;  %v7476_v59 = vld [vmem:[%s10828_s1 + $0xa24] sm:$0xf]  ;;  %v6415_v63 = vld [vmem:[%s10828_s1 + $0xa28] sm:$0xf0] }
 0x165   :  { %3239 = vmatpush.bf16.msrb.mxu1 %v6458_v40  ;;  %3205 = vmatmul.bf16.vlgmr.msra.gmra.mxu2 %v8888_v56  ;;  %v2717_v56 = vadd.f32 %v9912_v60, %v2703_v45  ;;  %v6506_v60 = vor.u32 %v7498_v47, %v6503_v3  ;;  %v2747_v40 = vadd.f32 %v10074_v18, %v2733_v5  ;;  %v6359_v18 = vld [vmem:[%s10828_s1 + $0x9b8] sm:$0xf0]  ;;  %v7492_v47 = vld [vmem:[%s10828_s1 + $0xaa4] sm:$0xf]  ;;  %v6479_v3 = vld [vmem:[%s10828_s1 + $0xaa8] sm:$0xf0] }
 0x166   :  { %3253 = vmatpush.bf16.msrb.mxu2 %v6522_v24  ;;  %3219 = vmatmul.bf16.vlgmr.msra.gmra.mxu3 %v8877_v51  ;;  %v7464_v51 = vld [vmem:[%s10828_s1 + $0x9c4] sm:$0xf]  ;;  %v6434_v24 = vor.u32 %v7480_v6, %v6431_v8  ;;  %v6562_v45 = vor.u32 %v7512_v14, %v6559_v48  ;;  %v6543_v42 = vld [vmem:[%s10828_s1 + $0xb28] sm:$0xf0]  ;;  %v6407_v6 = vld [vmem:[%s10828_s1 + $0xa18] sm:$0xf0] }
 0x167   :  { %3267 = vmatpush.bf16.msrb.mxu3 %v6586_v38  ;;  %v2731_v31 = vadd.f32 %v9925_v22, %v2717_v56  ;;  %v6370_v22 = vor.u32 %v7464_v51, %v6367_v21  ;;  %v2761_v25 = vadd.f32 %v10095_v30, %v2747_v40  ;;  %v10275_v38 = vpop.f32.mrf.mxu3  ;;  %v6362_v30 = vor.u32 %v7462_v35, %v6359_v18  ;;  %v7508_v41 = vld [vmem:[%s10828_s1 + $0xb24] sm:$0xf]  ;;  %v7474_v51 = vld [vmem:[%s10828_s1 + $0xa14] sm:$0xf]  ;;  %v6471_v8 = vld [vmem:[%s10828_s1 + $0xa98] sm:$0xf0] }
 0x168   :  { %3226 = vmatpush.bf16.msrb.mxu0 %v6386_v53  ;;  %v7510_v53 = vld [vmem:[%s10828_s1 + $0xb34] sm:$0xf]  ;;  %v6546_v44 = vor.u32 %v7508_v41, %v6543_v42  ;;  %v7456_v14 = vld [vmem:[%s10828_s1 + $0x984] sm:$0xf]  ;;  %v6399_v18 = vld [vmem:[%s10828_s1 + $0xa08] sm:$0xf0] }
 0x169   :  { %3240 = vmatpush.bf16.msrb.mxu1 %v6450_v55  ;;  %v2745_v12 = vadd.f32 %v10005_v36, %v2731_v31  ;;  %v10286_v55 = vpop.f32.mrf.mxu0  ;;  %v2775_v62 = vadd.f32 %v10130_v1, %v2761_v25  ;;  %v6554_v56 = vor.u32 %v7510_v53, %v6551_v52  ;;  %v7490_v31 = vld [vmem:[%s10828_s1 + $0xa94] sm:$0xf]  ;;  %v7472_v35 = vld [vmem:[%s10828_s1 + $0xa04] sm:$0xf] }
 0x16a   :  { %3254 = vmatpush.bf16.msrb.mxu2 %v6514_v58  ;;  %v6426_v58 = vor.u32 %v7478_v29, %v6423_v27  ;;  %v7506_v40 = vld [vmem:[%s10828_s1 + $0xb14] sm:$0xf]  ;;  %v7488_v25 = vld [vmem:[%s10828_s1 + $0xa84] sm:$0xf]  ;;  %v6463_v27 = vld [vmem:[%s10828_s1 + $0xa88] sm:$0xf0] }
 0x16b   :  { %3268 = vmatpush.bf16.msrb.mxu3 %v6578_v43  ;;  %v2759_v36 = vadd.f32 %v10016_v26, %v2745_v12  ;;  %v7460_v26 = vld [vmem:[%s10828_s1 + $0x9a4] sm:$0xf]  ;;  %v10307_v43 = vpop.f32.mrf.mxu2  ;;  %v2789_v1 = vadd.f32 %v10152_v15, %v2775_v62  ;;  %v6343_v15 = vld [vmem:[%s10828_s1 + $0x998] sm:$0xf0]  ;;  %v2858_v34 = vpop.f32.mrf.mxu1 }
 0x16c   :  { %3227 = vmatpush.bf16.msrb.mxu0 %v6378_v28  ;;  %v6354_v28 = vor.u32 %v7460_v26, %v6351_v11  ;;  %v7504_v52 = vld [vmem:[%s10828_s1 + $0xb04] sm:$0xf]  ;;  %v6402_v26 = vor.u32 %v7472_v35, %v6399_v18  ;;  %v6466_v11 = vor.u32 %v7488_v25, %v6463_v27  ;;  %v7526_v35 = vld [vmem:[%s10828_s1 + $0xbb4] sm:$0xf]  ;;  %v6615_v18 = vld [vmem:[%s10828_s1 + $0xbb8] sm:$0xf0] }
 0x16d   :  { %3241 = vmatpush.bf16.msrb.mxu1 %v6442_v50  ;;  %v2773_v5 = vadd.f32 %v10044_v61, %v2759_v36  ;;  %v6418_v50 = vor.u32 %v7476_v59, %v6415_v63  ;;  %v7458_v61 = vld [vmem:[%s10828_s1 + $0x994] sm:$0xf]  ;;  %v6711_v36 = vld [vmem:[%s10828_s1 + $0xc78] sm:$0xf0] }
 0x16e   :  { %3255 = vmatpush.bf16.msrb.mxu2 %v6506_v60  ;;  %v6482_v60 = vor.u32 %v7492_v47, %v6479_v3  ;;  %v7532_v3 = vld [vmem:[%s10828_s1 + $0xbe4] sm:$0xf]  ;;  %v7542_v25 = vld [vmem:[%s10828_s1 + $0xc34] sm:$0xf]  ;;  %v6679_v27 = vld [vmem:[%s10828_s1 + $0xc38] sm:$0xf0] }
 0x16f   :  { %3269 = vmatpush.bf16.msrb.mxu3 %v6570_v0  ;;  %v2787_v21 = vadd.f32 %v10065_v7, %v2773_v5  ;;  %v10336_v13 = vpop.f32.mrf.mxu3  ;;  %v2803_v0 = vadd.f32 %v10225_v4, %v2789_v1  ;;  %v6346_v7 = vor.u32 %v7458_v61, %v6343_v15  ;;  %v6474_v4 = vor.u32 %v7490_v31, %v6471_v8  ;;  %v7548_v1 = vld [vmem:[%s10828_s1 + $0xc64] sm:$0xf]  ;;  %v7558_v61 = vld [vmem:[%s10831_s3 + $0x30] sm:$0xff] }
 0x170   :  { %3228 = vmatpush.bf16.msrb.mxu0 %v6370_v22  ;;  %v6535_v22 = vld [vmem:[%s10828_s1 + $0xb18] sm:$0xf0]  ;;  %v7530_v15 = vld [vmem:[%s10828_s1 + $0xbd4] sm:$0xf] }
 0x171   :  { %3242 = vmatpush.bf16.msrb.mxu1 %v6434_v24  ;;  %v10348_v48 = vpop.f32.mrf.mxu0  ;;  %v6410_v24 = vor.u32 %v7474_v51, %v6407_v6  ;;  %v2801_v29 = vadd.f32 %v10150_v32, %v2787_v21  ;;  %v2817_v12 = vadd.f32 %v10246_v2, %v2803_v0  ;;  %v6647_v32 = vld [vmem:[%s10828_s1 + $0xbf8] sm:$0xf0]  ;;  %v7550_v2 = vld [vmem:[%s10828_s1 + $0xc74] sm:$0xf]  ;;  %v7557_v0 = vld [vmem:[%s10831_s3 + $0x28] sm:$0xff] }
 0x172   :  { %3256 = vmatpush.bf16.msrb.mxu2 %v6498_v37  ;;  %v6335_v37 = vld [vmem:[%s10828_s1 + $0x988] sm:$0xf0]  ;;  %v6650_v62 = vor.u32 %v7534_v33, %v6647_v32  ;;  %v6714_v63 = vor.u32 %v7550_v2, %v6711_v36  ;;  %v7546_v21 = vld [vmem:[%s10828_s1 + $0xc54] sm:$0xf]  ;;  %v6695_v6 = vld [vmem:[%s10828_s1 + $0xc58] sm:$0xf0]  ;;  %v6682_v2 = vor.u32 %v7542_v25, %v6679_v27 }
 0x173   :  { %3270 = vmatpush.bf16.msrb.mxu3 %v6562_v45  ;;  %v6538_v45 = vor.u32 %v7506_v40, %v6535_v22  ;;  %v6338_v53 = vor.u32 %v7456_v14, %v6335_v37  ;;  %v2831_v59 = vadd.f32 %v10275_v38, %v2817_v12  ;;  %v6687_v40 = vld [vmem:[%s10828_s1 + $0xc48] sm:$0xf0]  ;;  %v7524_v36 = vld [vmem:[%s10828_s1 + $0xba4] sm:$0xf] }
 0x174   :  { %3229 = vmatpush.bf16.msrb.mxu0 %v6362_v30  ;;  %v2815_v30 = vadd.f32 %v10162_v23, %v2801_v29  ;;  %v7559_v23 = vld [vmem:[%s10831_s3 + $0x38] sm:$0xff] }
 0x175   :  { %3243 = vmatpush.bf16.msrb.mxu1 %v6426_v58  ;;  %v6527_v58 = vld [vmem:[%s10828_s1 + $0xb08] sm:$0xf0]  ;;  %v2845_v38 = vadd.f32 %v10286_v55, %v2831_v59 }
 0x176   :  { %3257 = vmatpush.bf16.msrb.mxu2 %v6490_v46  ;;  %v2872_v46 = vpop.f32.mrf.mxu2  ;;  %v6530_v47 = vor.u32 %v7504_v52, %v6527_v58  ;;  %v2829_v5 = vadd.f32 %v10190_v20, %v2815_v30  ;;  %v2912_v20 = vpop.f32.mrf.mxu1  ;;  %v6607_v30 = vld [vmem:[%s10828_s1 + $0xba8] sm:$0xf0] }
 0x177   :  { %3271 = vmatpush.bf16.msrb.mxu3 %v6554_v56  ;;  %v6639_v56 = vld [vmem:[%s10828_s1 + $0xbe8] sm:$0xf0]  ;;  %v2886_v41 = vpop.f32.mrf.mxu3  ;;  %v2859_v51 = vadd.f32 %v2858_v34, %v2845_v38 }
 0x178   :  { %3230 = vmatpush.bf16.msrb.mxu0 %v6354_v28  ;;  %v6703_v28 = vld [vmem:[%s10828_s1 + $0xc68] sm:$0xf0]  ;;  %v2843_v42 = vadd.f32 %v10213_v49, %v2829_v5  ;;  %v6631_v49 = vld [vmem:[%s10828_s1 + $0xbd8] sm:$0xf0] }
 0x179   :  { %3244 = vmatpush.bf16.msrb.mxu1 %v6418_v50  ;;  %v6642_v50 = vor.u32 %v7532_v3, %v6639_v56  ;;  %v6706_v55 = vor.u32 %v7548_v1, %v6703_v28  ;;  %v6671_v52 = vld [vmem:[%s10828_s1 + $0xc28] sm:$0xf0]  ;;  %v7538_v3 = vld [vmem:[%s10828_s1 + $0xc14] sm:$0xf]  ;;  %v6663_v56 = vld [vmem:[%s10828_s1 + $0xc18] sm:$0xf0] }
 0x17a   :  { %3258 = vmatpush.bf16.msrb.mxu2 %v6482_v60  ;;  %v2900_v60 = vpop.f32.mrf.mxu0  ;;  %v2857_v8 = vadd.f32 %v10284_v54, %v2843_v42  ;;  %v6666_v28 = vor.u32 %v7538_v3, %v6663_v56  ;;  %v7520_v42 = vld [vmem:[%s10828_s1 + $0xb84] sm:$0xf] }
 0x17b   :  { %3272 = vmatpush.bf16.msrb.mxu3 %v6546_v44  ;;  %v2873_v44 = vadd.f32 %v2872_v46, %v2859_v51 }
 0x17c   :  { %3231 = vmatpush.bf16.msrb.mxu0 %v6346_v7  ;;  %v7528_v7 = vld [vmem:[%s10828_s1 + $0xbc4] sm:$0xf]  ;;  %v2871_v54 = vadd.f32 %v10307_v43, %v2857_v8 }
 0x17d   :  { %3245 = vmatpush.bf16.msrb.mxu1 %v6410_v24  ;;  %v2887_v14 = vadd.f32 %v2886_v41, %v2873_v44  ;;  %v7556_v43 = vld [vmem:[%s10831_s3 + $0x20] sm:$0xff]  ;;  %v7553_v41 = vld [vmem:[%s10831_s3 + $0x8] sm:$0xff] }
 0x17e   :  { %3259 = vmatpush.bf16.msrb.mxu2 %v6474_v4  ;;  %v2926_v31 = vpop.f32.mrf.mxu2  ;;  %v2885_v29 = vadd.f32 %v10336_v13, %v2871_v54  ;;  %v2914_v33 = vpop.f32.mrf.mxu1  ;;  %v7555_v13 = vld [vmem:[%s10831_s3 + $0x18] sm:$0xff] }
 0x17f   :  { %3273 = vmatpush.bf16.msrb.mxu3 %v6538_v45  ;;  %v2940_v22 = vpop.f32.mrf.mxu3  ;;  %v2901_v12 = vadd.f32 %v2900_v60, %v2887_v14  ;;  %v6618_v45 = vor.u32 %v7526_v35, %v6615_v18 }
 0x180   :  { %3232 = vmatpush.bf16.msrb.mxu0 %v6338_v53  ;;  %v2899_v34 = vadd.f32 %v10348_v48, %v2885_v29  ;;  %v7540_v48 = vld [vmem:[%s10828_s1 + $0xc24] sm:$0xf] }
 0x181   :  { %3246 = vmatpush.bf16.msrb.mxu1 %v6402_v26  ;;  %v2915_v53 = vadd.f32 %v2914_v33, %v2901_v12  ;;  %v6610_v26 = vor.u32 %v7524_v36, %v6607_v30  ;;  %v6674_v59 = vor.u32 %v7540_v48, %v6671_v52 }
 0x182   :  { %3260 = vmatpush.bf16.msrb.mxu2 %v6466_v11  ;;  %v2954_v4 = vpop.f32.mrf.mxu0  ;;  %v2913_v58 = vadd.f32 %v2912_v20, %v2899_v34 }
 0x183   :  { %3274 = vmatpush.bf16.msrb.mxu3 %v6530_v47  ;;  %3233 = vmatmul.bf16.vlgmr.msrb.gmra.mxu0 %v8890_v57  ;;  %v6634_v57 = vor.u32 %v7530_v15, %v6631_v49 }
 0x184   :  { %3281 = vmatpush.bf16.msra.mxu0 %v6650_v62  ;;  %3247 = vmatmul.bf16.vlgmr.msrb.gmra.mxu1 %v9103_v9  ;;  %v6623_v9 = vld [vmem:[%s10828_s1 + $0xbc8] sm:$0xf0]  ;;  %v7554_v62 = vld [vmem:[%s10831_s3 + $0x10] sm:$0xff]  ;;  %v2927_v47 = vadd.f32 %v2926_v31, %v2913_v58 }
 0x185   :  { %3295 = vmatpush.bf16.msra.mxu1 %v6714_v63  ;;  %3261 = vmatmul.bf16.vlgmr.msrb.gmra.mxu2 %v9116_v16  ;;  %v6698_v16 = vor.u32 %v7546_v21, %v6695_v6  ;;  %v6626_v24 = vor.u32 %v7528_v7, %v6623_v9  ;;  %v7522_v63 = vld [vmem:[%s10828_s1 + $0xb94] sm:$0xf]  ;;  %v7552_v21 = vld [vmem:[%s10831_s3] sm:$0xff] }
 0x186   :  { %3447 = vmatpush.bf16.msra.mxu2 %v7559_v23  ;;  %3275 = vmatmul.bf16.vlgmr.msrb.gmra.mxu3 %v9105_v10  ;;  %v7544_v10 = vld [vmem:[%s10828_s1 + $0xc44] sm:$0xf]  ;;  %v2928_v32 = vpop.f32.mrf.mxu2  ;;  %v6599_v23 = vld [vmem:[%s10828_s1 + $0xb98] sm:$0xf0]  ;;  %v2941_v20 = vadd.f32 %v2940_v22, %v2927_v47  ;;  %v2968_v44 = vpop.f32.mrf.mxu1 }
 0x187   :  { %v6690_v37 = vor.u32 %v7544_v10, %v6687_v40  ;;  %v2929_v46 = vadd.f32 %v2928_v32, %v2915_v53  ;;  %v2942_v11 = vpop.f32.mrf.mxu3  ;;  %v6602_v1 = vor.u32 %v7522_v63, %v6599_v23  ;;  %v7566_v63 = vld [vmem:[%s10831_s3 + $0x70] sm:$0xff] }
 0x188   :  { %3282 = vmatpush.bf16.msra.mxu0 %v6642_v50  ;;  %v6591_v50 = vld [vmem:[%s10828_s1 + $0xb88] sm:$0xf0]  ;;  %v2955_v15 = vadd.f32 %v2954_v4, %v2941_v20  ;;  %v480_v4 = vperm.slane %v9917_v19, 1 }
 0x189   :  { %3296 = vmatpush.bf16.msra.mxu1 %v6706_v55  ;;  %v2943_v38 = vadd.f32 %v2942_v11, %v2929_v46  ;;  %v7536_v55 = vld [vmem:[%s10828_s1 + $0xc04] sm:$0xf]  ;;  %v6594_v49 = vor.u32 %v7520_v42, %v6591_v50  ;;  %v7567_v46 = vld [vmem:[%s10831_s3 + $0x78] sm:$0xff] }
 0x18a   :  { %3448 = vmatpush.bf16.msra.mxu2 %v7558_v61  ;;  %v2956_v5 = vpop.f32.mrf.mxu0  ;;  %v6655_v61 = vld [vmem:[%s10828_s1 + $0xc08] sm:$0xf0]  ;;  %v3309_v31 = vmax.f32 %v2955_v15, 0.0  ;;  %v2969_v35 = vadd.f32 %v2968_v44, %v480_v4  ;;  %3461 = vmatpush.bf16.msra.mxu3 %v7567_v46  ;;  %v7562_v44 = vld [vmem:[%s10831_s3 + $0x50] sm:$0xff] }
 0x18b   :  { %v2957_v60 = vadd.f32 %v2956_v5, %v2943_v38  ;;  %v6658_v51 = vor.u32 %v7536_v55, %v6655_v61  ;;  %v7565_v5 = vld [vmem:[%s10831_s3 + $0x68] sm:$0xff] }
 0x18c   :  { %3283 = vmatpush.bf16.msra.mxu0 %v6634_v57 }
 0x18d   :  { %3297 = vmatpush.bf16.msra.mxu1 %v6698_v16  ;;  %v3311_v6 = vmax.f32 %v2957_v60, 0.0 }
 0x18e   :  { %3449 = vmatpush.bf16.msra.mxu2 %v7557_v0  ;;  %v2982_v57 = vpop.f32.mrf.mxu2  ;;  %v2970_v16 = vpop.f32.mrf.mxu1  ;;  %3462 = vmatpush.bf16.msra.mxu3 %v7566_v63 }
 0x18f   :  { %v3313_v8 = vpack.c.bf16 %v3311_v6, %v3309_v31  ;;  %v2996_v0 = vpop.f32.mrf.mxu3  ;;  %v2983_v18 = vadd.f32 %v2982_v57, %v2969_v35  ;;  %v2971_v27 = vadd.f32 %v2970_v16, %v480_v4 }
 0x190   :  { %3284 = vmatpush.bf16.msra.mxu0 %v6626_v24 }
 0x191   :  { %3298 = vmatpush.bf16.msra.mxu1 %v6690_v37  ;;  %v2997_v25 = vadd.f32 %v2996_v0, %v2983_v18 }
 0x192   :  { %3450 = vmatpush.bf16.msra.mxu2 %v7556_v43  ;;  %v3010_v9 = vpop.f32.mrf.mxu0  ;;  %3463 = vmatpush.bf16.msra.mxu3 %v7565_v5 }
 0x193   :  { %v3011_v32 = vadd.f32 %v3010_v9, %v2997_v25 }
 0x194   :  { %3285 = vmatpush.bf16.msra.mxu0 %v6618_v45 }
 0x195   :  { %3299 = vmatpush.bf16.msra.mxu1 %v6682_v2 }
 0x196   :  { %3451 = vmatpush.bf16.msra.mxu2 %v7555_v13  ;;  %v2984_v7 = vpop.f32.mrf.mxu2  ;;  %v3024_v54 = vpop.f32.mrf.mxu1 }
 0x197   :  { %v2998_v10 = vpop.f32.mrf.mxu3  ;;  %v2985_v45 = vadd.f32 %v2984_v7, %v2971_v27  ;;  %v3025_v30 = vadd.f32 %v3024_v54, %v3011_v32  ;;  %v7561_v54 = vld [vmem:[%s10831_s3 + $0x48] sm:$0xff] }
 0x198   :  { %3286 = vmatpush.bf16.msra.mxu0 %v6610_v26 }
 0x199   :  { %3300 = vmatpush.bf16.msra.mxu1 %v6674_v59  ;;  %v2999_v36 = vadd.f32 %v2998_v10, %v2985_v45 }
 0x19a   :  { %3452 = vmatpush.bf16.msra.mxu2 %v7554_v62  ;;  %v3012_v22 = vpop.f32.mrf.mxu0 }
 0x19b   :  { %v3013_v19 = vadd.f32 %v3012_v22, %v2999_v36 }
 0x19c   :  { %3287 = vmatpush.bf16.msra.mxu0 %v6602_v1 }
 0x19d   :  { %3301 = vmatpush.bf16.msra.mxu1 %v6666_v28 }
 0x19e   :  { %3453 = vmatpush.bf16.msra.mxu2 %v7553_v41  ;;  %v3038_v40 = vpop.f32.mrf.mxu2  ;;  %v3026_v14 = vpop.f32.mrf.mxu1  ;;  %v7564_v41 = vld [vmem:[%s10831_s3 + $0x60] sm:$0xff] }
 0x19f   :  { %v3052_v24 = vpop.f32.mrf.mxu3  ;;  %v3039_v52 = vadd.f32 %v3038_v40, %v3025_v30  ;;  %v3027_v58 = vadd.f32 %v3026_v14, %v3013_v19  ;;  %3464 = vmatpush.bf16.msra.mxu3 %v7564_v41  ;;  %v7560_v14 = vld [vmem:[%s10831_s3 + $0x40] sm:$0xff]  ;;  %v7569_v41 = vld [vmem:[%s10833_s5 + $0x8] sm:$0xff] }
 0x1a0   :  { %3288 = vmatpush.bf16.msra.mxu0 %v6594_v49 }
 0x1a1   :  { %3302 = vmatpush.bf16.msra.mxu1 %v6658_v51  ;;  %v3053_v11 = vadd.f32 %v3052_v24, %v3039_v52  ;;  %v7563_v51 = vld [vmem:[%s10831_s3 + $0x58] sm:$0xff] }
 0x1a2   :  { %3454 = vmatpush.bf16.msra.mxu2 %v7552_v21  ;;  %v3066_v43 = vpop.f32.mrf.mxu0 }
 0x1a3   :  { %3289 = vmatmul.bf16.vlgmr.msra.gmra.mxu0 %v9118_v17  ;;  %v3067_v23 = vadd.f32 %v3066_v43, %v3053_v11  ;;  %3465 = vmatpush.bf16.msra.mxu3 %v7563_v51 }
 0x1a4   :  { %3303 = vmatmul.bf16.vlgmr.msra.gmra.mxu1 %v9316_v39 }
 0x1a5   :  { %3455 = vmatmul.bf16.vlgmr.msra.gmra.mxu2 %v3313_v8 }
 0x1a6   :  { %v3040_v37 = vpop.f32.mrf.mxu2  ;;  %v3080_v17 = vpop.f32.mrf.mxu1 }
 0x1a7   :  { %v3054_v39 = vpop.f32.mrf.mxu3  ;;  %v3041_v59 = vadd.f32 %v3040_v37, %v3027_v58  ;;  %v3081_v38 = vadd.f32 %v3080_v17, %v3067_v23  ;;  %3466 = vmatpush.bf16.msra.mxu3 %v7562_v44 }
 0x1a9   :  { %v3055_v56 = vadd.f32 %v3054_v39, %v3041_v59  ;;  %v7571_v39 = vld [vmem:[%s10833_s5 + $0x18] sm:$0xff] }
 0x1aa   :  { %v3068_v12 = vpop.f32.mrf.mxu0  ;;  %3522 = vmatpush.bf16.msrb.mxu0 %v7571_v39 }
 0x1ab   :  { %v3069_v1 = vadd.f32 %v3068_v12, %v3055_v56  ;;  %3467 = vmatpush.bf16.msra.mxu3 %v7561_v54 }
 0x1ae   :  { %v3094_v29 = vpop.f32.mrf.mxu2  ;;  %v3082_v33 = vpop.f32.mrf.mxu1 }
 0x1af   :  { %v3108_v34 = vpop.f32.mrf.mxu3  ;;  %v3095_v28 = vadd.f32 %v3094_v29, %v3081_v38  ;;  %v3083_v20 = vadd.f32 %v3082_v33, %v3069_v1  ;;  %3468 = vmatpush.bf16.msra.mxu3 %v7560_v14  ;;  %v7576_v14 = vld [vmem:[%s10835_s7 + $0x20] sm:$0xff] }
 0x1b1   :  { %v3109_v55 = vadd.f32 %v3108_v34, %v3095_v28  ;;  %v7570_v28 = vld [vmem:[%s10833_s5 + $0x10] sm:$0xff] }
 0x1b2   :  { %3523 = vmatpush.bf16.msrb.mxu0 %v7570_v28  ;;  %v7625_v28 = vld [vmem:[%s10836_s8] ss:$0 sm:$0xff] }
 0x1b6   :  { %v3096_v2 = vpop.f32.mrf.mxu2  ;;  %3524 = vmatpush.bf16.msrb.mxu0 %v7569_v41 }
 0x1b7   :  { %v3110_v48 = vpop.f32.mrf.mxu3  ;;  %v3097_v61 = vadd.f32 %v3096_v2, %v3083_v20  ;;  %v7633_v20 = vmov 0.0  }
 0x1b8   :  { %3533 = vst.msk [vmem:[#allocation2] sm:$0xff] %vm3532_vm0, %v7633_v20 }
 0x1b9   :  { %v3111_v21 = vadd.f32 %v3110_v48, %v3097_v61  ;;  %3534 = vst.msk [vmem:[#allocation2 + $0x8] sm:$0xff] %vm3532_vm0, %v7633_v20 }
 0x1ba   :  { %3535 = vst.msk [vmem:[#allocation2 + $0x10] sm:$0xff] %vm3532_vm0, %v7633_v20 }
 0x1bf   :  { %v3537_v61 = vld [vmem:[#allocation2] sm:$0xff] }
 0x1c0   :  { %v3122_v13 = vpop.f32.mrf.mxu0 }
 0x1c1   :  { %v3136_v53 = vpop.f32.mrf.mxu1  ;;  %v3123_v49 = vadd.f32 %v3122_v13, %v3109_v55  ;;  %v7581_v55 = vld [vmem:[%s10835_s7 + $0x48] sm:$0xff] }
 0x1c3   :  { %v3137_v31 = vadd.f32 %v3136_v53, %v3123_v49 }
 0x1c8   :  { %v3150_v26 = vpop.f32.mrf.mxu2  ;;  %v3124_v62 = vpop.f32.mrf.mxu0 }
 0x1c9   :  { %v3138_v47 = vpop.f32.mrf.mxu1  ;;  %v3164_v3 = vpop.f32.mrf.mxu3  ;;  %v3125_v8 = vadd.f32 %v3124_v62, %v3111_v21  ;;  %v3151_v16 = vadd.f32 %v3150_v26, %v3137_v31 }
 0x1cb   :  { %v3139_v9 = vadd.f32 %v3138_v47, %v3125_v8  ;;  %v3165_v10 = vadd.f32 %v3164_v3, %v3151_v16 }
 0x1d0   :  { %v3152_v42 = vpop.f32.mrf.mxu2 }
 0x1d1   :  { %v3166_v15 = vpop.f32.mrf.mxu3  ;;  %v3153_v40 = vadd.f32 %v3152_v42, %v3139_v9  ;;  %v7568_v42 = vld [vmem:[%s10833_s5] sm:$0xff] }
 0x1d2   :  { %3525 = vmatpush.bf16.msrb.mxu0 %v7568_v42 }
 0x1d3   :  { %v3167_v37 = vadd.f32 %v3166_v15, %v3153_v40  ;;  %v3538_v15 = vld [vmem:[#allocation2 + $0x8] sm:$0xff] }
 0x1d4   :  { %v10557_v49 = vpack.c.bf16 %v3538_v15, %v3537_v61  ;;  %v7577_v40 = vld [vmem:[%s10835_s7 + $0x28] sm:$0xff]  ;;  %v7585_v61 = vld [vmem:[%s10838_s9 + $0x18] sm:$0xff]  ;;  %v7586_v15 = vld [vmem:[%s10838_s9 + $0x20] sm:$0xff] }
 0x1d5   :  { %3682 = vmatpush.bf16.msrb.mxu3 %v7577_v40 }
 0x1d6   :  { %v3597_v39 = vshll.u32 %v10557_v49, 16 }
 0x1d9   :  { %3683 = vmatpush.bf16.msrb.mxu3 %v7576_v14 }
 0x1e0   :  { %v3178_v50 = vpop.f32.mrf.mxu0 }
 0x1e1   :  { %v3192_v60 = vpop.f32.mrf.mxu1  ;;  %v3179_v22 = vadd.f32 %v3178_v50, %v3165_v10  ;;  %v7573_v50 = vld [vmem:[%s10835_s7 + $0x8] sm:$0xff]  ;;  %v7575_v10 = vld [vmem:[%s10835_s7 + $0x18] sm:$0xff] }
 0x1e2   :  { %3571 = vmatpush.bf16.msrb.mxu1 %v7573_v50  ;;  %3632 = vmatpush.bf16.msrb.mxu2 %v7575_v10 }
 0x1e3   :  { %v3193_v17 = vadd.f32 %v3192_v60, %v3179_v22  ;;  %v7572_v60 = vld [vmem:[%s10835_s7] sm:$0xff]  ;;  %v7574_v22 = vld [vmem:[%s10835_s7 + $0x10] sm:$0xff] }
 0x1e6   :  { %3572 = vmatpush.bf16.msrb.mxu1 %v7572_v60  ;;  %3633 = vmatpush.bf16.msrb.mxu2 %v7574_v22 }
 0x1e8   :  { %v3206_v6 = vpop.f32.mrf.mxu2  ;;  %v3180_v57 = vpop.f32.mrf.mxu0 }
 0x1e9   :  { %v3194_v0 = vpop.f32.mrf.mxu1  ;;  %v3220_v7 = vpop.f32.mrf.mxu3  ;;  %v3181_v35 = vadd.f32 %v3180_v57, %v3167_v37  ;;  %v3207_v29 = vadd.f32 %v3206_v6, %v3193_v17  ;;  %6804 = vmatmul.msk.bf16.vlgmr.msrb.gmra.mxu1 %vm3532_vm0, %v10557_v49  ;;  %v7623_v6 = vld [vmem:[%s10832_s4] ss:$0 sm:$0xff]  ;;  %v7578_v37 = vld [vmem:[%s10835_s7 + $0x30] sm:$0xff] }
 0x1ea   :  { %3782 = vmatpush.bf16.msra.mxu1 %v7581_v55 }
 0x1eb   :  { %v3195_v12 = vadd.f32 %v3194_v0, %v3181_v35  ;;  %v3221_v27 = vadd.f32 %v3220_v7, %v3207_v29 }
 0x1f0   :  { %v3208_v24 = vpop.f32.mrf.mxu2 }
 0x1f1   :  { %v3222_v18 = vpop.f32.mrf.mxu3  ;;  %v3209_v33 = vadd.f32 %v3208_v24, %v3195_v12  ;;  %v7579_v24 = vld [vmem:[%s10835_s7 + $0x38] sm:$0xff] }
 0x1f2   :  { %3734 = vmatpush.bf16.msra.mxu0 %v7579_v24 }
 0x1f3   :  { %v3223_v13 = vadd.f32 %v3222_v18, %v3209_v33  ;;  %v3595_v18 = vshrl.u32 %v10557_v49, 16 }
 0x1f5   :  { %v3703_v33 = vrot.slane %v3595_v18, 1 }
 0x1f6   :  { %3735 = vmatpush.bf16.msra.mxu0 %v7578_v37 }
 0x200   :  { %v3234_v4 = vpop.f32.mrf.mxu0 }
 0x201   :  { %v3248_v43 = vpop.f32.mrf.mxu1  ;;  %v3235_v45 = vadd.f32 %v3234_v4, %v3221_v27  ;;  %v7580_v4 = vld [vmem:[%s10835_s7 + $0x40] sm:$0xff] }
 0x202   :  { %3783 = vmatpush.bf16.msra.mxu1 %v7580_v4 }
 0x203   :  { %v3249_v36 = vadd.f32 %v3248_v43, %v3235_v45  ;;  %v7624_v43 = vld [vmem:[%s10834_s6] ss:$0 sm:$0xff] }
 0x208   :  { %v3262_v25 = vpop.f32.mrf.mxu2  ;;  %v3236_v34 = vpop.f32.mrf.mxu0 }
 0x209   :  { %v3250_v32 = vpop.f32.mrf.mxu1  ;;  %v3276_v2 = vpop.f32.mrf.mxu3  ;;  %v3237_v30 = vadd.f32 %v3236_v34, %v3223_v13  ;;  %v3263_v53 = vadd.f32 %v3262_v25, %v3249_v36  ;;  %v3599_v25 = vrot.slane %v3597_v39, 1  ;;  %v3704_v34 = vrot.slane %v3597_v39, 2 }
 0x20b   :  { %v3251_v52 = vadd.f32 %v3250_v32, %v3237_v30  ;;  %v3277_v46 = vadd.f32 %v3276_v2, %v3263_v53  ;;  %v3655_v32 = vrot.slane %v10557_v49, 1  ;;  %v10594_v13 = vor.u32 %v3599_v25, %v3595_v18 }
 0x20c   :  { %v10596_v53 = vor.u32 %v3704_v34, %v3703_v33 }
 0x210   :  { %v3264_v19 = vpop.f32.mrf.mxu2 }
 0x211   :  { %v3265_v26 = vadd.f32 %v3264_v19, %v3251_v52  ;;  %v3278_v11 = vpop.f32.mrf.mxu3 }
 0x213   :  { %v3279_v62 = vadd.f32 %v3278_v11, %v3265_v26 }
 0x220   :  { %v3290_v48 = vpop.f32.mrf.mxu0 }
 0x221   :  { %v3304_v58 = vpop.f32.mrf.mxu1  ;;  %v3291_v59 = vadd.f32 %v3290_v48, %v3277_v46 }
 0x223   :  { %v3305_v23 = vadd.f32 %v3304_v58, %v3291_v59  ;;  %v3755_v59 = vrot.slane %v10557_v49, 2 }
 0x225   :  { %v3310_v5 = vmax.f32 %v3305_v23, 0.0 }
 0x228   :  { %v3292_v63 = vpop.f32.mrf.mxu0  ;;  %v3456_v51 = vpop.f32.mrf.mxu2 }
 0x229   :  { %v3293_v47 = vadd.f32 %v3292_v63, %v3279_v62  ;;  %v3306_v3 = vpop.f32.mrf.mxu1  ;;  %v3457_v8 = vadd.f32 %v7623_v6, %v3456_v51 }
 0x22b   :  { %v3307_v56 = vadd.f32 %v3306_v3, %v3293_v47  ;;  %v7582_v3 = vld [vmem:[%s10838_s9] sm:$0xff] }
 0x22c   :  { %3821 = vmatpush.bf16.msra.mxu2 %v7582_v3 }
 0x22d   :  { %v3312_v38 = vmax.f32 %v3307_v56, 0.0  ;;  %v7583_v56 = vld [vmem:[%s10838_s9 + $0x8] sm:$0xff] }
 0x22f   :  { %v3314_v1 = vpack.c.bf16 %v3312_v38, %v3310_v5 }
 0x230   :  { %v3458_v31 = vpop.f32.mrf.mxu2 }
 0x231   :  { %3469 = vmatmul.bf16.vlgmr.msra.gmra.mxu3 %v3314_v1  ;;  %v3459_v44 = vadd.f32 %v7623_v6, %v3458_v31  ;;  %v7584_v1 = vld [vmem:[%s10838_s9 + $0x10] sm:$0xff] }
 0x232   :  { %3864 = vmatpush.bf16.msra.mxu3 %v7583_v56 }
 0x266   :  { %v3574_v47 = vpop.f32.mrf.mxu1 }
 0x267   :  { %v3586_v20 = vadd.f32 %v7625_v28, %v3574_v47 }
 0x26e   :  { %v3576_v5 = vpop.f32.mrf.mxu1 }
 0x2b4   :  { %v3470_v21 = vpop.f32.mrf.mxu3 }
 0x2b5   :  { %v3471_v57 = vadd.f32 %v3470_v21, %v3457_v8  ;;  %v3587_v8 = vadd.f32 %v7625_v28, %v3576_v5 }
 0x2b7   :  { %v3475_v7 = vmax.f32 %v3471_v57, 0.0 }
 0x2bc   :  { %v3472_v16 = vpop.f32.mrf.mxu3 }
 0x2bd   :  { %v3473_v0 = vadd.f32 %v3472_v16, %v3459_v44 }
 0x2bf   :  { %v3476_v9 = vmax.f32 %v3473_v0, 0.0 }
 0x2c1   :  { %v3477_v54 = vpack.c.bf16 %v3476_v9, %v3475_v7 }
 0x2c3   :  { %6795 = vmatmul.msk.bf16.vlgmr.msrb.gmra.mxu0 %vm3514_vm1, %v3477_v54 }
 0x2c4   :  { %3897 = vmatpush.bf16.msrb.mxu0 %v7584_v1 }
 0x340   :  { %v3527_v17 = vpop.f32.mrf.mxu0 }
 0x341   :  { %v3528_v35 = vadd.f32 %v7624_v43, %v3527_v17 }
 0x343   :  { %3536 = vst.msk [vmem:[#allocation2 + $0x10] sm:$0xff] %vm3532_vm0, %v3528_v35 }
 0x348   :  { %v3529_v29 = vpop.f32.mrf.mxu0 }
 0x349   :  { %v3530_v12 = vadd.f32 %v7624_v43, %v3529_v29 }
 0x34a   :  { %v3539_v27 = vld [vmem:[#allocation2 + $0x10] sm:$0xff] }
 0x34b   :  { %4284 = vst.msk [vmem:[#allocation2 + $0x10] sm:$0xff] %vm3532_vm0, %v3530_v12  ;;  %v3542_v45 = vpack.c.bf16 %v3539_v27, %v3539_v27 }
 0x34d   :  { %6805 = vmatmul.msk.bf16.gmra.mxu1 %vm3532_vm0, %v3542_v45  ;;  %v3656_v2 = vrot.slane %v3542_v45, 1  ;;  %v3601_v36 = vshll.u32 %v3542_v45, 16  ;;  %v3605_v30 = vshrl.u32 %v3542_v45, 16  ;;  %v3756_v62 = vrot.slane %v3542_v45, 2 }
 0x34f   :  { %v3657_v19 = vsel %vm3654_vm2, %v3655_v32, %v3656_v2  ;;  %v3603_v48 = vrot.slane %v3601_v36, 1  ;;  %v3706_v52 = vrot.slane %v3605_v30, 1  ;;  %v3707_v58 = vrot.slane %v3601_v36, 2 }
 0x350   :  { %6832 = vmatmul.msk.bf16.vlgmr.msrb.gmra.mxu3 %vm3532_vm0, %v3657_v19  ;;  %v3757_v63 = vsel %vm3754_vm5, %v3755_v59, %v3756_v62 }
 0x351   :  { %v3604_v46 = vsel %vm3594_vm3, %v10594_v13, %v3603_v48  ;;  %v3708_v26 = vor.u32 %v3707_v58, %v3706_v52  ;;  %v3607_v23 = vor.u32 %v3605_v30, %v3603_v48  ;;  %3965 = vmatpush.bf16.msrb.mxu3 %v7586_v15 }
 0x352   :  { %6818 = vmatmul.msk.bf16.vlgmr.msrb.gmra.mxu2 %vm3532_vm0, %v3604_v46 }
 0x353   :  { %v3709_v11 = vsel %vm3702_vm4, %v10596_v53, %v3708_v26  ;;  %3934 = vmatpush.bf16.msrb.mxu2 %v7585_v61 }
 0x354   :  { %6846 = vmatmul.msk.bf16.vlgmr.msra.gmra.mxu0 %vm3532_vm0, %v3709_v11 }
 0x35d   :  { %6860 = vmatmul.msk.bf16.vlgmr.msra.gmra.mxu1 %vm3532_vm0, %v3757_v63 }
 0x360   :  { %6833 = vmatmul.msk.bf16.gmra.mxu3 %vm3532_vm0, %v3656_v2 }
 0x362   :  { %6819 = vmatmul.msk.bf16.gmra.mxu2 %vm3532_vm0, %v3607_v23 }
 0x364   :  { %6847 = vmatmul.msk.bf16.gmra.mxu0 %vm3532_vm0, %v3708_v26 }
 0x36d   :  { %6861 = vmatmul.msk.bf16.gmra.mxu1 %vm3532_vm0, %v3756_v62 }
 0x3ca   :  { %v3579_v38 = vpop.f32.mrf.mxu1 }
 0x3cb   :  { %v3588_v22 = vadd.f32 %v7625_v28, %v3579_v38 }
 0x3d1   :  { %v3737_v41 = vpop.f32.mrf.mxu0 }
 0x3d2   :  { %v3581_v42 = vpop.f32.mrf.mxu1 }
 0x3d3   :  { %v3685_v50 = vpop.f32.mrf.mxu3  ;;  %v7588_v42 = vld [vmem:[%s10840_s11 + $0x8] sm:$0xff] }
 0x3d4   :  { %4033 = vmatpush.bf16.msrb.mxu1 %v7588_v42 }
 0x3d5   :  { %v3635_v60 = vpop.f32.mrf.mxu2 }
 0x3d6   :  { %v3644_v55 = vadd.f32 %v3635_v60, %v3586_v20  ;;  %v7589_v20 = vld [vmem:[%s10840_s11 + $0x10] sm:$0xff]  ;;  %v7590_v60 = vld [vmem:[%s10840_s11 + $0x18] sm:$0xff] }
 0x3d8   :  { %v3694_v21 = vadd.f32 %v3685_v50, %v3644_v55  ;;  %v7587_v50 = vld [vmem:[%s10840_s11] sm:$0xff] }
 0x3d9   :  { %v3739_v51 = vpop.f32.mrf.mxu0  ;;  %3996 = vmatpush.bf16.msra.mxu0 %v7587_v50 }
 0x3da   :  { %v3785_v6 = vpop.f32.mrf.mxu1  ;;  %v3746_v57 = vadd.f32 %v3737_v41, %v3694_v21  ;;  %v7626_v21 = vld [vmem:[%s10837_s10] ss:$0 sm:$0xff] }
 0x3db   :  { %v3687_v31 = vpop.f32.mrf.mxu3 }
 0x3dc   :  { %v3794_v9 = vadd.f32 %v3785_v6, %v3746_v57 }
 0x3dd   :  { %v3637_v44 = vpop.f32.mrf.mxu2 }
 0x3de   :  { %v3645_v16 = vadd.f32 %v3637_v44, %v3587_v8  ;;  %v3797_v4 = vmax.f32 %v3794_v9, 0.0 }
 0x3e0   :  { %v3695_v0 = vadd.f32 %v3687_v31, %v3645_v16 }
 0x3e1   :  { %v3742_v7 = vpop.f32.mrf.mxu0 }
 0x3e2   :  { %v3747_v54 = vadd.f32 %v3739_v51, %v3695_v0  ;;  %v3787_v10 = vpop.f32.mrf.mxu1  ;;  %v7591_v51 = vld [vmem:[%s10840_s11 + $0x20] sm:$0xff] }
 0x3e3   :  { %v3690_v40 = vpop.f32.mrf.mxu3 }
 0x3e4   :  { %v3795_v14 = vadd.f32 %v3787_v10, %v3747_v54 }
 0x3e5   :  { %v3640_v24 = vpop.f32.mrf.mxu2 }
 0x3e6   :  { %v3798_v37 = vmax.f32 %v3795_v14, 0.0  ;;  %v3646_v43 = vadd.f32 %v3640_v24, %v3588_v22 }
 0x3e8   :  { %v3801_v17 = vpack.c.bf16 %v3798_v37, %v3797_v4  ;;  %v3696_v35 = vadd.f32 %v3690_v40, %v3646_v43 }
 0x3e9   :  { %v3744_v39 = vpop.f32.mrf.mxu0 }
 0x3ea   :  { %v3748_v18 = vadd.f32 %v3742_v7, %v3696_v35  ;;  %v3790_v29 = vpop.f32.mrf.mxu1  ;;  %6866 = vmatmul.msk.bf16.vlgmr.msra.gmra.mxu2 %vm3810_vm6, %v3801_v17  ;;  %v3839_v12 = vshll.u32 %v3801_v17, 16  ;;  %v3837_v34 = vshrl.u32 %v3801_v17, 16  ;;  %v3878_v30 = vrot.slane %v3801_v17, 1 }
 0x3eb   :  { %v3692_v25 = vpop.f32.mrf.mxu3  ;;  %v3946_v28 = vrot.slane %v3801_v17, 2  ;;  %4063 = vmatpush.bf16.msra.mxu2 %v7589_v20 }
 0x3ec   :  { %v3796_v27 = vadd.f32 %v3790_v29, %v3748_v18  ;;  %v3841_v2 = vrot.slane %v3839_v12, 1  ;;  %v3909_v19 = vrot.slane %v3837_v34, 1  ;;  %v3910_v26 = vrot.slane %v3839_v12, 2 }
 0x3ed   :  { %v3642_v33 = vpop.f32.mrf.mxu2 }
 0x3ee   :  { %v3799_v45 = vmax.f32 %v3796_v27, 0.0  ;;  %v3842_v11 = vor.u32 %v3841_v2, %v3837_v34  ;;  %v3911_v5 = vor.u32 %v3910_v26, %v3909_v19  ;;  %v7592_v2 = vld [vmem:[%s10842_s13] sm:$0xff] }
 0x3ef   :  { %4154 = vmatpush.bf16.msra.mxu1 %v7592_v2 }
 0x3f0   :  { %v3833_v36 = vpack.c.bf16 %v3799_v45, %v3799_v45 }
 0x3f2   :  { %v3844_v48 = vshll.u32 %v3833_v36, 16  ;;  %v3879_v52 = vrot.slane %v3833_v36, 1  ;;  %v3912_v58 = vshrl.u32 %v3833_v36, 16  ;;  %v3792_v46 = vpop.f32.mrf.mxu1  ;;  %v3947_v1 = vrot.slane %v3833_v36, 2  ;;  %v7593_v36 = vld [vmem:[%s10842_s13 + $0x8] sm:$0xff] }
 0x3f3   :  { %v7598_v46 = vld [vmem:[%s10835_s7 + $0x8] sm:$0xff] }
 0x3f4   :  { %v3846_v62 = vrot.slane %v3844_v48, 1  ;;  %v3914_v63 = vrot.slane %v3912_v58, 1  ;;  %v3915_v23 = vrot.slane %v3844_v48, 2  ;;  %v3880_v47 = vsel %vm3654_vm2, %v3878_v30, %v3879_v52  ;;  %v7594_v30 = vld [vmem:[%s10842_s13 + $0x10] sm:$0xff]  ;;  %v7595_v48 = vld [vmem:[%s10842_s13 + $0x18] sm:$0xff]  ;;  %v7596_v58 = vld [vmem:[%s10842_s13 + $0x20] sm:$0xff] }
 0x3f5   :  { %6880 = vmatmul.msk.bf16.vlgmr.msrb.gmra.mxu0 %vm3810_vm6, %v3880_v47  ;;  %v3948_v41 = vsel %vm3754_vm5, %v3946_v28, %v3947_v1  ;;  %v7627_v52 = vld [vmem:[%s10839_s12] ss:$0 sm:$0xff] }
 0x3f6   :  { %v3916_v3 = vor.u32 %v3915_v23, %v3914_v63  ;;  %v3847_v56 = vsel %vm3594_vm3, %v3842_v11, %v3846_v62  ;;  %4123 = vmatpush.bf16.msrb.mxu0 %v7591_v51  ;;  %v7600_v62 = vld [vmem:[%s10835_s7 + $0x18] sm:$0xff]  ;;  %v7597_v63 = vld [vmem:[%s10835_s7] sm:$0xff] }
 0x3f7   :  { %6873 = vmatmul.msk.bf16.vlgmr.msra.gmra.mxu3 %vm3810_vm6, %v3847_v56 }
 0x3f8   :  { %v3917_v38 = vsel %vm3702_vm4, %v3911_v5, %v3916_v3  ;;  %4094 = vmatpush.bf16.msra.mxu3 %v7590_v60  ;;  %v7602_v3 = vld [vmem:[%s10835_s7 + $0x28] sm:$0xff]  ;;  %v7599_v5 = vld [vmem:[%s10835_s7 + $0x10] sm:$0xff] }
 0x3fa   :  { %6887 = vmatmul.msk.bf16.vlgmr.msrb.gmra.mxu2 %vm3810_vm6, %v3917_v38 }
 0x3fb   :  { %4191 = vmatpush.bf16.msrb.mxu2 %v7593_v36 }
 0x407   :  { %6894 = vmatmul.msk.bf16.vlgmr.msrb.gmra.mxu3 %vm3810_vm6, %v3948_v41 }
 0x408   :  { %4219 = vmatpush.bf16.msrb.mxu3 %v7594_v30 }
 0x46d   :  { %v3823_v55 = vpop.f32.mrf.mxu2 }
 0x46e   :  { %v3831_v44 = vadd.f32 %v7626_v21, %v3823_v55  ;;  %v7601_v55 = vld [vmem:[%s10835_s7 + $0x20] sm:$0xff] }
 0x472   :  { %v3899_v6 = vpop.f32.mrf.mxu0 }
 0x475   :  { %v3825_v61 = vpop.f32.mrf.mxu2 }
 0x476   :  { %v3832_v57 = vadd.f32 %v7626_v21, %v3825_v61  ;;  %v7604_v21 = vld [vmem:[%s10835_s7 + $0x38] sm:$0xff] }
 0x47a   :  { %v3866_v15 = vpop.f32.mrf.mxu3  ;;  %v3901_v54 = vpop.f32.mrf.mxu0 }
 0x47b   :  { %v3871_v16 = vadd.f32 %v3866_v15, %v3831_v44 }
 0x47d   :  { %v3936_v8 = vpop.f32.mrf.mxu2  ;;  %v3904_v9 = vadd.f32 %v3899_v6, %v3871_v16 }
 0x47f   :  { %v3941_v22 = vadd.f32 %v3936_v8, %v3904_v9 }
 0x482   :  { %v3868_v31 = vpop.f32.mrf.mxu3 }
 0x483   :  { %v3872_v0 = vadd.f32 %v3868_v31, %v3832_v57  ;;  %v7603_v57 = vld [vmem:[%s10835_s7 + $0x30] sm:$0xff] }
 0x485   :  { %v3905_v10 = vadd.f32 %v3901_v54, %v3872_v0  ;;  %v3938_v40 = vpop.f32.mrf.mxu2 }
 0x487   :  { %v3942_v14 = vadd.f32 %v3938_v40, %v3905_v10 }
 0x48a   :  { %v3967_v7 = vpop.f32.mrf.mxu3 }
 0x48b   :  { %v3972_v24 = vadd.f32 %v3967_v7, %v3941_v22 }
 0x48d   :  { %v3974_v43 = vmax.f32 %v3972_v24, 0.0  ;;  %v4287_v24 = vld [vmem:[#allocation2 + $0x10] sm:$0xff] }
 0x492   :  { %v3969_v4 = vpop.f32.mrf.mxu3 }
 0x493   :  { %v3973_v37 = vadd.f32 %v3969_v4, %v3942_v14  ;;  %v7606_v4 = vld [vmem:[%s10835_s7 + $0x48] sm:$0xff] }
 0x495   :  { %v3975_v17 = vmax.f32 %v3973_v37, 0.0 }
 0x497   :  { %v3977_v35 = vpack.c.bf16 %v3975_v17, %v3974_v43  ;;  %v4290_v17 = vpack.c.bf16 %v4287_v24, %v4287_v24 }
 0x499   :  { %v4011_v39 = vshrl.u32 %v3977_v35, 16  ;;  %v4013_v18 = vshll.u32 %v3977_v35, 16  ;;  %v4046_v29 = vrot.slane %v3977_v35, 1  ;;  %6899 = vmatmul.msk.bf16.vlgmr.msra.gmra.mxu0 %vm3810_vm6, %v3977_v35  ;;  %v4106_v45 = vrot.slane %v3977_v35, 2 }
 0x49a   :  { %4248 = vmatpush.bf16.msra.mxu0 %v7595_v48 }
 0x49b   :  { %v4015_v12 = vrot.slane %v4013_v18, 1  ;;  %v4075_v25 = vrot.slane %v4011_v39, 1  ;;  %v4076_v27 = vrot.slane %v4013_v18, 2  ;;  %6913 = vmatmul.msk.bf16.vlgmr.msra.gmra.mxu2 %vm3810_vm6, %v4046_v29  ;;  %v4347_v18 = vshll.u32 %v4290_v17, 16 }
 0x49c   :  { %4319 = vmatpush.bf16.msra.mxu2 %v7598_v46  ;;  %v4351_v29 = vshrl.u32 %v4290_v17, 16 }
 0x49d   :  { %v4016_v33 = vor.u32 %v4015_v12, %v4011_v39  ;;  %v4077_v34 = vor.u32 %v4076_v27, %v4075_v25  ;;  %v7605_v39 = vld [vmem:[%s10835_s7 + $0x40] sm:$0xff]  ;;  %v4349_v12 = vrot.slane %v4347_v18, 1  ;;  %v4449_v27 = vrot.slane %v4347_v18, 2 }
 0x49e   :  { %v4448_v25 = vrot.slane %v4351_v29, 1 }
 0x49f   :  { %6906 = vmatmul.msk.bf16.vlgmr.msrb.gmra.mxu1 %vm3810_vm6, %v4016_v33  ;;  %6920 = vmatmul.msk.bf16.vlgmr.msra.gmra.mxu3 %vm3810_vm6, %v4077_v34  ;;  %v4350_v33 = vsel %vm3594_vm3, %v10594_v13, %v4349_v12  ;;  %v4400_v34 = vrot.slane %v4290_v17, 1  ;;  %v4353_v30 = vor.u32 %v4351_v29, %v4349_v12 }
 0x4a0   :  { %4275 = vmatpush.bf16.msrb.mxu1 %v7596_v58  ;;  %4378 = vmatpush.bf16.msra.mxu3 %v7600_v62 }
 0x4a1   :  { %4320 = vmatpush.bf16.msra.mxu2 %v7597_v63  ;;  %v4401_v2 = vsel %vm3654_vm2, %v3655_v32, %v4400_v34  ;;  %v4496_v32 = vrot.slane %v4290_v17, 2 }
 0x4a3   :  { %v4497_v13 = vsel %vm3754_vm5, %v3755_v59, %v4496_v32 }
 0x4a4   :  { %4379 = vmatpush.bf16.msra.mxu3 %v7599_v5 }
 0x4a9   :  { %6927 = vmatmul.msk.bf16.vlgmr.msrb.gmra.mxu0 %vm3810_vm6, %v4106_v45  ;;  %v4450_v45 = vor.u32 %v4449_v27, %v4448_v25 }
 0x4aa   :  { %4426 = vmatpush.bf16.msrb.mxu0 %v7602_v3 }
 0x4ab   :  { %v4451_v36 = vsel %vm3702_vm4, %v10596_v53, %v4450_v45 }
 0x4ae   :  { %4427 = vmatpush.bf16.msrb.mxu0 %v7601_v55 }
 0x516   :  { %v3998_v19 = vpop.f32.mrf.mxu0 }
 0x517   :  { %v4006_v11 = vadd.f32 %v7627_v52, %v3998_v19 }
 0x51c   :  { %v4035_v26 = vpop.f32.mrf.mxu1 }
 0x51d   :  { %v4040_v56 = vadd.f32 %v4035_v26, %v4006_v11 }
 0x51e   :  { %v4000_v23 = vpop.f32.mrf.mxu0  ;;  %v4065_v47 = vpop.f32.mrf.mxu2 }
 0x51f   :  { %v4070_v1 = vadd.f32 %v4065_v47, %v4040_v56  ;;  %v4007_v41 = vadd.f32 %v7627_v52, %v4000_v23  ;;  %v7628_v52 = vld [vmem:[%s10841_s14] ss:$0 sm:$0xff] }
 0x520   :  { %v7607_v47 = vld [vmem:[%s10838_s9] sm:$0xff] }
 0x522   :  { %v4096_v38 = vpop.f32.mrf.mxu3 }
 0x523   :  { %v4101_v42 = vadd.f32 %v4096_v38, %v4070_v1  ;;  %v7608_v38 = vld [vmem:[%s10838_s9 + $0x8] sm:$0xff] }
 0x524   :  { %v4037_v28 = vpop.f32.mrf.mxu1 }
 0x525   :  { %v4041_v20 = vadd.f32 %v4037_v28, %v4007_v41 }
 0x526   :  { %v4125_v50 = vpop.f32.mrf.mxu0  ;;  %v4067_v61 = vpop.f32.mrf.mxu2 }
 0x527   :  { %v4130_v60 = vadd.f32 %v4125_v50, %v4101_v42  ;;  %v4071_v6 = vadd.f32 %v4067_v61, %v4041_v20 }
 0x529   :  { %v4132_v15 = vmax.f32 %v4130_v60, 0.0 }
 0x52a   :  { %v4098_v51 = vpop.f32.mrf.mxu3 }
 0x52b   :  { %v4135_v31 = vpack.c.bf16 %v4132_v15, %v4132_v15  ;;  %v4102_v8 = vadd.f32 %v4098_v51, %v4071_v6 }
 0x52d   :  { %6932 = vmatmul.msk.bf16.vlgmr.msra.gmra.mxu1 %vm3810_vm6, %v4135_v31 }
 0x52e   :  { %v4127_v44 = vpop.f32.mrf.mxu0  ;;  %4476 = vmatpush.bf16.msra.mxu1 %v7604_v21  ;;  %v7609_v21 = vld [vmem:[%s10838_s9 + $0x10] sm:$0xff] }
 0x52f   :  { %v4131_v16 = vadd.f32 %v4127_v44, %v4102_v8 }
 0x531   :  { %v4133_v0 = vmax.f32 %v4131_v16, 0.0 }
 0x532   :  { %4477 = vmatpush.bf16.msra.mxu1 %v7603_v57  ;;  %v7629_v57 = vld [vmem:[%s10836_s8] ss:$0 sm:$0xff] }
 0x533   :  { %v4164_v7 = vpack.c.bf16 %v4133_v0, %v4132_v15 }
 0x535   :  { %v4169_v9 = vshrl.u32 %v4164_v7, 16  ;;  %v4171_v54 = vshll.u32 %v4164_v7, 16  ;;  %v4202_v10 = vrot.slane %v4164_v7, 1  ;;  %v4258_v35 = vrot.slane %v4164_v7, 2 }
 0x537   :  { %v4173_v40 = vrot.slane %v4171_v54, 1  ;;  %v4229_v22 = vrot.slane %v4169_v9, 1  ;;  %v4230_v14 = vrot.slane %v4171_v54, 2  ;;  %6946 = vmatmul.msk.bf16.vlgmr.msrb.gmra.mxu3 %vm3810_vm6, %v4202_v10  ;;  %v7611_v54 = vld [vmem:[%s10838_s9 + $0x20] sm:$0xff] }
 0x538   :  { %4560 = vmatpush.bf16.msrb.mxu3 %v7607_v47 }
 0x539   :  { %v4174_v37 = vor.u32 %v4173_v40, %v4169_v9  ;;  %v4231_v43 = vor.u32 %v4230_v14, %v4229_v22  ;;  %v7610_v9 = vld [vmem:[%s10838_s9 + $0x18] sm:$0xff] }
 0x53b   :  { %6939 = vmatmul.msk.bf16.vlgmr.msrb.gmra.mxu2 %vm3810_vm6, %v4174_v37  ;;  %6953 = vmatmul.msk.bf16.vlgmr.msra.gmra.mxu0 %vm3810_vm6, %v4231_v43 }
 0x53c   :  { %4522 = vmatpush.bf16.msrb.mxu2 %v7606_v4  ;;  %4602 = vmatpush.bf16.msra.mxu0 %v7608_v38 }
 0x53d   :  { %6960 = vmatmul.msk.bf16.vlgmr.msrb.gmra.mxu1 %vm3810_vm6, %v4258_v35 }
 0x53e   :  { %4634 = vmatpush.bf16.msrb.mxu1 %v7609_v21 }
 0x540   :  { %4523 = vmatpush.bf16.msrb.mxu2 %v7605_v39 }
 0x547   :  { %6983 = vmatmul.msk.bf16.vlgmr.msra.gmra.mxu3 %vm3532_vm0, %v4350_v33 }
 0x548   :  { %4670 = vmatpush.bf16.msra.mxu3 %v7610_v9 }
 0x54b   :  { %6969 = vmatmul.msk.bf16.vlgmr.msra.gmra.mxu2 %vm3532_vm0, %v10557_v49  ;;  %6997 = vmatmul.msk.bf16.vlgmr.msrb.gmra.mxu0 %vm3532_vm0, %v4401_v2 }
 0x54c   :  { %4700 = vmatpush.bf16.msrb.mxu0 %v7611_v54 }
 0x54d   :  { %7011 = vmatmul.msk.bf16.vlgmr.msra.gmra.mxu1 %vm3532_vm0, %v4451_v36 }
 0x557   :  { %6984 = vmatmul.msk.bf16.gmra.mxu3 %vm3532_vm0, %v4353_v30 }
 0x55b   :  { %6970 = vmatmul.msk.bf16.gmra.mxu2 %vm3532_vm0, %v4290_v17  ;;  %6998 = vmatmul.msk.bf16.gmra.mxu0 %vm3532_vm0, %v4400_v34 }
 0x55d   :  { %7012 = vmatmul.msk.bf16.gmra.mxu1 %vm3532_vm0, %v4450_v45 }
 0x56b   :  { %7025 = vmatmul.msk.bf16.vlgmr.msrb.gmra.mxu2 %vm3532_vm0, %v4497_v13 }
 0x57b   :  { %7026 = vmatmul.msk.bf16.gmra.mxu2 %vm3532_vm0, %v4496_v32 }
 0x5aa   :  { %v4156_v53 = vpop.f32.mrf.mxu1 }
 0x5ab   :  { %v4163_v26 = vadd.f32 %v7628_v52, %v4156_v53 }
 0x5b2   :  { %v4158_v19 = vpop.f32.mrf.mxu1 }
 0x5b8   :  { %v4250_v48 = vpop.f32.mrf.mxu0 }
 0x5ba   :  { %v4221_v58 = vpop.f32.mrf.mxu3  ;;  %v4277_v46 = vpop.f32.mrf.mxu1 }
 0x5be   :  { %v4193_v11 = vpop.f32.mrf.mxu2 }
 0x5bf   :  { %v4197_v62 = vadd.f32 %v4193_v11, %v4163_v26 }
 0x5c0   :  { %v4252_v63 = vpop.f32.mrf.mxu0 }
 0x5c1   :  { %v4225_v49 = vadd.f32 %v4221_v58, %v4197_v62 }
 0x5c2   :  { %v4223_v23 = vpop.f32.mrf.mxu3  ;;  %v4279_v59 = vpop.f32.mrf.mxu1 }
 0x5c3   :  { %v4254_v3 = vadd.f32 %v4250_v48, %v4225_v49 }
 0x5c5   :  { %v4281_v56 = vadd.f32 %v4277_v46, %v4254_v3 }
 0x5c6   :  { %v4195_v5 = vpop.f32.mrf.mxu2 }
 0x5c7   :  { %4283 = vst.msk [vmem:[%s10843_s15] sm:$0xff] %vm4282_vm7, %v4281_v56 }
 0x5c8   :  { %v4429_v1 = vpop.f32.mrf.mxu0 }
 0x5ca   :  { %v4381_v28 = vpop.f32.mrf.mxu3  ;;  %v4479_v41 = vpop.f32.mrf.mxu1 }
 0x5ce   :  { %v4322_v42 = vpop.f32.mrf.mxu2 }
 0x5cf   :  { %v4334_v0 = vadd.f32 %v7629_v57, %v4322_v42  ;;  %v7614_v42 = vld [vmem:[%s10840_s11 + $0x10] sm:$0xff] }
 0x5d0   :  { %v4431_v50 = vpop.f32.mrf.mxu0 }
 0x5d1   :  { %v4390_v10 = vadd.f32 %v4381_v28, %v4334_v0  ;;  %v7613_v28 = vld [vmem:[%s10840_s11 + $0x8] sm:$0xff] }
 0x5d2   :  { %v4383_v20 = vpop.f32.mrf.mxu3  ;;  %v4481_v60 = vpop.f32.mrf.mxu1  ;;  %4767 = vmatpush.bf16.msra.mxu2 %v7613_v28 }
 0x5d3   :  { %v4438_v14 = vadd.f32 %v4429_v1, %v4390_v10 }
 0x5d5   :  { %v4488_v37 = vadd.f32 %v4479_v41, %v4438_v14  ;;  %v7612_v41 = vld [vmem:[%s10840_s11] sm:$0xff] }
 0x5d6   :  { %v4324_v55 = vpop.f32.mrf.mxu2  ;;  %4731 = vmatpush.bf16.msra.mxu1 %v7612_v41 }
 0x5d7   :  { %v4335_v7 = vadd.f32 %v7629_v57, %v4324_v55  ;;  %v7615_v55 = vld [vmem:[%s10840_s11 + $0x18] sm:$0xff] }
 0x5d8   :  { %v4434_v61 = vpop.f32.mrf.mxu0 }
 0x5d9   :  { %v4391_v40 = vadd.f32 %v4383_v20, %v4335_v7 }
 0x5da   :  { %v4386_v15 = vpop.f32.mrf.mxu3  ;;  %v4484_v51 = vpop.f32.mrf.mxu1 }
 0x5db   :  { %v4439_v4 = vadd.f32 %v4431_v50, %v4391_v40 }
 0x5dd   :  { %v4489_v35 = vadd.f32 %v4481_v60, %v4439_v4 }
 0x5de   :  { %v4327_v6 = vpop.f32.mrf.mxu2 }
 0x5df   :  { %v4336_v24 = vadd.f32 %v7629_v57, %v4327_v6 }
 0x5e0   :  { %v4436_v31 = vpop.f32.mrf.mxu0 }
 0x5e1   :  { %v4392_v43 = vadd.f32 %v4386_v15, %v4336_v24 }
 0x5e2   :  { %v4388_v8 = vpop.f32.mrf.mxu3  ;;  %v4486_v44 = vpop.f32.mrf.mxu1 }
 0x5e3   :  { %v4440_v25 = vadd.f32 %v4434_v61, %v4392_v43  ;;  %v7616_v61 = vld [vmem:[%s10840_s11 + $0x20] sm:$0xff] }
 0x5e5   :  { %v4490_v33 = vadd.f32 %v4484_v51, %v4440_v25  ;;  %v7630_v51 = vld [vmem:[%s10837_s10] ss:$0 sm:$0xff] }
 0x5e6   :  { %v4329_v16 = vpop.f32.mrf.mxu2 }
 0x5ee   :  { %v4525_v22 = vpop.f32.mrf.mxu2 }
 0x5ef   :  { %v4534_v17 = vadd.f32 %v4525_v22, %v4488_v37 }
 0x5f1   :  { %v4537_v29 = vmax.f32 %v4534_v17, 0.0 }
 0x5f6   :  { %v4527_v39 = vpop.f32.mrf.mxu2 }
 0x5f7   :  { %v4535_v18 = vadd.f32 %v4527_v39, %v4489_v35 }
 0x5f9   :  { %v4538_v12 = vmax.f32 %v4535_v18, 0.0 }
 0x5fb   :  { %v4541_v27 = vpack.c.bf16 %v4538_v12, %v4537_v29 }
 0x5fd   :  { %7031 = vmatmul.msk.bf16.vlgmr.msrb.gmra.mxu3 %vm3810_vm6, %v4541_v27  ;;  %v4577_v34 = vshll.u32 %v4541_v27, 16  ;;  %v4575_v36 = vshrl.u32 %v4541_v27, 16  ;;  %v4615_v53 = vrot.slane %v4541_v27, 1  ;;  %v4681_v38 = vrot.slane %v4541_v27, 2 }
 0x5fe   :  { %v4530_v45 = vpop.f32.mrf.mxu2  ;;  %4796 = vmatpush.bf16.msrb.mxu3 %v7614_v42 }
 0x5ff   :  { %v4536_v2 = vadd.f32 %v4530_v45, %v4490_v33  ;;  %v4579_v32 = vrot.slane %v4577_v34, 1  ;;  %v4645_v19 = vrot.slane %v4575_v36, 1  ;;  %v4646_v46 = vrot.slane %v4577_v34, 2  ;;  %v7617_v34 = vld [vmem:[%s10842_s13] sm:$0xff]  ;;  %v7619_v45 = vld [vmem:[%s10842_s13 + $0x10] sm:$0xff] }
 0x600   :  { %4885 = vmatpush.bf16.msrb.mxu2 %v7617_v34 }
 0x601   :  { %v4539_v30 = vmax.f32 %v4536_v2, 0.0  ;;  %v4580_v11 = vor.u32 %v4579_v32, %v4575_v36  ;;  %v4647_v3 = vor.u32 %v4646_v46, %v4645_v19  ;;  %v7618_v36 = vld [vmem:[%s10842_s13 + $0x8] sm:$0xff]  ;;  %v7621_v32 = vld [vmem:[%s10842_s13 + $0x20] sm:$0xff] }
 0x603   :  { %v4572_v13 = vpack.c.bf16 %v4539_v30, %v4539_v30  ;;  %v7620_v30 = vld [vmem:[%s10842_s13 + $0x18] sm:$0xff] }
 0x605   :  { %v4582_v48 = vshll.u32 %v4572_v13, 16  ;;  %v4616_v52 = vrot.slane %v4572_v13, 1  ;;  %v4648_v58 = vshrl.u32 %v4572_v13, 16  ;;  %v4682_v5 = vrot.slane %v4572_v13, 2  ;;  %v7631_v13 = vld [vmem:[%s10839_s12] ss:$0 sm:$0xff] }
 0x606   :  { %v4532_v26 = vpop.f32.mrf.mxu2 }
 0x607   :  { %v4584_v62 = vrot.slane %v4582_v48, 1  ;;  %v4650_v63 = vrot.slane %v4648_v58, 1  ;;  %v4651_v49 = vrot.slane %v4582_v48, 2  ;;  %v4617_v23 = vsel %vm3654_vm2, %v4615_v53, %v4616_v52 }
 0x608   :  { %7045 = vmatmul.msk.bf16.vlgmr.msrb.gmra.mxu1 %vm3810_vm6, %v4617_v23  ;;  %v4683_v1 = vsel %vm3754_vm5, %v4681_v38, %v4682_v5 }
 0x609   :  { %v4652_v59 = vor.u32 %v4651_v49, %v4650_v63  ;;  %v4585_v47 = vsel %vm3594_vm3, %v4580_v11, %v4584_v62  ;;  %4854 = vmatpush.bf16.msrb.mxu1 %v7616_v61 }
 0x60a   :  { %7038 = vmatmul.msk.bf16.vlgmr.msra.gmra.mxu0 %vm3810_vm6, %v4585_v47 }
 0x60b   :  { %v4653_v56 = vsel %vm3702_vm4, %v4647_v3, %v4652_v59  ;;  %4826 = vmatpush.bf16.msra.mxu0 %v7615_v55 }
 0x60d   :  { %7052 = vmatmul.msk.bf16.vlgmr.msra.gmra.mxu3 %vm3810_vm6, %v4653_v56 }
 0x60e   :  { %4921 = vmatpush.bf16.msra.mxu3 %v7618_v36 }
 0x61a   :  { %7059 = vmatmul.msk.bf16.vlgmr.msrb.gmra.mxu0 %vm3810_vm6, %v4683_v1 }
 0x61b   :  { %4948 = vmatpush.bf16.msrb.mxu0 %v7619_v45 }
 0x680   :  { %v4562_v50 = vpop.f32.mrf.mxu3 }
 0x681   :  { %v4570_v31 = vadd.f32 %v7630_v51, %v4562_v50 }
 0x685   :  { %v4636_v21 = vpop.f32.mrf.mxu1 }
 0x687   :  { %v4604_v20 = vpop.f32.mrf.mxu0 }
 0x688   :  { %v4564_v60 = vpop.f32.mrf.mxu3  ;;  %v4609_v8 = vadd.f32 %v4604_v20, %v4570_v31 }
 0x689   :  { %v4571_v44 = vadd.f32 %v7630_v51, %v4564_v60 }
 0x68a   :  { %v4641_v0 = vadd.f32 %v4636_v21, %v4609_v8 }
 0x68d   :  { %v4638_v7 = vpop.f32.mrf.mxu1 }
 0x68f   :  { %v4606_v15 = vpop.f32.mrf.mxu0 }
 0x690   :  { %v4672_v6 = vpop.f32.mrf.mxu3  ;;  %v4610_v16 = vadd.f32 %v4606_v15, %v4571_v44 }
 0x691   :  { %v4677_v54 = vadd.f32 %v4672_v6, %v4641_v0  ;;  %v7632_v0 = vld [vmem:[%s10841_s14] ss:$0 sm:$0xff] }
 0x692   :  { %v4642_v10 = vadd.f32 %v4638_v7, %v4610_v16 }
 0x697   :  { %v4702_v57 = vpop.f32.mrf.mxu0 }
 0x698   :  { %v4674_v9 = vpop.f32.mrf.mxu3  ;;  %v4707_v40 = vadd.f32 %v4702_v57, %v4677_v54 }
 0x699   :  { %v4678_v22 = vadd.f32 %v4674_v9, %v4642_v10 }
 0x69a   :  { %v4709_v4 = vmax.f32 %v4707_v40, 0.0 }
 0x69f   :  { %v4704_v14 = vpop.f32.mrf.mxu0 }
 0x6a0   :  { %v4708_v24 = vadd.f32 %v4704_v14, %v4678_v22 }
 0x6a2   :  { %v4710_v37 = vmax.f32 %v4708_v24, 0.0 }
 0x6a4   :  { %v4712_v43 = vpack.c.bf16 %v4710_v37, %v4709_v4 }
 0x6a6   :  { %v4745_v17 = vshrl.u32 %v4712_v43, 16  ;;  %v4747_v35 = vshll.u32 %v4712_v43, 16  ;;  %v4779_v39 = vrot.slane %v4712_v43, 1  ;;  %7064 = vmatmul.msk.bf16.vlgmr.msra.gmra.mxu1 %vm3810_vm6, %v4712_v43  ;;  %v4837_v33 = vrot.slane %v4712_v43, 2 }
 0x6a7   :  { %4976 = vmatpush.bf16.msra.mxu1 %v7620_v30 }
 0x6a8   :  { %v4749_v18 = vrot.slane %v4747_v35, 1  ;;  %v4807_v29 = vrot.slane %v4745_v17, 1  ;;  %v4808_v12 = vrot.slane %v4747_v35, 2  ;;  %7078 = vmatmul.msk.bf16.vlgmr.msrb.gmra.mxu3 %vm3810_vm6, %v4779_v39 }
 0x6aa   :  { %v4750_v25 = vor.u32 %v4749_v18, %v4745_v17  ;;  %v4809_v27 = vor.u32 %v4808_v12, %v4807_v29 }
 0x6ac   :  { %7071 = vmatmul.msk.bf16.vlgmr.msra.gmra.mxu2 %vm3810_vm6, %v4750_v25  ;;  %7085 = vmatmul.msk.bf16.vlgmr.msra.gmra.mxu0 %vm3810_vm6, %v4809_v27 }
 0x6ad   :  { %5002 = vmatpush.bf16.msra.mxu2 %v7621_v32 }
 0x6b6   :  { %7092 = vmatmul.msk.bf16.vlgmr.msrb.gmra.mxu1 %vm3810_vm6, %v4837_v33 }
 0x723   :  { %v4733_v2 = vpop.f32.mrf.mxu1 }
 0x724   :  { %v4741_v19 = vadd.f32 %v7631_v13, %v4733_v2 }
 0x729   :  { %v4828_v46 = vpop.f32.mrf.mxu0 }
 0x72b   :  { %v4735_v53 = vpop.f32.mrf.mxu1  ;;  %v4798_v48 = vpop.f32.mrf.mxu3 }
 0x72c   :  { %v4742_v63 = vadd.f32 %v7631_v13, %v4735_v53 }
 0x72f   :  { %v4769_v52 = vpop.f32.mrf.mxu2 }
 0x730   :  { %v4774_v58 = vadd.f32 %v4769_v52, %v4741_v19 }
 0x731   :  { %v4830_v38 = vpop.f32.mrf.mxu0 }
 0x732   :  { %v4803_v26 = vadd.f32 %v4798_v48, %v4774_v58 }
 0x733   :  { %v4856_v11 = vpop.f32.mrf.mxu1  ;;  %v4800_v3 = vpop.f32.mrf.mxu3 }
 0x734   :  { %v4833_v62 = vadd.f32 %v4828_v46, %v4803_v26 }
 0x736   :  { %v4861_v49 = vadd.f32 %v4856_v11, %v4833_v62 }
 0x737   :  { %v4771_v23 = vpop.f32.mrf.mxu2 }
 0x738   :  { %v4863_v59 = vmax.f32 %v4861_v49, 0.0  ;;  %v4775_v47 = vadd.f32 %v4771_v23, %v4742_v63 }
 0x73a   :  { %v4866_v56 = vpack.c.bf16 %v4863_v59, %v4863_v59  ;;  %v4804_v5 = vadd.f32 %v4800_v3, %v4775_v47 }
 0x73b   :  { %v4858_v28 = vpop.f32.mrf.mxu1 }
 0x73c   :  { %v4834_v1 = vadd.f32 %v4830_v38, %v4804_v5  ;;  %7097 = vmatmul.msk.bf16.vlgmr.msrb.gmra.mxu2 %vm3810_vm6, %v4866_v56 }
 0x73e   :  { %v4862_v41 = vadd.f32 %v4858_v28, %v4834_v1 }
 0x740   :  { %v4864_v42 = vmax.f32 %v4862_v41, 0.0 }
 0x742   :  { %v4895_v50 = vpack.c.bf16 %v4864_v42, %v4863_v59 }
 0x744   :  { %v4899_v20 = vshrl.u32 %v4895_v50, 16  ;;  %v4901_v60 = vshll.u32 %v4895_v50, 16  ;;  %v4931_v55 = vrot.slane %v4895_v50, 1  ;;  %v4985_v31 = vrot.slane %v4895_v50, 2 }
 0x746   :  { %v4903_v61 = vrot.slane %v4901_v60, 1  ;;  %v4957_v15 = vrot.slane %v4899_v20, 1  ;;  %v4958_v51 = vrot.slane %v4901_v60, 2  ;;  %7111 = vmatmul.msk.bf16.vlgmr.msrb.gmra.mxu0 %vm3810_vm6, %v4931_v55 }
 0x748   :  { %v4904_v21 = vor.u32 %v4903_v61, %v4899_v20  ;;  %v4959_v6 = vor.u32 %v4958_v51, %v4957_v15 }
 0x74a   :  { %7104 = vmatmul.msk.bf16.vlgmr.msra.gmra.mxu3 %vm3810_vm6, %v4904_v21  ;;  %7118 = vmatmul.msk.bf16.vlgmr.msra.gmra.mxu1 %vm3810_vm6, %v4959_v6 }
 0x74c   :  { %7125 = vmatmul.msk.bf16.vlgmr.msra.gmra.mxu2 %vm3810_vm6, %v4985_v31 }
 0x7bf   :  { %v4887_v8 = vpop.f32.mrf.mxu2 }
 0x7c0   :  { %v4894_v9 = vadd.f32 %v7632_v0, %v4887_v8 }
 0x7c3   :  { %v4950_v44 = vpop.f32.mrf.mxu0 }
 0x7c7   :  { %v4889_v57 = vpop.f32.mrf.mxu2  ;;  %v4978_v16 = vpop.f32.mrf.mxu1 }
 0x7cb   :  { %v4952_v7 = vpop.f32.mrf.mxu0 }
 0x7cd   :  { %v4923_v54 = vpop.f32.mrf.mxu3 }
 0x7ce   :  { %v4927_v10 = vadd.f32 %v4923_v54, %v4894_v9 }
 0x7cf   :  { %v4980_v40 = vpop.f32.mrf.mxu1  ;;  %v5004_v22 = vpop.f32.mrf.mxu2 }
 0x7d0   :  { %v4954_v14 = vadd.f32 %v4950_v44, %v4927_v10 }
 0x7d2   :  { %v4982_v24 = vadd.f32 %v4978_v16, %v4954_v14 }
 0x7d4   :  { %v5008_v4 = vadd.f32 %v5004_v22, %v4982_v24 }
 0x7d5   :  { %v4925_v37 = vpop.f32.mrf.mxu3 }
 0x7d6   :  { %7126 = vst.msk [vmem:[%s10843_s15 + $0x8] sm:$0xff] %vm4282_vm7, %v5008_v4 }
 0x7d7   :  { %v5006_v43 = vpop.f32.mrf.mxu2 }

</bundles_post_ra>
